<compile_context>
chip_gen: v6e
topology: v6e:2x2x1
jax: 0.10.0
libtpu: 0.0.40
codegen_flags: <defaults>
</compile_context>

<pallas_src>
import functools

import jax
import jax.numpy as jnp
from jax import lax
from jax.experimental import pallas as pl
from jax.experimental.pallas import tpu as pltpu

LANE = 128


def _round_up(x, m):
    return ((x + m - 1) // m) * m


def _pick_tile_rows(ho, wo, row_target=1024):
    """Largest divisor th of ho with th*wo <= row_target (>= 1)."""
    best = 1
    for d in range(1, ho + 1):
        if ho % d == 0 and d * wo <= row_target:
            best = d
    return best


# ----------------------------------------------------------------------------
# Fused kernel:
#   3x3 / stride-2 conv (BN folded into W) + bias + (optional) ReLU
#   + optional fused 1x1 conv (bias, no activation)
#
# Inputs (per grid step):
#   xm_ref : (2*th, 2*(wo+1), cin)   main padded-input row window (W parity-split)
#   xh_ref : (1,    2*(wo+1), cin)   halo row (first row of the next window)
#   w_ref  : (9, cin, coutp)         per-tap weights, BN scale folded, bf16
#   b_ref  : (1, coutp)              folded bias, f32
#   [w2_ref: (coutp, c2p), b2_ref: (1, c2p)]   fused 1x1 conv
#   o_ref  : (th, wo, c_final)
# ----------------------------------------------------------------------------
def _conv3x3_kernel(xm_ref, xh_ref, w_ref, b_ref, *rest,
                    th, wo, apply_relu, fuse_pointwise):
    if fuse_pointwise:
        w2_ref, b2_ref, o_ref = rest
    else:
        (o_ref,) = rest
        w2_ref = b2_ref = None

    cin = xm_ref.shape[-1]
    wcols = xm_ref.shape[-2]          # == 2 * (wo + 1)
    wo1 = wcols // 2
    cout = w_ref.shape[-1]

    xm = xm_ref[...]                  # (2*th, 2*wo1, cin)  bf16
    xh = xh_ref[...]                  # (1,    2*wo1, cin)  bf16

    # split the local H window into (row-pair index, H parity)
    x4 = xm.reshape(th, 2, 2 * wo1, cin)
    if th > 1:
        ev_shift = jnp.concatenate([x4[1:, 0], xh], axis=0)   # even rows + 1
    else:
        ev_shift = xh
    # padded-input rows needed per kernel-tap row offset di:
    #   di=0 -> even rows i, di=1 -> odd rows i, di=2 -> even rows i+1
    row_sets = (x4[:, 0], x4[:, 1], ev_shift)   # each (th, 2*wo1, cin)

    acc = jnp.zeros((th * wo, cout), jnp.float32)
    for di in range(3):
        rows = row_sets[di]
        for dj in range(3):
            q, off = dj % 2, dj // 2           # W parity / extra column offset
            start = q * wo1 + off
            tap = rows[:, start:start + wo, :]             # (th, wo, cin)
            acc = acc + jnp.dot(tap.reshape(th * wo, cin),
                                w_ref[di * 3 + dj],
                                preferred_element_type=jnp.float32)

    y = acc + b_ref[...]
    if apply_relu:
        y = jnp.maximum(y, 0.0)
    if fuse_pointwise:
        y = jnp.dot(y.astype(w2_ref.dtype), w2_ref[...],
                    preferred_element_type=jnp.float32) + b2_ref[...]

    o_ref[...] = y.reshape(th, wo, y.shape[-1]).astype(o_ref.dtype)


def conv3x3_stage(x, w9, bias, *, apply_relu=True, w_pw=None, b_pw=None,
                  out_dtype=jnp.bfloat16, row_target=1024):
    """One Conv(3x3, stride 2, pad 1) [+BN folded] [+ReLU] [+fused 1x1] stage.

    x    : (N, H, W, Cin)       activation (any float dtype; cast to bf16)
    w9   : (9, Cin, Coutp) bf16 per-tap weights (BN scale folded, zero-padded)
    bias : (1, Coutp) f32
    w_pw : optional (Coutp, C2p) bf16, b_pw: (1, C2p) f32 -> fused 1x1 conv
    returns (N, Ho, Wo, C_final) in `out_dtype`.
    """
    N, H, W, Cin = x.shape
    Ho = (H - 1) // 2 + 1
    Wo = (W - 1) // 2 + 1
    Wo1 = Wo + 1
    Coutp = w9.shape[-1]
    assert w9.shape == (9, Cin, Coutp), (w9.shape, Cin)
    Cfinal = w_pw.shape[-1] if w_pw is not None else Coutp

    # zero-pad spatially, then split W into (even, odd) parity planes so that
    # every stride-2 tap inside the kernel is a plain contiguous slice.
    Hp = H + 2
    Wp = 2 * Wo1
    xp = jnp.pad(x.astype(jnp.bfloat16),
                 ((0, 0), (1, 1), (1, Wp - W - 1), (0, 0)))
    xpe = xp.reshape(N, Hp, Wo1, 2, Cin).transpose(0, 1, 3, 2, 4)
    xpe = xpe.reshape(N, Hp, 2 * Wo1, Cin)        # [n, h, parity*Wo1 + j, c]

    th = _pick_tile_rows(Ho, Wo, row_target)      # output rows per grid step
    T = Ho // th

    in_specs = [
        # main window: padded rows [2*th*t, 2*th*(t+1))
        pl.BlockSpec((None, 2 * th, 2 * Wo1, Cin),
                     lambda n, t: (n, t, 0, 0)),
        # halo: single padded row 2*th*(t+1) (block size 1 -> element index)
        pl.BlockSpec((None, 1, 2 * Wo1, Cin),
                     lambda n, t: (n, 2 * th * (t + 1), 0, 0)),
        pl.BlockSpec((9, Cin, Coutp), lambda n, t: (0, 0, 0)),
        pl.BlockSpec((1, Coutp), lambda n, t: (0, 0)),
    ]
    args = [xpe, xpe, w9, bias]
    if w_pw is not None:
        in_specs += [pl.BlockSpec((Coutp, Cfinal), lambda n, t: (0, 0)),
                     pl.BlockSpec((1, Cfinal), lambda n, t: (0, 0))]
        args += [w_pw, b_pw]

    out = pl.pallas_call(
        functools.partial(_conv3x3_kernel, th=th, wo=Wo,
                          apply_relu=apply_relu,
                          fuse_pointwise=w_pw is not None),
        out_shape=jax.ShapeDtypeStruct((N, Ho, Wo, Cfinal), out_dtype),
        grid_spec=pltpu.PrefetchScalarGridSpec(
            num_scalar_prefetch=0,
            grid=(N, T),
            in_specs=in_specs,
            out_specs=pl.BlockSpec((None, th, Wo, Cfinal),
                                   lambda n, t: (n, t, 0, 0)),
        ),
        compiler_params=pltpu.CompilerParams(
            dimension_semantics=("parallel", "parallel"),
            vmem_limit_bytes=48 * 1024 * 1024,
        ),
    )(*args)
    return out


# ----------------------------------------------------------------------------
# Parameter handling: deterministic torch-like params, BN fold, packing
# ----------------------------------------------------------------------------
def _fold_conv_bn(w, b, gamma, beta, mean, var, eps=1e-5):
    s = gamma / jnp.sqrt(var + eps)
    return w * s[:, None, None, None], (b - mean) * s + beta


def _pack_conv3x3(w_f, b_f, cin_pad, cout_pad):
    cout, cin, kh, kw = w_f.shape
    w9 = jnp.transpose(w_f, (2, 3, 1, 0)).reshape(kh * kw, cin, cout)
    w9 = jnp.pad(w9, ((0, 0), (0, cin_pad - cin), (0, cout_pad - cout)))
    bb = jnp.pad(b_f, (0, cout_pad - cout)).reshape(1, cout_pad)
    return w9.astype(jnp.bfloat16), bb.astype(jnp.float32)


def _pack_conv1x1(w, b, cin_pad, cout_pad):
    cout, cin = w.shape[0], w.shape[1]
    wm = jnp.transpose(w[:, :, 0, 0], (1, 0))
    wm = jnp.pad(wm, ((0, cin_pad - cin), (0, cout_pad - cout)))
    bb = jnp.pad(b, (0, cout_pad - cout)).reshape(1, cout_pad)
    return wm.astype(jnp.bfloat16), bb.astype(jnp.float32)


def init_raw_params(key, in_chan, embed_dim):
    def conv_bn(k, cin, cout, ksz):
        ks = jax.random.split(k, 6)
        return dict(
            w=jax.random.normal(ks[0], (cout, cin, ksz, ksz), jnp.float32) * 0.1,
            b=jax.random.normal(ks[1], (cout,), jnp.float32) * 0.1,
            gamma=1.0 + 0.1 * jax.random.normal(ks[2], (cout,), jnp.float32),
            beta=0.1 * jax.random.normal(ks[3], (cout,), jnp.float32),
            mean=0.1 * jax.random.normal(ks[4], (cout,), jnp.float32),
            var=jnp.abs(1.0 + 0.1 * jax.random.normal(ks[5], (cout,), jnp.float32)),
        )

    ks = jax.random.split(key, 6)
    return {
        "conv1": conv_bn(ks[0], in_chan, embed_dim // 8, 3),
        "conv2": conv_bn(ks[1], embed_dim // 8, embed_dim // 4, 3),
        "conv3": conv_bn(ks[2], embed_dim // 4, embed_dim // 2, 3),
        "conv4": conv_bn(ks[3], embed_dim // 2, embed_dim, 3),
        "conv5": dict(
            w=jax.random.normal(ks[4], (embed_dim, embed_dim, 1, 1), jnp.float32) * 0.1,
            b=jax.random.normal(ks[5], (embed_dim,), jnp.float32) * 0.1),
    }


def prepare_params(raw, in_chan, embed_dim):
    folded = {}
    for name in ("conv1", "conv2", "conv3", "conv4"):
        p = raw[name]
        folded[name] = _fold_conv_bn(p["w"], p["b"], p["gamma"], p["beta"],
                                     p["mean"], p["var"])
    folded["conv5"] = (raw["conv5"]["w"], raw["conv5"]["b"])

    c_true = [in_chan, embed_dim // 8, embed_dim // 4, embed_dim // 2,
              embed_dim, embed_dim]
    c_pad = [in_chan] + [_round_up(c, LANE) for c in c_true[1:]]

    kp = {}
    for i, name in enumerate(("conv1", "conv2", "conv3", "conv4")):
        w_f, b_f = folded[name]
        kp[name] = _pack_conv3x3(w_f, b_f, c_pad[i], c_pad[i + 1])
    kp["conv5"] = _pack_conv1x1(*folded["conv5"], c_pad[4], c_pad[5])
    return kp, folded


# ----------------------------------------------------------------------------
# ConvolutionStem forward (Pallas path)
# ----------------------------------------------------------------------------
def convolution_stem(x_nchw, kp, embed_dim):
    x = jnp.transpose(x_nchw, (0, 2, 3, 1))                # NCHW -> NHWC
    x = conv3x3_stage(x, *kp["conv1"], apply_relu=True)
    x = conv3x3_stage(x, *kp["conv2"], apply_relu=True)
    x = conv3x3_stage(x, *kp["conv3"], apply_relu=True)
    w5, b5 = kp["conv5"]
    x = conv3x3_stage(x, *kp["conv4"], apply_relu=True,
                      w_pw=w5, b_pw=b5, out_dtype=jnp.float32)
    N, Ho, Wo, Cp = x.shape
    # 'b c h w -> b (h w) c' (already NHWC); drop lane-padding channels.
    return x.reshape(N, Ho * Wo, Cp)[:, :, :embed_dim]


# ----------------------------------------------------------------------------
# Pure-JAX reference (lax conv) using the same BN fold and bf16 rounding points
# ----------------------------------------------------------------------------
def reference_stem(x_nchw, folded, embed_dim):
    def conv(x, w, b, stride, relu):
        xb = x.astype(jnp.bfloat16).astype(jnp.float32)
        wb = w.astype(jnp.bfloat16).astype(jnp.float32)
        k = w.shape[-1]
        y = lax.conv_general_dilated(
            xb, jnp.transpose(wb, (2, 3, 1, 0)), (stride, stride),
            ((k // 2, k // 2), (k // 2, k // 2)),
            dimension_numbers=("NHWC", "HWIO", "NHWC"),
            precision=lax.Precision.HIGHEST)
        y = y + b.reshape(1, 1, 1, -1)
        return jnp.maximum(y, 0.0) if relu else y

    x = jnp.transpose(x_nchw, (0, 2, 3, 1))
    for name in ("conv1", "conv2", "conv3", "conv4"):
        w, b = folded[name]
        x = conv(x, w, b, 2, True)
    w5, b5 = folded["conv5"]
    x = conv(x, w5, b5, 1, False)
    N, H, W, C = x.shape
    return x.reshape(N, H * W, C)[:, :, :embed_dim]


if __name__ == "__main__":
    # 4 stride-2 convs => /16 spatial: patch_size = 16, img_size = 32 -> h=w=2.
    batch, in_chan, img_size, patch_size, embed_dim = 2, 4, 32, 16, 32

    key = jax.random.PRNGKey(0)
    kx, kparam = jax.random.split(key)
    x = jax.random.normal(kx, (batch, in_chan, img_size, img_size), jnp.float32)

    raw = init_raw_params(kparam, in_chan, embed_dim)
    kparams, folded = prepare_params(raw, in_chan, embed_dim)

    stem = jax.jit(functools.partial(convolution_stem, embed_dim=embed_dim))
    out = jax.block_until_ready(stem(x, kparams))

    h = w = img_size // patch_size
    assert out.shape == (batch, h * w, embed_dim), out.shape

    ref = jax.block_until_ready(reference_stem(x, folded, embed_dim))
    max_err = float(jnp.max(jnp.abs(out - ref)))
    assert jnp.allclose(out, ref, atol=3e-2, rtol=3e-2), max_err

    print("KERNEL_OK")
</pallas_src>

<mosaic_0001>
module attributes {stable_mosaic.version = 11 : i64} {
  func.func @_conv3x3_kernel(%arg0: i32, %arg1: i32, %arg2: memref<1x32x34x4xbf16, #tpu.memory_space<vmem>>, %arg3: memref<1x1x34x4xbf16, #tpu.memory_space<vmem>>, %arg4: memref<9x4x128xbf16, #tpu.memory_space<vmem>>, %arg5: memref<1x128xf32, #tpu.memory_space<vmem>>, %arg6: memref<1x16x16x128xbf16, #tpu.memory_space<vmem>>) attributes {dimension_semantics = [#tpu.dimension_semantics<parallel>, #tpu.dimension_semantics<parallel>], iteration_bounds = array<i64: 2, 1>, scalar_prefetch = 0 : i64, scratch_operands = 0 : i64, tpu.core_type = #tpu.core_type<tc>, window_params = [{transform_indices = @transform_0, window_bounds = array<i64: 1, 32, 34, 4>}, {transform_indices = @transform_1, window_bounds = array<i64: 1, 1, 34, 4>}, {pipeline_mode = #tpu.pipeline_mode<synchronous>, transform_indices = @transform_2, window_bounds = array<i64: 9, 4, 128>}, {pipeline_mode = #tpu.pipeline_mode<synchronous>, transform_indices = @transform_3, window_bounds = array<i64: 1, 128>}, {transform_indices = @transform_4, window_bounds = array<i64: 1, 16, 16, 128>}]} {
    %c0 = arith.constant 0 : index
    %c0_0 = arith.constant 0 : index
    %c0_1 = arith.constant 0 : index
    %c0_2 = arith.constant 0 : index
    %0 = vector.load %arg2[%c0, %c0_0, %c0_1, %c0_2] : memref<1x32x34x4xbf16, #tpu.memory_space<vmem>>, vector<1x32x34x4xbf16>
    %1 = vector.shape_cast %0 : vector<1x32x34x4xbf16> to vector<32x34x4xbf16>
    %c0_3 = arith.constant 0 : index
    %c0_4 = arith.constant 0 : index
    %c0_5 = arith.constant 0 : index
    %c0_6 = arith.constant 0 : index
    %2 = vector.load %arg3[%c0_3, %c0_4, %c0_5, %c0_6] : memref<1x1x34x4xbf16, #tpu.memory_space<vmem>>, vector<1x1x34x4xbf16>
    %3 = vector.shape_cast %2 : vector<1x1x34x4xbf16> to vector<1x34x4xbf16>
    %4 = vector.shape_cast %1 : vector<32x34x4xbf16> to vector<16x2x34x4xbf16>
    %5 = vector.extract_strided_slice %4 {offsets = [1, 0, 0, 0], sizes = [15, 1, 34, 4], strides = [1, 1, 1, 1]} : vector<16x2x34x4xbf16> to vector<15x1x34x4xbf16>
    %6 = vector.shape_cast %5 : vector<15x1x34x4xbf16> to vector<15x34x4xbf16>
    %7 = tpu.concatenate %6, %3 in 0 : vector<15x34x4xbf16>, vector<1x34x4xbf16> -> vector<16x34x4xbf16>
    %8 = vector.extract_strided_slice %4 {offsets = [0, 0, 0, 0], sizes = [16, 1, 34, 4], strides = [1, 1, 1, 1]} : vector<16x2x34x4xbf16> to vector<16x1x34x4xbf16>
    %9 = vector.shape_cast %8 : vector<16x1x34x4xbf16> to vector<16x34x4xbf16>
    %10 = vector.extract_strided_slice %4 {offsets = [0, 1, 0, 0], sizes = [16, 1, 34, 4], strides = [1, 1, 1, 1]} : vector<16x2x34x4xbf16> to vector<16x1x34x4xbf16>
    %11 = vector.shape_cast %10 : vector<16x1x34x4xbf16> to vector<16x34x4xbf16>
    %cst = arith.constant 0.000000e+00 : f32
    %12 = vector.broadcast %cst : f32 to vector<256x128xf32>
    %13 = vector.extract_strided_slice %9 {offsets = [0, 0, 0], sizes = [16, 16, 4], strides = [1, 1, 1]} : vector<16x34x4xbf16> to vector<16x16x4xbf16>
    %14 = vector.shape_cast %13 : vector<16x16x4xbf16> to vector<256x4xbf16>
    %c0_7 = arith.constant 0 : index
    %c0_8 = arith.constant 0 : index
    %c0_9 = arith.constant 0 : index
    %15 = vector.load %arg4[%c0_7, %c0_8, %c0_9] : memref<9x4x128xbf16, #tpu.memory_space<vmem>>, vector<1x4x128xbf16>
    %16 = vector.shape_cast %15 : vector<1x4x128xbf16> to vector<4x128xbf16>
    %cst_10 = arith.constant dense<0.000000e+00> : vector<256x128xf32>
    %17 = tpu.matmul %14, %16, %cst_10 {dimension_numbers = #tpu.dot_dimension_numbers<[1], [0], [0], [1], [0, 0, 1, 1], [], []>} : vector<256x4xbf16>, vector<4x128xbf16>, vector<256x128xf32> -> vector<256x128xf32>
    %18 = arith.addf %12, %17 : vector<256x128xf32>
    %19 = vector.extract_strided_slice %9 {offsets = [0, 17, 0], sizes = [16, 16, 4], strides = [1, 1, 1]} : vector<16x34x4xbf16> to vector<16x16x4xbf16>
    %20 = vector.shape_cast %19 : vector<16x16x4xbf16> to vector<256x4xbf16>
    %c1 = arith.constant 1 : index
    %c0_11 = arith.constant 0 : index
    %c0_12 = arith.constant 0 : index
    %21 = vector.load %arg4[%c1, %c0_11, %c0_12] : memref<9x4x128xbf16, #tpu.memory_space<vmem>>, vector<1x4x128xbf16>
    %22 = vector.shape_cast %21 : vector<1x4x128xbf16> to vector<4x128xbf16>
    %cst_13 = arith.constant dense<0.000000e+00> : vector<256x128xf32>
    %23 = tpu.matmul %20, %22, %cst_13 {dimension_numbers = #tpu.dot_dimension_numbers<[1], [0], [0], [1], [0, 0, 1, 1], [], []>} : vector<256x4xbf16>, vector<4x128xbf16>, vector<256x128xf32> -> vector<256x128xf32>
    %24 = arith.addf %18, %23 : vector<256x128xf32>
    %25 = vector.extract_strided_slice %9 {offsets = [0, 1, 0], sizes = [16, 16, 4], strides = [1, 1, 1]} : vector<16x34x4xbf16> to vector<16x16x4xbf16>
    %26 = vector.shape_cast %25 : vector<16x16x4xbf16> to vector<256x4xbf16>
    %c2 = arith.constant 2 : index
    %c0_14 = arith.constant 0 : index
    %c0_15 = arith.constant 0 : index
    %27 = vector.load %arg4[%c2, %c0_14, %c0_15] : memref<9x4x128xbf16, #tpu.memory_space<vmem>>, vector<1x4x128xbf16>
    %28 = vector.shape_cast %27 : vector<1x4x128xbf16> to vector<4x128xbf16>
    %cst_16 = arith.constant dense<0.000000e+00> : vector<256x128xf32>
    %29 = tpu.matmul %26, %28, %cst_16 {dimension_numbers = #tpu.dot_dimension_numbers<[1], [0], [0], [1], [0, 0, 1, 1], [], []>} : vector<256x4xbf16>, vector<4x128xbf16>, vector<256x128xf32> -> vector<256x128xf32>
    %30 = arith.addf %24, %29 : vector<256x128xf32>
    %31 = vector.extract_strided_slice %11 {offsets = [0, 0, 0], sizes = [16, 16, 4], strides = [1, 1, 1]} : vector<16x34x4xbf16> to vector<16x16x4xbf16>
    %32 = vector.shape_cast %31 : vector<16x16x4xbf16> to vector<256x4xbf16>
    %c3 = arith.constant 3 : index
    %c0_17 = arith.constant 0 : index
    %c0_18 = arith.constant 0 : index
    %33 = vector.load %arg4[%c3, %c0_17, %c0_18] : memref<9x4x128xbf16, #tpu.memory_space<vmem>>, vector<1x4x128xbf16>
    %34 = vector.shape_cast %33 : vector<1x4x128xbf16> to vector<4x128xbf16>
    %cst_19 = arith.constant dense<0.000000e+00> : vector<256x128xf32>
    %35 = tpu.matmul %32, %34, %cst_19 {dimension_numbers = #tpu.dot_dimension_numbers<[1], [0], [0], [1], [0, 0, 1, 1], [], []>} : vector<256x4xbf16>, vector<4x128xbf16>, vector<256x128xf32> -> vector<256x128xf32>
    %36 = arith.addf %30, %35 : vector<256x128xf32>
    %37 = vector.extract_strided_slice %11 {offsets = [0, 17, 0], sizes = [16, 16, 4], strides = [1, 1, 1]} : vector<16x34x4xbf16> to vector<16x16x4xbf16>
    %38 = vector.shape_cast %37 : vector<16x16x4xbf16> to vector<256x4xbf16>
    %c4 = arith.constant 4 : index
    %c0_20 = arith.constant 0 : index
    %c0_21 = arith.constant 0 : index
    %39 = vector.load %arg4[%c4, %c0_20, %c0_21] : memref<9x4x128xbf16, #tpu.memory_space<vmem>>, vector<1x4x128xbf16>
    %40 = vector.shape_cast %39 : vector<1x4x128xbf16> to vector<4x128xbf16>
    %cst_22 = arith.constant dense<0.000000e+00> : vector<256x128xf32>
    %41 = tpu.matmul %38, %40, %cst_22 {dimension_numbers = #tpu.dot_dimension_numbers<[1], [0], [0], [1], [0, 0, 1, 1], [], []>} : vector<256x4xbf16>, vector<4x128xbf16>, vector<256x128xf32> -> vector<256x128xf32>
    %42 = arith.addf %36, %41 : vector<256x128xf32>
    %43 = vector.extract_strided_slice %11 {offsets = [0, 1, 0], sizes = [16, 16, 4], strides = [1, 1, 1]} : vector<16x34x4xbf16> to vector<16x16x4xbf16>
    %44 = vector.shape_cast %43 : vector<16x16x4xbf16> to vector<256x4xbf16>
    %c5 = arith.constant 5 : index
    %c0_23 = arith.constant 0 : index
    %c0_24 = arith.constant 0 : index
    %45 = vector.load %arg4[%c5, %c0_23, %c0_24] : memref<9x4x128xbf16, #tpu.memory_space<vmem>>, vector<1x4x128xbf16>
    %46 = vector.shape_cast %45 : vector<1x4x128xbf16> to vector<4x128xbf16>
    %cst_25 = arith.constant dense<0.000000e+00> : vector<256x128xf32>
    %47 = tpu.matmul %44, %46, %cst_25 {dimension_numbers = #tpu.dot_dimension_numbers<[1], [0], [0], [1], [0, 0, 1, 1], [], []>} : vector<256x4xbf16>, vector<4x128xbf16>, vector<256x128xf32> -> vector<256x128xf32>
    %48 = arith.addf %42, %47 : vector<256x128xf32>
    %49 = vector.extract_strided_slice %7 {offsets = [0, 0, 0], sizes = [16, 16, 4], strides = [1, 1, 1]} : vector<16x34x4xbf16> to vector<16x16x4xbf16>
    %50 = vector.shape_cast %49 : vector<16x16x4xbf16> to vector<256x4xbf16>
    %c6 = arith.constant 6 : index
    %c0_26 = arith.constant 0 : index
    %c0_27 = arith.constant 0 : index
    %51 = vector.load %arg4[%c6, %c0_26, %c0_27] : memref<9x4x128xbf16, #tpu.memory_space<vmem>>, vector<1x4x128xbf16>
    %52 = vector.shape_cast %51 : vector<1x4x128xbf16> to vector<4x128xbf16>
    %cst_28 = arith.constant dense<0.000000e+00> : vector<256x128xf32>
    %53 = tpu.matmul %50, %52, %cst_28 {dimension_numbers = #tpu.dot_dimension_numbers<[1], [0], [0], [1], [0, 0, 1, 1], [], []>} : vector<256x4xbf16>, vector<4x128xbf16>, vector<256x128xf32> -> vector<256x128xf32>
    %54 = arith.addf %48, %53 : vector<256x128xf32>
    %55 = vector.extract_strided_slice %7 {offsets = [0, 17, 0], sizes = [16, 16, 4], strides = [1, 1, 1]} : vector<16x34x4xbf16> to vector<16x16x4xbf16>
    %56 = vector.shape_cast %55 : vector<16x16x4xbf16> to vector<256x4xbf16>
    %c7 = arith.constant 7 : index
    %c0_29 = arith.constant 0 : index
    %c0_30 = arith.constant 0 : index
    %57 = vector.load %arg4[%c7, %c0_29, %c0_30] : memref<9x4x128xbf16, #tpu.memory_space<vmem>>, vector<1x4x128xbf16>
    %58 = vector.shape_cast %57 : vector<1x4x128xbf16> to vector<4x128xbf16>
    %cst_31 = arith.constant dense<0.000000e+00> : vector<256x128xf32>
    %59 = tpu.matmul %56, %58, %cst_31 {dimension_numbers = #tpu.dot_dimension_numbers<[1], [0], [0], [1], [0, 0, 1, 1], [], []>} : vector<256x4xbf16>, vector<4x128xbf16>, vector<256x128xf32> -> vector<256x128xf32>
    %60 = arith.addf %54, %59 : vector<256x128xf32>
    %61 = vector.extract_strided_slice %7 {offsets = [0, 1, 0], sizes = [16, 16, 4], strides = [1, 1, 1]} : vector<16x34x4xbf16> to vector<16x16x4xbf16>
    %62 = vector.shape_cast %61 : vector<16x16x4xbf16> to vector<256x4xbf16>
    %c8 = arith.constant 8 : index
    %c0_32 = arith.constant 0 : index
    %c0_33 = arith.constant 0 : index
    %63 = vector.load %arg4[%c8, %c0_32, %c0_33] : memref<9x4x128xbf16, #tpu.memory_space<vmem>>, vector<1x4x128xbf16>
    %64 = vector.shape_cast %63 : vector<1x4x128xbf16> to vector<4x128xbf16>
    %cst_34 = arith.constant dense<0.000000e+00> : vector<256x128xf32>
    %65 = tpu.matmul %62, %64, %cst_34 {dimension_numbers = #tpu.dot_dimension_numbers<[1], [0], [0], [1], [0, 0, 1, 1], [], []>} : vector<256x4xbf16>, vector<4x128xbf16>, vector<256x128xf32> -> vector<256x128xf32>
    %66 = arith.addf %60, %65 : vector<256x128xf32>
    %c0_35 = arith.constant 0 : index
    %c0_36 = arith.constant 0 : index
    %67 = vector.load %arg5[%c0_35, %c0_36] : memref<1x128xf32, #tpu.memory_space<vmem>>, vector<1x128xf32>
    %68 = vector.broadcast %67 : vector<1x128xf32> to vector<256x128xf32>
    %69 = arith.addf %66, %68 : vector<256x128xf32>
    %cst_37 = arith.constant 0.000000e+00 : f32
    %70 = vector.broadcast %cst_37 : f32 to vector<256x128xf32>
    %71 = arith.maximumf %69, %70 : vector<256x128xf32>
    %72 = vector.shape_cast %71 : vector<256x128xf32> to vector<16x16x128xf32>
    %73 = arith.truncf %72 : vector<16x16x128xf32> to vector<16x16x128xbf16>
    %c0_38 = arith.constant 0 : index
    %c0_39 = arith.constant 0 : index
    %c0_40 = arith.constant 0 : index
    %c0_41 = arith.constant 0 : index
    %74 = vector.load %arg6[%c0_38, %c0_39, %c0_40, %c0_41] : memref<1x16x16x128xbf16, #tpu.memory_space<vmem>>, vector<1x16x16x128xbf16>
    %75 = vector.shape_cast %74 : vector<1x16x16x128xbf16> to vector<16x16x128xbf16>
    %76 = vector.shape_cast %73 : vector<16x16x128xbf16> to vector<1x16x16x128xbf16>
    tpu.vector_store %arg6[%c0_38, %c0_39, %c0_40, %c0_41], %76 {strides = array<i32>} : memref<1x16x16x128xbf16, #tpu.memory_space<vmem>>, vector<1x16x16x128xbf16>,
    return
  }
  func.func @transform_0(%arg0: i32, %arg1: i32) -> (i32, i32, i32, i32) {
    %c0_i32 = arith.constant 0 : i32
    %c0_i32_0 = arith.constant 0 : i32
    %c0_i32_1 = arith.constant 0 : i32
    return %arg0, %arg1, %c0_i32, %c0_i32_0 : i32, i32, i32, i32
  }
  func.func @transform_1(%arg0: i32, %arg1: i32) -> (i32, i32, i32, i32) {
    %c1_i32 = arith.constant 1 : i32
    %0 = arith.addi %arg1, %c1_i32 : i32
    %c32_i32 = arith.constant 32 : i32
    %1 = arith.muli %c32_i32, %0 : i32
    %c0_i32 = arith.constant 0 : i32
    %c0_i32_0 = arith.constant 0 : i32
    %c0_i32_1 = arith.constant 0 : i32
    return %arg0, %1, %c0_i32, %c0_i32_0 : i32, i32, i32, i32
  }
  func.func @transform_2(%arg0: i32, %arg1: i32) -> (i32, i32, i32) {
    %c0_i32 = arith.constant 0 : i32
    %c0_i32_0 = arith.constant 0 : i32
    %c0_i32_1 = arith.constant 0 : i32
    %c0_i32_2 = arith.constant 0 : i32
    return %c0_i32, %c0_i32_0, %c0_i32_1 : i32, i32, i32
  }
  func.func @transform_3(%arg0: i32, %arg1: i32) -> (i32, i32) {
    %c0_i32 = arith.constant 0 : i32
    %c0_i32_0 = arith.constant 0 : i32
    %c0_i32_1 = arith.constant 0 : i32
    return %c0_i32, %c0_i32_0 : i32, i32
  }
  func.func @transform_4(%arg0: i32, %arg1: i32) -> (i32, i32, i32, i32) {
    %c0_i32 = arith.constant 0 : i32
    %c0_i32_0 = arith.constant 0 : i32
    %c0_i32_1 = arith.constant 0 : i32
    return %arg0, %arg1, %c0_i32, %c0_i32_0 : i32, i32, i32, i32
  }
}

module attributes {stable_mosaic.version = 11 : i64} {
  func.func @_conv3x3_kernel(%arg0: i32, %arg1: i32, %arg2: memref<1x16x18x128xbf16, #tpu.memory_space<vmem>>, %arg3: memref<1x1x18x128xbf16, #tpu.memory_space<vmem>>, %arg4: memref<9x128x128xbf16, #tpu.memory_space<vmem>>, %arg5: memref<1x128xf32, #tpu.memory_space<vmem>>, %arg6: memref<1x8x8x128xbf16, #tpu.memory_space<vmem>>) attributes {dimension_semantics = [#tpu.dimension_semantics<parallel>, #tpu.dimension_semantics<parallel>], iteration_bounds = array<i64: 2, 1>, scalar_prefetch = 0 : i64, scratch_operands = 0 : i64, tpu.core_type = #tpu.core_type<tc>, window_params = [{transform_indices = @transform_0, window_bounds = array<i64: 1, 16, 18, 128>}, {transform_indices = @transform_1, window_bounds = array<i64: 1, 1, 18, 128>}, {pipeline_mode = #tpu.pipeline_mode<synchronous>, transform_indices = @transform_2, window_bounds = array<i64: 9, 128, 128>}, {pipeline_mode = #tpu.pipeline_mode<synchronous>, transform_indices = @transform_3, window_bounds = array<i64: 1, 128>}, {transform_indices = @transform_4, window_bounds = array<i64: 1, 8, 8, 128>}]} {
    %c0 = arith.constant 0 : index
    %c0_0 = arith.constant 0 : index
    %c0_1 = arith.constant 0 : index
    %c0_2 = arith.constant 0 : index
    %0 = vector.load %arg2[%c0, %c0_0, %c0_1, %c0_2] : memref<1x16x18x128xbf16, #tpu.memory_space<vmem>>, vector<1x16x18x128xbf16>
    %1 = vector.shape_cast %0 : vector<1x16x18x128xbf16> to vector<16x18x128xbf16>
    %c0_3 = arith.constant 0 : index
    %c0_4 = arith.constant 0 : index
    %c0_5 = arith.constant 0 : index
    %c0_6 = arith.constant 0 : index
    %2 = vector.load %arg3[%c0_3, %c0_4, %c0_5, %c0_6] : memref<1x1x18x128xbf16, #tpu.memory_space<vmem>>, vector<1x1x18x128xbf16>
    %3 = vector.shape_cast %2 : vector<1x1x18x128xbf16> to vector<1x18x128xbf16>
    %4 = vector.shape_cast %1 : vector<16x18x128xbf16> to vector<8x2x18x128xbf16>
    %5 = vector.extract_strided_slice %4 {offsets = [1, 0, 0, 0], sizes = [7, 1, 18, 128], strides = [1, 1, 1, 1]} : vector<8x2x18x128xbf16> to vector<7x1x18x128xbf16>
    %6 = vector.shape_cast %5 : vector<7x1x18x128xbf16> to vector<7x18x128xbf16>
    %7 = tpu.concatenate %6, %3 in 0 : vector<7x18x128xbf16>, vector<1x18x128xbf16> -> vector<8x18x128xbf16>
    %8 = vector.extract_strided_slice %4 {offsets = [0, 0, 0, 0], sizes = [8, 1, 18, 128], strides = [1, 1, 1, 1]} : vector<8x2x18x128xbf16> to vector<8x1x18x128xbf16>
    %9 = vector.shape_cast %8 : vector<8x1x18x128xbf16> to vector<8x18x128xbf16>
    %10 = vector.extract_strided_slice %4 {offsets = [0, 1, 0, 0], sizes = [8, 1, 18, 128], strides = [1, 1, 1, 1]} : vector<8x2x18x128xbf16> to vector<8x1x18x128xbf16>
    %11 = vector.shape_cast %10 : vector<8x1x18x128xbf16> to vector<8x18x128xbf16>
    %cst = arith.constant 0.000000e+00 : f32
    %12 = vector.broadcast %cst : f32 to vector<64x128xf32>
    %13 = vector.extract_strided_slice %9 {offsets = [0, 0, 0], sizes = [8, 8, 128], strides = [1, 1, 1]} : vector<8x18x128xbf16> to vector<8x8x128xbf16>
    %14 = vector.shape_cast %13 : vector<8x8x128xbf16> to vector<64x128xbf16>
    %c0_7 = arith.constant 0 : index
    %c0_8 = arith.constant 0 : index
    %c0_9 = arith.constant 0 : index
    %15 = vector.load %arg4[%c0_7, %c0_8, %c0_9] : memref<9x128x128xbf16, #tpu.memory_space<vmem>>, vector<1x128x128xbf16>
    %16 = vector.shape_cast %15 : vector<1x128x128xbf16> to vector<128x128xbf16>
    %cst_10 = arith.constant dense<0.000000e+00> : vector<64x128xf32>
    %17 = tpu.matmul %14, %16, %cst_10 {dimension_numbers = #tpu.dot_dimension_numbers<[1], [0], [0], [1], [0, 0, 1, 1], [], []>} : vector<64x128xbf16>, vector<128x128xbf16>, vector<64x128xf32> -> vector<64x128xf32>
    %18 = arith.addf %12, %17 : vector<64x128xf32>
    %19 = vector.extract_strided_slice %9 {offsets = [0, 9, 0], sizes = [8, 8, 128], strides = [1, 1, 1]} : vector<8x18x128xbf16> to vector<8x8x128xbf16>
    %20 = vector.shape_cast %19 : vector<8x8x128xbf16> to vector<64x128xbf16>
    %c1 = arith.constant 1 : index
    %c0_11 = arith.constant 0 : index
    %c0_12 = arith.constant 0 : index
    %21 = vector.load %arg4[%c1, %c0_11, %c0_12] : memref<9x128x128xbf16, #tpu.memory_space<vmem>>, vector<1x128x128xbf16>
    %22 = vector.shape_cast %21 : vector<1x128x128xbf16> to vector<128x128xbf16>
    %cst_13 = arith.constant dense<0.000000e+00> : vector<64x128xf32>
    %23 = tpu.matmul %20, %22, %cst_13 {dimension_numbers = #tpu.dot_dimension_numbers<[1], [0], [0], [1], [0, 0, 1, 1], [], []>} : vector<64x128xbf16>, vector<128x128xbf16>, vector<64x128xf32> -> vector<64x128xf32>
    %24 = arith.addf %18, %23 : vector<64x128xf32>
    %25 = vector.extract_strided_slice %9 {offsets = [0, 1, 0], sizes = [8, 8, 128], strides = [1, 1, 1]} : vector<8x18x128xbf16> to vector<8x8x128xbf16>
    %26 = vector.shape_cast %25 : vector<8x8x128xbf16> to vector<64x128xbf16>
    %c2 = arith.constant 2 : index
    %c0_14 = arith.constant 0 : index
    %c0_15 = arith.constant 0 : index
    %27 = vector.load %arg4[%c2, %c0_14, %c0_15] : memref<9x128x128xbf16, #tpu.memory_space<vmem>>, vector<1x128x128xbf16>
    %28 = vector.shape_cast %27 : vector<1x128x128xbf16> to vector<128x128xbf16>
    %cst_16 = arith.constant dense<0.000000e+00> : vector<64x128xf32>
    %29 = tpu.matmul %26, %28, %cst_16 {dimension_numbers = #tpu.dot_dimension_numbers<[1], [0], [0], [1], [0, 0, 1, 1], [], []>} : vector<64x128xbf16>, vector<128x128xbf16>, vector<64x128xf32> -> vector<64x128xf32>
    %30 = arith.addf %24, %29 : vector<64x128xf32>
    %31 = vector.extract_strided_slice %11 {offsets = [0, 0, 0], sizes = [8, 8, 128], strides = [1, 1, 1]} : vector<8x18x128xbf16> to vector<8x8x128xbf16>
    %32 = vector.shape_cast %31 : vector<8x8x128xbf16> to vector<64x128xbf16>
    %c3 = arith.constant 3 : index
    %c0_17 = arith.constant 0 : index
    %c0_18 = arith.constant 0 : index
    %33 = vector.load %arg4[%c3, %c0_17, %c0_18] : memref<9x128x128xbf16, #tpu.memory_space<vmem>>, vector<1x128x128xbf16>
    %34 = vector.shape_cast %33 : vector<1x128x128xbf16> to vector<128x128xbf16>
    %cst_19 = arith.constant dense<0.000000e+00> : vector<64x128xf32>
    %35 = tpu.matmul %32, %34, %cst_19 {dimension_numbers = #tpu.dot_dimension_numbers<[1], [0], [0], [1], [0, 0, 1, 1], [], []>} : vector<64x128xbf16>, vector<128x128xbf16>, vector<64x128xf32> -> vector<64x128xf32>
    %36 = arith.addf %30, %35 : vector<64x128xf32>
    %37 = vector.extract_strided_slice %11 {offsets = [0, 9, 0], sizes = [8, 8, 128], strides = [1, 1, 1]} : vector<8x18x128xbf16> to vector<8x8x128xbf16>
    %38 = vector.shape_cast %37 : vector<8x8x128xbf16> to vector<64x128xbf16>
    %c4 = arith.constant 4 : index
    %c0_20 = arith.constant 0 : index
    %c0_21 = arith.constant 0 : index
    %39 = vector.load %arg4[%c4, %c0_20, %c0_21] : memref<9x128x128xbf16, #tpu.memory_space<vmem>>, vector<1x128x128xbf16>
    %40 = vector.shape_cast %39 : vector<1x128x128xbf16> to vector<128x128xbf16>
    %cst_22 = arith.constant dense<0.000000e+00> : vector<64x128xf32>
    %41 = tpu.matmul %38, %40, %cst_22 {dimension_numbers = #tpu.dot_dimension_numbers<[1], [0], [0], [1], [0, 0, 1, 1], [], []>} : vector<64x128xbf16>, vector<128x128xbf16>, vector<64x128xf32> -> vector<64x128xf32>
    %42 = arith.addf %36, %41 : vector<64x128xf32>
    %43 = vector.extract_strided_slice %11 {offsets = [0, 1, 0], sizes = [8, 8, 128], strides = [1, 1, 1]} : vector<8x18x128xbf16> to vector<8x8x128xbf16>
    %44 = vector.shape_cast %43 : vector<8x8x128xbf16> to vector<64x128xbf16>
    %c5 = arith.constant 5 : index
    %c0_23 = arith.constant 0 : index
    %c0_24 = arith.constant 0 : index
    %45 = vector.load %arg4[%c5, %c0_23, %c0_24] : memref<9x128x128xbf16, #tpu.memory_space<vmem>>, vector<1x128x128xbf16>
    %46 = vector.shape_cast %45 : vector<1x128x128xbf16> to vector<128x128xbf16>
    %cst_25 = arith.constant dense<0.000000e+00> : vector<64x128xf32>
    %47 = tpu.matmul %44, %46, %cst_25 {dimension_numbers = #tpu.dot_dimension_numbers<[1], [0], [0], [1], [0, 0, 1, 1], [], []>} : vector<64x128xbf16>, vector<128x128xbf16>, vector<64x128xf32> -> vector<64x128xf32>
    %48 = arith.addf %42, %47 : vector<64x128xf32>
    %49 = vector.extract_strided_slice %7 {offsets = [0, 0, 0], sizes = [8, 8, 128], strides = [1, 1, 1]} : vector<8x18x128xbf16> to vector<8x8x128xbf16>
    %50 = vector.shape_cast %49 : vector<8x8x128xbf16> to vector<64x128xbf16>
    %c6 = arith.constant 6 : index
    %c0_26 = arith.constant 0 : index
    %c0_27 = arith.constant 0 : index
    %51 = vector.load %arg4[%c6, %c0_26, %c0_27] : memref<9x128x128xbf16, #tpu.memory_space<vmem>>, vector<1x128x128xbf16>
    %52 = vector.shape_cast %51 : vector<1x128x128xbf16> to vector<128x128xbf16>
    %cst_28 = arith.constant dense<0.000000e+00> : vector<64x128xf32>
    %53 = tpu.matmul %50, %52, %cst_28 {dimension_numbers = #tpu.dot_dimension_numbers<[1], [0], [0], [1], [0, 0, 1, 1], [], []>} : vector<64x128xbf16>, vector<128x128xbf16>, vector<64x128xf32> -> vector<64x128xf32>
    %54 = arith.addf %48, %53 : vector<64x128xf32>
    %55 = vector.extract_strided_slice %7 {offsets = [0, 9, 0], sizes = [8, 8, 128], strides = [1, 1, 1]} : vector<8x18x128xbf16> to vector<8x8x128xbf16>
    %56 = vector.shape_cast %55 : vector<8x8x128xbf16> to vector<64x128xbf16>
    %c7 = arith.constant 7 : index
    %c0_29 = arith.constant 0 : index
    %c0_30 = arith.constant 0 : index
    %57 = vector.load %arg4[%c7, %c0_29, %c0_30] : memref<9x128x128xbf16, #tpu.memory_space<vmem>>, vector<1x128x128xbf16>
    %58 = vector.shape_cast %57 : vector<1x128x128xbf16> to vector<128x128xbf16>
    %cst_31 = arith.constant dense<0.000000e+00> : vector<64x128xf32>
    %59 = tpu.matmul %56, %58, %cst_31 {dimension_numbers = #tpu.dot_dimension_numbers<[1], [0], [0], [1], [0, 0, 1, 1], [], []>} : vector<64x128xbf16>, vector<128x128xbf16>, vector<64x128xf32> -> vector<64x128xf32>
    %60 = arith.addf %54, %59 : vector<64x128xf32>
    %61 = vector.extract_strided_slice %7 {offsets = [0, 1, 0], sizes = [8, 8, 128], strides = [1, 1, 1]} : vector<8x18x128xbf16> to vector<8x8x128xbf16>
    %62 = vector.shape_cast %61 : vector<8x8x128xbf16> to vector<64x128xbf16>
    %c8 = arith.constant 8 : index
    %c0_32 = arith.constant 0 : index
    %c0_33 = arith.constant 0 : index
    %63 = vector.load %arg4[%c8, %c0_32, %c0_33] : memref<9x128x128xbf16, #tpu.memory_space<vmem>>, vector<1x128x128xbf16>
    %64 = vector.shape_cast %63 : vector<1x128x128xbf16> to vector<128x128xbf16>
    %cst_34 = arith.constant dense<0.000000e+00> : vector<64x128xf32>
    %65 = tpu.matmul %62, %64, %cst_34 {dimension_numbers = #tpu.dot_dimension_numbers<[1], [0], [0], [1], [0, 0, 1, 1], [], []>} : vector<64x128xbf16>, vector<128x128xbf16>, vector<64x128xf32> -> vector<64x128xf32>
    %66 = arith.addf %60, %65 : vector<64x128xf32>
    %c0_35 = arith.constant 0 : index
    %c0_36 = arith.constant 0 : index
    %67 = vector.load %arg5[%c0_35, %c0_36] : memref<1x128xf32, #tpu.memory_space<vmem>>, vector<1x128xf32>
    %68 = vector.broadcast %67 : vector<1x128xf32> to vector<64x128xf32>
    %69 = arith.addf %66, %68 : vector<64x128xf32>
    %cst_37 = arith.constant 0.000000e+00 : f32
    %70 = vector.broadcast %cst_37 : f32 to vector<64x128xf32>
    %71 = arith.maximumf %69, %70 : vector<64x128xf32>
    %72 = vector.shape_cast %71 : vector<64x128xf32> to vector<8x8x128xf32>
    %73 = arith.truncf %72 : vector<8x8x128xf32> to vector<8x8x128xbf16>
    %c0_38 = arith.constant 0 : index
    %c0_39 = arith.constant 0 : index
    %c0_40 = arith.constant 0 : index
    %c0_41 = arith.constant 0 : index
    %74 = vector.load %arg6[%c0_38, %c0_39, %c0_40, %c0_41] : memref<1x8x8x128xbf16, #tpu.memory_space<vmem>>, vector<1x8x8x128xbf16>
    %75 = vector.shape_cast %74 : vector<1x8x8x128xbf16> to vector<8x8x128xbf16>
    %76 = vector.shape_cast %73 : vector<8x8x128xbf16> to vector<1x8x8x128xbf16>
    tpu.vector_store %arg6[%c0_38, %c0_39, %c0_40, %c0_41], %76 {strides = array<i32>} : memref<1x8x8x128xbf16, #tpu.memory_space<vmem>>, vector<1x8x8x128xbf16>,
    return
  }
  func.func @transform_0(%arg0: i32, %arg1: i32) -> (i32, i32, i32, i32) {
    %c0_i32 = arith.constant 0 : i32
    %c0_i32_0 = arith.constant 0 : i32
    %c0_i32_1 = arith.constant 0 : i32
    return %arg0, %arg1, %c0_i32, %c0_i32_0 : i32, i32, i32, i32
  }
  func.func @transform_1(%arg0: i32, %arg1: i32) -> (i32, i32, i32, i32) {
    %c1_i32 = arith.constant 1 : i32
    %0 = arith.addi %arg1, %c1_i32 : i32
    %c16_i32 = arith.constant 16 : i32
    %1 = arith.muli %c16_i32, %0 : i32
    %c0_i32 = arith.constant 0 : i32
    %c0_i32_0 = arith.constant 0 : i32
    %c0_i32_1 = arith.constant 0 : i32
    return %arg0, %1, %c0_i32, %c0_i32_0 : i32, i32, i32, i32
  }
  func.func @transform_2(%arg0: i32, %arg1: i32) -> (i32, i32, i32) {
    %c0_i32 = arith.constant 0 : i32
    %c0_i32_0 = arith.constant 0 : i32
    %c0_i32_1 = arith.constant 0 : i32
    %c0_i32_2 = arith.constant 0 : i32
    return %c0_i32, %c0_i32_0, %c0_i32_1 : i32, i32, i32
  }
  func.func @transform_3(%arg0: i32, %arg1: i32) -> (i32, i32) {
    %c0_i32 = arith.constant 0 : i32
    %c0_i32_0 = arith.constant 0 : i32
    %c0_i32_1 = arith.constant 0 : i32
    return %c0_i32, %c0_i32_0 : i32, i32
  }
  func.func @transform_4(%arg0: i32, %arg1: i32) -> (i32, i32, i32, i32) {
    %c0_i32 = arith.constant 0 : i32
    %c0_i32_0 = arith.constant 0 : i32
    %c0_i32_1 = arith.constant 0 : i32
    return %arg0, %arg1, %c0_i32, %c0_i32_0 : i32, i32, i32, i32
  }
}

module attributes {stable_mosaic.version = 11 : i64} {
  func.func @_conv3x3_kernel(%arg0: i32, %arg1: i32, %arg2: memref<1x8x10x128xbf16, #tpu.memory_space<vmem>>, %arg3: memref<1x1x10x128xbf16, #tpu.memory_space<vmem>>, %arg4: memref<9x128x128xbf16, #tpu.memory_space<vmem>>, %arg5: memref<1x128xf32, #tpu.memory_space<vmem>>, %arg6: memref<1x4x4x128xbf16, #tpu.memory_space<vmem>>) attributes {dimension_semantics = [#tpu.dimension_semantics<parallel>, #tpu.dimension_semantics<parallel>], iteration_bounds = array<i64: 2, 1>, scalar_prefetch = 0 : i64, scratch_operands = 0 : i64, tpu.core_type = #tpu.core_type<tc>, window_params = [{transform_indices = @transform_0, window_bounds = array<i64: 1, 8, 10, 128>}, {transform_indices = @transform_1, window_bounds = array<i64: 1, 1, 10, 128>}, {pipeline_mode = #tpu.pipeline_mode<synchronous>, transform_indices = @transform_2, window_bounds = array<i64: 9, 128, 128>}, {pipeline_mode = #tpu.pipeline_mode<synchronous>, transform_indices = @transform_3, window_bounds = array<i64: 1, 128>}, {transform_indices = @transform_4, window_bounds = array<i64: 1, 4, 4, 128>}]} {
    %c0 = arith.constant 0 : index
    %c0_0 = arith.constant 0 : index
    %c0_1 = arith.constant 0 : index
    %c0_2 = arith.constant 0 : index
    %0 = vector.load %arg2[%c0, %c0_0, %c0_1, %c0_2] : memref<1x8x10x128xbf16, #tpu.memory_space<vmem>>, vector<1x8x10x128xbf16>
    %1 = vector.shape_cast %0 : vector<1x8x10x128xbf16> to vector<8x10x128xbf16>
    %c0_3 = arith.constant 0 : index
    %c0_4 = arith.constant 0 : index
    %c0_5 = arith.constant 0 : index
    %c0_6 = arith.constant 0 : index
    %2 = vector.load %arg3[%c0_3, %c0_4, %c0_5, %c0_6] : memref<1x1x10x128xbf16, #tpu.memory_space<vmem>>, vector<1x1x10x128xbf16>
    %3 = vector.shape_cast %2 : vector<1x1x10x128xbf16> to vector<1x10x128xbf16>
    %4 = vector.shape_cast %1 : vector<8x10x128xbf16> to vector<4x2x10x128xbf16>
    %5 = vector.extract_strided_slice %4 {offsets = [1, 0, 0, 0], sizes = [3, 1, 10, 128], strides = [1, 1, 1, 1]} : vector<4x2x10x128xbf16> to vector<3x1x10x128xbf16>
    %6 = vector.shape_cast %5 : vector<3x1x10x128xbf16> to vector<3x10x128xbf16>
    %7 = tpu.concatenate %6, %3 in 0 : vector<3x10x128xbf16>, vector<1x10x128xbf16> -> vector<4x10x128xbf16>
    %8 = vector.extract_strided_slice %4 {offsets = [0, 0, 0, 0], sizes = [4, 1, 10, 128], strides = [1, 1, 1, 1]} : vector<4x2x10x128xbf16> to vector<4x1x10x128xbf16>
    %9 = vector.shape_cast %8 : vector<4x1x10x128xbf16> to vector<4x10x128xbf16>
    %10 = vector.extract_strided_slice %4 {offsets = [0, 1, 0, 0], sizes = [4, 1, 10, 128], strides = [1, 1, 1, 1]} : vector<4x2x10x128xbf16> to vector<4x1x10x128xbf16>
    %11 = vector.shape_cast %10 : vector<4x1x10x128xbf16> to vector<4x10x128xbf16>
    %cst = arith.constant 0.000000e+00 : f32
    %12 = vector.broadcast %cst : f32 to vector<16x128xf32>
    %13 = vector.extract_strided_slice %9 {offsets = [0, 0, 0], sizes = [4, 4, 128], strides = [1, 1, 1]} : vector<4x10x128xbf16> to vector<4x4x128xbf16>
    %14 = vector.shape_cast %13 : vector<4x4x128xbf16> to vector<16x128xbf16>
    %c0_7 = arith.constant 0 : index
    %c0_8 = arith.constant 0 : index
    %c0_9 = arith.constant 0 : index
    %15 = vector.load %arg4[%c0_7, %c0_8, %c0_9] : memref<9x128x128xbf16, #tpu.memory_space<vmem>>, vector<1x128x128xbf16>
    %16 = vector.shape_cast %15 : vector<1x128x128xbf16> to vector<128x128xbf16>
    %cst_10 = arith.constant dense<0.000000e+00> : vector<16x128xf32>
    %17 = tpu.matmul %14, %16, %cst_10 {dimension_numbers = #tpu.dot_dimension_numbers<[1], [0], [0], [1], [0, 0, 1, 1], [], []>} : vector<16x128xbf16>, vector<128x128xbf16>, vector<16x128xf32> -> vector<16x128xf32>
    %18 = arith.addf %12, %17 : vector<16x128xf32>
    %19 = vector.extract_strided_slice %9 {offsets = [0, 5, 0], sizes = [4, 4, 128], strides = [1, 1, 1]} : vector<4x10x128xbf16> to vector<4x4x128xbf16>
    %20 = vector.shape_cast %19 : vector<4x4x128xbf16> to vector<16x128xbf16>
    %c1 = arith.constant 1 : index
    %c0_11 = arith.constant 0 : index
    %c0_12 = arith.constant 0 : index
    %21 = vector.load %arg4[%c1, %c0_11, %c0_12] : memref<9x128x128xbf16, #tpu.memory_space<vmem>>, vector<1x128x128xbf16>
    %22 = vector.shape_cast %21 : vector<1x128x128xbf16> to vector<128x128xbf16>
    %cst_13 = arith.constant dense<0.000000e+00> : vector<16x128xf32>
    %23 = tpu.matmul %20, %22, %cst_13 {dimension_numbers = #tpu.dot_dimension_numbers<[1], [0], [0], [1], [0, 0, 1, 1], [], []>} : vector<16x128xbf16>, vector<128x128xbf16>, vector<16x128xf32> -> vector<16x128xf32>
    %24 = arith.addf %18, %23 : vector<16x128xf32>
    %25 = vector.extract_strided_slice %9 {offsets = [0, 1, 0], sizes = [4, 4, 128], strides = [1, 1, 1]} : vector<4x10x128xbf16> to vector<4x4x128xbf16>
    %26 = vector.shape_cast %25 : vector<4x4x128xbf16> to vector<16x128xbf16>
    %c2 = arith.constant 2 : index
    %c0_14 = arith.constant 0 : index
    %c0_15 = arith.constant 0 : index
    %27 = vector.load %arg4[%c2, %c0_14, %c0_15] : memref<9x128x128xbf16, #tpu.memory_space<vmem>>, vector<1x128x128xbf16>
    %28 = vector.shape_cast %27 : vector<1x128x128xbf16> to vector<128x128xbf16>
    %cst_16 = arith.constant dense<0.000000e+00> : vector<16x128xf32>
    %29 = tpu.matmul %26, %28, %cst_16 {dimension_numbers = #tpu.dot_dimension_numbers<[1], [0], [0], [1], [0, 0, 1, 1], [], []>} : vector<16x128xbf16>, vector<128x128xbf16>, vector<16x128xf32> -> vector<16x128xf32>
    %30 = arith.addf %24, %29 : vector<16x128xf32>
    %31 = vector.extract_strided_slice %11 {offsets = [0, 0, 0], sizes = [4, 4, 128], strides = [1, 1, 1]} : vector<4x10x128xbf16> to vector<4x4x128xbf16>
    %32 = vector.shape_cast %31 : vector<4x4x128xbf16> to vector<16x128xbf16>
    %c3 = arith.constant 3 : index
    %c0_17 = arith.constant 0 : index
    %c0_18 = arith.constant 0 : index
    %33 = vector.load %arg4[%c3, %c0_17, %c0_18] : memref<9x128x128xbf16, #tpu.memory_space<vmem>>, vector<1x128x128xbf16>
    %34 = vector.shape_cast %33 : vector<1x128x128xbf16> to vector<128x128xbf16>
    %cst_19 = arith.constant dense<0.000000e+00> : vector<16x128xf32>
    %35 = tpu.matmul %32, %34, %cst_19 {dimension_numbers = #tpu.dot_dimension_numbers<[1], [0], [0], [1], [0, 0, 1, 1], [], []>} : vector<16x128xbf16>, vector<128x128xbf16>, vector<16x128xf32> -> vector<16x128xf32>
    %36 = arith.addf %30, %35 : vector<16x128xf32>
    %37 = vector.extract_strided_slice %11 {offsets = [0, 5, 0], sizes = [4, 4, 128], strides = [1, 1, 1]} : vector<4x10x128xbf16> to vector<4x4x128xbf16>
    %38 = vector.shape_cast %37 : vector<4x4x128xbf16> to vector<16x128xbf16>
    %c4 = arith.constant 4 : index
    %c0_20 = arith.constant 0 : index
    %c0_21 = arith.constant 0 : index
    %39 = vector.load %arg4[%c4, %c0_20, %c0_21] : memref<9x128x128xbf16, #tpu.memory_space<vmem>>, vector<1x128x128xbf16>
    %40 = vector.shape_cast %39 : vector<1x128x128xbf16> to vector<128x128xbf16>
    %cst_22 = arith.constant dense<0.000000e+00> : vector<16x128xf32>
    %41 = tpu.matmul %38, %40, %cst_22 {dimension_numbers = #tpu.dot_dimension_numbers<[1], [0], [0], [1], [0, 0, 1, 1], [], []>} : vector<16x128xbf16>, vector<128x128xbf16>, vector<16x128xf32> -> vector<16x128xf32>
    %42 = arith.addf %36, %41 : vector<16x128xf32>
    %43 = vector.extract_strided_slice %11 {offsets = [0, 1, 0], sizes = [4, 4, 128], strides = [1, 1, 1]} : vector<4x10x128xbf16> to vector<4x4x128xbf16>
    %44 = vector.shape_cast %43 : vector<4x4x128xbf16> to vector<16x128xbf16>
    %c5 = arith.constant 5 : index
    %c0_23 = arith.constant 0 : index
    %c0_24 = arith.constant 0 : index
    %45 = vector.load %arg4[%c5, %c0_23, %c0_24] : memref<9x128x128xbf16, #tpu.memory_space<vmem>>, vector<1x128x128xbf16>
    %46 = vector.shape_cast %45 : vector<1x128x128xbf16> to vector<128x128xbf16>
    %cst_25 = arith.constant dense<0.000000e+00> : vector<16x128xf32>
    %47 = tpu.matmul %44, %46, %cst_25 {dimension_numbers = #tpu.dot_dimension_numbers<[1], [0], [0], [1], [0, 0, 1, 1], [], []>} : vector<16x128xbf16>, vector<128x128xbf16>, vector<16x128xf32> -> vector<16x128xf32>
    %48 = arith.addf %42, %47 : vector<16x128xf32>
    %49 = vector.extract_strided_slice %7 {offsets = [0, 0, 0], sizes = [4, 4, 128], strides = [1, 1, 1]} : vector<4x10x128xbf16> to vector<4x4x128xbf16>
    %50 = vector.shape_cast %49 : vector<4x4x128xbf16> to vector<16x128xbf16>
    %c6 = arith.constant 6 : index
    %c0_26 = arith.constant 0 : index
    %c0_27 = arith.constant 0 : index
    %51 = vector.load %arg4[%c6, %c0_26, %c0_27] : memref<9x128x128xbf16, #tpu.memory_space<vmem>>, vector<1x128x128xbf16>
    %52 = vector.shape_cast %51 : vector<1x128x128xbf16> to vector<128x128xbf16>
    %cst_28 = arith.constant dense<0.000000e+00> : vector<16x128xf32>
    %53 = tpu.matmul %50, %52, %cst_28 {dimension_numbers = #tpu.dot_dimension_numbers<[1], [0], [0], [1], [0, 0, 1, 1], [], []>} : vector<16x128xbf16>, vector<128x128xbf16>, vector<16x128xf32> -> vector<16x128xf32>
    %54 = arith.addf %48, %53 : vector<16x128xf32>
    %55 = vector.extract_strided_slice %7 {offsets = [0, 5, 0], sizes = [4, 4, 128], strides = [1, 1, 1]} : vector<4x10x128xbf16> to vector<4x4x128xbf16>
    %56 = vector.shape_cast %55 : vector<4x4x128xbf16> to vector<16x128xbf16>
    %c7 = arith.constant 7 : index
    %c0_29 = arith.constant 0 : index
    %c0_30 = arith.constant 0 : index
    %57 = vector.load %arg4[%c7, %c0_29, %c0_30] : memref<9x128x128xbf16, #tpu.memory_space<vmem>>, vector<1x128x128xbf16>
    %58 = vector.shape_cast %57 : vector<1x128x128xbf16> to vector<128x128xbf16>
    %cst_31 = arith.constant dense<0.000000e+00> : vector<16x128xf32>
    %59 = tpu.matmul %56, %58, %cst_31 {dimension_numbers = #tpu.dot_dimension_numbers<[1], [0], [0], [1], [0, 0, 1, 1], [], []>} : vector<16x128xbf16>, vector<128x128xbf16>, vector<16x128xf32> -> vector<16x128xf32>
    %60 = arith.addf %54, %59 : vector<16x128xf32>
    %61 = vector.extract_strided_slice %7 {offsets = [0, 1, 0], sizes = [4, 4, 128], strides = [1, 1, 1]} : vector<4x10x128xbf16> to vector<4x4x128xbf16>
    %62 = vector.shape_cast %61 : vector<4x4x128xbf16> to vector<16x128xbf16>
    %c8 = arith.constant 8 : index
    %c0_32 = arith.constant 0 : index
    %c0_33 = arith.constant 0 : index
    %63 = vector.load %arg4[%c8, %c0_32, %c0_33] : memref<9x128x128xbf16, #tpu.memory_space<vmem>>, vector<1x128x128xbf16>
    %64 = vector.shape_cast %63 : vector<1x128x128xbf16> to vector<128x128xbf16>
    %cst_34 = arith.constant dense<0.000000e+00> : vector<16x128xf32>
    %65 = tpu.matmul %62, %64, %cst_34 {dimension_numbers = #tpu.dot_dimension_numbers<[1], [0], [0], [1], [0, 0, 1, 1], [], []>} : vector<16x128xbf16>, vector<128x128xbf16>, vector<16x128xf32> -> vector<16x128xf32>
    %66 = arith.addf %60, %65 : vector<16x128xf32>
    %c0_35 = arith.constant 0 : index
    %c0_36 = arith.constant 0 : index
    %67 = vector.load %arg5[%c0_35, %c0_36] : memref<1x128xf32, #tpu.memory_space<vmem>>, vector<1x128xf32>
    %68 = vector.broadcast %67 : vector<1x128xf32> to vector<16x128xf32>
    %69 = arith.addf %66, %68 : vector<16x128xf32>
    %cst_37 = arith.constant 0.000000e+00 : f32
    %70 = vector.broadcast %cst_37 : f32 to vector<16x128xf32>
    %71 = arith.maximumf %69, %70 : vector<16x128xf32>
    %72 = vector.shape_cast %71 : vector<16x128xf32> to vector<4x4x128xf32>
    %73 = arith.truncf %72 : vector<4x4x128xf32> to vector<4x4x128xbf16>
    %c0_38 = arith.constant 0 : index
    %c0_39 = arith.constant 0 : index
    %c0_40 = arith.constant 0 : index
    %c0_41 = arith.constant 0 : index
    %74 = vector.load %arg6[%c0_38, %c0_39, %c0_40, %c0_41] : memref<1x4x4x128xbf16, #tpu.memory_space<vmem>>, vector<1x4x4x128xbf16>
    %75 = vector.shape_cast %74 : vector<1x4x4x128xbf16> to vector<4x4x128xbf16>
    %76 = vector.shape_cast %73 : vector<4x4x128xbf16> to vector<1x4x4x128xbf16>
    tpu.vector_store %arg6[%c0_38, %c0_39, %c0_40, %c0_41], %76 {strides = array<i32>} : memref<1x4x4x128xbf16, #tpu.memory_space<vmem>>, vector<1x4x4x128xbf16>,
    return
  }
  func.func @transform_0(%arg0: i32, %arg1: i32) -> (i32, i32, i32, i32) {
    %c0_i32 = arith.constant 0 : i32
    %c0_i32_0 = arith.constant 0 : i32
    %c0_i32_1 = arith.constant 0 : i32
    return %arg0, %arg1, %c0_i32, %c0_i32_0 : i32, i32, i32, i32
  }
  func.func @transform_1(%arg0: i32, %arg1: i32) -> (i32, i32, i32, i32) {
    %c1_i32 = arith.constant 1 : i32
    %0 = arith.addi %arg1, %c1_i32 : i32
    %c8_i32 = arith.constant 8 : i32
    %1 = arith.muli %c8_i32, %0 : i32
    %c0_i32 = arith.constant 0 : i32
    %c0_i32_0 = arith.constant 0 : i32
    %c0_i32_1 = arith.constant 0 : i32
    return %arg0, %1, %c0_i32, %c0_i32_0 : i32, i32, i32, i32
  }
  func.func @transform_2(%arg0: i32, %arg1: i32) -> (i32, i32, i32) {
    %c0_i32 = arith.constant 0 : i32
    %c0_i32_0 = arith.constant 0 : i32
    %c0_i32_1 = arith.constant 0 : i32
    %c0_i32_2 = arith.constant 0 : i32
    return %c0_i32, %c0_i32_0, %c0_i32_1 : i32, i32, i32
  }
  func.func @transform_3(%arg0: i32, %arg1: i32) -> (i32, i32) {
    %c0_i32 = arith.constant 0 : i32
    %c0_i32_0 = arith.constant 0 : i32
    %c0_i32_1 = arith.constant 0 : i32
    return %c0_i32, %c0_i32_0 : i32, i32
  }
  func.func @transform_4(%arg0: i32, %arg1: i32) -> (i32, i32, i32, i32) {
    %c0_i32 = arith.constant 0 : i32
    %c0_i32_0 = arith.constant 0 : i32
    %c0_i32_1 = arith.constant 0 : i32
    return %arg0, %arg1, %c0_i32, %c0_i32_0 : i32, i32, i32, i32
  }
}

module attributes {stable_mosaic.version = 11 : i64} {
  func.func @_conv3x3_kernel(%arg0: i32, %arg1: i32, %arg2: memref<1x4x6x128xbf16, #tpu.memory_space<vmem>>, %arg3: memref<1x1x6x128xbf16, #tpu.memory_space<vmem>>, %arg4: memref<9x128x128xbf16, #tpu.memory_space<vmem>>, %arg5: memref<1x128xf32, #tpu.memory_space<vmem>>, %arg6: memref<128x128xbf16, #tpu.memory_space<vmem>>, %arg7: memref<1x128xf32, #tpu.memory_space<vmem>>, %arg8: memref<1x2x2x128xf32, #tpu.memory_space<vmem>>) attributes {dimension_semantics = [#tpu.dimension_semantics<parallel>, #tpu.dimension_semantics<parallel>], iteration_bounds = array<i64: 2, 1>, scalar_prefetch = 0 : i64, scratch_operands = 0 : i64, tpu.core_type = #tpu.core_type<tc>, window_params = [{transform_indices = @transform_0, window_bounds = array<i64: 1, 4, 6, 128>}, {transform_indices = @transform_1, window_bounds = array<i64: 1, 1, 6, 128>}, {pipeline_mode = #tpu.pipeline_mode<synchronous>, transform_indices = @transform_2, window_bounds = array<i64: 9, 128, 128>}, {pipeline_mode = #tpu.pipeline_mode<synchronous>, transform_indices = @transform_3, window_bounds = array<i64: 1, 128>}, {pipeline_mode = #tpu.pipeline_mode<synchronous>, transform_indices = @transform_4, window_bounds = array<i64: 128, 128>}, {pipeline_mode = #tpu.pipeline_mode<synchronous>, transform_indices = @transform_5, window_bounds = array<i64: 1, 128>}, {transform_indices = @transform_6, window_bounds = array<i64: 1, 2, 2, 128>}]} {
    %c0 = arith.constant 0 : index
    %c0_0 = arith.constant 0 : index
    %c0_1 = arith.constant 0 : index
    %c0_2 = arith.constant 0 : index
    %0 = vector.load %arg2[%c0, %c0_0, %c0_1, %c0_2] : memref<1x4x6x128xbf16, #tpu.memory_space<vmem>>, vector<1x4x6x128xbf16>
    %1 = vector.shape_cast %0 : vector<1x4x6x128xbf16> to vector<4x6x128xbf16>
    %c0_3 = arith.constant 0 : index
    %c0_4 = arith.constant 0 : index
    %c0_5 = arith.constant 0 : index
    %c0_6 = arith.constant 0 : index
    %2 = vector.load %arg3[%c0_3, %c0_4, %c0_5, %c0_6] : memref<1x1x6x128xbf16, #tpu.memory_space<vmem>>, vector<1x1x6x128xbf16>
    %3 = vector.shape_cast %2 : vector<1x1x6x128xbf16> to vector<1x6x128xbf16>
    %4 = vector.shape_cast %1 : vector<4x6x128xbf16> to vector<2x2x6x128xbf16>
    %5 = vector.extract_strided_slice %4 {offsets = [1, 0, 0, 0], sizes = [1, 1, 6, 128], strides = [1, 1, 1, 1]} : vector<2x2x6x128xbf16> to vector<1x1x6x128xbf16>
    %6 = vector.shape_cast %5 : vector<1x1x6x128xbf16> to vector<1x6x128xbf16>
    %7 = tpu.concatenate %6, %3 in 0 : vector<1x6x128xbf16>, vector<1x6x128xbf16> -> vector<2x6x128xbf16>
    %8 = vector.extract_strided_slice %4 {offsets = [0, 0, 0, 0], sizes = [2, 1, 6, 128], strides = [1, 1, 1, 1]} : vector<2x2x6x128xbf16> to vector<2x1x6x128xbf16>
    %9 = vector.shape_cast %8 : vector<2x1x6x128xbf16> to vector<2x6x128xbf16>
    %10 = vector.extract_strided_slice %4 {offsets = [0, 1, 0, 0], sizes = [2, 1, 6, 128], strides = [1, 1, 1, 1]} : vector<2x2x6x128xbf16> to vector<2x1x6x128xbf16>
    %11 = vector.shape_cast %10 : vector<2x1x6x128xbf16> to vector<2x6x128xbf16>
    %cst = arith.constant 0.000000e+00 : f32
    %12 = vector.broadcast %cst : f32 to vector<4x128xf32>
    %13 = vector.extract_strided_slice %9 {offsets = [0, 0, 0], sizes = [2, 2, 128], strides = [1, 1, 1]} : vector<2x6x128xbf16> to vector<2x2x128xbf16>
    %14 = vector.shape_cast %13 : vector<2x2x128xbf16> to vector<4x128xbf16>
    %c0_7 = arith.constant 0 : index
    %c0_8 = arith.constant 0 : index
    %c0_9 = arith.constant 0 : index
    %15 = vector.load %arg4[%c0_7, %c0_8, %c0_9] : memref<9x128x128xbf16, #tpu.memory_space<vmem>>, vector<1x128x128xbf16>
    %16 = vector.shape_cast %15 : vector<1x128x128xbf16> to vector<128x128xbf16>
    %cst_10 = arith.constant dense<0.000000e+00> : vector<4x128xf32>
    %17 = tpu.matmul %14, %16, %cst_10 {dimension_numbers = #tpu.dot_dimension_numbers<[1], [0], [0], [1], [0, 0, 1, 1], [], []>} : vector<4x128xbf16>, vector<128x128xbf16>, vector<4x128xf32> -> vector<4x128xf32>
    %18 = arith.addf %12, %17 : vector<4x128xf32>
    %19 = vector.extract_strided_slice %9 {offsets = [0, 3, 0], sizes = [2, 2, 128], strides = [1, 1, 1]} : vector<2x6x128xbf16> to vector<2x2x128xbf16>
    %20 = vector.shape_cast %19 : vector<2x2x128xbf16> to vector<4x128xbf16>
    %c1 = arith.constant 1 : index
    %c0_11 = arith.constant 0 : index
    %c0_12 = arith.constant 0 : index
    %21 = vector.load %arg4[%c1, %c0_11, %c0_12] : memref<9x128x128xbf16, #tpu.memory_space<vmem>>, vector<1x128x128xbf16>
    %22 = vector.shape_cast %21 : vector<1x128x128xbf16> to vector<128x128xbf16>
    %cst_13 = arith.constant dense<0.000000e+00> : vector<4x128xf32>
    %23 = tpu.matmul %20, %22, %cst_13 {dimension_numbers = #tpu.dot_dimension_numbers<[1], [0], [0], [1], [0, 0, 1, 1], [], []>} : vector<4x128xbf16>, vector<128x128xbf16>, vector<4x128xf32> -> vector<4x128xf32>
    %24 = arith.addf %18, %23 : vector<4x128xf32>
    %25 = vector.extract_strided_slice %9 {offsets = [0, 1, 0], sizes = [2, 2, 128], strides = [1, 1, 1]} : vector<2x6x128xbf16> to vector<2x2x128xbf16>
    %26 = vector.shape_cast %25 : vector<2x2x128xbf16> to vector<4x128xbf16>
    %c2 = arith.constant 2 : index
    %c0_14 = arith.constant 0 : index
    %c0_15 = arith.constant 0 : index
    %27 = vector.load %arg4[%c2, %c0_14, %c0_15] : memref<9x128x128xbf16, #tpu.memory_space<vmem>>, vector<1x128x128xbf16>
    %28 = vector.shape_cast %27 : vector<1x128x128xbf16> to vector<128x128xbf16>
    %cst_16 = arith.constant dense<0.000000e+00> : vector<4x128xf32>
    %29 = tpu.matmul %26, %28, %cst_16 {dimension_numbers = #tpu.dot_dimension_numbers<[1], [0], [0], [1], [0, 0, 1, 1], [], []>} : vector<4x128xbf16>, vector<128x128xbf16>, vector<4x128xf32> -> vector<4x128xf32>
    %30 = arith.addf %24, %29 : vector<4x128xf32>
    %31 = vector.extract_strided_slice %11 {offsets = [0, 0, 0], sizes = [2, 2, 128], strides = [1, 1, 1]} : vector<2x6x128xbf16> to vector<2x2x128xbf16>
    %32 = vector.shape_cast %31 : vector<2x2x128xbf16> to vector<4x128xbf16>
    %c3 = arith.constant 3 : index
    %c0_17 = arith.constant 0 : index
    %c0_18 = arith.constant 0 : index
    %33 = vector.load %arg4[%c3, %c0_17, %c0_18] : memref<9x128x128xbf16, #tpu.memory_space<vmem>>, vector<1x128x128xbf16>
    %34 = vector.shape_cast %33 : vector<1x128x128xbf16> to vector<128x128xbf16>
    %cst_19 = arith.constant dense<0.000000e+00> : vector<4x128xf32>
    %35 = tpu.matmul %32, %34, %cst_19 {dimension_numbers = #tpu.dot_dimension_numbers<[1], [0], [0], [1], [0, 0, 1, 1], [], []>} : vector<4x128xbf16>, vector<128x128xbf16>, vector<4x128xf32> -> vector<4x128xf32>
    %36 = arith.addf %30, %35 : vector<4x128xf32>
    %37 = vector.extract_strided_slice %11 {offsets = [0, 3, 0], sizes = [2, 2, 128], strides = [1, 1, 1]} : vector<2x6x128xbf16> to vector<2x2x128xbf16>
    %38 = vector.shape_cast %37 : vector<2x2x128xbf16> to vector<4x128xbf16>
    %c4 = arith.constant 4 : index
    %c0_20 = arith.constant 0 : index
    %c0_21 = arith.constant 0 : index
    %39 = vector.load %arg4[%c4, %c0_20, %c0_21] : memref<9x128x128xbf16, #tpu.memory_space<vmem>>, vector<1x128x128xbf16>
    %40 = vector.shape_cast %39 : vector<1x128x128xbf16> to vector<128x128xbf16>
    %cst_22 = arith.constant dense<0.000000e+00> : vector<4x128xf32>
    %41 = tpu.matmul %38, %40, %cst_22 {dimension_numbers = #tpu.dot_dimension_numbers<[1], [0], [0], [1], [0, 0, 1, 1], [], []>} : vector<4x128xbf16>, vector<128x128xbf16>, vector<4x128xf32> -> vector<4x128xf32>
    %42 = arith.addf %36, %41 : vector<4x128xf32>
    %43 = vector.extract_strided_slice %11 {offsets = [0, 1, 0], sizes = [2, 2, 128], strides = [1, 1, 1]} : vector<2x6x128xbf16> to vector<2x2x128xbf16>
    %44 = vector.shape_cast %43 : vector<2x2x128xbf16> to vector<4x128xbf16>
    %c5 = arith.constant 5 : index
    %c0_23 = arith.constant 0 : index
    %c0_24 = arith.constant 0 : index
    %45 = vector.load %arg4[%c5, %c0_23, %c0_24] : memref<9x128x128xbf16, #tpu.memory_space<vmem>>, vector<1x128x128xbf16>
    %46 = vector.shape_cast %45 : vector<1x128x128xbf16> to vector<128x128xbf16>
    %cst_25 = arith.constant dense<0.000000e+00> : vector<4x128xf32>
    %47 = tpu.matmul %44, %46, %cst_25 {dimension_numbers = #tpu.dot_dimension_numbers<[1], [0], [0], [1], [0, 0, 1, 1], [], []>} : vector<4x128xbf16>, vector<128x128xbf16>, vector<4x128xf32> -> vector<4x128xf32>
    %48 = arith.addf %42, %47 : vector<4x128xf32>
    %49 = vector.extract_strided_slice %7 {offsets = [0, 0, 0], sizes = [2, 2, 128], strides = [1, 1, 1]} : vector<2x6x128xbf16> to vector<2x2x128xbf16>
    %50 = vector.shape_cast %49 : vector<2x2x128xbf16> to vector<4x128xbf16>
    %c6 = arith.constant 6 : index
    %c0_26 = arith.constant 0 : index
    %c0_27 = arith.constant 0 : index
    %51 = vector.load %arg4[%c6, %c0_26, %c0_27] : memref<9x128x128xbf16, #tpu.memory_space<vmem>>, vector<1x128x128xbf16>
    %52 = vector.shape_cast %51 : vector<1x128x128xbf16> to vector<128x128xbf16>
    %cst_28 = arith.constant dense<0.000000e+00> : vector<4x128xf32>
    %53 = tpu.matmul %50, %52, %cst_28 {dimension_numbers = #tpu.dot_dimension_numbers<[1], [0], [0], [1], [0, 0, 1, 1], [], []>} : vector<4x128xbf16>, vector<128x128xbf16>, vector<4x128xf32> -> vector<4x128xf32>
    %54 = arith.addf %48, %53 : vector<4x128xf32>
    %55 = vector.extract_strided_slice %7 {offsets = [0, 3, 0], sizes = [2, 2, 128], strides = [1, 1, 1]} : vector<2x6x128xbf16> to vector<2x2x128xbf16>
    %56 = vector.shape_cast %55 : vector<2x2x128xbf16> to vector<4x128xbf16>
    %c7 = arith.constant 7 : index
    %c0_29 = arith.constant 0 : index
    %c0_30 = arith.constant 0 : index
    %57 = vector.load %arg4[%c7, %c0_29, %c0_30] : memref<9x128x128xbf16, #tpu.memory_space<vmem>>, vector<1x128x128xbf16>
    %58 = vector.shape_cast %57 : vector<1x128x128xbf16> to vector<128x128xbf16>
    %cst_31 = arith.constant dense<0.000000e+00> : vector<4x128xf32>
    %59 = tpu.matmul %56, %58, %cst_31 {dimension_numbers = #tpu.dot_dimension_numbers<[1], [0], [0], [1], [0, 0, 1, 1], [], []>} : vector<4x128xbf16>, vector<128x128xbf16>, vector<4x128xf32> -> vector<4x128xf32>
    %60 = arith.addf %54, %59 : vector<4x128xf32>
    %61 = vector.extract_strided_slice %7 {offsets = [0, 1, 0], sizes = [2, 2, 128], strides = [1, 1, 1]} : vector<2x6x128xbf16> to vector<2x2x128xbf16>
    %62 = vector.shape_cast %61 : vector<2x2x128xbf16> to vector<4x128xbf16>
    %c8 = arith.constant 8 : index
    %c0_32 = arith.constant 0 : index
    %c0_33 = arith.constant 0 : index
    %63 = vector.load %arg4[%c8, %c0_32, %c0_33] : memref<9x128x128xbf16, #tpu.memory_space<vmem>>, vector<1x128x128xbf16>
    %64 = vector.shape_cast %63 : vector<1x128x128xbf16> to vector<128x128xbf16>
    %cst_34 = arith.constant dense<0.000000e+00> : vector<4x128xf32>
    %65 = tpu.matmul %62, %64, %cst_34 {dimension_numbers = #tpu.dot_dimension_numbers<[1], [0], [0], [1], [0, 0, 1, 1], [], []>} : vector<4x128xbf16>, vector<128x128xbf16>, vector<4x128xf32> -> vector<4x128xf32>
    %66 = arith.addf %60, %65 : vector<4x128xf32>
    %c0_35 = arith.constant 0 : index
    %c0_36 = arith.constant 0 : index
    %67 = vector.load %arg5[%c0_35, %c0_36] : memref<1x128xf32, #tpu.memory_space<vmem>>, vector<1x128xf32>
    %68 = vector.broadcast %67 : vector<1x128xf32> to vector<4x128xf32>
    %69 = arith.addf %66, %68 : vector<4x128xf32>
    %cst_37 = arith.constant 0.000000e+00 : f32
    %70 = vector.broadcast %cst_37 : f32 to vector<4x128xf32>
    %71 = arith.maximumf %69, %70 : vector<4x128xf32>
    %72 = arith.truncf %71 : vector<4x128xf32> to vector<4x128xbf16>
    %c0_38 = arith.constant 0 : index
    %c0_39 = arith.constant 0 : index
    %73 = vector.load %arg6[%c0_38, %c0_39] : memref<128x128xbf16, #tpu.memory_space<vmem>>, vector<128x128xbf16>
    %cst_40 = arith.constant dense<0.000000e+00> : vector<4x128xf32>
    %74 = tpu.matmul %72, %73, %cst_40 {dimension_numbers = #tpu.dot_dimension_numbers<[1], [0], [0], [1], [0, 0, 1, 1], [], []>} : vector<4x128xbf16>, vector<128x128xbf16>, vector<4x128xf32> -> vector<4x128xf32>
    %c0_41 = arith.constant 0 : index
    %c0_42 = arith.constant 0 : index
    %75 = vector.load %arg7[%c0_41, %c0_42] : memref<1x128xf32, #tpu.memory_space<vmem>>, vector<1x128xf32>
    %76 = vector.broadcast %75 : vector<1x128xf32> to vector<4x128xf32>
    %77 = arith.addf %74, %76 : vector<4x128xf32>
    %78 = vector.shape_cast %77 : vector<4x128xf32> to vector<2x2x128xf32>
    %c0_43 = arith.constant 0 : index
    %c0_44 = arith.constant 0 : index
    %c0_45 = arith.constant 0 : index
    %c0_46 = arith.constant 0 : index
    %79 = vector.load %arg8[%c0_43, %c0_44, %c0_45, %c0_46] : memref<1x2x2x128xf32, #tpu.memory_space<vmem>>, vector<1x2x2x128xf32>
    %80 = vector.shape_cast %79 : vector<1x2x2x128xf32> to vector<2x2x128xf32>
    %81 = vector.shape_cast %78 : vector<2x2x128xf32> to vector<1x2x2x128xf32>
    tpu.vector_store %arg8[%c0_43, %c0_44, %c0_45, %c0_46], %81 {strides = array<i32>} : memref<1x2x2x128xf32, #tpu.memory_space<vmem>>, vector<1x2x2x128xf32>,
    return
  }
  func.func @transform_0(%arg0: i32, %arg1: i32) -> (i32, i32, i32, i32) {
    %c0_i32 = arith.constant 0 : i32
    %c0_i32_0 = arith.constant 0 : i32
    %c0_i32_1 = arith.constant 0 : i32
    return %arg0, %arg1, %c0_i32, %c0_i32_0 : i32, i32, i32, i32
  }
  func.func @transform_1(%arg0: i32, %arg1: i32) -> (i32, i32, i32, i32) {
    %c1_i32 = arith.constant 1 : i32
    %0 = arith.addi %arg1, %c1_i32 : i32
    %c4_i32 = arith.constant 4 : i32
    %1 = arith.muli %c4_i32, %0 : i32
    %c0_i32 = arith.constant 0 : i32
    %c0_i32_0 = arith.constant 0 : i32
    %c0_i32_1 = arith.constant 0 : i32
    return %arg0, %1, %c0_i32, %c0_i32_0 : i32, i32, i32, i32
  }
  func.func @transform_2(%arg0: i32, %arg1: i32) -> (i32, i32, i32) {
    %c0_i32 = arith.constant 0 : i32
    %c0_i32_0 = arith.constant 0 : i32
    %c0_i32_1 = arith.constant 0 : i32
    %c0_i32_2 = arith.constant 0 : i32
    return %c0_i32, %c0_i32_0, %c0_i32_1 : i32, i32, i32
  }
  func.func @transform_3(%arg0: i32, %arg1: i32) -> (i32, i32) {
    %c0_i32 = arith.constant 0 : i32
    %c0_i32_0 = arith.constant 0 : i32
    %c0_i32_1 = arith.constant 0 : i32
    return %c0_i32, %c0_i32_0 : i32, i32
  }
  func.func @transform_4(%arg0: i32, %arg1: i32) -> (i32, i32) {
    %c0_i32 = arith.constant 0 : i32
    %c0_i32_0 = arith.constant 0 : i32
    %c0_i32_1 = arith.constant 0 : i32
    return %c0_i32, %c0_i32_0 : i32, i32
  }
  func.func @transform_5(%arg0: i32, %arg1: i32) -> (i32, i32) {
    %c0_i32 = arith.constant 0 : i32
    %c0_i32_0 = arith.constant 0 : i32
    %c0_i32_1 = arith.constant 0 : i32
    return %c0_i32, %c0_i32_0 : i32, i32
  }
  func.func @transform_6(%arg0: i32, %arg1: i32) -> (i32, i32, i32, i32) {
    %c0_i32 = arith.constant 0 : i32
    %c0_i32_0 = arith.constant 0 : i32
    %c0_i32_1 = arith.constant 0 : i32
    return %arg0, %arg1, %c0_i32, %c0_i32_0 : i32, i32, i32, i32
  }
}

</mosaic_0001>

<bundles_post_ra>
// kernel: convolution_stem.5
= control target key start
LH: loop header
LB: loop body
LE: loop exit
PB: predicated region body
PF: predicated region fallthrough
CT: control target
= control target key end

     0   :  { %s3064_s15 = smov 0   ;;  %s3066_s16 = smov 0   ;;  %s3736_s0 = inlined_call_operand.vmem [shape: bf16[2,18,18,128], index: 0, kind: input, shape index: {}, may-alias: {0,1}]   ;;  %s3737_s1 = inlined_call_operand.vmem [shape: bf16[2,18,18,128], index: 1, kind: input, shape index: {}, may-alias: {0,1}]   ;;  %s3738_s2 = inlined_call_operand.vmem [shape: bf16[9,128,128], index: 2, kind: input, shape index: {}]   ;;  %s3739_s3 = inlined_call_operand.vmem [shape: f32[1,128], index: 3, kind: input, shape index: {}]   ;;  %s3740_s4 = inlined_call_operand.vmem [shape: bf16[2,8,8,128], index: 4, kind: output, shape index: {}]  }
   0x1   :  { %s3068_s17 = smov 0  }
   0x2 LB: > { %s26_s18 = sadd.s32 1, %s3033_s16  ;;  %p2295_p0 = scmp.ge.s32.totalorder %s3037_s17, 1  ;;  %s3037_s17 = sphi %s3068_s17, %s14_s17   ;;  %s3033_s16 = sphi %s3066_s16, %s3776_s16   ;;  %s3029_s15 = sphi %s3064_s15, %s3775_s15  }
   0x3   : > { %p28_p1 = scmp.ge.s32.totalorder %s26_s18, 2  ;;  %p218_p2 = scmp.lt.s32.totalorder %s3037_s17, 3 }
   0x5   : > { %s3778_s18 = smov (%p28_p1, %s26_s18), 0  ;;  %p219_p3 = pnand %p2295_p0, %p218_p2 }
   0x7   : > { %222 = sbr.rel (%p219_p3) target bundleno = 382 (0x17e), region = 36 }
   0xc   : > { %v2932_v0 = vld [vmem:[%s3738_s2 + $0x78] sm:$0xff]   ;;  %p275_p4 = scmp.lt.s32.totalorder %s3029_s15, 1  ;;  %v2934_v2 = vld [vmem:[%s3738_s2 + $0x70] sm:$0xff]   ;;  %v2936_v4 = vld [vmem:[%s3738_s2 + $0x68] sm:$0xff]   ;;  %vm381_vm0 = vsmask.f32 3328 }
   0xd   : > { %v2933_v1 = vld [vmem:[%s3738_s2 + $0x38] sm:$0xff]   ;;  %2673 = vmatprep.subr.bf16.mxu0 %v2932_v0  ;;  %v2935_v3 = vld [vmem:[%s3738_s2 + $0x30] sm:$0xff]   ;;  %v2937_v5 = vld [vmem:[%s3738_s2 + $0x28] sm:$0xff]   ;;  %vm382_vm1 = vsmask.f32 7440 }
   0xe   : > { %2697 = vmatprep.subr.bf16.mxu1 %v2933_v1  ;;  %2674 = vmatpush3.bf16.msra.mxu0 %v2932_v0  ;;  %s3780_s15 = smov (!%p275_p4, %s3029_s15), 1  ;;  %v2938_v6 = vld [vmem:[%s3738_s2 + $0x60] sm:$0xff]   ;;  %v2940_v8 = vld [vmem:[%s3738_s2 + $0x58] sm:$0xff]   ;;  %v2942_v10 = vld [vmem:[%s3738_s2 + $0x50] sm:$0xff]  }
   0xf   : > { %2698 = vmatpush3.bf16.msra.mxu1 %v2933_v1  ;;  %2675 = vmatprep.subr.bf16.mxu0 %v2934_v2  ;;  %v2939_v7 = vld [vmem:[%s3738_s2 + $0x20] sm:$0xff]   ;;  %s2905_s9 = smul.u32 216, %s3780_s15  ;;  %v2941_v9 = vld [vmem:[%s3738_s2 + $0x18] sm:$0xff]   ;;  %v2943_v11 = vld [vmem:[%s3738_s2 + $0x10] sm:$0xff]   ;;  %s2541_s24 = sshll.u32 %s3780_s15, 5 }
  0x10   : > { %2699 = vmatprep.subr.bf16.mxu1 %v2935_v3  ;;  %v2944_v18 = vld [vmem:[%s3738_s2 + $0x48] sm:$0xff]   ;;  %v2946_v40 = vld [vmem:[%s3738_s2 + $0x40] sm:$0xff]   ;;  %vm3156_vm2 = vmor %vm381_vm0, %vm382_vm1  ;;  %s311_s28 = scalar_lea.vmem %s3740_s4, %s2541_s24 }
  0x11   : > { %s3120_s20 = scalar_lea.vmem %s3736_s0, %s2905_s9  ;;  %v2945_v31 = vld [vmem:[%s3738_s2 + $0x8] sm:$0xff]   ;;  %v2947_v51 = vld [vmem:[%s3738_s2] sm:$0xff]   ;;  %v2950_v61 = vld [vmem:[%s3738_s2 + $0xb8] sm:$0xff]   ;;  %s2540_s12 = sadd.s32 192, %s2905_s9 }
  0x12   : > { %2676 = vmatpush3.bf16.msra.mxu0 %v2934_v2  ;;  %v315_v12 = vld [vmem:[%s3120_s20 + $0x4] sm:$0xf]  ;;  %v316_v13 = vld [vmem:[%s3120_s20 + $0x8] sm:$0x1]  ;;  %v321_v14 = vld [vmem:[%s3120_s20 + $0x1c] sm:$0xf]  ;;  %s3381_s25 = scalar_lea.vmem %s3737_s1, %s2540_s12 }
  0x13   : > { %2700 = vmatpush3.bf16.msra.mxu1 %v2935_v3  ;;  %2677 = vmatprep.subr.bf16.mxu0 %v2936_v4  ;;  %v322_v15 = vld [vmem:[%s3120_s20 + $0x20] sm:$0x1]  ;;  %v327_v16 = vld [vmem:[%s3120_s20 + $0x34] sm:$0xf]  ;;  %v328_v17 = vld [vmem:[%s3120_s20 + $0x38] sm:$0x1] }
  0x14   : > { %2701 = vmatprep.subr.bf16.mxu1 %v2937_v5  ;;  %v385_v19 = vshrl.u32 %v315_v12, 16  ;;  %v388_v20 = vshll.u32 %v315_v12, 16  ;;  %v394_v21 = vshll.u32 %v316_v13, 16  ;;  %v399_v22 = vshrl.u32 %v321_v14, 16  ;;  %v314_v25 = vld [vmem:[%s3120_s20] sm:$0xf] }
  0x15   : > { %v402_v23 = vshll.u32 %v321_v14, 16  ;;  %v408_v24 = vshll.u32 %v322_v15, 16  ;;  %v413_v28 = vshrl.u32 %v327_v16, 16  ;;  %v416_v29 = vshll.u32 %v327_v16, 16  ;;  %v3141_v30 = vld [vmem:[%s3120_s20 + $0x18] sm:$0xf] }
  0x16   : > { %2678 = vmatpush3.bf16.msra.mxu0 %v2936_v4  ;;  %v387_v26 = vrot.slane %v385_v19, 4  ;;  %v3138_v27 = vrot.slane %v388_v20, 5  ;;  %v396_v32 = vrot.slane %v394_v21, 5  ;;  %v401_v33 = vrot.slane %v399_v22, 4  ;;  %v333_v46 = vld [vmem:[%s3120_s20 + $0x4c] sm:$0xf] }
  0x17   : > { %2702 = vmatpush3.bf16.msra.mxu1 %v2937_v5  ;;  %2679 = vmatprep.subr.bf16.mxu0 %v2938_v6  ;;  %v3146_v34 = vrot.slane %v402_v23, 5  ;;  %v410_v35 = vrot.slane %v408_v24, 5  ;;  %v415_v37 = vrot.slane %v413_v28, 4  ;;  %v3149_v38 = vrot.slane %v416_v29, 5  ;;  %v334_v50 = vld [vmem:[%s3120_s20 + $0x50] sm:$0x1] }
  0x18   : > { %2703 = vmatprep.subr.bf16.mxu1 %v2939_v7  ;;  %v391_v36 = vor.u32 %v3138_v27, %v387_v26  ;;  %v422_v39 = vshll.u32 %v328_v17, 16  ;;  %v2328_v43 = vcombine.low %v314_v25, %v3141_v30  ;;  %v780_v44 = vshrl.u32 %v314_v25, 16  ;;  %v3173_v59 = vld [vmem:[%s3120_s20 + $0x30] sm:$0xf]  ;;  %v3176_v60 = vld [vmem:[%s3120_s20 + $0x48] sm:$0xf] }
  0x19   : > { %v405_v42 = vor.u32 %v3146_v34, %v401_v33  ;;  %v783_v45 = vshll.u32 %v314_v25, 16  ;;  %v419_v48 = vor.u32 %v3149_v38, %v415_v37  ;;  %v790_v53 = vshrl.u32 %v3141_v30, 16  ;;  %v2953_v19 = vld [vmem:[%s3738_s2 + $0xf0] sm:$0xff]   ;;  %v2955_v33 = vld [vmem:[%s3738_s2 + $0xe8] sm:$0xff]   ;;  %v337_v20 = vld [vmem:[%s3120_s20 + $0x5c] sm:$0x1] }
  0x1a   : > { %2680 = vmatpush3.bf16.msra.mxu0 %v2938_v6  ;;  %v392_v47 = vrot.slane %v391_v36, 4  ;;  %v424_v49 = vrot.slane %v422_v39, 5  ;;  %2713 = vmatprep.mubr.bf16.mxu1 %v2328_v43  ;;  %v793_v54 = vshll.u32 %v3141_v30, 16  ;;  %v782_v57 = vrot.slane %v780_v44, 4  ;;  %v2952_v26 = vld [vmem:[%s3738_s2 + $0xb0] sm:$0xff]   ;;  %v3000_v41 = vld [vmem:[%s3738_s2 + $0x188] sm:$0xff]  }
  0x1b   : > { %2704 = vmatpush3.bf16.msra.mxu1 %v2939_v7  ;;  %2681 = vmatprep.subr.bf16.mxu0 %v2940_v8  ;;  %v406_v52 = vrot.slane %v405_v42, 4  ;;  %v420_v56 = vrot.slane %v419_v48, 4  ;;  %v427_v58 = vshrl.u32 %v333_v46, 16  ;;  %v785_v63 = vrot.slane %v783_v45, 5  ;;  %v340_v36 = vld [vmem:[%s3120_s20 + $0x68] sm:$0x1] }
  0x1c   : > { %2705 = vmatprep.subr.bf16.mxu1 %v2941_v9  ;;  %v397_v55 = vsel %vm3156_vm2, %v392_v47, %v396_v32  ;;  %v430_v0 = vshll.u32 %v333_v46, 16  ;;  %v436_v4 = vshll.u32 %v334_v50, 16  ;;  %v792_v6 = vrot.slane %v790_v53, 4  ;;  %v345_v39 = vld [vmem:[%s3120_s20 + $0x7c] sm:$0xf]  ;;  %v2954_v50 = vld [vmem:[%s3738_s2 + $0xa8] sm:$0xff]  }
  0x1d   : > { %v3183_v62 = vsel %vm3156_vm2, %v406_v52, %v410_v35  ;;  %v3187_v1 = vsel %vm3156_vm2, %v420_v56, %v424_v49  ;;  %v429_v3 = vrot.slane %v427_v58, 4  ;;  %v795_v7 = vrot.slane %v793_v54, 5  ;;  %v339_v35 = vld [vmem:[%s3120_s20 + $0x64] sm:$0xf]  ;;  %v3228_v48 = vld [vmem:[%s3120_s20 + $0x60] sm:$0xf] }
  0x1e   : > { %2682 = vmatpush3.bf16.msra.mxu0 %v2940_v8  ;;  %v2316_v2 = vcombine.low %v397_v55, %v3183_v62  ;;  %v3192_v8 = vrot.slane %v430_v0, 5  ;;  %v786_v12 = vor.u32 %v785_v63, %v782_v57  ;;  %v438_v14 = vrot.slane %v436_v4, 5  ;;  %v3236_v53 = vld [vmem:[%s3120_s20 + $0x78] sm:$0xf]  ;;  %v2957_v56 = vld [vmem:[%s3738_s2 + $0xe0] sm:$0xff]  }
  0x1f   : > { %2706 = vmatpush3.bf16.msra.mxu1 %v2941_v9  ;;  %2683 = vmatprep.subr.bf16.mxu0 %v2942_v10  ;;  %v2951_v9 = vld [vmem:[%s3738_s2 + $0xf8] sm:$0xff]   ;;  %v2329_v15 = vcombine.low %v3173_v59, %v3176_v60  ;;  %v810_v17 = vshrl.u32 %v3176_v60, 16  ;;  %v796_v23 = vor.u32 %v795_v7, %v792_v6  ;;  %v441_v42 = vshrl.u32 %v339_v35, 16  ;;  %v2956_v0 = vld [vmem:[%s3738_s2 + $0xa0] sm:$0xff]  }
  0x20   : > { %2707 = vmatprep.subr.bf16.mxu1 %v2943_v11  ;;  %2689 = vmatprep.mubr.bf16.mxu0 %v2316_v2  ;;  %v433_v13 = vor.u32 %v3192_v8, %v429_v3  ;;  %v3209_v24 = vrot.slane %v786_v12, 4  ;;  %v444_v43 = vshll.u32 %v339_v35, 16  ;;  %v450_v44 = vshll.u32 %v340_v36, 16  ;;  %v352_v7 = vld [vmem:[%s3120_s20 + $0x98] sm:$0x1] }
  0x21   : > { %v812_v29 = vrot.slane %v810_v17, 4  ;;  %v797_v37 = vrot.slane %v796_v23, 4  ;;  %v455_v45 = vshrl.u32 %v345_v39, 16  ;;  %v458_v46 = vshll.u32 %v345_v39, 16 }
  0x22   : > { %2684 = vmatpush3.bf16.msra.mxu0 %v2942_v10  ;;  %v800_v10 = vshrl.u32 %v3173_v59, 16  ;;  %v434_v21 = vrot.slane %v433_v13, 4  ;;  %v3233_v52 = vrot.slane %v444_v43, 5  ;;  %v788_v54 = vsel %vm3156_vm2, %v3209_v24, %v3138_v27 }
  0x23   : > { %2708 = vmatpush3.bf16.msra.mxu1 %v2943_v11  ;;  %2685 = vmatprep.subr.bf16.mxu0 %v2944_v18  ;;  %v803_v11 = vshll.u32 %v3173_v59, 16  ;;  %v457_v57 = vrot.slane %v455_v45, 4  ;;  %v3245_v58 = vrot.slane %v458_v46, 5  ;;  %v3251_v63 = vsel %vm3156_vm2, %v797_v37, %v3146_v34  ;;  %v2959_v34 = vld [vmem:[%s3738_s2 + $0xd8] sm:$0xff]  }
  0x24   : > { %2709 = vmatprep.subr.bf16.mxu1 %v2945_v31  ;;  %v802_v16 = vrot.slane %v800_v10, 4  ;;  %v3213_v25 = vsel %vm3156_vm2, %v434_v21, %v438_v14  ;;  %v452_v3 = vrot.slane %v450_v44, 5  ;;  %v2330_v6 = vcombine.low %v3228_v48, %v3236_v53 }
  0x25   : > { %v805_v22 = vrot.slane %v803_v11, 5  ;;  %v2317_v28 = vcombine.low %v3187_v1, %v3213_v25  ;;  %v461_v10 = vor.u32 %v3245_v58, %v457_v57  ;;  %v358_v11 = vld [vmem:[%s3120_s20 + $0xb0] sm:$0x1]  ;;  %v478_v14 = vshll.u32 %v352_v7, 16 }
  0x26   : > { %2686 = vmatpush3.bf16.msra.mxu0 %v2944_v18  ;;  %v813_v18 = vshll.u32 %v3176_v60, 16  ;;  %v820_v43 = vshrl.u32 %v3228_v48, 16  ;;  %v823_v46 = vshll.u32 %v3228_v48, 16 }
  0x27   : > { %2710 = vmatpush3.bf16.msra.mxu1 %v2945_v31  ;;  %2687 = vmatprep.subr.bf16.mxu0 %v2946_v40  ;;  %v806_v32 = vor.u32 %v805_v22, %v802_v16  ;;  %v462_v22 = vrot.slane %v461_v10, 4  ;;  %v323_v10 = vld [vmem:[%s3120_s20 + $0x24] sm:$0xf] }
  0x28   : > { %2711 = vmatprep.subr.bf16.mxu1 %v2947_v51  ;;  %v815_v31 = vrot.slane %v813_v18, 5  ;;  %v492_v18 = vshll.u32 %v358_v11, 16 }
  0x29   : > { %v807_v55 = vrot.slane %v806_v32, 4  ;;  %v480_v32 = vrot.slane %v478_v14, 5  ;;  %v2965_v14 = vld [vmem:[%s3738_s2 + $0xc8] sm:$0xff]  }
  0x2a   : > { %2688 = vmatpush3.bf16.msra.mxu0 %v2946_v40  ;;  %v346_v40 = vld [vmem:[%s3120_s20 + $0x80] sm:$0x1]  ;;  %v816_v49 = vor.u32 %v815_v31, %v812_v29  ;;  %v2958_v29 = vld [vmem:[%s3738_s2 + $0x98] sm:$0xff]   ;;  %v494_v45 = vrot.slane %v492_v18, 5 }
  0x2b   : > { %2712 = vmatpush3.bf16.msra.mxu1 %v2947_v51  ;;  %2721 = vmatprep.subr.bf16.mxu0 %v2950_v61  ;;  %v464_v47 = vshll.u32 %v346_v40, 16  ;;  %v443_v51 = vrot.slane %v441_v42, 4 }
  0x2c   : > { %2745 = vmatprep.subr.bf16.mxu1 %v2951_v9  ;;  %v3269_v21 = vrot.slane %v816_v49, 4 }
  0x2d   : > { %2690 = vmatmul.mubr.bf16.vlgmr.msra.gmra.mxu0 %v2317_v28  ;;  %v447_v2 = vor.u32 %v3233_v52, %v443_v51  ;;  %v466_v4 = vrot.slane %v464_v47, 5  ;;  %v3274_v28 = vld [vmem:[%s3120_s20 + $0xa8] sm:$0xf]  ;;  %v830_v47 = vshrl.u32 %v3236_v53, 16  ;;  %v3306_v51 = vsel %vm3156_vm2, %v807_v55, %v3149_v38 }
  0x2e   : > { %2714 = vmatmul.mubr.bf16.vlgmr.msra.gmra.mxu1 %v2329_v15  ;;  %2722 = vmatpush3.bf16.msra.mxu0 %v2950_v61  ;;  %v351_v61 = vld [vmem:[%s3120_s20 + $0x94] sm:$0xf]  ;;  %v2356_v55 = vcombine.low %v788_v54, %v3251_v63  ;;  %v850_v18 = vshrl.u32 %v3274_v28, 16 }
  0x2f   : > { %2746 = vmatpush3.bf16.msra.mxu1 %v2951_v9  ;;  %2723 = vmatprep.subr.bf16.mxu0 %v2952_v26  ;;  %v357_v9 = vld [vmem:[%s3120_s20 + $0xac] sm:$0xf]  ;;  %v469_v12 = vshrl.u32 %v351_v61, 16  ;;  %v472_v13 = vshll.u32 %v351_v61, 16  ;;  %v448_v15 = vrot.slane %v447_v2, 4  ;;  %v3287_v36 = vsel %vm3156_vm2, %v462_v22, %v466_v4  ;;  %v2962_v61 = vld [vmem:[%s3738_s2 + $0x90] sm:$0xff]  }
  0x30   : > { %2747 = vmatprep.subr.bf16.mxu1 %v2953_v19  ;;  %v483_v16 = vshrl.u32 %v357_v9, 16  ;;  %v486_v17 = vshll.u32 %v357_v9, 16  ;;  %2717 = vmatprep.mubr.bf16.mxu1 %v2330_v6  ;;  %v317_v9 = vld [vmem:[%s3120_s20 + $0xc] sm:$0xf]  ;;  %v853_v22 = vshll.u32 %v3274_v28, 16 }
  0x31   : > { %v471_v23 = vrot.slane %v469_v12, 4  ;;  %v3281_v31 = vsel %vm3156_vm2, %v448_v15, %v452_v3  ;;  %v2384_v54 = vcombine.low %v317_v9, %v323_v10  ;;  %v1442_v11 = vshrl.u32 %v317_v9, 16  ;;  %v3341_v12 = vld [vmem:[%s3120_s20 + $0x3c] sm:$0xf] }
  0x32   : > { %2724 = vmatpush3.bf16.msra.mxu0 %v2952_v26  ;;  %v3271_v26 = vrot.slane %v472_v13, 5  ;;  %v3283_v35 = vrot.slane %v486_v17, 5  ;;  %v2318_v42 = vcombine.low %v3281_v31, %v3287_v36  ;;  %v2964_v13 = vld [vmem:[%s3738_s2 + $0x88] sm:$0xff]   ;;  %v1452_v15 = vshrl.u32 %v323_v10, 16 }
  0x33   : > { %2748 = vmatpush3.bf16.msra.mxu1 %v2953_v19  ;;  %2725 = vmatprep.subr.bf16.mxu0 %v2954_v50  ;;  %v3267_v19 = vld [vmem:[%s3120_s20 + $0x90] sm:$0xf]  ;;  %v1462_v17 = vshrl.u32 %v3341_v12, 16 }
  0x34   : > { %2749 = vmatprep.subr.bf16.mxu1 %v2955_v33  ;;  %v475_v39 = vor.u32 %v3271_v26, %v471_v23  ;;  %v2331_v40 = vcombine.low %v3267_v19, %v3274_v28  ;;  %2693 = vmatprep.mubr.bf16.mxu0 %v2318_v42  ;;  %v840_v6 = vshrl.u32 %v3267_v19, 16  ;;  %v843_v7 = vshll.u32 %v3267_v19, 16  ;;  %v3369_v42 = vld [vmem:[%s3120_s20 + $0x54] sm:$0xf] }
  0x35   : > { %v1465_v23 = vshll.u32 %v3341_v12, 16 }
  0x36   : > { %2726 = vmatpush3.bf16.msra.mxu0 %v2954_v50  ;;  %v476_v49 = vrot.slane %v475_v39, 4  ;;  %2718 = vmatmul.mubr.bf16.gmra.mxu1 %v2331_v40  ;;  %v2963_v50 = vld [vmem:[%s3738_s2 + $0xd0] sm:$0xff]   ;;  %v3358_v39 = vrot.slane %v1442_v11, 4  ;;  %v3397_v11 = vld [vmem:[%s3381_s25 + $0x4] sm:$0xf] }
  0x37   : > { %2750 = vmatpush3.bf16.msra.mxu1 %v2955_v33  ;;  %v485_v33 = vrot.slane %v483_v16, 4  ;;  %2727 = vmatprep.subr.bf16.mxu0 %v2956_v0  ;;  %v1455_v16 = vshll.u32 %v323_v10, 16  ;;  %v2385_v10 = vcombine.low %v3341_v12, %v3369_v42 }
  0x38   : > { %2751 = vmatprep.subr.bf16.mxu1 %v2957_v56  ;;  %v3318_v38 = vsel %vm3156_vm2, %v476_v49, %v480_v32  ;;  %2761 = vmatprep.mubr.bf16.mxu1 %v2384_v54  ;;  %v822_v32 = vrot.slane %v820_v43, 4  ;;  %v3371_v43 = vrot.slane %v1452_v15, 4  ;;  %v1472_v49 = vshrl.u32 %v3369_v42, 16  ;;  %v3394_v54 = vld [vmem:[%s3381_s25] sm:$0xf] }
  0x39   : > { %v489_v44 = vor.u32 %v3283_v35, %v485_v33  ;;  %v2967_v33 = vld [vmem:[%s3738_s2 + $0xc0] sm:$0xff]  }
  0x3a   : > { %2728 = vmatpush3.bf16.msra.mxu0 %v2956_v0 }
  0x3b   : > { %2752 = vmatpush3.bf16.msra.mxu1 %v2957_v56  ;;  %v833_v56 = vshll.u32 %v3236_v53, 16  ;;  %v490_v57 = vrot.slane %v489_v44, 4  ;;  %2729 = vmatprep.subr.bf16.mxu0 %v2958_v29  ;;  %v3373_v44 = vrot.slane %v1455_v16, 5  ;;  %v845_v16 = vrot.slane %v843_v7, 5 }
  0x3c   : > { %2753 = vmatprep.subr.bf16.mxu1 %v2959_v34 }
  0x3d   : > { %v3330_v0 = vsel %vm3156_vm2, %v490_v57, %v494_v45  ;;  %v3375_v45 = vrot.slane %v1462_v17, 4  ;;  %v825_v57 = vrot.slane %v823_v46, 5  ;;  %v852_v17 = vrot.slane %v850_v18, 4 }
  0x3e   : > { %v2319_v24 = vcombine.low %v3318_v38, %v3330_v0  ;;  %2730 = vmatpush3.bf16.msra.mxu0 %v2958_v29  ;;  %v3366_v29 = vsel %vm3156_vm2, %v3269_v21, %v3192_v8  ;;  %v2966_v8 = vld [vmem:[%s3738_s2 + $0x80] sm:$0xff]   ;;  %v3386_v21 = vrot.slane %v1465_v23, 5  ;;  %v3399_v46 = vrot.slane %v1472_v49, 4 }
  0x3f   : > { %2754 = vmatpush3.bf16.msra.mxu1 %v2959_v34  ;;  %v1445_v34 = vshll.u32 %v317_v9, 16  ;;  %2731 = vmatprep.subr.bf16.mxu0 %v2962_v61  ;;  %v2357_v9 = vcombine.low %v3306_v51, %v3366_v29  ;;  %v826_v15 = vor.u32 %v825_v57, %v822_v32  ;;  %v1988_v23 = vshll.u32 %v3394_v54, 16 }
  0x40   : > { %2755 = vmatprep.subr.bf16.mxu1 %v2963_v50  ;;  %2694 = vmatmul.mubr.bf16.gmra.mxu0 %v2319_v24  ;;  %v835_v24 = vrot.slane %v833_v56, 5  ;;  %v1985_v56 = vshrl.u32 %v3394_v54, 16 }
  0x41   : > { %v3360_v40 = vrot.slane %v1445_v34, 5  ;;  %2737 = vmatprep.mubr.bf16.mxu0 %v2356_v55  ;;  %v832_v55 = vrot.slane %v830_v47, 4  ;;  %v842_v34 = vrot.slane %v840_v6, 4  ;;  %v2971_v47 = vld [vmem:[%s3738_s2 + $0x178] sm:$0xff]   ;;  %v827_v7 = vrot.slane %v826_v15, 4 }
  0x42   : > { %2732 = vmatpush3.bf16.msra.mxu0 %v2962_v61  ;;  %v855_v61 = vrot.slane %v853_v22, 5  ;;  %v2970_v6 = vld [vmem:[%s3738_s2 + $0x138] sm:$0xff]   ;;  %v1987_v49 = vrot.slane %v1985_v56, 4  ;;  %v1990_v57 = vrot.slane %v1988_v23, 5  ;;  %v347_v15 = vld [vmem:[%s3120_s20 + $0x84] sm:$0xf] }
  0x43   : > { %2756 = vmatpush3.bf16.msra.mxu1 %v2963_v50  ;;  %v1475_v50 = vshll.u32 %v3369_v42, 16  ;;  %2733 = vmatprep.subr.bf16.mxu0 %v2964_v13  ;;  %v836_v12 = vor.u32 %v835_v24, %v832_v55  ;;  %v1827_v42 = vshll.u32 %v3397_v11, 16  ;;  %v341_v55 = vld [vmem:[%s3120_s20 + $0x6c] sm:$0xf]  ;;  %v1492_v22 = vshrl.u32 %v347_v15, 16 }
  0x44   : > { %2757 = vmatprep.subr.bf16.mxu1 %v2965_v14  ;;  %v856_v18 = vor.u32 %v855_v61, %v852_v17  ;;  %v2972_v17 = vld [vmem:[%s3738_s2 + $0x130] sm:$0xff]   ;;  %v2386_v56 = vcombine.low %v341_v55, %v347_v15  ;;  %v1485_v4 = vshll.u32 %v341_v55, 16 }
  0x45   : > { %v837_v32 = vrot.slane %v836_v12, 4  ;;  %v2973_v61 = vld [vmem:[%s3738_s2 + $0x170] sm:$0xff]   ;;  %v1991_v12 = vor.u32 %v1990_v57, %v1987_v49 }
  0x46   : > { %2734 = vmatpush3.bf16.msra.mxu0 %v2964_v13  ;;  %v3416_v13 = vsel %vm3156_vm2, %v827_v7, %v3233_v52  ;;  %v353_v7 = vld [vmem:[%s3120_s20 + $0x9c] sm:$0xf]  ;;  %v359_v49 = vld [vmem:[%s3120_s20 + $0xb4] sm:$0xf]  ;;  %v336_v52 = vld [vmem:[%s3120_s20 + $0x58] sm:$0xf] }
  0x47   : > { %2758 = vmatpush3.bf16.msra.mxu1 %v2965_v14  ;;  %v846_v14 = vor.u32 %v845_v16, %v842_v34  ;;  %2735 = vmatprep.subr.bf16.mxu0 %v2966_v8  ;;  %3744 = vst [vmem:[#allocation2_spill] sm:$0xff] %v3416_v13  ;;  %v857_v34 = vrot.slane %v856_v18, 4  ;;  %v1482_v16 = vshrl.u32 %v341_v55, 16  ;;  %v1992_v18 = vrot.slane %v1991_v12, 4 }
  0x48   : > { %2759 = vmatprep.subr.bf16.mxu1 %v2967_v33  ;;  %v1505_v57 = vshll.u32 %v353_v7, 16  ;;  %v3461_v55 = vrot.slane %v1485_v4, 5  ;;  %v1515_v12 = vshll.u32 %v359_v49, 16  ;;  %v1458_v4 = vor.u32 %v3373_v44, %v3371_v43  ;;  %v2981_v43 = vld [vmem:[%s3738_s2 + $0x158] sm:$0xff]   ;;  %v318_v44 = vld [vmem:[%s3120_s20 + $0x10] sm:$0xf] }
  0x49   : > { %v847_v24 = vrot.slane %v846_v14, 4  ;;  %v3435_v14 = vrot.slane %v1827_v42, 5  ;;  %v3454_v42 = vrot.slane %v1482_v16, 4  ;;  %v2387_v16 = vcombine.low %v353_v7, %v359_v49 }
  0x4a   : > { %2736 = vmatpush3.bf16.msra.mxu0 %v2966_v8  ;;  %v858_v8 = vsel %vm3156_vm2, %v857_v34, %v3283_v35  ;;  %v1512_v34 = vshrl.u32 %v359_v49, 16  ;;  %v324_v49 = vld [vmem:[%s3120_s20 + $0x28] sm:$0xf] }
  0x4b   : > { %2760 = vmatpush3.bf16.msra.mxu1 %v2967_v33  ;;  %v3428_v33 = vsel %vm3156_vm2, %v837_v32, %v3245_v58  ;;  %2769 = vmatprep.subr.bf16.mxu0 %v2970_v6  ;;  %v3437_v58 = vrot.slane %v1475_v50, 5  ;;  %v3442_v32 = vsel %vm3156_vm2, %v847_v24, %v3271_v26  ;;  %v1993_v50 = vsel %vm3156_vm2, %v1992_v18, %v3435_v14  ;;  %v2978_v18 = vld [vmem:[%s3738_s2 + $0x120] sm:$0xff]  }
  0x4c   : > { %2793 = vmatprep.subr.bf16.mxu1 %v2971_v47  ;;  %v2358_v23 = vcombine.low %v3416_v13, %v3428_v33  ;;  %v1502_v26 = vshrl.u32 %v353_v7, 16  ;;  %v3456_v35 = vcombine.low %v858_v8, %v1993_v50  ;;  %v3463_v24 = vrot.slane %v1492_v22, 4  ;;  %v325_v50 = vld [vmem:[%s3120_s20 + $0x2c] sm:$0x1] }
  0x4d   : > { %2738 = vmatmul.mubr.bf16.vlgmr.msra.gmra.mxu0 %v2357_v9  ;;  %v2974_v9 = vld [vmem:[%s3738_s2 + $0x128] sm:$0xff]   ;;  %v2359_v22 = vcombine.low %v3442_v32, %v858_v8  ;;  %v3477_v7 = vrot.slane %v1505_v57, 5  ;;  %v1459_v8 = vrot.slane %v1458_v4, 4  ;;  %v1179_v57 = vshll.u32 %v318_v44, 16 }
  0x4e   : > { %2762 = vmatmul.mubr.bf16.vlgmr.msra.gmra.mxu1 %v2385_v10  ;;  %v1495_v10 = vshll.u32 %v347_v15, 16  ;;  %2770 = vmatpush3.bf16.msra.mxu0 %v2970_v6  ;;  %v2979_v6 = vld [vmem:[%s3738_s2 + $0x160] sm:$0xff]   ;;  %v1199_v4 = vshll.u32 %v325_v50, 16  ;;  %v1478_v3 = vor.u32 %v3437_v58, %v3399_v46 }
  0x4f   : > { %2794 = vmatpush3.bf16.msra.mxu1 %v2971_v47  ;;  %2765 = vmatprep.mubr.bf16.mxu1 %v2386_v56  ;;  %v2975_v47 = vld [vmem:[%s3738_s2 + $0x168] sm:$0xff]   ;;  %v1448_v56 = vor.u32 %v3360_v40, %v3358_v39  ;;  %v3482_v39 = vrot.slane %v1512_v34, 4  ;;  %v3484_v40 = vrot.slane %v1515_v12, 5  ;;  %v330_v12 = vld [vmem:[%s3120_s20 + $0x40] sm:$0xf] }
  0x50   : > { %2795 = vmatprep.subr.bf16.mxu1 %v2973_v61  ;;  %2741 = vmatprep.mubr.bf16.mxu0 %v2358_v23  ;;  %v3465_v15 = vrot.slane %v1495_v10, 5  ;;  %v3475_v23 = vrot.slane %v1502_v26, 4  ;;  %v319_v10 = vld [vmem:[%s3120_s20 + $0x14] sm:$0x1]  ;;  %v1468_v26 = vor.u32 %v3386_v21, %v3375_v45  ;;  %v1201_v46 = vrot.slane %v1199_v4, 5 }
  0x51   : > { %2771 = vmatprep.subr.bf16.mxu0 %v2972_v17  ;;  %v1185_v34 = vshll.u32 %v319_v10, 16  ;;  %v2983_v45 = vld [vmem:[%s3738_s2 + $0x150] sm:$0xff]   ;;  %v1204_v58 = vshrl.u32 %v330_v12, 16  ;;  %v1207_v27 = vshll.u32 %v330_v12, 16 }
  0x52   : > { %2772 = vmatpush3.bf16.msra.mxu0 %v2972_v17  ;;  %v2980_v17 = vld [vmem:[%s3738_s2 + $0x118] sm:$0xff]  }
  0x53   : > { %2796 = vmatpush3.bf16.msra.mxu1 %v2973_v61  ;;  %2773 = vmatprep.subr.bf16.mxu0 %v2974_v9  ;;  %v1449_v61 = vrot.slane %v1448_v56, 4  ;;  %v1193_v56 = vshll.u32 %v324_v49, 16  ;;  %v1209_v2 = vrot.slane %v1207_v27, 5 }
  0x54   : > { %2797 = vmatprep.subr.bf16.mxu1 %v2975_v47 }
  0x55   : > { %2742 = vmatmul.mubr.bf16.gmra.mxu0 %v2359_v22  ;;  %v331_v22 = vld [vmem:[%s3120_s20 + $0x44] sm:$0x1]  ;;  %v1195_v50 = vrot.slane %v1193_v56, 5 }
  0x56   : > { %2766 = vmatmul.mubr.bf16.gmra.mxu1 %v2387_v16  ;;  %2774 = vmatpush3.bf16.msra.mxu0 %v2974_v9  ;;  %v1190_v16 = vshrl.u32 %v324_v49, 16  ;;  %v1181_v9 = vrot.slane %v1179_v57, 5  ;;  %v2982_v49 = vld [vmem:[%s3738_s2 + $0x110] sm:$0xff]   ;;  %v1213_v5 = vshll.u32 %v331_v22, 16 }
  0x57   : > { %2798 = vmatpush3.bf16.msra.mxu1 %v2975_v47  ;;  %v1176_v47 = vshrl.u32 %v318_v44, 16  ;;  %2775 = vmatprep.subr.bf16.mxu0 %v2978_v18  ;;  %v1187_v44 = vrot.slane %v1185_v34, 5  ;;  %v1460_v34 = vsel %vm3156_vm2, %v1459_v8, %v1195_v50  ;;  %v2984_v8 = vld [vmem:[%s3738_s2 + $0x108] sm:$0xff]  }
  0x58   : > { %2799 = vmatprep.subr.bf16.mxu1 %v2979_v6  ;;  %v1192_v10 = vrot.slane %v1190_v16, 4  ;;  %v1206_v16 = vrot.slane %v1204_v58, 4  ;;  %v3516_v13 = vrot.slane %v1213_v5, 5  ;;  %v1469_v5 = vrot.slane %v1468_v26, 4  ;;  %v348_v58 = vld [vmem:[%s3120_s20 + $0x88] sm:$0xf] }
  0x59   : > { %v1178_v21 = vrot.slane %v1176_v47, 4  ;;  %v1218_v47 = vshrl.u32 %v336_v52, 16 }
  0x5a   : > { %2776 = vmatpush3.bf16.msra.mxu0 %v2978_v18  ;;  %v1196_v57 = vor.u32 %v1195_v50, %v1192_v10  ;;  %v1210_v22 = vor.u32 %v1209_v2, %v1206_v16  ;;  %v343_v50 = vld [vmem:[%s3120_s20 + $0x74] sm:$0x1] }
  0x5b   : > { %2800 = vmatpush3.bf16.msra.mxu1 %v2979_v6  ;;  %v1182_v37 = vor.u32 %v1181_v9, %v1178_v21  ;;  %v1450_v6 = vsel %vm3156_vm2, %v1449_v61, %v1181_v9  ;;  %2777 = vmatprep.subr.bf16.mxu0 %v2980_v17  ;;  %v1220_v18 = vrot.slane %v1218_v47, 4  ;;  %v2985_v61 = vld [vmem:[%s3738_s2 + $0x148] sm:$0xff]   ;;  %v1221_v21 = vshll.u32 %v336_v52, 16 }
  0x5c   : > { %2801 = vmatprep.subr.bf16.mxu1 %v2981_v43  ;;  %v2440_v4 = vcombine.low %v1450_v6, %v1460_v34  ;;  %v1197_v12 = vrot.slane %v1196_v57, 4  ;;  %v1227_v9 = vshll.u32 %v337_v20, 16  ;;  %v1211_v52 = vrot.slane %v1210_v22, 4  ;;  %v349_v6 = vld [vmem:[%s3120_s20 + $0x8c] sm:$0x1]  ;;  %v2987_v57 = vld [vmem:[%s3738_s2 + $0x140] sm:$0xff]  }
  0x5d   : > { %v1183_v56 = vrot.slane %v1182_v37, 4  ;;  %v1479_v37 = vrot.slane %v1478_v3, 4  ;;  %v1470_v3 = vsel %vm3156_vm2, %v1469_v5, %v1209_v2  ;;  %v360_v5 = vld [vmem:[%s3120_s20 + $0xb8] sm:$0xf] }
  0x5e   : > { %2778 = vmatpush3.bf16.msra.mxu0 %v2980_v17  ;;  %2809 = vmatprep.mubr.bf16.mxu1 %v2440_v4  ;;  %v1202_v20 = vsel %vm3156_vm2, %v1197_v12, %v1201_v46  ;;  %v1223_v17 = vrot.slane %v1221_v21, 5  ;;  %v1229_v10 = vrot.slane %v1227_v9, 5  ;;  %v355_v4 = vld [vmem:[%s3120_s20 + $0xa4] sm:$0x1]  ;;  %v1241_v9 = vshll.u32 %v343_v50, 16 }
  0x5f   : > { %2802 = vmatpush3.bf16.msra.mxu1 %v2981_v43  ;;  %v1188_v27 = vsel %vm3156_vm2, %v1183_v56, %v1187_v44  ;;  %2779 = vmatprep.subr.bf16.mxu0 %v2982_v49  ;;  %v342_v44 = vld [vmem:[%s3120_s20 + $0x70] sm:$0xf]  ;;  %v354_v56 = vld [vmem:[%s3120_s20 + $0xa0] sm:$0xf] }
  0x60   : > { %2803 = vmatprep.subr.bf16.mxu1 %v2983_v45  ;;  %v2412_v26 = vcombine.low %v1188_v27, %v1202_v20  ;;  %v1224_v2 = vor.u32 %v1223_v17, %v1220_v18  ;;  %v1480_v34 = vsel %vm3156_vm2, %v1479_v37, %v1223_v17  ;;  %v1232_v16 = vshrl.u32 %v342_v44, 16  ;;  %v2986_v12 = vld [vmem:[%s3738_s2 + $0x100] sm:$0xff]  }
  0x61   : > { %v2441_v22 = vcombine.low %v1470_v3, %v1480_v34  ;;  %v1235_v21 = vshll.u32 %v342_v44, 16  ;;  %v1246_v27 = vshrl.u32 %v348_v58, 16  ;;  %v1249_v20 = vshll.u32 %v348_v58, 16  ;;  %v2989_v44 = vld [vmem:[%s3738_s2 + $0x1f8] sm:$0xff]  }
  0x62   : > { %2780 = vmatpush3.bf16.msra.mxu0 %v2982_v49  ;;  %2785 = vmatprep.mubr.bf16.mxu0 %v2412_v26  ;;  %v1234_v18 = vrot.slane %v1232_v16, 4  ;;  %v1255_v37 = vshll.u32 %v349_v6, 16  ;;  %v1243_v46 = vrot.slane %v1241_v9, 5  ;;  %v1260_v47 = vshrl.u32 %v354_v56, 16  ;;  %v2988_v16 = vld [vmem:[%s3738_s2 + $0x1b8] sm:$0xff]  }
  0x63   : > { %2804 = vmatpush3.bf16.msra.mxu1 %v2983_v45  ;;  %v1216_v45 = vsel %vm3156_vm2, %v1211_v52, %v3516_v13  ;;  %2781 = vmatprep.subr.bf16.mxu0 %v2984_v8  ;;  %v1225_v13 = vrot.slane %v1224_v2, 4  ;;  %v361_v52 = vld [vmem:[%s3120_s20 + $0xbc] sm:$0x1]  ;;  %v1237_v17 = vrot.slane %v1235_v21, 5  ;;  %v1248_v49 = vrot.slane %v1246_v27, 4 }
  0x64   : > { %2805 = vmatprep.subr.bf16.mxu1 %v2985_v61  ;;  %v1251_v3 = vrot.slane %v1249_v20, 5  ;;  %v1257_v50 = vrot.slane %v1255_v37, 5  ;;  %v1263_v2 = vshll.u32 %v354_v56, 16  ;;  %v1262_v34 = vrot.slane %v1260_v47, 4  ;;  %v2990_v47 = vld [vmem:[%s3738_s2 + $0x1b0] sm:$0xff]  }
  0x65   : > { %v1230_v26 = vsel %vm3156_vm2, %v1225_v13, %v1229_v10  ;;  %v1238_v6 = vor.u32 %v1237_v17, %v1234_v18  ;;  %v1274_v10 = vshrl.u32 %v360_v5, 16  ;;  %v1277_v27 = vshll.u32 %v360_v5, 16  ;;  %v2991_v56 = vld [vmem:[%s3738_s2 + $0x1f0] sm:$0xff]  }
  0x66   : > { %2782 = vmatpush3.bf16.msra.mxu0 %v2984_v8  ;;  %v2413_v58 = vcombine.low %v1216_v45, %v1230_v26  ;;  %v1252_v21 = vor.u32 %v1251_v3, %v1248_v49  ;;  %v1265_v9 = vrot.slane %v1263_v2, 5  ;;  %v1283_v20 = vshll.u32 %v361_v52, 16 }
  0x67   : > { %2806 = vmatpush3.bf16.msra.mxu1 %v2985_v61  ;;  %v1269_v61 = vshll.u32 %v355_v4, 16  ;;  %2783 = vmatprep.subr.bf16.mxu0 %v2986_v12  ;;  %v1239_v13 = vrot.slane %v1238_v6, 4  ;;  %v3745_v8 = vor.u32 %v3461_v55, %v3454_v42  ;;  %v1276_v5 = vrot.slane %v1274_v10, 4 }
  0x68   : > { %2807 = vmatprep.subr.bf16.mxu1 %v2987_v57  ;;  %v1253_v4 = vrot.slane %v1252_v21, 4  ;;  %v1266_v18 = vor.u32 %v1265_v9, %v1262_v34  ;;  %v1285_v52 = vrot.slane %v1283_v20, 5  ;;  %v3746_v55 = vor.u32 %v3465_v15, %v3463_v24 }
  0x69   : > { %v1271_v43 = vrot.slane %v1269_v61, 5  ;;  %v1489_v45 = vrot.slane %v3745_v8, 4  ;;  %v1244_v37 = vsel %vm3156_vm2, %v1239_v13, %v1243_v46  ;;  %v3748_v24 = vor.u32 %v3484_v40, %v3482_v39  ;;  %v364_v13 = vld [vmem:[%s3381_s25 + $0x8] sm:$0x1] }
  0x6a   : > { %2784 = vmatpush3.bf16.msra.mxu0 %v2986_v12  ;;  %v1499_v49 = vrot.slane %v3746_v55, 4  ;;  %v1258_v26 = vsel %vm3156_vm2, %v1253_v4, %v1257_v50  ;;  %v1267_v2 = vrot.slane %v1266_v18, 4  ;;  %v3747_v12 = vor.u32 %v3477_v7, %v3475_v23  ;;  %v2993_v50 = vld [vmem:[%s3738_s2 + $0x1e8] sm:$0xff]   ;;  %v3003_v4 = vld [vmem:[%s3738_s2 + $0x1c0] sm:$0xff]   ;;  %v3006_v18 = vld [vmem:[%s3738_s2 + $0x238] sm:$0xff]  }
  0x6b   : > { %2808 = vmatpush3.bf16.msra.mxu1 %v2987_v57  ;;  %v1279_v57 = vrot.slane %v1277_v27, 5  ;;  %v1490_v42 = vsel %vm3156_vm2, %v1489_v45, %v1237_v17  ;;  %2817 = vmatprep.subr.bf16.mxu0 %v2988_v16  ;;  %v2414_v46 = vcombine.low %v1244_v37, %v1258_v26  ;;  %v1519_v15 = vrot.slane %v3748_v24, 4  ;;  %v2997_v27 = vld [vmem:[%s3738_s2 + $0x1d8] sm:$0xff]  }
  0x6c   : > { %2841 = vmatprep.subr.bf16.mxu1 %v2989_v44  ;;  %v1509_v34 = vrot.slane %v3747_v12, 4  ;;  %v1500_v17 = vsel %vm3156_vm2, %v1499_v49, %v1251_v3  ;;  %v1272_v7 = vsel %vm3156_vm2, %v1267_v2, %v1271_v43  ;;  %v2995_v43 = vld [vmem:[%s3738_s2 + $0x1e0] sm:$0xff]   ;;  %v3750_v20 = vcombine.low %v3141_v30, %v3173_v59  ;;  %v2998_v30 = vld [vmem:[%s3738_s2 + $0x190] sm:$0xff]  }
  0x6d   : > { %v1280_v6 = vor.u32 %v1279_v57, %v1276_v5  ;;  %2786 = vmatmul.mubr.bf16.vlgmr.msra.gmra.mxu0 %v2413_v58  ;;  %v2442_v61 = vcombine.low %v1490_v42, %v1500_v17  ;;  %v1520_v39 = vsel %vm3156_vm2, %v1519_v15, %v1279_v57  ;;  %v1824_v58 = vshrl.u32 %v3397_v11, 16  ;;  %v3007_v5 = vld [vmem:[%s3738_s2 + $0x230] sm:$0xff]   ;;  %v3009_v42 = vld [vmem:[%s3738_s2 + $0x228] sm:$0xff]  }
  0x6e   : > { %2810 = vmatmul.mubr.bf16.vlgmr.msra.gmra.mxu1 %v2441_v22  ;;  %v1510_v23 = vsel %vm3156_vm2, %v1509_v34, %v1265_v9  ;;  %2818 = vmatpush3.bf16.msra.mxu0 %v2988_v16  ;;  %v2994_v9 = vld [vmem:[%s3738_s2 + $0x1a0] sm:$0xff]   ;;  %v3749_v11 = vcombine.low %v3183_v62, %v3187_v1  ;;  %v1833_v45 = vshll.u32 %v364_v13, 16  ;;  %v2996_v62 = vld [vmem:[%s3738_s2 + $0x198] sm:$0xff]   ;;  %v3751_v57 = vcombine.low %v3213_v25, %v3281_v31 }
  0x6f   : > { %2842 = vmatpush3.bf16.msra.mxu1 %v2989_v44  ;;  %v1281_v22 = vrot.slane %v1280_v6, 4  ;;  %2789 = vmatprep.mubr.bf16.mxu0 %v2414_v46  ;;  %v2992_v44 = vld [vmem:[%s3738_s2 + $0x1a8] sm:$0xff]   ;;  %v2443_v3 = vcombine.low %v1510_v23, %v1520_v39  ;;  %v1826_v21 = vrot.slane %v1824_v58, 4  ;;  %v3752_v37 = vcombine.low %v3287_v36, %v3318_v38  ;;  %v3012_v36 = vld [vmem:[%s3738_s2 + $0x210] sm:$0xff]  }
  0x70   : > { %2843 = vmatprep.subr.bf16.mxu1 %v2991_v56  ;;  %2819 = vmatprep.subr.bf16.mxu0 %v2990_v47  ;;  %v1835_v1 = vrot.slane %v1833_v45, 5  ;;  %v3754_v25 = vcombine.low %v3236_v53, %v3267_v19  ;;  %v2526_v31 = vcombine.low %v3428_v33, %v3442_v32  ;;  %v3011_v53 = vld [vmem:[%s3738_s2 + $0x218] sm:$0xff]   ;;  %v3756_v19 = vcombine.low %v3251_v63, %v3306_v51  ;;  %v3014_v63 = vld [vmem:[%s3738_s2 + $0x200] sm:$0xff]  }
  0x71   : > { %v1286_v40 = vsel %vm3156_vm2, %v1281_v22, %v1285_v52  ;;  %2813 = vmatprep.mubr.bf16.mxu1 %v2442_v61  ;;  %v1830_v10 = vor.u32 %v3435_v14, %v1826_v21  ;;  %v2999_v14 = vld [vmem:[%s3738_s2 + $0x1d0] sm:$0xff]   ;;  %v3753_v52 = vcombine.low %v3176_v60, %v3228_v48  ;;  %v3010_v60 = vld [vmem:[%s3738_s2 + $0x220] sm:$0xff]   ;;  %v3755_v48 = vcombine.low %v3274_v28, %v3394_v54  ;;  %v3013_v28 = vld [vmem:[%s3738_s2 + $0x208] sm:$0xff]  }
  0x72   : > { %v2415_v16 = vcombine.low %v1272_v7, %v1286_v40  ;;  %2820 = vmatpush3.bf16.msra.mxu0 %v2990_v47  ;;  %v3757_v51 = vld [vmem:[#allocation2_spill] sm:$0xff] }
  0x73   : > { %2844 = vmatpush3.bf16.msra.mxu1 %v2991_v56  ;;  %2821 = vmatprep.subr.bf16.mxu0 %v2992_v44  ;;  %v1831_v8 = vrot.slane %v1830_v10, 4  ;;  %v3001_v56 = vld [vmem:[%s3738_s2 + $0x1c8] sm:$0xff]   ;;  %v3758_v38 = vcombine.low %v3366_v29, %v3757_v51 }
  0x74   : > { %2845 = vmatprep.subr.bf16.mxu1 %v2993_v50 }
  0x75   : > { %2790 = vmatmul.mubr.bf16.gmra.mxu0 %v2415_v16  ;;  %v1836_v47 = vsel %vm3156_vm2, %v1831_v8, %v1835_v1 }
  0x76   : > { %2814 = vmatmul.mubr.bf16.gmra.mxu1 %v2443_v3  ;;  %2822 = vmatpush3.bf16.msra.mxu0 %v2992_v44  ;;  %v2499_v59 = vcombine.low %v3330_v0, %v1836_v47  ;;  %v3002_v0 = vld [vmem:[%s3738_s2 + $0x180] sm:$0xff]  }
  0x77   : > { %2846 = vmatpush3.bf16.msra.mxu1 %v2993_v50  ;;  %2857 = vmatprep.mubr.bf16.mxu1 %v3749_v11 }
  0x78   : > { %2847 = vmatprep.subr.bf16.mxu1 %v2995_v43  ;;  %2833 = vmatprep.mubr.bf16.mxu0 %v3750_v20 }
  0x79   : > { %2823 = vmatprep.subr.bf16.mxu0 %v2994_v9 }
  0x7a   : > { %2824 = vmatpush3.bf16.msra.mxu0 %v2994_v9 }
  0x7b   : > { %2848 = vmatpush3.bf16.msra.mxu1 %v2995_v43  ;;  %2825 = vmatprep.subr.bf16.mxu0 %v2996_v62 }
  0x7c   : > { %2849 = vmatprep.subr.bf16.mxu1 %v2997_v27 }
  0x7e   : > { %2826 = vmatpush3.bf16.msra.mxu0 %v2996_v62 }
  0x7f   : > { %2850 = vmatpush3.bf16.msra.mxu1 %v2997_v27  ;;  %2827 = vmatprep.subr.bf16.mxu0 %v2998_v30 }
  0x80   : > { %2851 = vmatprep.subr.bf16.mxu1 %v2999_v14 }
  0x82   : > { %2828 = vmatpush3.bf16.msra.mxu0 %v2998_v30 }
  0x83   : > { %2852 = vmatpush3.bf16.msra.mxu1 %v2999_v14  ;;  %2829 = vmatprep.subr.bf16.mxu0 %v3000_v41 }
  0x84   : > { %2853 = vmatprep.subr.bf16.mxu1 %v3001_v56 }
  0x86   : > { %2830 = vmatpush3.bf16.msra.mxu0 %v3000_v41 }
  0x87   : > { %2854 = vmatpush3.bf16.msra.mxu1 %v3001_v56  ;;  %2831 = vmatprep.subr.bf16.mxu0 %v3002_v0 }
  0x88   : > { %2855 = vmatprep.subr.bf16.mxu1 %v3003_v4 }
  0x8a   : > { %2832 = vmatpush3.bf16.msra.mxu0 %v3002_v0 }
  0x8b   : > { %2856 = vmatpush3.bf16.msra.mxu1 %v3003_v4  ;;  %2865 = vmatprep.subr.bf16.mxu0 %v3006_v18 }
  0x8c   : > { %2889 = vmatprep.subr.bf16.mxu1 %v3006_v18 }
  0x8d   : > { %2834 = vmatmul.mubr.bf16.vlgmr.msra.gmra.mxu0 %v3753_v52 }
  0x8e   : > { %2858 = vmatmul.mubr.bf16.vlgmr.msra.gmra.mxu1 %v3751_v57  ;;  %2866 = vmatpush3.bf16.msra.mxu0 %v3006_v18 }
  0x8f   : > { %2897 = vmatpush3.bf16.msra.mxu1 %v3006_v18  ;;  %2861 = vmatprep.mubr.bf16.mxu1 %v3752_v37 }
  0x90   : > { %2890 = vmatprep.subr.bf16.mxu1 %v3007_v5  ;;  %2837 = vmatprep.mubr.bf16.mxu0 %v3754_v25 }
  0x91   : > { %2867 = vmatprep.subr.bf16.mxu0 %v3007_v5 }
  0x92   : > { %2868 = vmatpush3.bf16.msra.mxu0 %v3007_v5 }
  0x93   : > { %2898 = vmatpush3.bf16.msra.mxu1 %v3007_v5  ;;  %2869 = vmatprep.subr.bf16.mxu0 %v3009_v42 }
  0x94   : > { %2891 = vmatprep.subr.bf16.mxu1 %v3009_v42 }
  0x95   : > { %2838 = vmatmul.mubr.bf16.gmra.mxu0 %v3755_v48 }
  0x96   : > { %2862 = vmatmul.mubr.bf16.gmra.mxu1 %v2499_v59  ;;  %2870 = vmatpush3.bf16.msra.mxu0 %v3009_v42 }
  0x97   : > { %2899 = vmatpush3.bf16.msra.mxu1 %v3009_v42  ;;  %2885 = vmatprep.mubr.bf16.mxu1 %v2526_v31 }
  0x98   : > { %2892 = vmatprep.subr.bf16.mxu1 %v3010_v60  ;;  %2881 = vmatprep.mubr.bf16.mxu0 %v3756_v19 }
  0x99   : > { %2871 = vmatprep.subr.bf16.mxu0 %v3010_v60 }
  0x9a   : > { %2872 = vmatpush3.bf16.msra.mxu0 %v3010_v60 }
  0x9b   : > { %2900 = vmatpush3.bf16.msra.mxu1 %v3010_v60  ;;  %2873 = vmatprep.subr.bf16.mxu0 %v3011_v53 }
  0x9c   : > { %2893 = vmatprep.subr.bf16.mxu1 %v3011_v53 }
  0x9e   : > { %2874 = vmatpush3.bf16.msra.mxu0 %v3011_v53 }
  0x9f   : > { %2901 = vmatpush3.bf16.msra.mxu1 %v3011_v53  ;;  %2875 = vmatprep.subr.bf16.mxu0 %v3012_v36 }
  0xa0   : > { %2894 = vmatprep.subr.bf16.mxu1 %v3012_v36 }
  0xa2   : > { %2876 = vmatpush3.bf16.msra.mxu0 %v3012_v36 }
  0xa3   : > { %2902 = vmatpush3.bf16.msra.mxu1 %v3012_v36  ;;  %2877 = vmatprep.subr.bf16.mxu0 %v3013_v28 }
  0xa4   : > { %2895 = vmatprep.subr.bf16.mxu1 %v3013_v28 }
  0xa6   : > { %2878 = vmatpush3.bf16.msra.mxu0 %v3013_v28 }
  0xa7   : > { %2903 = vmatpush3.bf16.msra.mxu1 %v3013_v28  ;;  %2879 = vmatprep.subr.bf16.mxu0 %v3014_v63 }
  0xa8   : > { %2896 = vmatprep.subr.bf16.mxu1 %v3014_v63 }
  0xaa   : > { %2880 = vmatpush3.bf16.msra.mxu0 %v3014_v63 }
  0xab   : > { %2904 = vmatpush3.bf16.msra.mxu1 %v3014_v63 }
  0xad   : > { %2882 = vmatmul.mubr.bf16.vlgmr.msra.gmra.mxu0 %v3758_v38 }
  0xae   : > { %2886 = vmatmul.mubr.bf16.vlgmr.msra.gmra.mxu1 %v3456_v35 }
  0xed   : > { %v2691_v54 = vpop.f32.mrf.mxu0 }
  0xee   : > { %v2715_v32 = vpop.f32.mrf.mxu1 }
  0xef   : > { %v611_v33 = vpop.f32.mrf.mxu0  ;;  %v757_v60 = vadd.f32 %v2715_v32, %v2691_v54 }
  0xf0   : > { %v748_v49 = vpop.f32.mrf.mxu1 }
  0xf1   : > { %v2692_v55 = vpop.f32.mrf.mxu0  ;;  %v749_v28 = vadd.f32 %v748_v49, %v611_v33 }
  0xf2   : > { %v2716_v2 = vpop.f32.mrf.mxu1 }
  0xf3   : > { %v3693_v26 = vpop.f32.mrf.mxu0 }
  0xf4   : > { %3759 = vst [vmem:[#allocation2_spill] sm:$0xff] %v3693_v26  ;;  %v3695_v12 = vpop.f32.mrf.mxu1 }
  0xf5   : > { %3760 = vst [vmem:[#allocation3_spill] sm:$0xff] %v3695_v12 }
  0xf6   : > { %v2719_v46 = vpop.f32.mrf.mxu1 }
  0xf8   : > { %v764_v24 = vpop.f32.mrf.mxu1 }
  0xfa   : > { %v2720_v15 = vpop.f32.mrf.mxu1 }
  0xfc   : > { %v767_v29 = vpop.f32.mrf.mxu1 }
 0x100   : > { %v2695_v6 = vpop.f32.mrf.mxu0 }
 0x101   : > { %v773_v31 = vadd.f32 %v2719_v46, %v2695_v6  ;;  %v3767_v6 = vld [vmem:[#allocation2_spill] sm:$0xff]  ;;  %v3768_v46 = vld [vmem:[#allocation3_spill] sm:$0xff] }
 0x102   : > { %v627_v34 = vpop.f32.mrf.mxu0  ;;  %v752_v54 = vadd.f32 %v3768_v46, %v3767_v6 }
 0x103   : > { %v765_v53 = vadd.f32 %v764_v24, %v627_v34 }
 0x104   : > { %v2696_v17 = vpop.f32.mrf.mxu0 }
 0x105   : > { %v776_v51 = vadd.f32 %v2720_v15, %v2696_v17 }
 0x106   : > { %v630_v35 = vpop.f32.mrf.mxu0 }
 0x10d   : > { %v2739_v22 = vpop.f32.mrf.mxu0 }
 0x10e   : > { %v2763_v61 = vpop.f32.mrf.mxu1  ;;  %v1007_v63 = vadd.f32 %v2739_v22, %v757_v60 }
 0x10f   : > { %v974_v50 = vpop.f32.mrf.mxu0 }
 0x110   : > { %v1136_v7 = vpop.f32.mrf.mxu1  ;;  %v1169_v32 = vadd.f32 %v2763_v61, %v1007_v63 }
 0x111   : > { %v2740_v23 = vpop.f32.mrf.mxu0 }
 0x112   : > { %v2764_v40 = vpop.f32.mrf.mxu1 }
 0x113   : > { %v977_v39 = vpop.f32.mrf.mxu0 }
 0x114   : > { %v3697_v3 = vpop.f32.mrf.mxu1  ;;  %v1006_v49 = vadd.f32 %v977_v39, %v752_v54 }
 0x115   : > { %v2743_v44 = vpop.f32.mrf.mxu0  ;;  %3761 = vst [vmem:[#allocation4_spill] sm:$0xff] %v3697_v3  ;;  %v1005_v3 = vadd.f32 %v974_v50, %v749_v28 }
 0x116   : > { %v2767_v58 = vpop.f32.mrf.mxu1  ;;  %v1011_v19 = vadd.f32 %v2743_v44, %v773_v31 }
 0x117   : > { %v990_v16 = vpop.f32.mrf.mxu0  ;;  %v1167_v33 = vadd.f32 %v1136_v7, %v1005_v3 }
 0x118   : > { %v1152_v43 = vpop.f32.mrf.mxu1  ;;  %v1009_v38 = vadd.f32 %v990_v16, %v765_v53  ;;  %v1173_v26 = vadd.f32 %v2767_v58, %v1011_v19 }
 0x119   : > { %v2744_v21 = vpop.f32.mrf.mxu0 }
 0x11a   : > { %v2768_v9 = vpop.f32.mrf.mxu1  ;;  %v1171_v34 = vadd.f32 %v1152_v43, %v1009_v38 }
 0x11b   : > { %v993_v10 = vpop.f32.mrf.mxu0 }
 0x11c   : > { %v1155_v27 = vpop.f32.mrf.mxu1 }
 0x12d   : > { %v2787_v11 = vpop.f32.mrf.mxu0 }
 0x12e   : > { %v2811_v13 = vpop.f32.mrf.mxu1  ;;  %v1435_v17 = vadd.f32 %v2787_v11, %v1169_v32 }
 0x12f   : > { %v1402_v20 = vpop.f32.mrf.mxu0 }
 0x130   : > { %v1636_v8 = vpop.f32.mrf.mxu1  ;;  %v1433_v50 = vadd.f32 %v1402_v20, %v1167_v33  ;;  %v1669_v61 = vadd.f32 %v2811_v13, %v1435_v17 }
 0x131   : > { %v2788_v45 = vpop.f32.mrf.mxu0 }
 0x132   : > { %v3699_v62 = vpop.f32.mrf.mxu1  ;;  %v1667_v7 = vadd.f32 %v1636_v8, %v1433_v50 }
 0x133   : > { %3762 = vst [vmem:[#allocation5_spill] sm:$0xff] %v3699_v62  ;;  %v1405_v1 = vpop.f32.mrf.mxu0  ;;  %v760_v62 = vadd.f32 %v2716_v2, %v2692_v55 }
 0x134   : > { %v3701_v14 = vpop.f32.mrf.mxu1 }
 0x135   : > { %3763 = vst [vmem:[#allocation6_spill] sm:$0xff] %v3701_v14  ;;  %v2791_v47 = vpop.f32.mrf.mxu0 }
 0x136   : > { %v2815_v30 = vpop.f32.mrf.mxu1  ;;  %v1439_v44 = vadd.f32 %v2791_v47, %v1173_v26 }
 0x137   : > { %v1418_v59 = vpop.f32.mrf.mxu0 }
 0x138   : > { %v1652_v56 = vpop.f32.mrf.mxu1  ;;  %v1437_v55 = vadd.f32 %v1418_v59, %v1171_v34 }
 0x139   : > { %v2792_v41 = vpop.f32.mrf.mxu0 }
 0x13a   : > { %v2816_v4 = vpop.f32.mrf.mxu1 }
 0x13b   : > { %v1421_v0 = vpop.f32.mrf.mxu0 }
 0x13c   : > { %v1655_v18 = vpop.f32.mrf.mxu1  ;;  %v3771_v13 = vld [vmem:[#allocation6_spill] sm:$0xff] }
 0x14d   : > { %v2835_v5 = vpop.f32.mrf.mxu0 }
 0x14e   : > { %v2859_v57 = vpop.f32.mrf.mxu1  ;;  %v1817_v3 = vadd.f32 %v2835_v5, %v1669_v61 }
 0x14f   : > { %v1784_v37 = vpop.f32.mrf.mxu0 }
 0x150   : > { %v3703_v52 = vpop.f32.mrf.mxu1 }
 0x151   : > { %3764 = vst [vmem:[#allocation7_spill] sm:$0xff] %v3703_v52  ;;  %v2836_v42 = vpop.f32.mrf.mxu0  ;;  %v768_v52 = vadd.f32 %v767_v29, %v630_v35  ;;  %v1673_v29 = vadd.f32 %v2815_v30, %v1439_v44 }
 0x152   : > { %v3705_v25 = vpop.f32.mrf.mxu1 }
 0x153   : > { %3765 = vst [vmem:[#allocation8_spill] sm:$0xff] %v3705_v25  ;;  %v3707_v48 = vpop.f32.mrf.mxu0  ;;  %v1012_v25 = vadd.f32 %v2744_v21, %v776_v51  ;;  %v1010_v24 = vadd.f32 %v993_v10, %v768_v52  ;;  %v3769_v21 = vld [vmem:[#allocation4_spill] sm:$0xff]  ;;  %v1671_v10 = vadd.f32 %v1652_v56, %v1437_v55 }
 0x154   : > { %3766 = vst [vmem:[#allocation9_spill] sm:$0xff] %v3707_v48  ;;  %v3709_v36 = vpop.f32.mrf.mxu1  ;;  %v1008_v48 = vadd.f32 %v2740_v23, %v760_v62  ;;  %v1168_v60 = vadd.f32 %v3769_v21, %v1006_v49 }
 0x155   : > { %v2839_v12 = vpop.f32.mrf.mxu0  ;;  %v1174_v22 = vadd.f32 %v2768_v9, %v1012_v25  ;;  %v1172_v35 = vadd.f32 %v1155_v27, %v1010_v24  ;;  %v1815_v27 = vadd.f32 %v1784_v37, %v1667_v7 }
 0x156   : > { %v2863_v14 = vpop.f32.mrf.mxu1  ;;  %v1170_v2 = vadd.f32 %v2764_v40, %v1008_v48  ;;  %v1821_v62 = vadd.f32 %v2839_v12, %v1673_v29  ;;  %v1434_v39 = vadd.f32 %v1405_v1, %v1168_v60  ;;  %v3770_v40 = vld [vmem:[#allocation5_spill] sm:$0xff]  ;;  %v1978_v48 = vadd.f32 %v2859_v57, %v1817_v3 }
 0x157   : > { %v1800_v15 = vpop.f32.mrf.mxu0  ;;  %v1440_v58 = vadd.f32 %v2792_v41, %v1174_v22  ;;  %v1438_v26 = vadd.f32 %v1421_v0, %v1172_v35 }
 0x158   : > { %v1961_v31 = vpop.f32.mrf.mxu1  ;;  %v1436_v23 = vadd.f32 %v2788_v45, %v1170_v2  ;;  %v1819_v9 = vadd.f32 %v1800_v15, %v1671_v10  ;;  %v1982_v41 = vadd.f32 %v2863_v14, %v1821_v62  ;;  %v1668_v45 = vadd.f32 %v3771_v13, %v1434_v39  ;;  %v2536_v14 = vld [vmem:[%s3739_s3] ss:$0 sm:$0xff] }
 0x159   : > { %v2840_v43 = vpop.f32.mrf.mxu0  ;;  %v1674_v11 = vadd.f32 %v2816_v4, %v1440_v58  ;;  %v1672_v59 = vadd.f32 %v1655_v18, %v1438_v26  ;;  %v3772_v4 = vld [vmem:[#allocation7_spill] sm:$0xff] }
 0x15a   : > { %v2864_v16 = vpop.f32.mrf.mxu1  ;;  %v1670_v20 = vadd.f32 %v3770_v40, %v1436_v23  ;;  %v1980_v0 = vadd.f32 %v1961_v31, %v1819_v9  ;;  %v1976_v53 = vadd.f32 %v3772_v4, %v1815_v27 }
 0x15b   : > { %v1803_v30 = vpop.f32.mrf.mxu0  ;;  %v1822_v52 = vadd.f32 %v2840_v43, %v1674_v11  ;;  %v3773_v19 = vld [vmem:[#allocation9_spill] sm:$0xff] }
 0x15c   : > { %v1964_v47 = vpop.f32.mrf.mxu1  ;;  %v1818_v56 = vadd.f32 %v2836_v42, %v1670_v20  ;;  %v1820_v12 = vadd.f32 %v1803_v30, %v1672_v59  ;;  %v1816_v28 = vadd.f32 %v3773_v19, %v1668_v45  ;;  %v3774_v42 = vld [vmem:[#allocation8_spill] sm:$0xff] }
 0x15d   : > { %v1983_v18 = vadd.f32 %v2864_v16, %v1822_v52 }
 0x15e   : > { %v1979_v38 = vadd.f32 %v3774_v42, %v1818_v56  ;;  %v1981_v46 = vadd.f32 %v1964_v47, %v1820_v12  ;;  %v1977_v44 = vadd.f32 %v3709_v36, %v1816_v28 }
 0x16d   : > { %v2883_v8 = vpop.f32.mrf.mxu0 }
 0x16e   : > { %v2887_v25 = vpop.f32.mrf.mxu1  ;;  %v2135_v63 = vadd.f32 %v2883_v8, %v1978_v48 }
 0x16f   : > { %v2139_v1 = vadd.f32 %v2887_v25, %v1982_v41  ;;  %v2102_v37 = vpop.f32.mrf.mxu0 }
 0x170   : > { %v2118_v5 = vpop.f32.mrf.mxu1  ;;  %v2133_v6 = vadd.f32 %v2102_v37, %v1976_v53  ;;  %v2150_v31 = vadd.f32 %v2536_v14, %v2135_v63 }
 0x171   : > { %v2137_v51 = vadd.f32 %v2118_v5, %v1980_v0  ;;  %v2154_v54 = vadd.f32 %v2536_v14, %v2139_v1  ;;  %v2884_v32 = vpop.f32.mrf.mxu0 }
 0x172   : > { %v2888_v57 = vpop.f32.mrf.mxu1  ;;  %v2136_v33 = vadd.f32 %v2884_v32, %v1979_v38  ;;  %v2148_v55 = vadd.f32 %v2536_v14, %v2133_v6  ;;  %v2158_v16 = vmax.f32 %v2150_v31, 0.0 }
 0x173   : > { %v2140_v34 = vadd.f32 %v2888_v57, %v1983_v18  ;;  %v2152_v49 = vadd.f32 %v2536_v14, %v2137_v51  ;;  %v2105_v15 = vpop.f32.mrf.mxu0  ;;  %v2162_v35 = vmax.f32 %v2154_v54, 0.0 }
 0x174   : > { %v2121_v24 = vpop.f32.mrf.mxu1  ;;  %v2151_v2 = vadd.f32 %v2536_v14, %v2136_v33  ;;  %v2134_v50 = vadd.f32 %v2105_v15, %v1977_v44  ;;  %v2156_v43 = vmax.f32 %v2148_v55, 0.0 }
 0x175   : > { %v2155_v17 = vadd.f32 %v2536_v14, %v2140_v34  ;;  %v2138_v22 = vadd.f32 %v2121_v24, %v1981_v46  ;;  %v2160_v60 = vmax.f32 %v2152_v49, 0.0 }
 0x176   : > { %v2159_v21 = vmax.f32 %v2151_v2, 0.0  ;;  %v2149_v36 = vadd.f32 %v2536_v14, %v2134_v50 }
 0x177   : > { %v2163_v29 = vmax.f32 %v2155_v17, 0.0  ;;  %v2153_v58 = vadd.f32 %v2536_v14, %v2138_v22 }
 0x178   : > { %v2550_v10 = vpack.c.bf16 %v2159_v21, %v2158_v16  ;;  %v2157_v26 = vmax.f32 %v2149_v36, 0.0 }
 0x179   : > { %v2560_v61 = vpack.c.bf16 %v2163_v29, %v2162_v35  ;;  %v2161_v23 = vmax.f32 %v2153_v58, 0.0 }
 0x17a   : > { %2562 = vst [vmem:[%s311_s28 + $0x8] sm:$0xff] %v2550_v10   ;;  %v2545_v7 = vpack.c.bf16 %v2157_v26, %v2156_v43 }
 0x17b   : > { %2564 = vst [vmem:[%s311_s28 + $0x18] sm:$0xff] %v2560_v61   ;;  %v2555_v62 = vpack.c.bf16 %v2161_v23, %v2160_v60 }
 0x17c   : > { %2546 = vst [vmem:[%s311_s28] sm:$0xff] %v2545_v7  }
 0x17d   : > { %2563 = vst [vmem:[%s311_s28 + $0x10] sm:$0xff] %v2555_v62  }
 0x17e PF: > { %s14_s17 = sadd.s32 1, %s3037_s17   ;;  %s3775_s15 = smov %s3033_s16 }
 0x17f   : > { %p11_p5 = scmp.ge.s32.totalorder %s14_s17, 4   ;;  %s3776_s16 = smov %s3778_s18 }
 0x181   :  { %13 = sbr.rel (!%p11_p5) target bundleno = 2 (0x2), region = 77 }

// kernel: convolution_stem.4
= control target key start
LH: loop header
LB: loop body
LE: loop exit
PB: predicated region body
PF: predicated region fallthrough
CT: control target
= control target key end

     0   :  { %s5668_s15 = smov 0   ;;  %s5670_s16 = smov 0   ;;  %s7546_s0 = inlined_call_operand.vmem [shape: bf16[2,34,34,4], index: 0, kind: input, shape index: {}, may-alias: {0,1}]   ;;  %s7547_s1 = inlined_call_operand.vmem [shape: bf16[2,34,34,4], index: 1, kind: input, shape index: {}, may-alias: {0,1}]   ;;  %s7548_s2 = inlined_call_operand.vmem [shape: bf16[9,4,128], index: 2, kind: input, shape index: {}]   ;;  %s7549_s3 = inlined_call_operand.vmem [shape: f32[1,128], index: 3, kind: input, shape index: {}]   ;;  %s7550_s4 = inlined_call_operand.vmem [shape: bf16[2,16,16,128], index: 4, kind: output, shape index: {}]  }
   0x1   :  { %s5672_s17 = smov 0  }
   0x2 LB: > { %s26_s18 = sadd.s32 1, %s5637_s16  ;;  %p4667_p0 = scmp.ge.s32.totalorder %s5641_s17, 1  ;;  %s5641_s17 = sphi %s5672_s17, %s14_s17   ;;  %s5637_s16 = sphi %s5670_s16, %s7821_s16   ;;  %s5633_s15 = sphi %s5668_s15, %s7820_s15  }
   0x3   : > { %p28_p1 = scmp.ge.s32.totalorder %s26_s18, 2  ;;  %p218_p2 = scmp.lt.s32.totalorder %s5641_s17, 3 }
   0x5   : > { %s7823_s18 = smov (%p28_p1, %s26_s18), 0  ;;  %p219_p3 = pnand %p4667_p0, %p218_p2 }
   0x7   : > { %222 = sbr.rel (%p219_p3) target bundleno = 595 (0x253), region = 36 }
   0xc   : > { %v4672_v0 = vld [vmem:[%s7548_s2 + $0x2] sm:$0x3]  ;;  %vm968_vm0 = vcmask 1041408   ;;  %p276_p4 = scmp.lt.s32.totalorder %s5633_s15, 1  ;;  %v481_v2 = vld [vmem:[%s7548_s2] sm:$0x3] }
   0xd   : > { %5550 = vmatprep.subr.msk.bf16.mxu1 %vm968_vm0, %v4672_v0  ;;  %5549 = vmatprep.subr.msk.bf16.mxu0 %vm968_vm0, %v4672_v0  ;;  %v970_v1 = vsel %vm968_vm0, %v4672_v0, 0  ;;  %v4737_v3 = vld [vmem:[%s7548_s2 + $0x4] sm:$0x3]  ;;  %v5705_v4 = vld [vmem:[%s7548_s2 + $0x6] sm:$0x3]  ;;  %v5716_v5 = vsel %vm968_vm0, %v481_v2, 0 }
   0xe   : > { %5548 = vmatpush3.bf16.msra.mxu1 %v970_v1  ;;  %5242 = vmatpush3.bf16.msra.mxu0 %v970_v1  ;;  %s7825_s15 = smov (!%p276_p4, %s5633_s15), 1  ;;  %vm482_vm1 = vsmask.f32 3328  ;;  %vm483_vm2 = vsmask.f32 7440  ;;  %v5719_v6 = vsel %vm968_vm0, %v4737_v3, 0 }
   0xf   : > { %5551 = vmatprep.subr.msk.bf16.mxu1 %vm968_vm0, %v481_v2  ;;  %5552 = vmatprep.subr.msk.bf16.mxu0 %vm968_vm0, %v4737_v3  ;;  %s5559_s27 = smul.u32 680, %s7825_s15  ;;  %v5723_v7 = vsel %vm968_vm0, %v5705_v4, 0  ;;  %vm919_vm3 = vcmask 31744   ;;  %vm5738_vm4 = vmor %vm482_vm1, %vm483_vm2  ;;  %s4960_s25 = sshll.u32 %s7825_s15, 7 }
  0x11   : > { %s5713_s30 = scalar_lea.vmem %s7546_s0, %s5559_s27  ;;  %s4959_s19 = sadd.s32 640, %s5559_s27 }
  0x12   : > { %v318_v8 = vld [vmem:[%s5713_s30 + $0x8] sm:$0xf]  ;;  %v319_v9 = vld [vmem:[%s5713_s30 + $0xc] sm:$0xf]  ;;  %v320_v10 = vld [vmem:[%s5713_s30 + $0x10] sm:$0x1]  ;;  %s7040_s22 = scalar_lea.vmem %s7547_s1, %s4959_s19  ;;  %s7445_s27 = scalar_lea.vmem %s7550_s4, %s4960_s25 }
  0x13   : > { %v486_v11 = vshrl.u32 %v318_v8, 16  ;;  %v489_v12 = vshll.u32 %v318_v8, 16  ;;  %v495_v13 = vshll.u32 %v319_v9, 16  ;;  %v499_v14 = vshrl.u32 %v319_v9, 16  ;;  %v398_v15 = vld [vmem:[%s5713_s30 + $0x148] sm:$0xf] }
  0x14   : > { %v505_v16 = vshll.u32 %v320_v10, 16  ;;  %v399_v17 = vld [vmem:[%s5713_s30 + $0x14c] sm:$0xf]  ;;  %v400_v18 = vld [vmem:[%s5713_s30 + $0x150] sm:$0x1]  ;;  %v678_v19 = vshrl.u32 %v398_v15, 16 }
  0x15   : > { %v488_v20 = vrot.slane %v486_v11, 4  ;;  %v5731_v21 = vrot.slane %v489_v12, 5  ;;  %v497_v22 = vrot.slane %v495_v13, 5  ;;  %v501_v23 = vrot.slane %v499_v14, 4  ;;  %v328_v24 = vld [vmem:[%s5713_s30 + $0x30] sm:$0xf] }
  0x16   : > { %v507_v25 = vrot.slane %v505_v16, 5  ;;  %v680_v26 = vrot.slane %v678_v19, 4  ;;  %v681_v27 = vshll.u32 %v398_v15, 16  ;;  %v687_v28 = vshll.u32 %v399_v17, 16  ;;  %v329_v33 = vld [vmem:[%s5713_s30 + $0x34] sm:$0xf] }
  0x17   : > { %v492_v29 = vor.u32 %v5731_v21, %v488_v20  ;;  %v502_v30 = vor.u32 %v501_v23, %v497_v22  ;;  %v691_v31 = vshrl.u32 %v399_v17, 16  ;;  %v697_v32 = vshll.u32 %v400_v18, 16  ;;  %v330_v43 = vld [vmem:[%s5713_s30 + $0x38] sm:$0x1]  ;;  %v408_v48 = vld [vmem:[%s5713_s30 + $0x170] sm:$0xf] }
  0x18   : > { %v5742_v35 = vrot.slane %v681_v27, 5  ;;  %v689_v36 = vrot.slane %v687_v28, 5  ;;  %v510_v37 = vshrl.u32 %v328_v24, 16  ;;  %v513_v38 = vshll.u32 %v328_v24, 16  ;;  %v409_v53 = vld [vmem:[%s5713_s30 + $0x174] sm:$0xf] }
  0x19   : > { %v493_v39 = vrot.slane %v492_v29, 4  ;;  %v503_v40 = vrot.slane %v502_v30, 4  ;;  %v693_v41 = vrot.slane %v691_v31, 4  ;;  %v699_v42 = vrot.slane %v697_v32, 5  ;;  %v410_v61 = vld [vmem:[%s5713_s30 + $0x178] sm:$0x1] }
  0x1a   : > { %v684_v44 = vor.u32 %v5742_v35, %v680_v26  ;;  %v512_v45 = vrot.slane %v510_v37, 4  ;;  %v5746_v46 = vrot.slane %v513_v38, 5  ;;  %v519_v47 = vshll.u32 %v329_v33, 16  ;;  %v338_v3 = vld [vmem:[%s5713_s30 + $0x58] sm:$0xf] }
  0x1b   : > { %v498_v49 = vsel %vm5738_vm4, %v493_v39, %v497_v22  ;;  %v508_v50 = vsel %vm5738_vm4, %v503_v40, %v507_v25  ;;  %v694_v51 = vor.u32 %v693_v41, %v689_v36  ;;  %v523_v52 = vshrl.u32 %v329_v33, 16  ;;  %v339_v12 = vld [vmem:[%s5713_s30 + $0x5c] sm:$0xf]  ;;  %v340_v20 = vld [vmem:[%s5713_s30 + $0x60] sm:$0x1] }
  0x1c   : > { %v4673_v54 = vcombine.low %v498_v49, %v508_v50  ;;  %v685_v55 = vrot.slane %v684_v44, 4  ;;  %v516_v56 = vor.u32 %v5746_v46, %v512_v45  ;;  %v521_v57 = vrot.slane %v519_v47, 5  ;;  %v418_v27 = vld [vmem:[%s5713_s30 + $0x198] sm:$0xf]  ;;  %v419_v32 = vld [vmem:[%s5713_s30 + $0x19c] sm:$0xf] }
  0x1d   : > { %v695_v58 = vrot.slane %v694_v51, 4  ;;  %v525_v59 = vrot.slane %v523_v52, 4  ;;  %v529_v60 = vshll.u32 %v330_v43, 16  ;;  %v702_v62 = vshrl.u32 %v408_v48, 16  ;;  %v5784_v43 = vld [vmem:[%s7548_s2 + $0x8] sm:$0x3] }
  0x1e   : > { %5243 = vmatprep.mubr.msk.bf16.mxu0 %vm919_vm3, %v4673_v54  ;;  %v690_v63 = vsel %vm5738_vm4, %v685_v55, %v689_v36  ;;  %v517_v0 = vrot.slane %v516_v56, 4  ;;  %v705_v1 = vshll.u32 %v408_v48, 16  ;;  %v711_v2 = vshll.u32 %v409_v53, 16  ;;  %v420_v47 = vld [vmem:[%s5713_s30 + $0x1a0] sm:$0x1] }
  0x1f   : > { %v700_v8 = vsel %vm5738_vm4, %v695_v58, %v699_v42  ;;  %v526_v9 = vor.u32 %v525_v59, %v521_v57  ;;  %v531_v10 = vrot.slane %v529_v60, 5  ;;  %v704_v11 = vrot.slane %v702_v62, 4  ;;  %v348_v50 = vld [vmem:[%s5713_s30 + $0x80] sm:$0xf]  ;;  %v349_v62 = vld [vmem:[%s5713_s30 + $0x84] sm:$0xf] }
  0x20   : > { %v5763_v13 = vcombine.low %v690_v63, %v700_v8  ;;  %v522_v14 = vsel %vm5738_vm4, %v517_v0, %v521_v57  ;;  %v5767_v15 = vrot.slane %v705_v1, 5  ;;  %v713_v16 = vrot.slane %v711_v2, 5  ;;  %v428_v8 = vld [vmem:[%s5713_s30 + $0x1c0] sm:$0xf] }
  0x21   : > { %v527_v17 = vrot.slane %v526_v9, 4  ;;  %v715_v18 = vshrl.u32 %v409_v53, 16  ;;  %v721_v19 = vshll.u32 %v410_v61, 16  ;;  %v534_v22 = vshrl.u32 %v338_v3, 16 }
  0x22   : > { %7618 = vst [vmem:[#allocation2_spill] sm:$0xff] %v5763_v13  ;;  %5259 = vmatprep.mubr.msk.bf16.mxu1 %vm919_vm3, %v5763_v13  ;;  %v708_v23 = vor.u32 %v5767_v15, %v704_v11  ;;  %v537_v24 = vshll.u32 %v338_v3, 16  ;;  %v543_v25 = vshll.u32 %v339_v12, 16  ;;  %v547_v26 = vshrl.u32 %v339_v12, 16  ;;  %v350_v3 = vld [vmem:[%s5713_s30 + $0x88] sm:$0x1] }
  0x23   : > { %v532_v28 = vsel %vm5738_vm4, %v527_v17, %v531_v10  ;;  %v717_v29 = vrot.slane %v715_v18, 4  ;;  %v723_v30 = vrot.slane %v721_v19, 5  ;;  %v536_v31 = vrot.slane %v534_v22, 4 }
  0x24   : > { %v5777_v33 = vcombine.low %v522_v14, %v532_v28  ;;  %v709_v36 = vrot.slane %v708_v23, 4  ;;  %v5779_v37 = vrot.slane %v537_v24, 5  ;;  %v545_v38 = vrot.slane %v543_v25, 5  ;;  %v429_v23 = vld [vmem:[%s5713_s30 + $0x1c4] sm:$0xf] }
  0x25   : > { %v718_v39 = vor.u32 %v717_v29, %v713_v16  ;;  %v549_v40 = vrot.slane %v547_v26, 4  ;;  %v553_v41 = vshll.u32 %v340_v20, 16  ;;  %v726_v42 = vshrl.u32 %v418_v27, 16  ;;  %v430_v28 = vld [vmem:[%s5713_s30 + $0x1c8] sm:$0x1] }
  0x26   : > { %7619 = vst [vmem:[#allocation3_spill] sm:$0xff] %v5777_v33  ;;  %5244 = vmatmul.mubr.msk.bf16.vlgmr.msra.gmra.mxu0 %vm919_vm3, %v5777_v33  ;;  %v714_v44 = vsel %vm5738_vm4, %v709_v36, %v713_v16  ;;  %v540_v45 = vor.u32 %v5779_v37, %v536_v31  ;;  %v729_v48 = vshll.u32 %v418_v27, 16  ;;  %v735_v49 = vshll.u32 %v419_v32, 16  ;;  %v358_v36 = vld [vmem:[%s5713_s30 + $0xa8] sm:$0xf] }
  0x27   : > { %v719_v51 = vrot.slane %v718_v39, 4  ;;  %5310 = vmatpush3.bf16.msra.mxu0 %v5719_v6  ;;  %v550_v52 = vor.u32 %v549_v40, %v545_v38  ;;  %v555_v53 = vrot.slane %v553_v41, 5  ;;  %v728_v54 = vrot.slane %v726_v42, 4  ;;  %v383_v33 = vld [vmem:[%s5713_s30 + $0x10c] sm:$0xf] }
  0x28   : > { %v541_v55 = vrot.slane %v540_v45, 4  ;;  %v5794_v56 = vrot.slane %v729_v48, 5  ;;  %v737_v57 = vrot.slane %v735_v49, 5  ;;  %v739_v58 = vshrl.u32 %v419_v32, 16  ;;  %5554 = vmatprep.subr.msk.bf16.mxu0 %vm968_vm0, %v5784_v43 }
  0x29   : > { %v724_v59 = vsel %vm5738_vm4, %v719_v51, %v723_v30  ;;  %v551_v60 = vrot.slane %v550_v52, 4  ;;  %v745_v61 = vshll.u32 %v420_v47, 16  ;;  %v558_v6 = vshrl.u32 %v348_v50, 16  ;;  %v360_v51 = vld [vmem:[%s5713_s30 + $0xb0] sm:$0x1] }
  0x2a   : > { %v5801_v63 = vcombine.low %v714_v44, %v724_v59  ;;  %v546_v0 = vsel %vm5738_vm4, %v541_v55, %v545_v38  ;;  %v732_v1 = vor.u32 %v5794_v56, %v728_v54  ;;  %v741_v2 = vrot.slane %v739_v58, 4 }
  0x2b   : > { %v556_v9 = vsel %vm5738_vm4, %v551_v60, %v555_v53  ;;  %v747_v10 = vrot.slane %v745_v61, 5  ;;  %v560_v11 = vrot.slane %v558_v6, 4  ;;  %v561_v12 = vshll.u32 %v348_v50, 16 }
  0x2c   : > { %7620 = vst [vmem:[#allocation4_spill] sm:$0xff] %v5801_v63  ;;  %5260 = vmatmul.mubr.msk.bf16.vlgmr.msra.gmra.mxu1 %vm919_vm3, %v5801_v63  ;;  %v5812_v14 = vcombine.low %v546_v0, %v556_v9  ;;  %v733_v16 = vrot.slane %v732_v1, 4  ;;  %v742_v17 = vor.u32 %v741_v2, %v737_v57  ;;  %v567_v18 = vshll.u32 %v349_v62, 16  ;;  %v355_v63 = vld [vmem:[%s5713_s30 + $0x9c] sm:$0x1] }
  0x2d   : > { %5276 = vmatpush3.bf16.msra.mxu1 %v5716_v5  ;;  %v5815_v19 = vrot.slane %v561_v12, 5  ;;  %v571_v20 = vshrl.u32 %v349_v62, 16  ;;  %v577_v22 = vshll.u32 %v350_v3, 16  ;;  %v750_v24 = vshrl.u32 %v428_v8, 16  ;;  %v438_v62 = vld [vmem:[%s5713_s30 + $0x1e8] sm:$0xf] }
  0x2e   : > { %7621 = vst [vmem:[#allocation5_spill] sm:$0xff] %v5812_v14  ;;  %5247 = vmatprep.mubr.msk.bf16.mxu0 %vm919_vm3, %v5812_v14  ;;  %v738_v25 = vsel %vm5738_vm4, %v733_v16, %v737_v57  ;;  %v743_v26 = vrot.slane %v742_v17, 4  ;;  %v569_v27 = vrot.slane %v567_v18, 5  ;;  %v753_v29 = vshll.u32 %v428_v8, 16  ;;  %5553 = vmatprep.subr.msk.bf16.mxu1 %vm968_vm0, %v5705_v4  ;;  %v359_v4 = vld [vmem:[%s5713_s30 + $0xac] sm:$0xf] }
  0x2f   : > { %v564_v5 = vor.u32 %v5815_v19, %v560_v11  ;;  %v573_v30 = vrot.slane %v571_v20, 4  ;;  %v579_v31 = vrot.slane %v577_v22, 5  ;;  %v752_v32 = vrot.slane %v750_v24, 4  ;;  %v439_v3 = vld [vmem:[%s5713_s30 + $0x1ec] sm:$0xf] }
  0x30   : > { %v748_v38 = vsel %vm5738_vm4, %v743_v26, %v747_v10  ;;  %v5829_v39 = vrot.slane %v753_v29, 5  ;;  %v759_v40 = vshll.u32 %v429_v23, 16  ;;  %v763_v41 = vshrl.u32 %v429_v23, 16  ;;  %v440_v18 = vld [vmem:[%s5713_s30 + $0x1f0] sm:$0x1] }
  0x31   : > { %v5831_v42 = vcombine.low %v738_v25, %v748_v38  ;;  %v565_v44 = vrot.slane %v564_v5, 4  ;;  %v574_v45 = vor.u32 %v573_v30, %v569_v27  ;;  %v769_v47 = vshll.u32 %v430_v28, 16  ;;  %v368_v26 = vld [vmem:[%s5713_s30 + $0xd0] sm:$0xf]  ;;  %v369_v30 = vld [vmem:[%s5713_s30 + $0xd4] sm:$0xf] }
  0x32   : > { %v756_v48 = vor.u32 %v5829_v39, %v752_v32  ;;  %v761_v49 = vrot.slane %v759_v40, 5  ;;  %v765_v50 = vrot.slane %v763_v41, 4  ;;  %v582_v52 = vshrl.u32 %v358_v36, 16 }
  0x33   : > { %7622 = vst [vmem:[#allocation6_spill] sm:$0xff] %v5831_v42  ;;  %5263 = vmatprep.mubr.msk.bf16.mxu1 %vm919_vm3, %v5831_v42  ;;  %v570_v53 = vsel %vm5738_vm4, %v565_v44, %v569_v27  ;;  %v575_v54 = vrot.slane %v574_v45, 4  ;;  %v771_v55 = vrot.slane %v769_v47, 5  ;;  %v585_v57 = vshll.u32 %v358_v36, 16 }
  0x34   : > { %v757_v58 = vrot.slane %v756_v48, 4  ;;  %v766_v59 = vor.u32 %v765_v50, %v761_v49  ;;  %v584_v60 = vrot.slane %v582_v52, 4  ;;  %v591_v61 = vshll.u32 %v359_v4, 16 }
  0x35   : > { %v580_v6 = vsel %vm5738_vm4, %v575_v54, %v579_v31  ;;  %v5843_v0 = vrot.slane %v585_v57, 5  ;;  %v595_v1 = vshrl.u32 %v359_v4, 16  ;;  %v601_v2 = vshll.u32 %v360_v51, 16  ;;  %v448_v51 = vld [vmem:[%s5713_s30 + $0x210] sm:$0xf] }
  0x36   : > { %v5846_v8 = vcombine.low %v570_v53, %v580_v6  ;;  %v762_v9 = vsel %vm5738_vm4, %v757_v58, %v761_v49  ;;  %v767_v10 = vrot.slane %v766_v59, 4  ;;  %v593_v11 = vrot.slane %v591_v61, 5  ;;  %v370_v49 = vld [vmem:[%s5713_s30 + $0xd8] sm:$0x1]  ;;  %v449_v57 = vld [vmem:[%s5713_s30 + $0x214] sm:$0xf] }
  0x37   : > { %v588_v12 = vor.u32 %v5843_v0, %v584_v60  ;;  %v597_v16 = vrot.slane %v595_v1, 4  ;;  %v603_v17 = vrot.slane %v601_v2, 5  ;;  %v774_v20 = vshrl.u32 %v438_v62, 16 }
  0x38   : > { %7623 = vst [vmem:[#allocation7_spill] sm:$0xff] %v5846_v8  ;;  %5248 = vmatmul.mubr.msk.bf16.gmra.mxu0 %vm919_vm3, %v5846_v8  ;;  %v772_v22 = vsel %vm5738_vm4, %v767_v10, %v771_v55  ;;  %v777_v23 = vshll.u32 %v438_v62, 16  ;;  %v783_v24 = vshll.u32 %v439_v3, 16  ;;  %v787_v25 = vshrl.u32 %v439_v3, 16  ;;  %v450_v10 = vld [vmem:[%s5713_s30 + $0x218] sm:$0x1] }
  0x39   : > { %v5857_v27 = vcombine.low %v762_v9, %v772_v22  ;;  %v589_v28 = vrot.slane %v588_v12, 4  ;;  %v598_v29 = vor.u32 %v597_v16, %v593_v11  ;;  %v776_v5 = vrot.slane %v774_v20, 4  ;;  %v378_v16 = vld [vmem:[%s5713_s30 + $0xf8] sm:$0xf] }
  0x3a   : > { %v5860_v31 = vrot.slane %v777_v23, 5  ;;  %v785_v32 = vrot.slane %v783_v24, 5  ;;  %v789_v36 = vrot.slane %v787_v25, 4  ;;  %v793_v38 = vshll.u32 %v440_v18, 16  ;;  %v379_v23 = vld [vmem:[%s5713_s30 + $0xfc] sm:$0xf] }
  0x3b   : > { %7624 = vst [vmem:[#allocation8_spill] sm:$0xff] %v5857_v27  ;;  %5264 = vmatmul.mubr.msk.bf16.gmra.mxu1 %vm919_vm3, %v5857_v27  ;;  %v594_v40 = vsel %vm5738_vm4, %v589_v28, %v593_v11  ;;  %v599_v41 = vrot.slane %v598_v29, 4  ;;  %v606_v44 = vshrl.u32 %v368_v26, 16  ;;  %v609_v45 = vshll.u32 %v368_v26, 16 }
  0x3c   : > { %v780_v47 = vor.u32 %v5860_v31, %v776_v5  ;;  %v790_v4 = vor.u32 %v789_v36, %v785_v32  ;;  %v795_v48 = vrot.slane %v793_v38, 5  ;;  %v615_v50 = vshll.u32 %v369_v30, 16 }
  0x3d   : > { %v604_v52 = vsel %vm5738_vm4, %v599_v41, %v603_v17  ;;  %v608_v53 = vrot.slane %v606_v44, 4  ;;  %v5871_v54 = vrot.slane %v609_v45, 5  ;;  %v619_v55 = vshrl.u32 %v369_v30, 16  ;;  %v458_v45 = vld [vmem:[%s5713_s30 + $0x238] sm:$0xf] }
  0x3e   : > { %v5874_v58 = vcombine.low %v594_v40, %v604_v52  ;;  %v781_v59 = vrot.slane %v780_v47, 4  ;;  %v791_v60 = vrot.slane %v790_v4, 4  ;;  %v617_v61 = vrot.slane %v615_v50, 5 }
  0x3f   : > { %v612_v62 = vor.u32 %v5871_v54, %v608_v53  ;;  %v621_v6 = vrot.slane %v619_v55, 4  ;;  %v625_v1 = vshll.u32 %v370_v49, 16  ;;  %v798_v2 = vshrl.u32 %v448_v51, 16  ;;  %v459_v55 = vld [vmem:[%s5713_s30 + $0x23c] sm:$0xf] }
  0x40   : > { %7625 = vst [vmem:[#allocation9_spill] sm:$0xff] %v5874_v58  ;;  %5251 = vmatprep.mubr.msk.bf16.mxu0 %vm919_vm3, %v5874_v58  ;;  %v786_v3 = vsel %vm5738_vm4, %v781_v59, %v785_v32  ;;  %v796_v9 = vsel %vm5738_vm4, %v791_v60, %v795_v48  ;;  %v801_v11 = vshll.u32 %v448_v51, 16  ;;  %v807_v12 = vshll.u32 %v449_v57, 16  ;;  %v380_v32 = vld [vmem:[%s5713_s30 + $0x100] sm:$0x1] }
  0x41   : > { %v5885_v17 = vcombine.low %v786_v3, %v796_v9  ;;  %v613_v18 = vrot.slane %v612_v62, 4  ;;  %v622_v20 = vor.u32 %v621_v6, %v617_v61  ;;  %v627_v22 = vrot.slane %v625_v1, 5 }
  0x42   : > { %v800_v24 = vrot.slane %v798_v2, 4  ;;  %v5888_v25 = vrot.slane %v801_v11, 5  ;;  %v809_v26 = vrot.slane %v807_v12, 5  ;;  %v811_v28 = vshrl.u32 %v449_v57, 16  ;;  %v460_v2 = vld [vmem:[%s5713_s30 + $0x240] sm:$0x1] }
  0x43   : > { %7626 = vst [vmem:[#allocation10_spill] sm:$0xff] %v5885_v17  ;;  %5267 = vmatprep.mubr.msk.bf16.mxu1 %vm919_vm3, %v5885_v17  ;;  %v618_v29 = vsel %vm5738_vm4, %v613_v18, %v617_v61  ;;  %v623_v5 = vrot.slane %v622_v20, 4  ;;  %v817_v30 = vshll.u32 %v450_v10, 16  ;;  %v630_v36 = vshrl.u32 %v378_v16, 16 }
  0x44   : > { %v804_v38 = vor.u32 %v5888_v25, %v800_v24  ;;  %v813_v40 = vrot.slane %v811_v28, 4  ;;  %v633_v41 = vshll.u32 %v378_v16, 16  ;;  %v639_v44 = vshll.u32 %v379_v23, 16  ;;  %v388_v16 = vld [vmem:[%s5713_s30 + $0x120] sm:$0xf] }
  0x45   : > { %v628_v47 = vsel %vm5738_vm4, %v623_v5, %v627_v22  ;;  %v819_v4 = vrot.slane %v817_v30, 5  ;;  %v632_v48 = vrot.slane %v630_v36, 4  ;;  %v643_v49 = vshrl.u32 %v379_v23, 16  ;;  %v389_v24 = vld [vmem:[%s5713_s30 + $0x124] sm:$0xf] }
  0x46   : > { %v5899_v50 = vcombine.low %v618_v29, %v628_v47  ;;  %v805_v51 = vrot.slane %v804_v38, 4  ;;  %v814_v52 = vor.u32 %v813_v40, %v809_v26  ;;  %v5901_v53 = vrot.slane %v633_v41, 5  ;;  %v390_v38 = vld [vmem:[%s5713_s30 + $0x128] sm:$0x1] }
  0x47   : > { %v641_v57 = vrot.slane %v639_v44, 5  ;;  %v645_v59 = vrot.slane %v643_v49, 4  ;;  %v649_v60 = vshll.u32 %v380_v32, 16  ;;  %v822_v61 = vshrl.u32 %v458_v45, 16 }
  0x48   : > { %7627 = vst [vmem:[#allocation11_spill] sm:$0xff] %v5899_v50  ;;  %5252 = vmatmul.mubr.msk.bf16.gmra.mxu0 %vm919_vm3, %v5899_v50  ;;  %v810_v62 = vsel %vm5738_vm4, %v805_v51, %v809_v26  ;;  %v815_v6 = vrot.slane %v814_v52, 4  ;;  %v636_v1 = vor.u32 %v5901_v53, %v632_v48  ;;  %v825_v3 = vshll.u32 %v458_v45, 16 }
  0x49   : > { %v646_v9 = vor.u32 %v645_v59, %v641_v57  ;;  %v651_v10 = vrot.slane %v649_v60, 5  ;;  %v824_v11 = vrot.slane %v822_v61, 4  ;;  %v831_v12 = vshll.u32 %v459_v55, 16 }
  0x4a   : > { %v820_v18 = vsel %vm5738_vm4, %v815_v6, %v819_v4  ;;  %v637_v20 = vrot.slane %v636_v1, 4  ;;  %v5913_v22 = vrot.slane %v825_v3, 5  ;;  %v835_v23 = vshrl.u32 %v459_v55, 16  ;;  %v468_v4 = vld [vmem:[%s5713_s30 + $0x260] sm:$0xf] }
  0x4b   : > { %v5916_v26 = vcombine.low %v810_v62, %v820_v18  ;;  %v647_v28 = vrot.slane %v646_v9, 4  ;;  %v833_v29 = vrot.slane %v831_v12, 5  ;;  %v841_v5 = vshll.u32 %v460_v2, 16  ;;  %v469_v55 = vld [vmem:[%s5713_s30 + $0x264] sm:$0xf] }
  0x4c   : > { %v642_v30 = vsel %vm5738_vm4, %v637_v20, %v641_v57  ;;  %v828_v32 = vor.u32 %v5913_v22, %v824_v11  ;;  %v837_v36 = vrot.slane %v835_v23, 4  ;;  %v654_v40 = vshrl.u32 %v388_v16, 16  ;;  %v470_v11 = vld [vmem:[%s5713_s30 + $0x268] sm:$0x1] }
  0x4d   : > { %7628 = vst [vmem:[#allocation12_spill] sm:$0xff] %v5916_v26  ;;  %5268 = vmatmul.mubr.msk.bf16.gmra.mxu1 %vm919_vm3, %v5916_v26  ;;  %v652_v41 = vsel %vm5738_vm4, %v647_v28, %v651_v10  ;;  %v843_v44 = vrot.slane %v841_v5, 5  ;;  %v657_v45 = vshll.u32 %v388_v16, 16  ;;  %v663_v47 = vshll.u32 %v389_v24, 16 }
  0x4e   : > { %v5927_v48 = vcombine.low %v642_v30, %v652_v41  ;;  %v829_v49 = vrot.slane %v828_v32, 4  ;;  %v838_v51 = vor.u32 %v837_v36, %v833_v29  ;;  %v656_v52 = vrot.slane %v654_v40, 4  ;;  %v317_v32 = vld [vmem:[%s5713_s30 + $0x4] sm:$0xf] }
  0x4f   : > { %v5930_v57 = vrot.slane %v657_v45, 5  ;;  %v665_v59 = vrot.slane %v663_v47, 5  ;;  %v667_v60 = vshrl.u32 %v389_v24, 16  ;;  %v673_v61 = vshll.u32 %v390_v38, 16  ;;  %v316_v24 = vld [vmem:[%s5713_s30] sm:$0xf] }
  0x50   : > { %7629 = vst [vmem:[#allocation13_spill] sm:$0xff] %v5927_v48  ;;  %5255 = vmatprep.mubr.msk.bf16.mxu0 %vm919_vm3, %v5927_v48  ;;  %v834_v62 = vsel %vm5738_vm4, %v829_v49, %v833_v29  ;;  %v839_v6 = vrot.slane %v838_v51, 4  ;;  %v846_v1 = vshrl.u32 %v468_v4, 16  ;;  %v849_v2 = vshll.u32 %v468_v4, 16  ;;  %v365_v48 = vld [vmem:[%s5713_s30 + $0xc4] sm:$0x1] }
  0x51   : > { %v660_v3 = vor.u32 %v5930_v57, %v656_v52  ;;  %v669_v9 = vrot.slane %v667_v60, 4  ;;  %v675_v10 = vrot.slane %v673_v61, 5  ;;  %v855_v12 = vshll.u32 %v469_v55, 16  ;;  %v326_v60 = vld [vmem:[%s5713_s30 + $0x28] sm:$0xf] }
  0x52   : > { %v844_v16 = vsel %vm5738_vm4, %v839_v6, %v843_v44  ;;  %v848_v18 = vrot.slane %v846_v1, 4  ;;  %v5940_v20 = vrot.slane %v849_v2, 5  ;;  %v859_v23 = vshrl.u32 %v469_v55, 16  ;;  %v327_v1 = vld [vmem:[%s5713_s30 + $0x2c] sm:$0xf] }
  0x53   : > { %v5943_v28 = vcombine.low %v834_v62, %v844_v16  ;;  %v661_v29 = vrot.slane %v660_v3, 4  ;;  %v670_v5 = vor.u32 %v669_v9, %v665_v59  ;;  %v857_v30 = vrot.slane %v855_v12, 5 }
  0x54   : > { %v852_v36 = vor.u32 %v5940_v20, %v848_v18  ;;  %v861_v38 = vrot.slane %v859_v23, 4  ;;  %v865_v40 = vshll.u32 %v470_v11, 16  ;;  %v5949_v41 = vsel %vm968_vm0, %v5784_v43, 0 }
  0x55   : > { %7630 = vst [vmem:[#allocation14_spill] sm:$0xff] %v5943_v28  ;;  %5271 = vmatprep.mubr.msk.bf16.mxu1 %vm919_vm3, %v5943_v28  ;;  %v666_v44 = vsel %vm5738_vm4, %v661_v29, %v665_v59  ;;  %v671_v45 = vrot.slane %v670_v5, 4  ;;  %v1426_v47 = vshrl.u32 %v316_v24, 16  ;;  %v1429_v4 = vshll.u32 %v316_v24, 16 }
  0x56   : > { %v853_v49 = vrot.slane %v852_v36, 4  ;;  %v862_v51 = vor.u32 %v861_v38, %v857_v30  ;;  %v867_v52 = vrot.slane %v865_v40, 5  ;;  %v1435_v55 = vshll.u32 %v317_v32, 16  ;;  %v336_v36 = vld [vmem:[%s5713_s30 + $0x50] sm:$0xf] }
  0x57   : > { %v676_v61 = vsel %vm5738_vm4, %v671_v45, %v675_v10  ;;  %v1428_v62 = vrot.slane %v1426_v47, 4  ;;  %v1431_v43 = vrot.slane %v1429_v4, 5  ;;  %v1439_v6 = vshrl.u32 %v317_v32, 16 }
  0x58   : > { %v5959_v2 = vcombine.low %v666_v44, %v676_v61  ;;  %v858_v59 = vsel %vm5738_vm4, %v853_v49, %v857_v30  ;;  %v863_v3 = vrot.slane %v862_v51, 4  ;;  %v1437_v9 = vrot.slane %v1435_v55, 5 }
  0x59   : > { %v4705_v11 = vcombine.low %v316_v24, %v317_v32  ;;  %v1441_v12 = vrot.slane %v1439_v6, 4  ;;  %v1432_v16 = vor.u32 %v1431_v43, %v1428_v62  ;;  %v1446_v18 = vshrl.u32 %v326_v60, 16  ;;  %v337_v24 = vld [vmem:[%s5713_s30 + $0x54] sm:$0xf]  ;;  %v346_v6 = vld [vmem:[%s5713_s30 + $0x78] sm:$0xf] }
  0x5a   : > { %7631 = vst [vmem:[#allocation15_spill] sm:$0xff] %v5959_v2  ;;  %5256 = vmatmul.mubr.msk.bf16.gmra.mxu0 %vm919_vm3, %v5959_v2  ;;  %v868_v10 = vsel %vm5738_vm4, %v863_v3, %v867_v52  ;;  %v1449_v23 = vshll.u32 %v326_v60, 16  ;;  %v1455_v29 = vshll.u32 %v327_v1, 16  ;;  %v1459_v5 = vshrl.u32 %v327_v1, 16 }
  0x5b   : > { %v5968_v38 = vcombine.low %v858_v59, %v868_v10  ;;  %v1433_v30 = vrot.slane %v1432_v16, 4  ;;  %v1442_v40 = vor.u32 %v1441_v12, %v1437_v9  ;;  %v1448_v44 = vrot.slane %v1446_v18, 4 }
  0x5c   : > { %v5971_v32 = vcombine.low %v326_v60, %v327_v1  ;;  %v1451_v45 = vrot.slane %v1449_v23, 5  ;;  %v1457_v47 = vrot.slane %v1455_v29, 5  ;;  %v1461_v4 = vrot.slane %v1459_v5, 4 }
  0x5d   : > { %7632 = vst [vmem:[#allocation16_spill] sm:$0xff] %v5968_v38  ;;  %5272 = vmatmul.mubr.msk.bf16.gmra.mxu1 %vm919_vm3, %v5968_v38  ;;  %v1438_v49 = vsel %vm5738_vm4, %v1433_v30, %v1437_v9  ;;  %v1443_v51 = vrot.slane %v1442_v40, 4  ;;  %v1466_v52 = vshrl.u32 %v336_v36, 16  ;;  %v1469_v55 = vshll.u32 %v336_v36, 16  ;;  %v347_v9 = vld [vmem:[%s5713_s30 + $0x7c] sm:$0xf] }
  0x5e   : > { %5277 = vmatprep.mubr.msk.bf16.mxu1 %vm919_vm3, %v4705_v11  ;;  %v1452_v61 = vor.u32 %v1451_v45, %v1448_v44  ;;  %v1462_v62 = vor.u32 %v1461_v4, %v1457_v47  ;;  %v1475_v43 = vshll.u32 %v337_v24, 16  ;;  %v1479_v60 = vshrl.u32 %v337_v24, 16 }
  0x5f   : > { %v1444_v1 = vsel %vm5738_vm4, %v1443_v51, %v5731_v21  ;;  %v5982_v59 = vcombine.low %v336_v36, %v337_v24  ;;  %v1468_v3 = vrot.slane %v1466_v52, 4  ;;  %v1471_v12 = vrot.slane %v1469_v55, 5  ;;  %v356_v24 = vld [vmem:[%s5713_s30 + $0xa0] sm:$0xf]  ;;  %v357_v52 = vld [vmem:[%s5713_s30 + $0xa4] sm:$0xf] }
  0x60   : > { %v4738_v16 = vcombine.low %v1438_v49, %v1444_v1  ;;  %v1453_v18 = vrot.slane %v1452_v61, 4  ;;  %v1463_v10 = vrot.slane %v1462_v62, 4  ;;  %v1477_v11 = vrot.slane %v1475_v43, 5 }
  0x61   : > { %7633 = vst [vmem:[#allocation17_spill] sm:$0xff] %v5982_v59  ;;  %v1481_v23 = vrot.slane %v1479_v60, 4  ;;  %v1472_v29 = vor.u32 %v1471_v12, %v1468_v3  ;;  %v1486_v5 = vshrl.u32 %v346_v6, 16  ;;  %v1489_v30 = vshll.u32 %v346_v6, 16  ;;  %v6011_v3 = vld [vmem:[%s7548_s2 + $0xc] sm:$0x3] }
  0x62   : > { %5311 = vmatprep.mubr.msk.bf16.mxu0 %vm919_vm3, %v4738_v16  ;;  %v1458_v21 = vsel %vm5738_vm4, %v1453_v18, %v1457_v47  ;;  %v1464_v36 = vsel %vm5738_vm4, %v1463_v10, %v5746_v46  ;;  %v1495_v40 = vshll.u32 %v347_v9, 16  ;;  %v1499_v44 = vshrl.u32 %v347_v9, 16  ;;  %v6000_v47 = vld [vmem:[%s7548_s2 + $0xa] sm:$0x3] }
  0x63   : > { %v5992_v45 = vcombine.low %v1458_v21, %v1464_v36  ;;  %v1473_v4 = vrot.slane %v1472_v29, 4  ;;  %v1482_v49 = vor.u32 %v1481_v23, %v1477_v11  ;;  %v1488_v51 = vrot.slane %v1486_v5, 4  ;;  %v366_v10 = vld [vmem:[%s5713_s30 + $0xc8] sm:$0xf] }
  0x64   : > { %v5995_v55 = vcombine.low %v346_v6, %v347_v9  ;;  %v1491_v61 = vrot.slane %v1489_v30, 5  ;;  %v1497_v62 = vrot.slane %v1495_v40, 5  ;;  %v1501_v43 = vrot.slane %v1499_v44, 4  ;;  %v367_v30 = vld [vmem:[%s5713_s30 + $0xcc] sm:$0xf] }
  0x65   : > { %7634 = vst [vmem:[#allocation18_spill] sm:$0xff] %v5992_v45  ;;  %5278 = vmatmul.mubr.msk.bf16.vlgmr.msra.gmra.mxu1 %vm919_vm3, %v5971_v32  ;;  %5312 = vmatmul.mubr.msk.bf16.vlgmr.msra.gmra.mxu0 %vm919_vm3, %v5992_v45  ;;  %v1478_v46 = vsel %vm5738_vm4, %v1473_v4, %v1477_v11  ;;  %v1483_v60 = vrot.slane %v1482_v49, 4  ;;  %v1506_v6 = vshrl.u32 %v356_v24, 16  ;;  %v1509_v1 = vshll.u32 %v356_v24, 16 }
  0x66   : > { %7635 = vst [vmem:[#allocation19_spill] sm:$0xff] %v5995_v55  ;;  %5344 = vmatpush3.bf16.msra.mxu1 %v5723_v7  ;;  %5378 = vmatpush3.bf16.msra.mxu0 %v5949_v41  ;;  %v1492_v12 = vor.u32 %v1491_v61, %v1488_v51  ;;  %v1502_v9 = vor.u32 %v1501_v43, %v1497_v62  ;;  %v1515_v16 = vshll.u32 %v357_v52, 16  ;;  %v1519_v18 = vshrl.u32 %v357_v52, 16  ;;  %v376_v61 = vld [vmem:[%s5713_s30 + $0xf0] sm:$0xf] }
  0x67   : > { %5281 = vmatprep.mubr.msk.bf16.mxu1 %vm919_vm3, %v5982_v59  ;;  %v1484_v11 = vsel %vm5738_vm4, %v1483_v60, %v5779_v37  ;;  %v6021_v23 = vcombine.low %v356_v24, %v357_v52  ;;  %v1508_v29 = vrot.slane %v1506_v6, 4  ;;  %v1511_v5 = vrot.slane %v1509_v1, 5  ;;  %5555 = vmatprep.subr.msk.bf16.mxu1 %vm968_vm0, %v6000_v47  ;;  %v377_v1 = vld [vmem:[%s5713_s30 + $0xf4] sm:$0xf] }
  0x68   : > { %v6026_v7 = vcombine.low %v1478_v46, %v1484_v11  ;;  %v1493_v41 = vrot.slane %v1492_v12, 4  ;;  %v1503_v21 = vrot.slane %v1502_v9, 4  ;;  %v1517_v36 = vrot.slane %v1515_v16, 5  ;;  %5556 = vmatprep.subr.msk.bf16.mxu0 %vm968_vm0, %v6011_v3 }
  0x69   : > { %7636 = vst [vmem:[#allocation20_spill] sm:$0xff] %v6021_v23  ;;  %v1521_v40 = vrot.slane %v1519_v18, 4  ;;  %v1512_v37 = vor.u32 %v1511_v5, %v1508_v29  ;;  %v1526_v44 = vshrl.u32 %v366_v10, 16  ;;  %v1529_v24 = vshll.u32 %v366_v10, 16 }
  0x6a   : > { %7637 = vst [vmem:[#allocation21_spill] sm:$0xff] %v6026_v7  ;;  %5315 = vmatprep.mubr.msk.bf16.mxu0 %vm919_vm3, %v6026_v7  ;;  %v1498_v4 = vsel %vm5738_vm4, %v1493_v41, %v1497_v62  ;;  %v1504_v49 = vsel %vm5738_vm4, %v1503_v21, %v5815_v19  ;;  %v1535_v51 = vshll.u32 %v367_v30, 16  ;;  %v1539_v52 = vshrl.u32 %v367_v30, 16  ;;  %v386_v21 = vld [vmem:[%s5713_s30 + $0x118] sm:$0xf] }
  0x6b   : > { %v6038_v43 = vcombine.low %v1498_v4, %v1504_v49  ;;  %v1513_v46 = vrot.slane %v1512_v37, 4  ;;  %v1522_v60 = vor.u32 %v1521_v40, %v1517_v36  ;;  %v1528_v6 = vrot.slane %v1526_v44, 4 }
  0x6c   : > { %v6041_v12 = vcombine.low %v366_v10, %v367_v30  ;;  %v1531_v9 = vrot.slane %v1529_v24, 5  ;;  %v1537_v16 = vrot.slane %v1535_v51, 5  ;;  %v1541_v18 = vrot.slane %v1539_v52, 4  ;;  %v387_v24 = vld [vmem:[%s5713_s30 + $0x11c] sm:$0xf] }
  0x6d   : > { %7638 = vst [vmem:[#allocation22_spill] sm:$0xff] %v6038_v43  ;;  %5282 = vmatmul.mubr.msk.bf16.gmra.mxu1 %vm919_vm3, %v5995_v55  ;;  %5316 = vmatmul.mubr.msk.bf16.gmra.mxu0 %vm919_vm3, %v6038_v43  ;;  %v1518_v19 = vsel %vm5738_vm4, %v1513_v46, %v1517_v36  ;;  %v1523_v62 = vrot.slane %v1522_v60, 4  ;;  %v1546_v11 = vshrl.u32 %v376_v61, 16  ;;  %v1549_v29 = vshll.u32 %v376_v61, 16 }
  0x6e   : > { %7639 = vst [vmem:[#allocation23_spill] sm:$0xff] %v6041_v12  ;;  %5285 = vmatprep.mubr.msk.bf16.mxu1 %vm919_vm3, %v6021_v23  ;;  %v1532_v10 = vor.u32 %v1531_v9, %v1528_v6  ;;  %v1542_v5 = vor.u32 %v1541_v18, %v1537_v16  ;;  %v1555_v30 = vshll.u32 %v377_v1, 16  ;;  %v1559_v41 = vshrl.u32 %v377_v1, 16 }
  0x6f   : > { %v1524_v40 = vsel %vm5738_vm4, %v1523_v62, %v5843_v0  ;;  %v6055_v37 = vcombine.low %v376_v61, %v377_v1  ;;  %v1548_v44 = vrot.slane %v1546_v11, 4  ;;  %v1551_v36 = vrot.slane %v1549_v29, 5 }
  0x70   : > { %v6058_v4 = vcombine.low %v1518_v19, %v1524_v40  ;;  %v1533_v49 = vrot.slane %v1532_v10, 4  ;;  %v1543_v51 = vrot.slane %v1542_v5, 4  ;;  %v1557_v52 = vrot.slane %v1555_v30, 5  ;;  %v396_v19 = vld [vmem:[%s5713_s30 + $0x140] sm:$0xf] }
  0x71   : > { %7640 = vst [vmem:[#allocation24_spill] sm:$0xff] %v6055_v37  ;;  %v1561_v46 = vrot.slane %v1559_v41, 4  ;;  %v1552_v60 = vor.u32 %v1551_v36, %v1548_v44  ;;  %v1566_v6 = vshrl.u32 %v386_v21, 16  ;;  %v1569_v9 = vshll.u32 %v386_v21, 16  ;;  %v397_v5 = vld [vmem:[%s5713_s30 + $0x144] sm:$0xf] }
  0x72   : > { %7641 = vst [vmem:[#allocation25_spill] sm:$0xff] %v6058_v4  ;;  %5319 = vmatprep.mubr.msk.bf16.mxu0 %vm919_vm3, %v6058_v4  ;;  %v1538_v0 = vsel %vm5738_vm4, %v1533_v49, %v1537_v16  ;;  %v1544_v61 = vsel %vm5738_vm4, %v1543_v51, %v5871_v54  ;;  %v1575_v1 = vshll.u32 %v387_v24, 16  ;;  %v1579_v18 = vshrl.u32 %v387_v24, 16 }
  0x73   : > { %v6068_v62 = vcombine.low %v1538_v0, %v1544_v61  ;;  %v1553_v11 = vrot.slane %v1552_v60, 4  ;;  %v1562_v29 = vor.u32 %v1561_v46, %v1557_v52  ;;  %v1568_v10 = vrot.slane %v1566_v6, 4  ;;  %v406_v60 = vld [vmem:[%s5713_s30 + $0x168] sm:$0xf]  ;;  %v407_v61 = vld [vmem:[%s5713_s30 + $0x16c] sm:$0xf] }
  0x74   : > { %v6071_v30 = vcombine.low %v386_v21, %v387_v24  ;;  %v1571_v41 = vrot.slane %v1569_v9, 5  ;;  %v1577_v40 = vrot.slane %v1575_v1, 5  ;;  %v1581_v44 = vrot.slane %v1579_v18, 4 }
  0x75   : > { %7642 = vst [vmem:[#allocation26_spill] sm:$0xff] %v6068_v62  ;;  %5286 = vmatmul.mubr.msk.bf16.gmra.mxu1 %vm919_vm3, %v6041_v12  ;;  %5320 = vmatmul.mubr.msk.bf16.gmra.mxu0 %vm919_vm3, %v6068_v62  ;;  %v1558_v54 = vsel %vm5738_vm4, %v1553_v11, %v1557_v52  ;;  %v1563_v16 = vrot.slane %v1562_v29, 4  ;;  %v1586_v36 = vshrl.u32 %v396_v19, 16  ;;  %v1589_v49 = vshll.u32 %v396_v19, 16  ;;  %v6324_v62 = vld [vmem:[%s5713_s30 + $0xb8] sm:$0xf] }
  0x76   : > { %7643 = vst [vmem:[#allocation27_spill] sm:$0xff] %v6071_v30  ;;  %5289 = vmatprep.mubr.msk.bf16.mxu1 %vm919_vm3, %v6055_v37  ;;  %v1572_v21 = vor.u32 %v1571_v41, %v1568_v10  ;;  %v1582_v24 = vor.u32 %v1581_v44, %v1577_v40  ;;  %v1595_v51 = vshll.u32 %v397_v5, 16  ;;  %v1599_v46 = vshrl.u32 %v397_v5, 16 }
  0x77   : > { %v1564_v6 = vsel %vm5738_vm4, %v1563_v16, %v5901_v53  ;;  %v6085_v9 = vcombine.low %v396_v19, %v397_v5  ;;  %v1588_v0 = vrot.slane %v1586_v36, 4  ;;  %v1591_v52 = vrot.slane %v1589_v49, 5  ;;  %v416_v16 = vld [vmem:[%s5713_s30 + $0x190] sm:$0xf] }
  0x78   : > { %v6088_v1 = vcombine.low %v1558_v54, %v1564_v6  ;;  %v1573_v18 = vrot.slane %v1572_v21, 4  ;;  %v1583_v11 = vrot.slane %v1582_v24, 4  ;;  %v1597_v29 = vrot.slane %v1595_v51, 5  ;;  %v417_v51 = vld [vmem:[%s5713_s30 + $0x194] sm:$0xf] }
  0x79   : > { %7644 = vst [vmem:[#allocation28_spill] sm:$0xff] %v6085_v9  ;;  %v1601_v10 = vrot.slane %v1599_v46, 4  ;;  %v1592_v41 = vor.u32 %v1591_v52, %v1588_v0  ;;  %v1606_v44 = vshrl.u32 %v406_v60, 16  ;;  %v1609_v38 = vshll.u32 %v406_v60, 16 }
  0x7a   : > { %7645 = vst [vmem:[#allocation29_spill] sm:$0xff] %v6088_v1  ;;  %5323 = vmatprep.mubr.msk.bf16.mxu0 %vm919_vm3, %v6088_v1  ;;  %v1578_v53 = vsel %vm5738_vm4, %v1573_v18, %v1577_v40  ;;  %v1584_v19 = vsel %vm5738_vm4, %v1583_v11, %v5930_v57  ;;  %v1615_v5 = vshll.u32 %v407_v61, 16  ;;  %v1619_v54 = vshrl.u32 %v407_v61, 16 }
  0x7b   : > { %v6098_v36 = vcombine.low %v1578_v53, %v1584_v19  ;;  %v1593_v49 = vrot.slane %v1592_v41, 4  ;;  %v1602_v21 = vor.u32 %v1601_v10, %v1597_v29  ;;  %v1608_v24 = vrot.slane %v1606_v44, 4  ;;  %v426_v41 = vld [vmem:[%s5713_s30 + $0x1b8] sm:$0xf] }
  0x7c   : > { %v6101_v46 = vcombine.low %v406_v60, %v407_v61  ;;  %v1611_v6 = vrot.slane %v1609_v38, 5  ;;  %v1617_v0 = vrot.slane %v1615_v5, 5  ;;  %v1621_v52 = vrot.slane %v1619_v54, 4  ;;  %v427_v5 = vld [vmem:[%s5713_s30 + $0x1bc] sm:$0xf] }
  0x7d   : > { %7646 = vst [vmem:[#allocation30_spill] sm:$0xff] %v6098_v36  ;;  %5290 = vmatmul.mubr.msk.bf16.gmra.mxu1 %vm919_vm3, %v6071_v30  ;;  %5324 = vmatmul.mubr.msk.bf16.gmra.mxu0 %vm919_vm3, %v6098_v36  ;;  %v1598_v57 = vsel %vm5738_vm4, %v1593_v49, %v1597_v29  ;;  %v1603_v40 = vrot.slane %v1602_v21, 4  ;;  %v1626_v18 = vshrl.u32 %v416_v16, 16  ;;  %v1629_v11 = vshll.u32 %v416_v16, 16 }
  0x7e   : > { %7647 = vst [vmem:[#allocation31_spill] sm:$0xff] %v6101_v46  ;;  %5293 = vmatprep.mubr.msk.bf16.mxu1 %vm919_vm3, %v6085_v9  ;;  %v1612_v60 = vor.u32 %v1611_v6, %v1608_v24  ;;  %v1622_v38 = vor.u32 %v1621_v52, %v1617_v0  ;;  %v1635_v61 = vshll.u32 %v417_v51, 16  ;;  %v1639_v10 = vshrl.u32 %v417_v51, 16 }
  0x7f   : > { %v1604_v44 = vsel %vm5738_vm4, %v1603_v40, %v5742_v35  ;;  %v6115_v53 = vcombine.low %v416_v16, %v417_v51  ;;  %v1628_v19 = vrot.slane %v1626_v18, 4  ;;  %v1631_v29 = vrot.slane %v1629_v11, 5  ;;  %v436_v40 = vld [vmem:[%s5713_s30 + $0x1e0] sm:$0xf] }
  0x80   : > { %v6118_v54 = vcombine.low %v1598_v57, %v1604_v44  ;;  %v1613_v49 = vrot.slane %v1612_v60, 4  ;;  %v1623_v21 = vrot.slane %v1622_v38, 4  ;;  %v1637_v24 = vrot.slane %v1635_v61, 5  ;;  %v437_v61 = vld [vmem:[%s5713_s30 + $0x1e4] sm:$0xf] }
  0x81   : > { %7648 = vst [vmem:[#allocation32_spill] sm:$0xff] %v6115_v53  ;;  %v1641_v6 = vrot.slane %v1639_v10, 4  ;;  %v1632_v52 = vor.u32 %v1631_v29, %v1628_v19  ;;  %v1646_v28 = vshrl.u32 %v426_v41, 16  ;;  %v1649_v26 = vshll.u32 %v426_v41, 16 }
  0x82   : > { %7649 = vst [vmem:[#allocation33_spill] sm:$0xff] %v6118_v54  ;;  %5327 = vmatprep.mubr.msk.bf16.mxu0 %vm919_vm3, %v6118_v54  ;;  %v1618_v35 = vsel %vm5738_vm4, %v1613_v49, %v1617_v0  ;;  %v1624_v16 = vsel %vm5738_vm4, %v1623_v21, %v5767_v15  ;;  %v1655_v51 = vshll.u32 %v427_v5, 16  ;;  %v1659_v57 = vshrl.u32 %v427_v5, 16  ;;  %v345_v54 = vld [vmem:[%s5713_s30 + $0x74] sm:$0x1] }
  0x83   : > { %v6128_v18 = vcombine.low %v1618_v35, %v1624_v16  ;;  %v1633_v11 = vrot.slane %v1632_v52, 4  ;;  %v1642_v60 = vor.u32 %v1641_v6, %v1637_v24  ;;  %v1648_v38 = vrot.slane %v1646_v28, 4  ;;  %v446_v6 = vld [vmem:[%s5713_s30 + $0x208] sm:$0xf] }
  0x84   : > { %v6131_v10 = vcombine.low %v426_v41, %v427_v5  ;;  %v1651_v44 = vrot.slane %v1649_v26, 5  ;;  %v1657_v19 = vrot.slane %v1655_v51, 5  ;;  %v1661_v29 = vrot.slane %v1659_v57, 4  ;;  %v447_v51 = vld [vmem:[%s5713_s30 + $0x20c] sm:$0xf] }
  0x85   : > { %7650 = vst [vmem:[#allocation34_spill] sm:$0xff] %v6128_v18  ;;  %5294 = vmatmul.mubr.msk.bf16.gmra.mxu1 %vm919_vm3, %v6101_v46  ;;  %5328 = vmatmul.mubr.msk.bf16.gmra.mxu0 %vm919_vm3, %v6128_v18  ;;  %v1638_v15 = vsel %vm5738_vm4, %v1633_v11, %v1637_v24  ;;  %v1643_v0 = vrot.slane %v1642_v60, 4  ;;  %v1666_v49 = vshrl.u32 %v436_v40, 16  ;;  %v1669_v28 = vshll.u32 %v436_v40, 16  ;;  %v393_v46 = vld [vmem:[%s5713_s30 + $0x134] sm:$0xf] }
  0x86   : > { %7651 = vst [vmem:[#allocation35_spill] sm:$0xff] %v6131_v10  ;;  %5297 = vmatprep.mubr.msk.bf16.mxu1 %vm919_vm3, %v6115_v53  ;;  %v1652_v41 = vor.u32 %v1651_v44, %v1648_v38  ;;  %v1662_v26 = vor.u32 %v1661_v29, %v1657_v19  ;;  %v1675_v5 = vshll.u32 %v437_v61, 16  ;;  %v1679_v21 = vshrl.u32 %v437_v61, 16 }
  0x87   : > { %v1644_v52 = vsel %vm5738_vm4, %v1643_v0, %v5794_v56  ;;  %v6145_v35 = vcombine.low %v436_v40, %v437_v61  ;;  %v1668_v16 = vrot.slane %v1666_v49, 4  ;;  %v1671_v24 = vrot.slane %v1669_v28, 5  ;;  %v456_v0 = vld [vmem:[%s5713_s30 + $0x230] sm:$0xf] }
  0x88   : > { %v6148_v57 = vcombine.low %v1638_v15, %v1644_v52  ;;  %v1653_v11 = vrot.slane %v1652_v41, 4  ;;  %v1663_v60 = vrot.slane %v1662_v26, 4  ;;  %v1677_v38 = vrot.slane %v1675_v5, 5  ;;  %v457_v5 = vld [vmem:[%s5713_s30 + $0x234] sm:$0xf] }
  0x89   : > { %7652 = vst [vmem:[#allocation36_spill] sm:$0xff] %v6145_v35  ;;  %v1681_v44 = vrot.slane %v1679_v21, 4  ;;  %v1672_v29 = vor.u32 %v1671_v24, %v1668_v16  ;;  %v1686_v17 = vshrl.u32 %v446_v6, 16  ;;  %v1689_v18 = vshll.u32 %v446_v6, 16 }
  0x8a   : > { %7653 = vst [vmem:[#allocation37_spill] sm:$0xff] %v6148_v57  ;;  %5331 = vmatprep.mubr.msk.bf16.mxu0 %vm919_vm3, %v6148_v57  ;;  %v1658_v56 = vsel %vm5738_vm4, %v1653_v11, %v1657_v19  ;;  %v1664_v40 = vsel %vm5738_vm4, %v1663_v60, %v5829_v39  ;;  %v1695_v61 = vshll.u32 %v447_v51, 16  ;;  %v1699_v15 = vshrl.u32 %v447_v51, 16 }
  0x8b   : > { %v6158_v49 = vcombine.low %v1658_v56, %v1664_v40  ;;  %v1673_v28 = vrot.slane %v1672_v29, 4  ;;  %v1682_v41 = vor.u32 %v1681_v44, %v1677_v38  ;;  %v1688_v26 = vrot.slane %v1686_v17, 4  ;;  %v466_v44 = vld [vmem:[%s5713_s30 + $0x258] sm:$0xf] }
  0x8c   : > { %v6161_v21 = vcombine.low %v446_v6, %v447_v51  ;;  %v1691_v52 = vrot.slane %v1689_v18, 5  ;;  %v1697_v16 = vrot.slane %v1695_v61, 5  ;;  %v1701_v24 = vrot.slane %v1699_v15, 4 }
  0x8d   : > { %7654 = vst [vmem:[#allocation38_spill] sm:$0xff] %v6158_v49  ;;  %5298 = vmatmul.mubr.msk.bf16.gmra.mxu1 %vm919_vm3, %v6131_v10  ;;  %5332 = vmatmul.mubr.msk.bf16.gmra.mxu0 %vm919_vm3, %v6158_v49  ;;  %v1678_v39 = vsel %vm5738_vm4, %v1673_v28, %v1677_v38  ;;  %v1683_v19 = vrot.slane %v1682_v41, 4  ;;  %v1706_v11 = vshrl.u32 %v456_v0, 16  ;;  %v1709_v17 = vshll.u32 %v456_v0, 16  ;;  %v467_v38 = vld [vmem:[%s5713_s30 + $0x25c] sm:$0xf] }
  0x8e   : > { %7655 = vst [vmem:[#allocation39_spill] sm:$0xff] %v6161_v21  ;;  %5301 = vmatprep.mubr.msk.bf16.mxu1 %vm919_vm3, %v6145_v35  ;;  %v1692_v6 = vor.u32 %v1691_v52, %v1688_v26  ;;  %v1702_v18 = vor.u32 %v1701_v24, %v1697_v16  ;;  %v1715_v51 = vshll.u32 %v457_v5, 16  ;;  %v1719_v60 = vshrl.u32 %v457_v5, 16 }
  0x8f   : > { %v1684_v29 = vsel %vm5738_vm4, %v1683_v19, %v5860_v31  ;;  %v6175_v56 = vcombine.low %v456_v0, %v457_v5  ;;  %v1708_v40 = vrot.slane %v1706_v11, 4  ;;  %v1711_v61 = vrot.slane %v1709_v17, 5 }
  0x90   : > { %v6178_v15 = vcombine.low %v1678_v39, %v1684_v29  ;;  %v1693_v28 = vrot.slane %v1692_v6, 4  ;;  %v1703_v41 = vrot.slane %v1702_v18, 4  ;;  %v1717_v49 = vrot.slane %v1715_v51, 5  ;;  %v323_v29 = vld [vmem:[%s5713_s30 + $0x1c] sm:$0xf] }
  0x91   : > { %7656 = vst [vmem:[#allocation40_spill] sm:$0xff] %v6175_v56  ;;  %v1721_v57 = vrot.slane %v1719_v60, 4  ;;  %v1712_v26 = vor.u32 %v1711_v61, %v1708_v40  ;;  %v1726_v52 = vshrl.u32 %v466_v44, 16  ;;  %v1729_v24 = vshll.u32 %v466_v44, 16  ;;  %v6199_v61 = vld [vmem:[%s5713_s30 + $0x14] sm:$0xf] }
  0x92   : > { %7657 = vst [vmem:[#allocation41_spill] sm:$0xff] %v6178_v15  ;;  %5335 = vmatprep.mubr.msk.bf16.mxu0 %vm919_vm3, %v6178_v15  ;;  %v1698_v31 = vsel %vm5738_vm4, %v1693_v28, %v1697_v16  ;;  %v1704_v0 = vsel %vm5738_vm4, %v1703_v41, %v5888_v25  ;;  %v1735_v5 = vshll.u32 %v467_v38, 16  ;;  %v1739_v39 = vshrl.u32 %v467_v38, 16  ;;  %v6202_v28 = vld [vmem:[%s5713_s30 + $0x18] sm:$0xf] }
  0x93   : > { %v6187_v19 = vcombine.low %v1698_v31, %v1704_v0  ;;  %v1713_v11 = vrot.slane %v1712_v26, 4  ;;  %v1722_v17 = vor.u32 %v1721_v57, %v1717_v49  ;;  %v1728_v6 = vrot.slane %v1726_v52, 4  ;;  %v324_v41 = vld [vmem:[%s5713_s30 + $0x20] sm:$0xf]  ;;  %v325_v52 = vld [vmem:[%s5713_s30 + $0x24] sm:$0x1] }
  0x94   : > { %v1731_v18 = vrot.slane %v1729_v24, 5  ;;  %v1737_v51 = vrot.slane %v1735_v5, 5  ;;  %v1741_v60 = vrot.slane %v1739_v39, 4  ;;  %v2366_v24 = vshrl.u32 %v323_v29, 16  ;;  %v343_v15 = vld [vmem:[%s5713_s30 + $0x6c] sm:$0xf] }
  0x95   : > { %7658 = vst [vmem:[#allocation42_spill] sm:$0xff] %v6187_v19  ;;  %5302 = vmatmul.mubr.msk.bf16.gmra.mxu1 %vm919_vm3, %v6161_v21  ;;  %5336 = vmatmul.mubr.msk.bf16.gmra.mxu0 %vm919_vm3, %v6187_v19  ;;  %v1718_v25 = vsel %vm5738_vm4, %v1713_v11, %v1717_v49  ;;  %v1723_v16 = vrot.slane %v1722_v17, 4  ;;  %v6211_v49 = vcombine.low %v466_v44, %v467_v38  ;;  %v2369_v17 = vshll.u32 %v323_v29, 16 }
  0x96   : > { %5305 = vmatprep.mubr.msk.bf16.mxu1 %vm919_vm3, %v6175_v56  ;;  %v1732_v57 = vor.u32 %v1731_v18, %v1728_v6  ;;  %v1742_v40 = vor.u32 %v1741_v60, %v1737_v51  ;;  %v4771_v39 = vcombine.low %v6199_v61, %v6202_v28  ;;  %v2368_v11 = vrot.slane %v2366_v24, 4  ;;  %v333_v60 = vld [vmem:[%s5713_s30 + $0x44] sm:$0xf]  ;;  %v6238_v24 = vld [vmem:[%s5713_s30 + $0x40] sm:$0xf] }
  0x97   : > { %v1724_v26 = vsel %vm5738_vm4, %v1723_v16, %v5913_v22  ;;  %7660 = vst [vmem:[#allocation44_spill] sm:$0xff] %v6211_v49  ;;  %v2375_v6 = vshll.u32 %v324_v41, 16  ;;  %v2379_v38 = vshrl.u32 %v324_v41, 16  ;;  %v2385_v18 = vshll.u32 %v325_v52, 16 }
  0x98   : > { %v6209_v31 = vcombine.low %v1718_v25, %v1724_v26  ;;  %v1733_v0 = vrot.slane %v1732_v57, 4  ;;  %v1743_v5 = vrot.slane %v1742_v40, 4  ;;  %v6225_v29 = vrot.slane %v2369_v17, 5  ;;  %v334_v40 = vld [vmem:[%s5713_s30 + $0x48] sm:$0xf] }
  0x99   : > { %v2377_v16 = vrot.slane %v2375_v6, 5  ;;  %v2381_v57 = vrot.slane %v2379_v38, 4  ;;  %v2390_v41 = vshrl.u32 %v333_v60, 16  ;;  %v2387_v52 = vrot.slane %v2385_v18, 5 }
  0x9a   : > { %7659 = vst [vmem:[#allocation43_spill] sm:$0xff] %v6209_v31  ;;  %5339 = vmatprep.mubr.msk.bf16.mxu0 %vm919_vm3, %v6209_v31  ;;  %v1738_v22 = vsel %vm5738_vm4, %v1733_v0, %v1737_v51  ;;  %v1744_v44 = vsel %vm5738_vm4, %v1743_v5, %v5940_v20  ;;  %v2372_v20 = vor.u32 %v6225_v29, %v2368_v11  ;;  %v6233_v51 = vld [vmem:[%s5713_s30 + $0x3c] sm:$0xf]  ;;  %v335_v0 = vld [vmem:[%s5713_s30 + $0x4c] sm:$0x1]  ;;  %v2393_v5 = vshll.u32 %v333_v60, 16 }
  0x9b   : > { %v6223_v25 = vcombine.low %v1738_v22, %v1744_v44  ;;  %v2382_v26 = vor.u32 %v2381_v57, %v2377_v16  ;;  %v3044_v17 = vshrl.u32 %v6199_v61, 16  ;;  %v3047_v6 = vshll.u32 %v6199_v61, 16  ;;  %v6244_v44 = vld [vmem:[%s5713_s30 + $0x64] sm:$0xf]  ;;  %v6249_v57 = vld [vmem:[%s5713_s30 + $0x68] sm:$0xf] }
  0x9c   : > { %v2373_v22 = vrot.slane %v2372_v20, 4  ;;  %v2392_v11 = vrot.slane %v2390_v41, 4  ;;  %v2403_v18 = vshrl.u32 %v334_v40, 16  ;;  %v3053_v60 = vshll.u32 %v6202_v28, 16 }
  0x9d   : > { %7661 = vst [vmem:[#allocation45_spill] sm:$0xff] %v6223_v25  ;;  %5306 = vmatmul.mubr.msk.bf16.gmra.mxu1 %vm919_vm3, %v6211_v49  ;;  %5340 = vmatmul.mubr.msk.bf16.gmra.mxu0 %vm919_vm3, %v6223_v25  ;;  %v2383_v38 = vrot.slane %v2382_v26, 4  ;;  %v6246_v25 = vrot.slane %v2393_v5, 5  ;;  %v4772_v61 = vcombine.low %v6233_v51, %v6238_v24  ;;  %v2409_v20 = vshll.u32 %v335_v0, 16 }
  0x9e   : > { %5345 = vmatprep.mubr.msk.bf16.mxu1 %vm919_vm3, %v4771_v39  ;;  %v2399_v39 = vshll.u32 %v334_v40, 16  ;;  %v2378_v31 = vsel %vm5738_vm4, %v2373_v22, %v2377_v16  ;;  %v2405_v19 = vrot.slane %v2403_v18, 4  ;;  %v3462_v27 = vsel %vm968_vm0, %v6000_v47, 0  ;;  %v344_v22 = vld [vmem:[%s5713_s30 + $0x70] sm:$0xf] }
  0x9f   : > { %v2388_v41 = vsel %vm5738_vm4, %v2383_v38, %v2387_v52  ;;  %v2396_v26 = vor.u32 %v6246_v25, %v2392_v11  ;;  %v4773_v16 = vcombine.low %v6244_v44, %v6249_v57  ;;  %v3057_v0 = vshrl.u32 %v6202_v28, 16  ;;  %v6270_v11 = vld [vmem:[%s7548_s2 + $0xe] sm:$0x3] }
  0xa0   : > { %v2401_v5 = vrot.slane %v2399_v39, 5  ;;  %v4804_v40 = vcombine.low %v2378_v31, %v2388_v41  ;;  %v2411_v52 = vrot.slane %v2409_v20, 5  ;;  %v6272_v31 = vrot.slane %v3044_v17, 4  ;;  %v6279_v28 = vld [vmem:[%s5713_s30 + $0x8c] sm:$0xf] }
  0xa1   : > { %v2397_v42 = vrot.slane %v2396_v26, 4  ;;  %v6274_v38 = vrot.slane %v3047_v6, 5  ;;  %v2414_v47 = vshrl.u32 %v343_v15, 16  ;;  %v2417_v39 = vshll.u32 %v343_v15, 16  ;;  %v6288_v6 = vld [vmem:[%s5713_s30 + $0x90] sm:$0xf] }
  0xa2   : > { %v2406_v36 = vor.u32 %v2405_v19, %v2401_v5  ;;  %5379 = vmatprep.mubr.msk.bf16.mxu0 %vm919_vm3, %v4804_v40  ;;  %v6281_v19 = vrot.slane %v3053_v60, 5  ;;  %v3064_v18 = vshrl.u32 %v6233_v51, 16  ;;  %v3067_v15 = vshll.u32 %v6233_v51, 16 }
  0xa3   : > { %v2402_v20 = vsel %vm5738_vm4, %v2397_v42, %v2401_v5  ;;  %v6291_v41 = vrot.slane %v2417_v39, 5  ;;  %v2423_v60 = vshll.u32 %v344_v22, 16  ;;  %v2433_v26 = vshll.u32 %v345_v54, 16  ;;  %v353_v5 = vld [vmem:[%s5713_s30 + $0x94] sm:$0xf] }
  0xa4   : > { %v2407_v17 = vrot.slane %v2406_v36, 4  ;;  %v2427_v36 = vshrl.u32 %v344_v22, 16  ;;  %v354_v39 = vld [vmem:[%s5713_s30 + $0x98] sm:$0xf]  ;;  %v6305_v1 = vrot.slane %v3057_v0, 4  ;;  %v2438_v0 = vshrl.u32 %v353_v5, 16 }
  0xa5   : > { %5346 = vmatmul.mubr.msk.bf16.vlgmr.msra.gmra.mxu1 %vm919_vm3, %v4772_v61  ;;  %v2416_v61 = vrot.slane %v2414_v47, 4  ;;  %v4774_v47 = vcombine.low %v6279_v28, %v6288_v6  ;;  %v6312_v54 = vld [vmem:[%s7548_s2 + $0x10] sm:$0x3]  ;;  %v2441_v13 = vshll.u32 %v353_v5, 16  ;;  %v2457_v5 = vshll.u32 %v355_v63, 16 }
  0xa6   : > { %5412 = vmatpush3.bf16.msra.mxu1 %v3462_v27  ;;  %5349 = vmatprep.mubr.msk.bf16.mxu1 %vm919_vm3, %v4773_v16  ;;  %v2412_v42 = vsel %vm5738_vm4, %v2407_v17, %v2411_v52  ;;  %v3668_v27 = vsel %vm968_vm0, %v6011_v3, 0  ;;  %v2425_v16 = vrot.slane %v2423_v60, 5  ;;  %v3073_v52 = vshll.u32 %v6238_v24, 16  ;;  %v6320_v60 = vld [vmem:[%s5713_s30 + $0xb4] sm:$0xf] }
  0xa7   : > { %5557 = vmatprep.subr.msk.bf16.mxu1 %vm968_vm0, %v6270_v11  ;;  %v4805_v40 = vcombine.low %v2402_v20, %v2412_v42  ;;  %v2420_v51 = vor.u32 %v6291_v41, %v2416_v61  ;;  %v3077_v3 = vshrl.u32 %v6238_v24, 16  ;;  %v2429_v22 = vrot.slane %v2427_v36, 4  ;;  %v364_v63 = vld [vmem:[%s5713_s30 + $0xc0] sm:$0xf] }
  0xa8   : > { %v6314_v20 = vrot.slane %v3064_v18, 4  ;;  %v6316_v17 = vrot.slane %v3067_v15, 5  ;;  %v3084_v42 = vshrl.u32 %v6244_v44, 16  ;;  %v2435_v36 = vrot.slane %v2433_v26, 5 }
  0xa9   : > { %5380 = vmatmul.mubr.msk.bf16.vlgmr.msra.gmra.mxu0 %vm919_vm3, %v4805_v40  ;;  %v2421_v61 = vrot.slane %v2420_v51, 4  ;;  %v2430_v24 = vor.u32 %v2429_v22, %v2425_v16  ;;  %v3087_v18 = vshll.u32 %v6244_v44, 16  ;;  %v2440_v40 = vrot.slane %v2438_v0, 4 }
  0xaa   : > { %5446 = vmatpush3.bf16.msra.mxu0 %v3668_v27  ;;  %v2447_v51 = vshll.u32 %v354_v39, 16  ;;  %v6332_v22 = vrot.slane %v2441_v13, 5  ;;  %v2451_v26 = vshrl.u32 %v354_v39, 16  ;;  %v6334_v2 = vrot.slane %v3073_v52, 5 }
  0xab   : > { %v2426_v15 = vsel %vm5738_vm4, %v2421_v61, %v2425_v16  ;;  %5558 = vmatprep.subr.msk.bf16.mxu0 %vm968_vm0, %v6312_v54  ;;  %v2431_v27 = vrot.slane %v2430_v24, 4  ;;  %v6336_v44 = vrot.slane %v3077_v3, 4  ;;  %v4775_v16 = vcombine.low %v6320_v60, %v6324_v62 }
  0xac   : > { %v2449_v4 = vrot.slane %v2447_v51, 5  ;;  %v3093_v61 = vshll.u32 %v6249_v57, 16  ;;  %v2444_v13 = vor.u32 %v6332_v22, %v2440_v40  ;;  %v2453_v39 = vrot.slane %v2451_v26, 4  ;;  %v6359_v26 = vld [vmem:[%s5713_s30 + $0xe0] sm:$0xf] }
  0xad   : > { %5350 = vmatmul.mubr.msk.bf16.gmra.mxu1 %vm919_vm3, %v4774_v47  ;;  %v363_v47 = vld [vmem:[%s5713_s30 + $0xbc] sm:$0xf]  ;;  %v2436_v0 = vsel %vm5738_vm4, %v2431_v27, %v2435_v36  ;;  %v6346_v24 = vrot.slane %v3084_v42, 4  ;;  %v6348_v52 = vrot.slane %v3087_v18, 5  ;;  %v3097_v3 = vshrl.u32 %v6249_v57, 16 }
  0xae   : > { %v4806_v51 = vcombine.low %v2426_v15, %v2436_v0  ;;  %5353 = vmatprep.mubr.msk.bf16.mxu1 %vm919_vm3, %v4775_v16  ;;  %v2445_v43 = vrot.slane %v2444_v13, 4  ;;  %v2454_v50 = vor.u32 %v2453_v39, %v2449_v4  ;;  %v2459_v7 = vrot.slane %v2457_v5, 5  ;;  %v6354_v36 = vld [vmem:[%s5713_s30 + $0xdc] sm:$0xf] }
  0xaf   : > { %v2462_v58 = vshrl.u32 %v363_v47, 16  ;;  %v3104_v42 = vshrl.u32 %v6279_v28, 16  ;;  %v2465_v40 = vshll.u32 %v363_v47, 16  ;;  %v2471_v18 = vshll.u32 %v364_v63, 16 }
  0xb0   : > { %5383 = vmatprep.mubr.msk.bf16.mxu0 %vm919_vm3, %v4806_v51  ;;  %v2475_v27 = vshrl.u32 %v364_v63, 16  ;;  %v3107_v57 = vshll.u32 %v6279_v28, 16  ;;  %v2450_v15 = vsel %vm5738_vm4, %v2445_v43, %v2449_v4  ;;  %v2455_v5 = vrot.slane %v2454_v50, 4  ;;  %v373_v43 = vld [vmem:[%s5713_s30 + $0xe4] sm:$0xf] }
  0xb1   : > { %v2464_v16 = vrot.slane %v2462_v58, 4  ;;  %v6364_v0 = vrot.slane %v2465_v40, 5  ;;  %v2473_v13 = vrot.slane %v2471_v18, 5  ;;  %v2481_v51 = vshll.u32 %v365_v48, 16  ;;  %v374_v18 = vld [vmem:[%s5713_s30 + $0xe8] sm:$0xf] }
  0xb2   : > { %v2477_v39 = vrot.slane %v2475_v27, 4  ;;  %v6366_v47 = vrot.slane %v3093_v61, 5  ;;  %v3113_v63 = vshll.u32 %v6288_v6, 16  ;;  %v2460_v45 = vsel %vm5738_vm4, %v2455_v5, %v2459_v7  ;;  %v375_v5 = vld [vmem:[%s5713_s30 + $0xec] sm:$0x1] }
  0xb3   : > { %7662 = vst [vmem:[#allocation46_spill] sm:$0xff] %v6364_v0  ;;  %v4776_v28 = vcombine.low %v6354_v36, %v6359_v26  ;;  %v4807_v4 = vcombine.low %v2450_v15, %v2460_v45  ;;  %v2468_v58 = vor.u32 %v6364_v0, %v2464_v16  ;;  %v2483_v40 = vrot.slane %v2481_v51, 5  ;;  %v6387_v51 = vld [vmem:[%s5713_s30 + $0x104] sm:$0xf] }
  0xb4   : > { %v2478_v50 = vor.u32 %v2477_v39, %v2473_v13  ;;  %v6376_v48 = vrot.slane %v3097_v3, 4  ;;  %v6378_v61 = vrot.slane %v3104_v42, 4  ;;  %v6380_v27 = vrot.slane %v3107_v57, 5 }
  0xb5   : > { %v3117_v7 = vshrl.u32 %v6288_v6, 16  ;;  %5354 = vmatmul.mubr.msk.bf16.gmra.mxu1 %vm919_vm3, %v4776_v28  ;;  %5384 = vmatmul.mubr.msk.bf16.gmra.mxu0 %vm919_vm3, %v4807_v4  ;;  %v2469_v45 = vrot.slane %v2468_v58, 4  ;;  %v2486_v16 = vshrl.u32 %v373_v43, 16  ;;  %v2489_v39 = vshll.u32 %v373_v43, 16  ;;  %v6393_v6 = vld [vmem:[%s5713_s30 + $0x108] sm:$0xf] }
  0xb6   : > { %v2479_v15 = vrot.slane %v2478_v50, 4  ;;  %v6389_v3 = vrot.slane %v3113_v63, 5  ;;  %v3124_v42 = vshrl.u32 %v6320_v60, 16  ;;  %v2495_v57 = vshll.u32 %v374_v18, 16 }
  0xb7   : > { %v2499_v8 = vshrl.u32 %v374_v18, 16  ;;  %v2474_v28 = vsel %vm5738_vm4, %v2469_v45, %v2473_v13  ;;  %v2488_v58 = vrot.slane %v2486_v16, 4  ;;  %v6399_v43 = vrot.slane %v2489_v39, 5  ;;  %v385_v45 = vld [vmem:[%s5713_s30 + $0x114] sm:$0x1] }
  0xb8   : > { %v2484_v4 = vsel %vm5738_vm4, %v2479_v15, %v2483_v40  ;;  %v2497_v63 = vrot.slane %v2495_v57, 5  ;;  %v2505_v49 = vshll.u32 %v375_v5, 16  ;;  %v6402_v56 = vrot.slane %v3117_v7, 4  ;;  %v384_v40 = vld [vmem:[%s5713_s30 + $0x110] sm:$0xf] }
  0xb9   : > { %7663 = vst [vmem:[#allocation47_spill] sm:$0xff] %v6399_v43  ;;  %v4808_v50 = vcombine.low %v2474_v28, %v2484_v4  ;;  %v2501_v14 = vrot.slane %v2499_v8, 4  ;;  %v3127_v18 = vshll.u32 %v6320_v60, 16  ;;  %v2492_v21 = vor.u32 %v6399_v43, %v2488_v58  ;;  %v6415_v7 = vld [vmem:[%s5713_s30 + $0x12c] sm:$0xf] }
  0xba   : > { %v4777_v13 = vcombine.low %v6387_v51, %v6393_v6  ;;  %v6410_v15 = vrot.slane %v3124_v42, 4  ;;  %v3133_v16 = vshll.u32 %v6324_v62, 16  ;;  %v2507_v5 = vrot.slane %v2505_v49, 5  ;;  %v6421_v4 = vld [vmem:[%s5713_s30 + $0x130] sm:$0xf] }
  0xbb   : > { %5387 = vmatprep.mubr.msk.bf16.mxu0 %vm919_vm3, %v4808_v50  ;;  %v2502_v8 = vor.u32 %v2501_v14, %v2497_v63  ;;  %v3137_v60 = vshrl.u32 %v6324_v62, 16  ;;  %v3144_v39 = vshrl.u32 %v6354_v36, 16  ;;  %v2493_v57 = vrot.slane %v2492_v21, 4 }
  0xbc   : > { %5357 = vmatprep.mubr.msk.bf16.mxu1 %vm919_vm3, %v4777_v13  ;;  %v2510_v28 = vshrl.u32 %v383_v33, 16  ;;  %v3147_v42 = vshll.u32 %v6354_v36, 16  ;;  %v3153_v58 = vshll.u32 %v6359_v26, 16  ;;  %v2513_v49 = vshll.u32 %v383_v33, 16 }
  0xbd   : > { %v2503_v14 = vrot.slane %v2502_v8, 4  ;;  %v2498_v50 = vsel %vm5738_vm4, %v2493_v57, %v2497_v63  ;;  %v2519_v35 = vshll.u32 %v384_v40, 16  ;;  %v2523_v10 = vshrl.u32 %v384_v40, 16  ;;  %v394_v57 = vld [vmem:[%s5713_s30 + $0x138] sm:$0xf] }
  0xbe   : > { %v2512_v62 = vrot.slane %v2510_v28, 4  ;;  %v6429_v13 = vrot.slane %v2513_v49, 5  ;;  %v2529_v53 = vshll.u32 %v385_v45, 16  ;;  %v4778_v36 = vcombine.low %v6415_v7, %v6421_v4 }
  0xbf   : > { %v2508_v21 = vsel %vm5738_vm4, %v2503_v14, %v2507_v5  ;;  %v6434_v9 = vrot.slane %v3127_v18, 5  ;;  %v2521_v8 = vrot.slane %v2519_v35, 5  ;;  %v2525_v63 = vrot.slane %v2523_v10, 4  ;;  %v395_v14 = vld [vmem:[%s5713_s30 + $0x13c] sm:$0x1] }
  0xc0   : > { %7664 = vst [vmem:[#allocation48_spill] sm:$0xff] %v6429_v13  ;;  %v4809_v33 = vcombine.low %v2498_v50, %v2508_v21  ;;  %v6437_v28 = vrot.slane %v3133_v16, 5  ;;  %v6439_v40 = vrot.slane %v3137_v60, 4  ;;  %v6441_v5 = vrot.slane %v3144_v39, 4  ;;  %5358 = vmatmul.mubr.msk.bf16.gmra.mxu1 %vm919_vm3, %v4778_v36  ;;  %v6450_v50 = vld [vmem:[%s5713_s30 + $0x154] sm:$0xf] }
  0xc1   : > { %v2516_v45 = vor.u32 %v6429_v13, %v2512_v62  ;;  %v6446_v49 = vrot.slane %v3147_v42, 5  ;;  %v2526_v18 = vor.u32 %v2525_v63, %v2521_v8  ;;  %v2531_v35 = vrot.slane %v2529_v53, 5  ;;  %v6456_v62 = vld [vmem:[%s5713_s30 + $0x158] sm:$0xf] }
  0xc2   : > { %5388 = vmatmul.mubr.msk.bf16.gmra.mxu0 %vm919_vm3, %v4809_v33  ;;  %v2534_v10 = vshrl.u32 %v393_v46, 16  ;;  %v6452_v16 = vrot.slane %v3153_v58, 5  ;;  %v3157_v60 = vshrl.u32 %v6359_v26, 16  ;;  %v2537_v21 = vshll.u32 %v393_v46, 16 }
  0xc3   : > { %v2517_v39 = vrot.slane %v2516_v45, 4  ;;  %v3164_v36 = vshrl.u32 %v6387_v51, 16  ;;  %v2527_v42 = vrot.slane %v2526_v18, 4  ;;  %v2543_v33 = vshll.u32 %v394_v57, 16 }
  0xc4   : > { %v2536_v30 = vrot.slane %v2534_v10, 4  ;;  %v6461_v63 = vrot.slane %v2537_v21, 5  ;;  %v2547_v58 = vshrl.u32 %v394_v57, 16  ;;  %v2553_v37 = vshll.u32 %v395_v14, 16  ;;  %v403_v10 = vld [vmem:[%s5713_s30 + $0x15c] sm:$0xf] }
  0xc5   : > { %v2522_v53 = vsel %vm5738_vm4, %v2517_v39, %v2521_v8  ;;  %v3167_v26 = vshll.u32 %v6387_v51, 16  ;;  %v2532_v46 = vsel %vm5738_vm4, %v2527_v42, %v2531_v35  ;;  %v2545_v45 = vrot.slane %v2543_v33, 5  ;;  %v404_v57 = vld [vmem:[%s5713_s30 + $0x160] sm:$0xf]  ;;  %v405_v14 = vld [vmem:[%s5713_s30 + $0x164] sm:$0x1] }
  0xc6   : > { %7665 = vst [vmem:[#allocation49_spill] sm:$0xff] %v6461_v63  ;;  %v4779_v18 = vcombine.low %v6450_v50, %v6456_v62  ;;  %v6469_v12 = vrot.slane %v3157_v60, 4  ;;  %v4810_v23 = vcombine.low %v2522_v53, %v2532_v46  ;;  %v2540_v8 = vor.u32 %v6461_v63, %v2536_v30  ;;  %v6480_v33 = vld [vmem:[%s5713_s30 + $0x17c] sm:$0xf] }
  0xc7   : > { %v2549_v39 = vrot.slane %v2547_v58, 4  ;;  %v6474_v21 = vrot.slane %v3164_v36, 4  ;;  %v3173_v51 = vshll.u32 %v6393_v6, 16  ;;  %v3177_v35 = vshrl.u32 %v6393_v6, 16  ;;  %v6484_v58 = vld [vmem:[%s5713_s30 + $0x180] sm:$0xf] }
  0xc8   : > { %v2555_v42 = vrot.slane %v2553_v37, 5  ;;  %5361 = vmatprep.mubr.msk.bf16.mxu1 %vm919_vm3, %v4779_v18  ;;  %5391 = vmatprep.mubr.msk.bf16.mxu0 %vm919_vm3, %v4810_v23  ;;  %v2541_v60 = vrot.slane %v2540_v8, 4  ;;  %v2558_v46 = vshrl.u32 %v403_v10, 16  ;;  %v2561_v30 = vshll.u32 %v403_v10, 16 }
  0xc9   : > { %v2550_v53 = vor.u32 %v2549_v39, %v2545_v45  ;;  %v6486_v55 = vrot.slane %v3167_v26, 5  ;;  %v3184_v36 = vshrl.u32 %v6415_v7, 16  ;;  %v3187_v37 = vshll.u32 %v6415_v7, 16 }
  0xca   : > { %v2567_v6 = vshll.u32 %v404_v57, 16  ;;  %v2546_v18 = vsel %vm5738_vm4, %v2541_v60, %v2545_v45  ;;  %v2560_v23 = vrot.slane %v2558_v46, 4  ;;  %v6492_v8 = vrot.slane %v2561_v30, 5  ;;  %v413_v60 = vld [vmem:[%s5713_s30 + $0x184] sm:$0xf] }
  0xcb   : > { %v2551_v63 = vrot.slane %v2550_v53, 4  ;;  %v2571_v39 = vshrl.u32 %v404_v57, 16  ;;  %v2577_v59 = vshll.u32 %v405_v14, 16  ;;  %v4780_v26 = vcombine.low %v6480_v33, %v6484_v58  ;;  %v414_v53 = vld [vmem:[%s5713_s30 + $0x188] sm:$0xf] }
  0xcc   : > { %7666 = vst [vmem:[#allocation50_spill] sm:$0xff] %v6492_v8  ;;  %v2569_v10 = vrot.slane %v2567_v6, 5  ;;  %v6496_v13 = vrot.slane %v3173_v51, 5  ;;  %v6498_v43 = vrot.slane %v3177_v35, 4  ;;  %v2564_v45 = vor.u32 %v6492_v8, %v2560_v23  ;;  %v415_v51 = vld [vmem:[%s5713_s30 + $0x18c] sm:$0x1] }
  0xcd   : > { %v2556_v7 = vsel %vm5738_vm4, %v2551_v63, %v2555_v42  ;;  %v6505_v46 = vrot.slane %v3184_v36, 4  ;;  %v3193_v57 = vshll.u32 %v6421_v4, 16  ;;  %v2573_v30 = vrot.slane %v2571_v39, 4  ;;  %5362 = vmatmul.mubr.msk.bf16.gmra.mxu1 %vm919_vm3, %v4780_v26  ;;  %v6515_v23 = vld [vmem:[%s5713_s30 + $0x1a4] sm:$0xf] }
  0xce   : > { %7667 = vst [vmem:[#allocation51_spill] sm:$0xff] %v6496_v13  ;;  %7668 = vst [vmem:[#allocation52_spill] sm:$0xff] %v6498_v43  ;;  %v4811_v14 = vcombine.low %v2546_v18, %v2556_v7  ;;  %v6510_v6 = vrot.slane %v3187_v37, 5  ;;  %v3197_v35 = vshrl.u32 %v6421_v4, 16  ;;  %v3204_v63 = vshrl.u32 %v6450_v50, 16 }
  0xcf   : > { %7669 = vst [vmem:[#allocation53_spill] sm:$0xff] %v6505_v46  ;;  %v2565_v42 = vrot.slane %v2564_v45, 4  ;;  %v2574_v36 = vor.u32 %v2573_v30, %v2569_v10  ;;  %v2579_v8 = vrot.slane %v2577_v59, 5  ;;  %v2582_v46 = vshrl.u32 %v413_v60, 16  ;;  %v6519_v39 = vld [vmem:[%s5713_s30 + $0x1a8] sm:$0xf] }
  0xd0   : > { %7670 = vst [vmem:[#allocation54_spill] sm:$0xff] %v6510_v6  ;;  %5392 = vmatmul.mubr.msk.bf16.gmra.mxu0 %vm919_vm3, %v4811_v14  ;;  %v2585_v18 = vshll.u32 %v413_v60, 16  ;;  %v3207_v26 = vshll.u32 %v6450_v50, 16  ;;  %v2591_v4 = vshll.u32 %v414_v53, 16  ;;  %v2595_v7 = vshrl.u32 %v414_v53, 16 }
  0xd1   : > { %v2570_v37 = vsel %vm5738_vm4, %v2565_v42, %v2569_v10  ;;  %v2575_v45 = vrot.slane %v2574_v36, 4  ;;  %v2584_v6 = vrot.slane %v2582_v46, 4  ;;  %v2601_v14 = vshll.u32 %v415_v51, 16  ;;  %v423_v50 = vld [vmem:[%s5713_s30 + $0x1ac] sm:$0xf] }
  0xd2   : > { %v6524_v43 = vrot.slane %v2585_v18, 5  ;;  %v6526_v59 = vrot.slane %v3193_v57, 5  ;;  %v2593_v30 = vrot.slane %v2591_v4, 5  ;;  %v2597_v60 = vrot.slane %v2595_v7, 4  ;;  %v424_v51 = vld [vmem:[%s5713_s30 + $0x1b0] sm:$0xf] }
  0xd3   : > { %v4781_v13 = vcombine.low %v6515_v23, %v6519_v39  ;;  %v6531_v0 = vrot.slane %v3197_v35, 4  ;;  %v6533_v10 = vrot.slane %v3204_v63, 4  ;;  %v2580_v53 = vsel %vm5738_vm4, %v2575_v45, %v2579_v8  ;;  %v425_v4 = vld [vmem:[%s5713_s30 + $0x1b4] sm:$0x1]  ;;  %v6546_v8 = vld [vmem:[%s5713_s30 + $0x1cc] sm:$0xf] }
  0xd4   : > { %7671 = vst [vmem:[#allocation55_spill] sm:$0xff] %v6524_v43  ;;  %7672 = vst [vmem:[#allocation56_spill] sm:$0xff] %v6526_v59  ;;  %v2588_v46 = vor.u32 %v6524_v43, %v2584_v6  ;;  %v3213_v57 = vshll.u32 %v6456_v62, 16  ;;  %v4812_v42 = vcombine.low %v2570_v37, %v2580_v53  ;;  %v2598_v36 = vor.u32 %v2597_v60, %v2593_v30  ;;  %v6551_v60 = vld [vmem:[%s5713_s30 + $0x1d0] sm:$0xf] }
  0xd5   : > { %7673 = vst [vmem:[#allocation57_spill] sm:$0xff] %v6531_v0  ;;  %7674 = vst [vmem:[#allocation58_spill] sm:$0xff] %v6533_v10  ;;  %v2603_v18 = vrot.slane %v2601_v14, 5  ;;  %5365 = vmatprep.mubr.msk.bf16.mxu1 %vm919_vm3, %v4781_v13  ;;  %v6542_v7 = vrot.slane %v3207_v26, 5  ;;  %v3217_v35 = vshrl.u32 %v6456_v62, 16  ;;  %v2606_v10 = vshrl.u32 %v423_v50, 16 }
  0xd6   : > { %v2589_v63 = vrot.slane %v2588_v46, 4  ;;  %5395 = vmatprep.mubr.msk.bf16.mxu0 %vm919_vm3, %v4812_v42  ;;  %v3224_v6 = vshrl.u32 %v6480_v33, 16  ;;  %v2599_v45 = vrot.slane %v2598_v36, 4  ;;  %v2609_v37 = vshll.u32 %v423_v50, 16  ;;  %v433_v50 = vld [vmem:[%s5713_s30 + $0x1d4] sm:$0xf] }
  0xd7   : > { %7675 = vst [vmem:[#allocation59_spill] sm:$0xff] %v6542_v7  ;;  %v2615_v14 = vshll.u32 %v424_v51, 16  ;;  %v3227_v13 = vshll.u32 %v6480_v33, 16  ;;  %v2608_v26 = vrot.slane %v2606_v10, 4  ;;  %v2619_v53 = vshrl.u32 %v424_v51, 16 }
  0xd8   : > { %v2594_v62 = vsel %vm5738_vm4, %v2589_v63, %v2593_v30  ;;  %v2604_v46 = vsel %vm5738_vm4, %v2599_v45, %v2603_v18  ;;  %v6558_v42 = vrot.slane %v2609_v37, 5  ;;  %v2625_v36 = vshll.u32 %v425_v4, 16  ;;  %v434_v30 = vld [vmem:[%s5713_s30 + $0x1d8] sm:$0xf]  ;;  %v435_v4 = vld [vmem:[%s5713_s30 + $0x1dc] sm:$0x1] }
  0xd9   : > { %v2617_v43 = vrot.slane %v2615_v14, 5  ;;  %v6561_v7 = vrot.slane %v3213_v57, 5  ;;  %v4813_v0 = vcombine.low %v2594_v62, %v2604_v46  ;;  %v2621_v59 = vrot.slane %v2619_v53, 4  ;;  %v6578_v62 = vld [vmem:[%s5713_s30 + $0x1f4] sm:$0xf] }
  0xda   : > { %7676 = vst [vmem:[#allocation60_spill] sm:$0xff] %v6558_v42  ;;  %v4782_v33 = vcombine.low %v6546_v8, %v6551_v60  ;;  %v6566_v10 = vrot.slane %v3217_v35, 4  ;;  %v6568_v51 = vrot.slane %v3224_v6, 4  ;;  %v3233_v18 = vshll.u32 %v6484_v58, 16 }
  0xdb   : > { %7677 = vst [vmem:[#allocation61_spill] sm:$0xff] %v6561_v7  ;;  %v2612_v63 = vor.u32 %v6558_v42, %v2608_v26  ;;  %v6573_v45 = vrot.slane %v3227_v13, 5  ;;  %5396 = vmatmul.mubr.msk.bf16.gmra.mxu0 %vm919_vm3, %v4813_v0  ;;  %v2622_v57 = vor.u32 %v2621_v59, %v2617_v43  ;;  %v2627_v37 = vrot.slane %v2625_v36, 5  ;;  %v6583_v26 = vld [vmem:[%s5713_s30 + $0x1f8] sm:$0xf] }
  0xdc   : > { %7678 = vst [vmem:[#allocation62_spill] sm:$0xff] %v6566_v10  ;;  %7679 = vst [vmem:[#allocation63_spill] sm:$0xff] %v6568_v51  ;;  %5366 = vmatmul.mubr.msk.bf16.gmra.mxu1 %vm919_vm3, %v4782_v33  ;;  %v2630_v14 = vshrl.u32 %v433_v50, 16  ;;  %v3237_v35 = vshrl.u32 %v6484_v58, 16  ;;  %v3244_v6 = vshrl.u32 %v6515_v23, 16  ;;  %v2633_v46 = vshll.u32 %v433_v50, 16 }
  0xdd   : > { %7680 = vst [vmem:[#allocation64_spill] sm:$0xff] %v6573_v45  ;;  %v2613_v53 = vrot.slane %v2612_v63, 4  ;;  %v3247_v13 = vshll.u32 %v6515_v23, 16  ;;  %v2623_v42 = vrot.slane %v2622_v57, 4  ;;  %v2639_v59 = vshll.u32 %v434_v30, 16 }
  0xde   : > { %v2632_v0 = vrot.slane %v2630_v14, 4  ;;  %v6588_v33 = vrot.slane %v2633_v46, 5  ;;  %v2643_v58 = vshrl.u32 %v434_v30, 16  ;;  %v2649_v45 = vshll.u32 %v435_v4, 16  ;;  %v443_v57 = vld [vmem:[%s5713_s30 + $0x1fc] sm:$0xf] }
  0xdf   : > { %v2618_v36 = vsel %vm5738_vm4, %v2613_v53, %v2617_v43  ;;  %v6590_v51 = vrot.slane %v3233_v18, 5  ;;  %v2628_v50 = vsel %vm5738_vm4, %v2623_v42, %v2627_v37  ;;  %v2641_v63 = vrot.slane %v2639_v59, 5  ;;  %v444_v30 = vld [vmem:[%s5713_s30 + $0x200] sm:$0xf]  ;;  %v445_v4 = vld [vmem:[%s5713_s30 + $0x204] sm:$0x1] }
  0xe0   : > { %7681 = vst [vmem:[#allocation65_spill] sm:$0xff] %v6588_v33  ;;  %v4783_v23 = vcombine.low %v6578_v62, %v6583_v26  ;;  %v6597_v14 = vrot.slane %v3237_v35, 4  ;;  %v4814_v10 = vcombine.low %v2618_v36, %v2628_v50  ;;  %v2636_v43 = vor.u32 %v6588_v33, %v2632_v0  ;;  %v6609_v59 = vld [vmem:[%s5713_s30 + $0x21c] sm:$0xf] }
  0xe1   : > { %7682 = vst [vmem:[#allocation66_spill] sm:$0xff] %v6590_v51  ;;  %v2645_v53 = vrot.slane %v2643_v58, 4  ;;  %v6602_v18 = vrot.slane %v3244_v6, 4  ;;  %v6604_v46 = vrot.slane %v3247_v13, 5  ;;  %v3253_v42 = vshll.u32 %v6519_v39, 16 }
  0xe2   : > { %7683 = vst [vmem:[#allocation67_spill] sm:$0xff] %v6597_v14  ;;  %v2651_v37 = vrot.slane %v2649_v45, 5  ;;  %5369 = vmatprep.mubr.msk.bf16.mxu1 %vm919_vm3, %v4783_v23  ;;  %5399 = vmatprep.mubr.msk.bf16.mxu0 %vm919_vm3, %v4814_v10  ;;  %v2637_v35 = vrot.slane %v2636_v43, 4  ;;  %v2654_v50 = vshrl.u32 %v443_v57, 16  ;;  %v2657_v0 = vshll.u32 %v443_v57, 16 }
  0xe3   : > { %7684 = vst [vmem:[#allocation68_spill] sm:$0xff] %v6602_v18  ;;  %7685 = vst [vmem:[#allocation69_spill] sm:$0xff] %v6604_v46  ;;  %v2646_v36 = vor.u32 %v2645_v53, %v2641_v63  ;;  %v6613_v58 = vld [vmem:[%s5713_s30 + $0x220] sm:$0xf]  ;;  %v3257_v6 = vshrl.u32 %v6519_v39, 16  ;;  %v3264_v13 = vshrl.u32 %v6546_v8, 16 }
  0xe4   : > { %v3267_v45 = vshll.u32 %v6546_v8, 16  ;;  %v2663_v33 = vshll.u32 %v444_v30, 16  ;;  %v2642_v23 = vsel %vm5738_vm4, %v2637_v35, %v2641_v63  ;;  %v2656_v10 = vrot.slane %v2654_v50, 4  ;;  %v453_v35 = vld [vmem:[%s5713_s30 + $0x224] sm:$0xf] }
  0xe5   : > { %v2647_v46 = vrot.slane %v2646_v36, 4  ;;  %v6620_v43 = vrot.slane %v2657_v0, 5  ;;  %v2667_v57 = vshrl.u32 %v444_v30, 16  ;;  %v2673_v18 = vshll.u32 %v445_v4, 16  ;;  %v454_v36 = vld [vmem:[%s5713_s30 + $0x228] sm:$0xf] }
  0xe6   : > { %v2665_v53 = vrot.slane %v2663_v33, 5  ;;  %v4784_v39 = vcombine.low %v6609_v59, %v6613_v58  ;;  %v6624_v14 = vrot.slane %v3253_v42, 5  ;;  %v3273_v51 = vshll.u32 %v6551_v60, 16  ;;  %v6632_v50 = vpop.f32.mrf.mxu0  ;;  %v455_v0 = vld [vmem:[%s5713_s30 + $0x22c] sm:$0x1] }
  0xe7   : > { %7686 = vst [vmem:[#allocation70_spill] sm:$0xff] %v6620_v43  ;;  %v2652_v8 = vsel %vm5738_vm4, %v2647_v46, %v2651_v37  ;;  %v2660_v63 = vor.u32 %v6620_v43, %v2656_v10  ;;  %7688 = vst [vmem:[#allocation72_spill] sm:$0xff] %v6632_v50  ;;  %v6634_v33 = vrot.slane %v3257_v6, 4  ;;  %v6636_v30 = vrot.slane %v3264_v13, 4  ;;  %v6645_v43 = vld [vmem:[%s5713_s30 + $0x244] sm:$0xf] }
  0xe8   : > { %7687 = vst [vmem:[#allocation71_spill] sm:$0xff] %v6624_v14  ;;  %v4815_v4 = vcombine.low %v2642_v23, %v2652_v8  ;;  %v2669_v42 = vrot.slane %v2667_v57, 4  ;;  %5370 = vmatmul.mubr.msk.bf16.gmra.mxu1 %vm919_vm3, %v4784_v39  ;;  %v6640_v14 = vrot.slane %v3267_v45, 5  ;;  %v3277_v46 = vshrl.u32 %v6551_v60, 16  ;;  %7692 = vst [vmem:[#allocation76_spill] sm:$0xff] %v6645_v43 }
  0xe9   : > { %7689 = vst [vmem:[#allocation73_spill] sm:$0xff] %v6634_v33  ;;  %7690 = vst [vmem:[#allocation74_spill] sm:$0xff] %v6636_v30  ;;  %v3284_v37 = vshrl.u32 %v6578_v62, 16  ;;  %v2661_v10 = vrot.slane %v2660_v63, 4  ;;  %v2675_v50 = vrot.slane %v2673_v18, 5  ;;  %v2678_v13 = vshrl.u32 %v453_v35, 16  ;;  %v6657_v63 = vpop.f32.mrf.mxu0 }
  0xea   : > { %7691 = vst [vmem:[#allocation75_spill] sm:$0xff] %v6640_v14  ;;  %5400 = vmatmul.mubr.msk.bf16.gmra.mxu0 %vm919_vm3, %v4815_v4  ;;  %v2670_v6 = vor.u32 %v2669_v42, %v2665_v53  ;;  %v2681_v30 = vshll.u32 %v453_v35, 16  ;;  %v6649_v23 = vld [vmem:[%s5713_s30 + $0x248] sm:$0xf]  ;;  %v6653_v45 = vrot.slane %v3273_v51, 5  ;;  %v2687_v39 = vshll.u32 %v454_v36, 16 }
  0xeb   : > { %7693 = vst [vmem:[#allocation77_spill] sm:$0xff] %v6649_v23  ;;  %v2666_v60 = vsel %vm5738_vm4, %v2661_v10, %v2665_v53  ;;  %v2691_v8 = vshrl.u32 %v454_v36, 16  ;;  %7696 = vst [vmem:[#allocation80_spill] sm:$0xff] %v6657_v63  ;;  %v2680_v42 = vrot.slane %v2678_v13, 4  ;;  %v2697_v35 = vshll.u32 %v455_v0, 16  ;;  %v6678_v63 = vpop.f32.mrf.mxu0 }
  0xec   : > { %v6651_v57 = vpop.f32.mrf.mxu1  ;;  %7695 = vst [vmem:[#allocation79_spill] sm:$0xff] %v6653_v45  ;;  %v2671_v4 = vrot.slane %v2670_v6, 4  ;;  %v6659_v18 = vrot.slane %v2681_v30, 5  ;;  %v6661_v14 = vrot.slane %v3277_v46, 4  ;;  %v2689_v33 = vrot.slane %v2687_v39, 5  ;;  %7701 = vst [vmem:[#allocation85_spill] sm:$0xff] %v6678_v63 }
  0xed   : > { %7694 = vst [vmem:[#allocation78_spill] sm:$0xff] %v6651_v57  ;;  %v2693_v57 = vrot.slane %v2691_v8, 4  ;;  %v4785_v51 = vcombine.low %v6645_v43, %v6649_v23  ;;  %v463_v45 = vld [vmem:[%s5713_s30 + $0x24c] sm:$0xf]  ;;  %v6666_v53 = vrot.slane %v3284_v37, 4  ;;  %v3287_v36 = vshll.u32 %v6578_v62, 16 }
  0xee   : > { %7697 = vst [vmem:[#allocation81_spill] sm:$0xff] %v6659_v18  ;;  %7698 = vst [vmem:[#allocation82_spill] sm:$0xff] %v6661_v14  ;;  %v2676_v10 = vsel %vm5738_vm4, %v2671_v4, %v2675_v50  ;;  %v2684_v30 = vor.u32 %v6659_v18, %v2680_v42  ;;  %v464_v0 = vld [vmem:[%s5713_s30 + $0x250] sm:$0xf]  ;;  %v6673_v46 = vpop.f32.mrf.mxu1  ;;  %v3293_v6 = vshll.u32 %v6583_v26, 16  ;;  %v2699_v8 = vrot.slane %v2697_v35, 5 }
  0xef   : > { %7699 = vst [vmem:[#allocation83_spill] sm:$0xff] %v6666_v53  ;;  %7700 = vst [vmem:[#allocation84_spill] sm:$0xff] %v6673_v46  ;;  %v4816_v13 = vcombine.low %v2666_v60, %v2676_v10  ;;  %v2694_v39 = vor.u32 %v2693_v57, %v2689_v33  ;;  %5373 = vmatprep.mubr.msk.bf16.mxu1 %vm919_vm3, %v4785_v51  ;;  %v465_v37 = vld [vmem:[%s5713_s30 + $0x254] sm:$0x1]  ;;  %v3297_v62 = vshrl.u32 %v6583_v26, 16  ;;  %v3304_v50 = vshrl.u32 %v6609_v59, 16  ;;  %v6700_v53 = vpop.f32.mrf.mxu0 }
  0xf0   : > { %v2685_v4 = vrot.slane %v2684_v30, 4  ;;  %v2702_v42 = vshrl.u32 %v463_v45, 16  ;;  %v6683_v23 = vld [vmem:[%s5713_s30 + $0x26c] sm:$0xf]  ;;  %v3307_v60 = vshll.u32 %v6609_v59, 16  ;;  %v2705_v35 = vshll.u32 %v463_v45, 16  ;;  %v6693_v43 = vpop.f32.mrf.mxu1 }
  0xf1   : > { %5403 = vmatprep.mubr.msk.bf16.mxu0 %vm919_vm3, %v4816_v13  ;;  %v2695_v57 = vrot.slane %v2694_v39, 4  ;;  %v2711_v10 = vshll.u32 %v464_v0, 16  ;;  %v6688_v51 = vld [vmem:[%s5713_s30 + $0x270] sm:$0xf]  ;;  %v3313_v46 = vshll.u32 %v6613_v58, 16  ;;  %v2715_v30 = vshrl.u32 %v464_v0, 16 }
  0xf2   : > { %v2690_v26 = vsel %vm5738_vm4, %v2685_v4, %v2689_v33  ;;  %v2704_v63 = vrot.slane %v2702_v42, 4  ;;  %7702 = vst [vmem:[#allocation86_spill] sm:$0xff] %v6693_v43  ;;  %v6697_v18 = vrot.slane %v2705_v35, 5  ;;  %v2721_v45 = vshll.u32 %v465_v37, 16  ;;  %v473_v39 = vld [vmem:[%s5713_s30 + $0x274] sm:$0xf] }
  0xf3   : > { %v2700_v13 = vsel %vm5738_vm4, %v2695_v57, %v2699_v8  ;;  %v2713_v59 = vrot.slane %v2711_v10, 5  ;;  %7704 = vst [vmem:[#allocation88_spill] sm:$0xff] %v6700_v53  ;;  %v3317_v14 = vshrl.u32 %v6613_v58, 16  ;;  %v2717_v33 = vrot.slane %v2715_v30, 4  ;;  %v474_v37 = vld [vmem:[%s5713_s30 + $0x278] sm:$0xf] }
  0xf4   : > { %7703 = vst [vmem:[#allocation87_spill] sm:$0xff] %v6697_v18  ;;  %v4817_v7 = vcombine.low %v2690_v26, %v2700_v13  ;;  %v4786_v0 = vcombine.low %v6683_v23, %v6688_v51  ;;  %v6705_v4 = vrot.slane %v3287_v36, 5  ;;  %v6707_v42 = vrot.slane %v3293_v6, 5  ;;  %v475_v26 = vld [vmem:[%s5713_s30 + $0x27c] sm:$0x1]  ;;  %v6718_v13 = vpop.f32.mrf.mxu1 }
  0xf5   : > { %v6709_v8 = vrot.slane %v3297_v62, 4  ;;  %v2708_v57 = vor.u32 %v6697_v18, %v2704_v63  ;;  %v6713_v35 = vrot.slane %v3304_v50, 4  ;;  %v2718_v10 = vor.u32 %v2717_v33, %v2713_v59  ;;  %7705 = vst [vmem:[#allocation89_spill] sm:$0xff] %v6718_v13 }
  0xf6   : > { %5404 = vmatmul.mubr.msk.bf16.gmra.mxu0 %vm919_vm3, %v4817_v7  ;;  %v2723_v58 = vrot.slane %v2721_v45, 5  ;;  %5374 = vmatmul.mubr.msk.bf16.gmra.mxu1 %vm919_vm3, %v4786_v0  ;;  %v2726_v30 = vshrl.u32 %v473_v39, 16  ;;  %v6720_v36 = vrot.slane %v3307_v60, 5  ;;  %v6722_v6 = vrot.slane %v3313_v46, 5 }
  0xf7   : > { %v2709_v62 = vrot.slane %v2708_v57, 4  ;;  %v2729_v53 = vshll.u32 %v473_v39, 16  ;;  %v6726_v50 = vrot.slane %v3317_v14, 4  ;;  %v2719_v43 = vrot.slane %v2718_v10, 4 }
  0xf8   : > { %v6724_v63 = vpop.f32.mrf.mxu0  ;;  %v2728_v7 = vrot.slane %v2726_v30, 4  ;;  %v2735_v33 = vshll.u32 %v474_v37, 16  ;;  %v2739_v18 = vshrl.u32 %v474_v37, 16  ;;  %v2745_v13 = vshll.u32 %v475_v26, 16 }
  0xf9   : > { %v2714_v45 = vsel %vm5738_vm4, %v2709_v62, %v2713_v59  ;;  %v6730_v0 = vrot.slane %v2729_v53, 5  ;;  %v2724_v46 = vsel %vm5738_vm4, %v2719_v43, %v2723_v58  ;;  %v3050_v39 = vor.u32 %v6274_v38, %v6272_v31 }
  0xfa   : > { %v2737_v60 = vrot.slane %v2735_v33, 5  ;;  %v3060_v14 = vor.u32 %v6305_v1, %v6281_v19  ;;  %v4818_v10 = vcombine.low %v2714_v45, %v2724_v46  ;;  %v2741_v59 = vrot.slane %v2739_v18, 4  ;;  %v6741_v62 = vpop.f32.mrf.mxu0 }
  0xfb   : > { %v6738_v57 = vpop.f32.mrf.mxu1  ;;  %v2732_v30 = vor.u32 %v6730_v0, %v2728_v7  ;;  %v2747_v53 = vrot.slane %v2745_v13, 5  ;;  %v3051_v37 = vrot.slane %v3050_v39, 4  ;;  %v3070_v43 = vor.u32 %v6316_v17, %v6314_v20 }
  0xfc   : > { %v3061_v26 = vrot.slane %v3060_v14, 4  ;;  %v3080_v31 = vor.u32 %v6336_v44, %v6334_v2  ;;  %5407 = vmatprep.mubr.msk.bf16.mxu0 %vm919_vm3, %v4818_v10  ;;  %v2742_v38 = vor.u32 %v2741_v59, %v2737_v60  ;;  %v3896_v58 = vsel %vm968_vm0, %v6270_v11, 0  ;;  %v6766_v46 = vpop.f32.mrf.mxu0 }
  0xfd   : > { %v2733_v1 = vrot.slane %v2732_v30, 4  ;;  %v6752_v18 = vsel %vm968_vm0, %v6312_v54, 0  ;;  %v3056_v13 = vsel %vm5738_vm4, %v3051_v37, %v6281_v19  ;;  %v3071_v17 = vrot.slane %v3070_v43, 4  ;;  %v6760_v7 = vpop.f32.mrf.mxu1 }
  0xfe   : > { %v3062_v20 = vsel %vm5738_vm4, %v3061_v26, %v6225_v29  ;;  %v3081_v44 = vrot.slane %v3080_v31, 4  ;;  %v2743_v11 = vrot.slane %v2742_v38, 4  ;;  %v3090_v54 = vor.u32 %v6348_v52, %v6346_v24  ;;  %v6795_v37 = vpop.f32.mrf.mxu0 }
  0xff   : > { %v2738_v33 = vsel %vm5738_vm4, %v2733_v1, %v2737_v60  ;;  %v4837_v45 = vcombine.low %v3056_v13, %v3062_v20  ;;  %v3076_v19 = vsel %vm5738_vm4, %v3071_v17, %v6334_v2  ;;  %v3100_v39 = vor.u32 %v6376_v48, %v6366_v47  ;;  %v6785_v48 = vpop.f32.mrf.mxu1  ;;  %v7708_v13 = vld [vmem:[#allocation52_spill] sm:$0xff]  ;;  %v7710_v17 = vld [vmem:[#allocation54_spill] sm:$0xff] }
 0x100   : > { %v3082_v29 = vsel %vm5738_vm4, %v3081_v44, %v6246_v25  ;;  %v3110_v60 = vor.u32 %v6380_v27, %v6378_v61  ;;  %v2748_v14 = vsel %vm5738_vm4, %v2743_v11, %v2747_v53  ;;  %v3091_v52 = vrot.slane %v3090_v54, 4  ;;  %v7712_v54 = vld [vmem:[#allocation56_spill] sm:$0xff] }
 0x101   : > { %5413 = vmatprep.mubr.msk.bf16.mxu1 %vm919_vm3, %v4837_v45  ;;  %v4838_v24 = vcombine.low %v3076_v19, %v3082_v29  ;;  %v3120_v2 = vor.u32 %v6402_v56, %v6389_v3  ;;  %v4819_v10 = vcombine.low %v2738_v33, %v2748_v14  ;;  %v3101_v30 = vrot.slane %v3100_v39, 4  ;;  %v7713_v19 = vld [vmem:[#allocation57_spill] sm:$0xff]  ;;  %v7714_v14 = vld [vmem:[#allocation58_spill] sm:$0xff] }
 0x102   : > { %v3111_v59 = vrot.slane %v3110_v60, 4  ;;  %v3130_v25 = vor.u32 %v6434_v9, %v6410_v15  ;;  %v3096_v61 = vsel %vm5738_vm4, %v3091_v52, %v6366_v47  ;;  %v3140_v53 = vor.u32 %v6439_v40, %v6437_v28 }
 0x103   : > { %5414 = vmatmul.mubr.msk.bf16.vlgmr.msra.gmra.mxu1 %vm919_vm3, %v4838_v24  ;;  %v3121_v27 = vrot.slane %v3120_v2, 4  ;;  %v3150_v56 = vor.u32 %v6446_v49, %v6441_v5  ;;  %5408 = vmatmul.mubr.msk.bf16.gmra.mxu0 %vm919_vm3, %v4819_v10  ;;  %v3102_v9 = vsel %vm5738_vm4, %v3101_v30, %v6291_v41  ;;  %v3160_v40 = vor.u32 %v6469_v12, %v6452_v16  ;;  %v6816_v12 = vpop.f32.mrf.mxu1  ;;  %v7715_v24 = vld [vmem:[#allocation59_spill] sm:$0xff]  ;;  %v7716_v30 = vld [vmem:[#allocation61_spill] sm:$0xff] }
 0x104   : > { %5480 = vmatpush3.bf16.msra.mxu1 %v3896_v58  ;;  %v3116_v47 = vsel %vm5738_vm4, %v3111_v59, %v6389_v3  ;;  %v3131_v15 = vrot.slane %v3130_v25, 4  ;;  %5447 = vmatprep.mubr.msk.bf16.mxu0 %vm919_vm3, %v5971_v32  ;;  %v4839_v5 = vcombine.low %v3096_v61, %v3102_v9  ;;  %v3141_v26 = vrot.slane %v3140_v53, 4  ;;  %v7706_v32 = vld [vmem:[#allocation46_spill] sm:$0xff]  ;;  %v7707_v58 = vld [vmem:[#allocation51_spill] sm:$0xff]  ;;  %v7720_v9 = vld [vmem:[#allocation48_spill] sm:$0xff] }
 0x105   : > { %v3122_v49 = vsel %vm5738_vm4, %v3121_v27, %v6332_v22  ;;  %v3151_v43 = vrot.slane %v3150_v56, 4  ;;  %v3161_v3 = vrot.slane %v3160_v40, 4  ;;  %v3170_v1 = vor.u32 %v6486_v55, %v6474_v21  ;;  %v7711_v21 = vld [vmem:[#allocation47_spill] sm:$0xff]  ;;  %v7717_v59 = vld [vmem:[#allocation62_spill] sm:$0xff]  ;;  %v7719_v27 = vld [vmem:[#allocation64_spill] sm:$0xff] }
 0x106   : > { %v4840_v31 = vcombine.low %v3116_v47, %v3122_v49  ;;  %v3136_v41 = vsel %vm5738_vm4, %v3131_v15, %v6437_v28  ;;  %5417 = vmatprep.mubr.msk.bf16.mxu1 %vm919_vm3, %v4839_v5  ;;  %v3142_v38 = vsel %vm5738_vm4, %v3141_v26, %v7706_v32  ;;  %v3180_v20 = vor.u32 %v7708_v13, %v7707_v58  ;;  %v7709_v28 = vld [vmem:[#allocation53_spill] sm:$0xff]  ;;  %v7718_v61 = vld [vmem:[#allocation63_spill] sm:$0xff]  ;;  %v7721_v5 = vld [vmem:[#allocation66_spill] sm:$0xff] }
 0x107   : > { %v3156_v22 = vsel %vm5738_vm4, %v3151_v43, %v6452_v16  ;;  %v3190_v44 = vor.u32 %v7710_v17, %v7709_v28  ;;  %v4841_v55 = vcombine.low %v3136_v41, %v3142_v38  ;;  %v3162_v11 = vsel %vm5738_vm4, %v3161_v3, %v7711_v21  ;;  %v7722_v49 = vld [vmem:[#allocation67_spill] sm:$0xff]  ;;  %v7723_v41 = vld [vmem:[#allocation17_spill] sm:$0xff]  ;;  %v7726_v28 = vld [vmem:[#allocation68_spill] sm:$0xff] }
 0x108   : > { %v6829_v33 = vpop.f32.mrf.mxu0  ;;  %v3171_v45 = vrot.slane %v3170_v1, 4  ;;  %v3200_v29 = vor.u32 %v7713_v19, %v7712_v54  ;;  %v4842_v39 = vcombine.low %v3156_v22, %v3162_v11  ;;  %v3181_v60 = vrot.slane %v3180_v20, 4  ;;  %v7724_v3 = vld [vmem:[#allocation49_spill] sm:$0xff]  ;;  %v7725_v22 = vld [vmem:[#allocation19_spill] sm:$0xff]  ;;  %v7731_v19 = vld [vmem:[#allocation74_spill] sm:$0xff] }
 0x109   : > { %v3191_v16 = vrot.slane %v3190_v44, 4  ;;  %v3210_v52 = vor.u32 %v7715_v24, %v7714_v14  ;;  %v3220_v25 = vor.u32 %v7717_v59, %v7716_v30  ;;  %v3230_v53 = vor.u32 %v7719_v27, %v7718_v61  ;;  %v7727_v17 = vld [vmem:[#allocation69_spill] sm:$0xff]  ;;  %v7729_v11 = vld [vmem:[#allocation71_spill] sm:$0xff] }
 0x10a   : > { %v3176_v2 = vsel %vm5738_vm4, %v3171_v45, %v7707_v58  ;;  %v3201_v10 = vrot.slane %v3200_v29, 4  ;;  %v3182_v47 = vsel %vm5738_vm4, %v3181_v60, %v7720_v9  ;;  %v3240_v26 = vor.u32 %v7722_v49, %v7721_v5  ;;  %v6856_v43 = vpop.f32.mrf.mxu0  ;;  %v7730_v45 = vld [vmem:[#allocation73_spill] sm:$0xff]  ;;  %v7732_v29 = vld [vmem:[#allocation75_spill] sm:$0xff] }
 0x10b   : > { %5418 = vmatmul.mubr.msk.bf16.gmra.mxu1 %vm919_vm3, %v4840_v31  ;;  %v3196_v15 = vsel %vm5738_vm4, %v3191_v16, %v7712_v54  ;;  %v3211_v40 = vrot.slane %v3210_v52, 4  ;;  %5448 = vmatmul.mubr.msk.bf16.vlgmr.msra.gmra.mxu0 %vm919_vm3, %v7723_v41  ;;  %v4843_v31 = vcombine.low %v3176_v2, %v3182_v47  ;;  %v3221_v32 = vrot.slane %v3220_v25, 4  ;;  %v7733_v24 = vld [vmem:[#allocation55_spill] sm:$0xff] }
 0x10c   : > { %5421 = vmatprep.mubr.msk.bf16.mxu1 %vm919_vm3, %v4841_v55  ;;  %v3202_v1 = vsel %vm5738_vm4, %v3201_v10, %v7724_v3  ;;  %v3231_v38 = vrot.slane %v3230_v53, 4  ;;  %5514 = vmatpush3.bf16.msra.mxu0 %v6752_v18  ;;  %v3241_v20 = vrot.slane %v3240_v26, 4  ;;  %v3250_v44 = vor.u32 %v7727_v17, %v7726_v28  ;;  %v7728_v55 = vld [vmem:[#allocation50_spill] sm:$0xff]  ;;  %v7734_v10 = vld [vmem:[#allocation79_spill] sm:$0xff]  ;;  %v6889_v25 = vpop.f32.mrf.mxu0  ;;  %v7737_v26 = vld [vmem:[#allocation60_spill] sm:$0xff] }
 0x10d   : > { %v6845_v56 = vpop.f32.mrf.mxu1  ;;  %5451 = vmatprep.mubr.msk.bf16.mxu0 %vm919_vm3, %v7725_v22  ;;  %v4844_v58 = vcombine.low %v3196_v15, %v3202_v1  ;;  %v3216_v13 = vsel %vm5738_vm4, %v3211_v40, %v7716_v30  ;;  %v3222_v21 = vsel %vm5738_vm4, %v3221_v32, %v7728_v55  ;;  %v3260_v54 = vor.u32 %v7730_v45, %v7729_v11  ;;  %v7735_v30 = vld [vmem:[#allocation82_spill] sm:$0xff]  ;;  %v7736_v9 = vld [vmem:[#allocation83_spill] sm:$0xff] }
 0x10e   : > { %v3236_v18 = vsel %vm5738_vm4, %v3231_v38, %v7721_v5  ;;  %v3270_v60 = vor.u32 %v7732_v29, %v7731_v19  ;;  %v4845_v14 = vcombine.low %v3216_v13, %v3222_v21  ;;  %v3242_v52 = vsel %vm5738_vm4, %v3241_v20, %v7733_v24  ;;  %v7738_v38 = vld [vmem:[#allocation65_spill] sm:$0xff]  ;;  %v6914_v13 = vpop.f32.mrf.mxu0  ;;  %v7739_v20 = vld [vmem:[#allocation20_spill] sm:$0xff]  ;;  %v7740_v17 = vld [vmem:[#allocation23_spill] sm:$0xff] }
 0x10f   : > { %v6882_v16 = vpop.f32.mrf.mxu1  ;;  %v3251_v2 = vrot.slane %v3250_v44, 4  ;;  %v3280_v59 = vor.u32 %v7735_v30, %v7734_v10  ;;  %v4846_v61 = vcombine.low %v3236_v18, %v3242_v52  ;;  %v3261_v27 = vrot.slane %v3260_v54, 4  ;;  %v7741_v44 = vld [vmem:[#allocation70_spill] sm:$0xff]  ;;  %v7744_v52 = vld [vmem:[#allocation76_spill] sm:$0xff]  ;;  %v7745_v30 = vld [vmem:[#allocation77_spill] sm:$0xff] }
 0x110   : > { %v3271_v53 = vrot.slane %v3270_v60, 4  ;;  %v3290_v47 = vor.u32 %v6705_v4, %v7736_v9  ;;  %v3300_v5 = vor.u32 %v6709_v8, %v6707_v42  ;;  %v3310_v49 = vor.u32 %v6720_v36, %v6713_v35 }
 0x111   : > { %v3256_v15 = vsel %vm5738_vm4, %v3251_v2, %v7729_v11  ;;  %v3281_v40 = vrot.slane %v3280_v59, 4  ;;  %v3262_v41 = vsel %vm5738_vm4, %v3261_v27, %v7737_v26  ;;  %v3320_v1 = vor.u32 %v6726_v50, %v6722_v6  ;;  %v6908_v32 = vpop.f32.mrf.mxu1  ;;  %v7742_v11 = vld [vmem:[#allocation81_spill] sm:$0xff] }
 0x112   : > { %v3276_v3 = vsel %vm5738_vm4, %v3271_v53, %v7734_v10  ;;  %v3291_v4 = vrot.slane %v3290_v47, 4  ;;  %v4847_v8 = vcombine.low %v3256_v15, %v3262_v41  ;;  %v3301_v36 = vrot.slane %v3300_v5, 4  ;;  %v7746_v53 = vld [vmem:[#allocation27_spill] sm:$0xff]  ;;  %v7747_v41 = vld [vmem:[#allocation72_spill] sm:$0xff] }
 0x113   : > { %5422 = vmatmul.mubr.msk.bf16.gmra.mxu1 %vm919_vm3, %v4842_v39  ;;  %v3282_v35 = vsel %vm5738_vm4, %v3281_v40, %v7738_v38  ;;  %v3311_v22 = vrot.slane %v3310_v49, 4  ;;  %5452 = vmatmul.mubr.msk.bf16.gmra.mxu0 %vm919_vm3, %v7739_v20  ;;  %v3321_v39 = vrot.slane %v3320_v1, 4  ;;  %v6933_v45 = vpop.f32.mrf.mxu1  ;;  %v3324_v2 = vshrl.u32 %v7744_v52, 16 }
 0x114   : > { %5425 = vmatprep.mubr.msk.bf16.mxu1 %vm919_vm3, %v4843_v31  ;;  %v4848_v28 = vcombine.low %v3276_v3, %v3282_v35  ;;  %v3296_v50 = vsel %vm5738_vm4, %v3291_v4, %v6707_v42  ;;  %5455 = vmatprep.mubr.msk.bf16.mxu0 %vm919_vm3, %v7740_v17  ;;  %v3302_v55 = vsel %vm5738_vm4, %v3301_v36, %v7741_v44  ;;  %v3327_v10 = vshll.u32 %v7744_v52, 16  ;;  %v7748_v36 = vld [vmem:[#allocation28_spill] sm:$0xff] }
 0x115   : > { %v3316_v21 = vsel %vm5738_vm4, %v3311_v22, %v6722_v6  ;;  %v4849_v18 = vcombine.low %v3296_v50, %v3302_v55  ;;  %v3322_v31 = vsel %vm5738_vm4, %v3321_v39, %v7742_v11  ;;  %v7743_v6 = vld [vmem:[#allocation24_spill] sm:$0xff]  ;;  %v3333_v59 = vshll.u32 %v7745_v30, 16  ;;  %v7749_v50 = vld [vmem:[#allocation31_spill] sm:$0xff] }
 0x116   : > { %v6935_v42 = vcombine.low %v3316_v21, %v3322_v31  ;;  %v3337_v27 = vshrl.u32 %v7745_v30, 16  ;;  %v3329_v15 = vrot.slane %v3327_v10, 5  ;;  %v3344_v4 = vshrl.u32 %v6683_v23, 16  ;;  %v7750_v44 = vld [vmem:[#allocation80_spill] sm:$0xff] }
 0x117   : > { %v3335_v40 = vrot.slane %v3333_v59, 5  ;;  %v3347_v1 = vshll.u32 %v6683_v23, 16  ;;  %v3353_v38 = vshll.u32 %v6688_v51, 16  ;;  %v3357_v35 = vshrl.u32 %v6688_v51, 16  ;;  %v7751_v51 = vld [vmem:[#allocation85_spill] sm:$0xff] }
 0x118   : > { %v3339_v5 = vrot.slane %v3337_v27, 4 }
 0x119   : > { %v3349_v52 = vrot.slane %v3347_v1, 5  ;;  %v7753_v1 = vld [vmem:[#allocation35_spill] sm:$0xff] }
 0x11a   : > { %v6937_v54 = vpop.f32.mrf.mxu0  ;;  %v3340_v39 = vor.u32 %v3339_v5, %v3335_v40 }
 0x11b   : > { %5426 = vmatmul.mubr.msk.bf16.gmra.mxu1 %vm919_vm3, %v4844_v58  ;;  %5456 = vmatmul.mubr.msk.bf16.gmra.mxu0 %vm919_vm3, %v7743_v6  ;;  %v3346_v6 = vrot.slane %v3344_v4, 4 }
 0x11c   : > { %v6939_v19 = vpop.f32.mrf.mxu0  ;;  %5429 = vmatprep.mubr.msk.bf16.mxu1 %vm919_vm3, %v4845_v14  ;;  %5459 = vmatprep.mubr.msk.bf16.mxu0 %vm919_vm3, %v7746_v53  ;;  %v3326_v14 = vrot.slane %v3324_v2, 4  ;;  %v3359_v2 = vrot.slane %v3357_v35, 4  ;;  %v3341_v27 = vrot.slane %v3340_v39, 4  ;;  %v7754_v35 = vld [vmem:[#allocation87_spill] sm:$0xff] }
 0x11d   : > { %v6941_v29 = vpop.f32.mrf.mxu1 }
 0x11e   : > { %v6944_v60 = vpop.f32.mrf.mxu0 }
 0x11f   : > { %v6949_v24 = vpop.f32.mrf.mxu1 }
 0x120   : > { %v6959_v9 = vpop.f32.mrf.mxu0 }
 0x121   : > { %v6957_v58 = vpop.f32.mrf.mxu1 }
 0x123   : > { %v6961_v47 = vpop.f32.mrf.mxu1  ;;  %5430 = vmatmul.mubr.msk.bf16.gmra.mxu1 %vm919_vm3, %v4846_v61  ;;  %5460 = vmatmul.mubr.msk.bf16.gmra.mxu0 %vm919_vm3, %v7748_v36  ;;  %v3330_v61 = vor.u32 %v3329_v15, %v3326_v14 }
 0x124   : > { %5433 = vmatprep.mubr.msk.bf16.mxu1 %vm919_vm3, %v4847_v8  ;;  %5463 = vmatprep.mubr.msk.bf16.mxu0 %vm919_vm3, %v7749_v50  ;;  %v3355_v8 = vrot.slane %v3353_v38, 5 }
 0x125   : > { %v5279_v49 = vpop.f32.mrf.mxu1  ;;  %v5313_v26 = vpop.f32.mrf.mxu0  ;;  %v3331_v59 = vrot.slane %v3330_v61, 4 }
 0x126   : > { %v1307_v3 = vadd.f32 %v5279_v49, %v7747_v41  ;;  %v7752_v49 = vld [vmem:[#allocation32_spill] sm:$0xff]  ;;  %v3360_v41 = vor.u32 %v3359_v2, %v3355_v8 }
 0x127   : > { %v1298_v22 = vpop.f32.mrf.mxu1  ;;  %v1880_v20 = vpop.f32.mrf.mxu0  ;;  %v3336_v38 = vsel %vm5738_vm4, %v3331_v59, %v3335_v40  ;;  %v7756_v59 = vld [vmem:[#allocation39_spill] sm:$0xff] }
 0x128   : > { %v6974_v17 = vadd.f32 %v5313_v26, %v1307_v3  ;;  %v1299_v23 = vadd.f32 %v1298_v22, %v7750_v44  ;;  %v3350_v26 = vor.u32 %v3349_v52, %v3346_v6  ;;  %v3361_v44 = vrot.slane %v3360_v41, 4 }
 0x129   : > { %v5280_v55 = vpop.f32.mrf.mxu1  ;;  %v5314_v21 = vpop.f32.mrf.mxu0 }
 0x12a   : > { %v6977_v11 = vadd.f32 %v1880_v20, %v1299_v23  ;;  %v1310_v31 = vadd.f32 %v5280_v55, %v7751_v51  ;;  %v3351_v39 = vrot.slane %v3350_v26, 4  ;;  %v3362_v6 = vsel %vm5738_vm4, %v3361_v44, %v6730_v0 }
 0x12b   : > { %v6980_v10 = vpop.f32.mrf.mxu1  ;;  %v6982_v30 = vpop.f32.mrf.mxu0  ;;  %5434 = vmatmul.mubr.msk.bf16.gmra.mxu1 %vm919_vm3, %v4848_v28  ;;  %5464 = vmatmul.mubr.msk.bf16.gmra.mxu0 %vm919_vm3, %v7752_v49  ;;  %v3342_v28 = vsel %vm5738_vm4, %v3341_v27, %v7754_v35  ;;  %v7759_v35 = vld [vmem:[#allocation44_spill] sm:$0xff] }
 0x12c   : > { %v6984_v53 = vadd.f32 %v5314_v21, %v1310_v31  ;;  %5437 = vmatprep.mubr.msk.bf16.mxu1 %vm919_vm3, %v4849_v18  ;;  %5467 = vmatprep.mubr.msk.bf16.mxu0 %vm919_vm3, %v7753_v1  ;;  %v4851_v61 = vcombine.low %v3336_v38, %v3342_v28  ;;  %v7755_v31 = vld [vmem:[#allocation36_spill] sm:$0xff]  ;;  %v7051_v28 = vld [vmem:[%s7040_s22] sm:$0xf] }
 0x12d   : > { %v5283_v14 = vpop.f32.mrf.mxu1  ;;  %v5317_v15 = vpop.f32.mrf.mxu0 }
 0x12e   : > { %v1323_v5 = vadd.f32 %v5283_v14, %v6724_v63 }
 0x12f   : > { %v1314_v3 = vpop.f32.mrf.mxu1  ;;  %v1896_v4 = vpop.f32.mrf.mxu0 }
 0x130   : > { %v6998_v63 = vadd.f32 %v5317_v15, %v1323_v5  ;;  %v1315_v36 = vadd.f32 %v1314_v3, %v6741_v62 }
 0x131   : > { %v5284_v22 = vpop.f32.mrf.mxu1  ;;  %v5318_v18 = vpop.f32.mrf.mxu0 }
 0x132   : > { %v7001_v20 = vadd.f32 %v1896_v4, %v1315_v36  ;;  %v1326_v50 = vadd.f32 %v5284_v22, %v6766_v46  ;;  %v3356_v46 = vsel %vm5738_vm4, %v3351_v39, %v3355_v8  ;;  %v7758_v4 = vld [vmem:[#allocation3_spill] sm:$0xff]  ;;  %v7054_v36 = vld [vmem:[%s7040_s22 + $0x4] sm:$0xf] }
 0x133   : > { %v7004_v23 = vpop.f32.mrf.mxu1  ;;  %v7006_v40 = vpop.f32.mrf.mxu0  ;;  %5438 = vmatmul.mubr.msk.bf16.gmra.mxu1 %vm919_vm3, %v6935_v42  ;;  %5468 = vmatmul.mubr.msk.bf16.gmra.mxu0 %vm919_vm3, %v7755_v31  ;;  %v4852_v15 = vcombine.low %v3356_v46, %v3362_v6  ;;  %v4870_v44 = vcombine.low %v7051_v28, %v7054_v36  ;;  %v7760_v6 = vld [vmem:[#allocation5_spill] sm:$0xff] }
 0x134   : > { %v7008_v55 = vadd.f32 %v5318_v18, %v1326_v50  ;;  %5441 = vmatprep.mubr.msk.bf16.mxu1 %vm919_vm3, %v4851_v61  ;;  %5471 = vmatprep.mubr.msk.bf16.mxu0 %vm919_vm3, %v7756_v59 }
 0x135   : > { %v5287_v21 = vpop.f32.mrf.mxu1  ;;  %v5321_v51 = vpop.f32.mrf.mxu0 }
 0x136   : > { %v1339_v62 = vadd.f32 %v5287_v21, %v6829_v33 }
 0x137   : > { %v1330_v52 = vpop.f32.mrf.mxu1  ;;  %v1912_v2 = vpop.f32.mrf.mxu0 }
 0x138   : > { %v7023_v42 = vadd.f32 %v5321_v51, %v1339_v62  ;;  %v1331_v33 = vadd.f32 %v1330_v52, %v6856_v43 }
 0x139   : > { %v5288_v27 = vpop.f32.mrf.mxu1  ;;  %v5322_v14 = vpop.f32.mrf.mxu0 }
 0x13a   : > { %v7028_v5 = vadd.f32 %v1912_v2, %v1331_v33  ;;  %v1342_v8 = vadd.f32 %v5288_v27, %v6889_v25  ;;  %v7757_v25 = vld [vmem:[#allocation40_spill] sm:$0xff]  ;;  %v7762_v2 = vld [vmem:[#allocation7_spill] sm:$0xff]  ;;  %v7763_v33 = vld [vmem:[#allocation18_spill] sm:$0xff] }
 0x13b   : > { %v7031_v49 = vpop.f32.mrf.mxu1  ;;  %v7033_v0 = vpop.f32.mrf.mxu0  ;;  %5442 = vmatmul.mubr.msk.bf16.gmra.mxu1 %vm919_vm3, %v4852_v15  ;;  %5472 = vmatmul.mubr.msk.bf16.gmra.mxu0 %vm919_vm3, %v7757_v25 }
 0x13c   : > { %v7035_v26 = vadd.f32 %v5322_v14, %v1342_v8  ;;  %5481 = vmatprep.mubr.msk.bf16.mxu1 %vm919_vm3, %v7758_v4  ;;  %5475 = vmatprep.mubr.msk.bf16.mxu0 %vm919_vm3, %v7759_v35  ;;  %v7764_v14 = vld [vmem:[#allocation84_spill] sm:$0xff]  ;;  %v7766_v35 = vld [vmem:[#allocation89_spill] sm:$0xff] }
 0x13d   : > { %v5291_v43 = vpop.f32.mrf.mxu1  ;;  %v5325_v41 = vpop.f32.mrf.mxu0 }
 0x13e   : > { %v1355_v3 = vadd.f32 %v5291_v43, %v6937_v54 }
 0x13f   : > { %v1346_v1 = vpop.f32.mrf.mxu1  ;;  %v1928_v38 = vpop.f32.mrf.mxu0 }
 0x140   : > { %v7056_v22 = vadd.f32 %v5325_v41, %v1355_v3  ;;  %v1347_v18 = vadd.f32 %v1346_v1, %v6939_v19  ;;  %v7761_v19 = vld [vmem:[#allocation78_spill] sm:$0xff] }
 0x141   : > { %v5292_v54 = vpop.f32.mrf.mxu1  ;;  %v5326_v50 = vpop.f32.mrf.mxu0  ;;  %v7765_v3 = vld [vmem:[#allocation86_spill] sm:$0xff] }
 0x142   : > { %v7059_v61 = vadd.f32 %v1928_v38, %v1347_v18  ;;  %v1358_v39 = vadd.f32 %v5292_v54, %v6944_v60 }
 0x143   : > { %v7064_v21 = vpop.f32.mrf.mxu1  ;;  %v7066_v51 = vpop.f32.mrf.mxu0  ;;  %5482 = vmatmul.mubr.msk.bf16.vlgmr.msra.gmra.mxu1 %vm919_vm3, %v7760_v6  ;;  %5476 = vmatmul.mubr.msk.bf16.gmra.mxu0 %vm919_vm3, %v4870_v44  ;;  %v7769_v6 = vld [vmem:[#allocation11_spill] sm:$0xff] }
 0x144   : > { %v7068_v62 = vadd.f32 %v5326_v50, %v1358_v39  ;;  %5485 = vmatprep.mubr.msk.bf16.mxu1 %vm919_vm3, %v7762_v2  ;;  %5515 = vmatprep.mubr.msk.bf16.mxu0 %vm919_vm3, %v7763_v33  ;;  %v7767_v39 = vld [vmem:[#allocation9_spill] sm:$0xff]  ;;  %v7770_v2 = vld [vmem:[#allocation22_spill] sm:$0xff] }
 0x145   : > { %v5295_v31 = vpop.f32.mrf.mxu1  ;;  %v5329_v46 = vpop.f32.mrf.mxu0 }
 0x146   : > { %v1371_v52 = vadd.f32 %v5295_v31, %v7761_v19 }
 0x147   : > { %v1362_v60 = vpop.f32.mrf.mxu1  ;;  %v1944_v59 = vpop.f32.mrf.mxu0 }
 0x148   : > { %v7078_v27 = vadd.f32 %v5329_v46, %v1371_v52  ;;  %v1363_v15 = vadd.f32 %v1362_v60, %v7764_v14  ;;  %v7768_v46 = vld [vmem:[#allocation21_spill] sm:$0xff] }
 0x149   : > { %v5296_v8 = vpop.f32.mrf.mxu1  ;;  %v5330_v43 = vpop.f32.mrf.mxu0 }
 0x14a   : > { %v7081_v41 = vadd.f32 %v1944_v59, %v1363_v15  ;;  %v1374_v25 = vadd.f32 %v5296_v8, %v7765_v3 }
 0x14b   : > { %v1365_v4 = vpop.f32.mrf.mxu1  ;;  %v1947_v1 = vpop.f32.mrf.mxu0  ;;  %5486 = vmatmul.mubr.msk.bf16.gmra.mxu1 %vm919_vm3, %v7767_v39  ;;  %5516 = vmatmul.mubr.msk.bf16.vlgmr.msra.gmra.mxu0 %vm919_vm3, %v7768_v46 }
 0x14c   : > { %v7084_v38 = vadd.f32 %v5330_v43, %v1374_v25  ;;  %v1366_v18 = vadd.f32 %v1365_v4, %v7766_v35  ;;  %5489 = vmatprep.mubr.msk.bf16.mxu1 %vm919_vm3, %v7769_v6  ;;  %5519 = vmatprep.mubr.msk.bf16.mxu0 %vm919_vm3, %v7770_v2  ;;  %v7771_v35 = vld [vmem:[#allocation13_spill] sm:$0xff] }
 0x14d   : > { %v5299_v54 = vpop.f32.mrf.mxu1  ;;  %v5333_v50 = vpop.f32.mrf.mxu0 }
 0x14e   : > { %v7089_v44 = vadd.f32 %v1947_v1, %v1366_v18  ;;  %v1387_v31 = vadd.f32 %v5299_v54, %v6738_v57  ;;  %v7772_v54 = vld [vmem:[#allocation25_spill] sm:$0xff] }
 0x14f   : > { %v1378_v19 = vpop.f32.mrf.mxu1  ;;  %v1960_v52 = vpop.f32.mrf.mxu0 }
 0x150   : > { %v7098_v60 = vadd.f32 %v5333_v50, %v1387_v31  ;;  %v1379_v59 = vadd.f32 %v1378_v19, %v6760_v7  ;;  %v7773_v50 = vld [vmem:[#allocation15_spill] sm:$0xff]  ;;  %v7774_v31 = vld [vmem:[#allocation26_spill] sm:$0xff] }
 0x151   : > { %v5300_v33 = vpop.f32.mrf.mxu1  ;;  %v5334_v14 = vpop.f32.mrf.mxu0 }
 0x152   : > { %v7101_v15 = vadd.f32 %v1960_v52, %v1379_v59  ;;  %v1390_v57 = vadd.f32 %v5300_v33, %v6785_v48 }
 0x153   : > { %v1381_v8 = vpop.f32.mrf.mxu1  ;;  %v1963_v43 = vpop.f32.mrf.mxu0  ;;  %5490 = vmatmul.mubr.msk.bf16.gmra.mxu1 %vm919_vm3, %v7771_v35  ;;  %5520 = vmatmul.mubr.msk.bf16.gmra.mxu0 %vm919_vm3, %v7772_v54 }
 0x154   : > { %v7104_v3 = vadd.f32 %v5334_v14, %v1390_v57  ;;  %v1382_v25 = vadd.f32 %v1381_v8, %v6816_v12  ;;  %5493 = vmatprep.mubr.msk.bf16.mxu1 %vm919_vm3, %v7773_v50  ;;  %5523 = vmatprep.mubr.msk.bf16.mxu0 %vm919_vm3, %v7774_v31 }
 0x155   : > { %v5303_v4 = vpop.f32.mrf.mxu1  ;;  %v5337_v1 = vpop.f32.mrf.mxu0 }
 0x156   : > { %v7109_v18 = vadd.f32 %v1963_v43, %v1382_v25  ;;  %v1403_v7 = vadd.f32 %v5303_v4, %v6845_v56  ;;  %v7775_v43 = vld [vmem:[#allocation2_spill] sm:$0xff]  ;;  %v7776_v4 = vld [vmem:[#allocation29_spill] sm:$0xff] }
 0x157   : > { %v1394_v48 = vpop.f32.mrf.mxu1  ;;  %v1976_v39 = vpop.f32.mrf.mxu0 }
 0x158   : > { %v7118_v12 = vadd.f32 %v5337_v1, %v1403_v7  ;;  %v1395_v46 = vadd.f32 %v1394_v48, %v6882_v16 }
 0x159   : > { %v5304_v6 = vpop.f32.mrf.mxu1  ;;  %v5338_v19 = vpop.f32.mrf.mxu0 }
 0x15a   : > { %v7121_v52 = vadd.f32 %v1976_v39, %v1395_v46  ;;  %v1406_v56 = vadd.f32 %v5304_v6, %v6908_v32  ;;  %v7777_v32 = vld [vmem:[#allocation4_spill] sm:$0xff]  ;;  %v478_v46 = vld [vmem:[%s7040_s22 + $0x8] sm:$0xf]  ;;  %v479_v6 = vld [vmem:[%s7040_s22 + $0xc] sm:$0xf] }
 0x15b   : > { %v1397_v2 = vpop.f32.mrf.mxu1  ;;  %v1979_v59 = vpop.f32.mrf.mxu0  ;;  %5494 = vmatmul.mubr.msk.bf16.gmra.mxu1 %vm919_vm3, %v7775_v43  ;;  %5524 = vmatmul.mubr.msk.bf16.gmra.mxu0 %vm919_vm3, %v7776_v4  ;;  %v3864_v4 = vshrl.u32 %v478_v46, 16 }
 0x15c   : > { %v7124_v33 = vadd.f32 %v5338_v19, %v1406_v56  ;;  %v1398_v14 = vadd.f32 %v1397_v2, %v6933_v45  ;;  %5497 = vmatprep.mubr.msk.bf16.mxu1 %vm919_vm3, %v7777_v32  ;;  %v7778_v45 = vld [vmem:[#allocation30_spill] sm:$0xff]  ;;  %v3873_v32 = vshll.u32 %v479_v6, 16 }
 0x15d   : > { %v5307_v57 = vpop.f32.mrf.mxu1  ;;  %v5341_v8 = vpop.f32.mrf.mxu0  ;;  %5527 = vmatprep.mubr.msk.bf16.mxu0 %vm919_vm3, %v7778_v45 }
 0x15e   : > { %v7129_v16 = vadd.f32 %v1979_v59, %v1398_v14  ;;  %v1419_v25 = vadd.f32 %v5307_v57, %v6941_v29  ;;  %v7779_v14 = vld [vmem:[#allocation88_spill] sm:$0xff] }
 0x15f   : > { %v1410_v1 = vpop.f32.mrf.mxu1  ;;  %v1992_v35 = vpop.f32.mrf.mxu0  ;;  %v1302_v57 = vadd.f32 %v6980_v10, %v7779_v14  ;;  %v7783_v10 = vld [vmem:[#allocation34_spill] sm:$0xff] }
 0x160   : > { %v7138_v7 = vadd.f32 %v5341_v8, %v1419_v25  ;;  %v1411_v54 = vadd.f32 %v1410_v1, %v6949_v24  ;;  %v7780_v8 = vld [vmem:[#allocation6_spill] sm:$0xff]  ;;  %v7782_v25 = vld [vmem:[#allocation8_spill] sm:$0xff]  ;;  %v3877_v1 = vshrl.u32 %v479_v6, 16 }
 0x161   : > { %v5308_v50 = vpop.f32.mrf.mxu1  ;;  %v5342_v48 = vpop.f32.mrf.mxu0 }
 0x162   : > { %v7141_v39 = vadd.f32 %v1992_v35, %v1411_v54  ;;  %v1422_v29 = vadd.f32 %v5308_v50, %v6957_v58  ;;  %v7781_v58 = vld [vmem:[#allocation33_spill] sm:$0xff] }
 0x163   : > { %v1413_v31 = vpop.f32.mrf.mxu1  ;;  %v1995_v2 = vpop.f32.mrf.mxu0  ;;  %5498 = vmatmul.mubr.msk.bf16.gmra.mxu1 %vm919_vm3, %v7780_v8  ;;  %5528 = vmatmul.mubr.msk.bf16.gmra.mxu0 %vm919_vm3, %v7781_v58 }
 0x164   : > { %v7146_v19 = vadd.f32 %v5342_v48, %v1422_v29  ;;  %v1414_v56 = vadd.f32 %v1413_v31, %v6961_v47  ;;  %5501 = vmatprep.mubr.msk.bf16.mxu1 %vm919_vm3, %v7782_v25  ;;  %v3867_v47 = vshll.u32 %v478_v46, 16  ;;  %5531 = vmatprep.mubr.msk.bf16.mxu0 %vm919_vm3, %v7783_v10  ;;  %v3866_v48 = vrot.slane %v3864_v4, 4 }
 0x165   : > { %v5347_v59 = vpop.f32.mrf.mxu1  ;;  %v3875_v31 = vrot.slane %v3873_v32, 5  ;;  %v4095_v4 = vshll.u32 %v7051_v28, 16  ;;  %v4101_v10 = vshll.u32 %v7054_v36, 16 }
 0x166   : > { %v7153_v24 = vadd.f32 %v1995_v2, %v1414_v56  ;;  %v2335_v43 = vadd.f32 %v5347_v59, %v6974_v17  ;;  %v2008_v17 = vadd.f32 %v6982_v30, %v1302_v57  ;;  %v7165_v29 = vrot.slane %v3867_v47, 5  ;;  %v480_v59 = vld [vmem:[%s7040_s22 + $0x10] sm:$0x1]  ;;  %v7784_v57 = vld [vmem:[#allocation10_spill] sm:$0xff]  ;;  %v7785_v47 = vld [vmem:[#allocation37_spill] sm:$0xff] }
 0x167   : > { %v2206_v35 = vpop.f32.mrf.mxu1  ;;  %v3879_v56 = vrot.slane %v3877_v1, 4  ;;  %v1318_v30 = vadd.f32 %v7004_v23, %v6795_v37 }
 0x168   : > { %v2333_v45 = vadd.f32 %v2206_v35, %v6977_v11  ;;  %v4092_v11 = vshrl.u32 %v7051_v28, 16  ;;  %v3870_v32 = vor.u32 %v7165_v29, %v3866_v48  ;;  %v3883_v35 = vshll.u32 %v480_v59, 16 }
 0x169   : > { %v5348_v54 = vpop.f32.mrf.mxu1  ;;  %v5381_v2 = vpop.f32.mrf.mxu0  ;;  %v3880_v1 = vor.u32 %v3879_v56, %v3875_v31 }
 0x16a   : > { %v2336_v50 = vadd.f32 %v5348_v54, %v6984_v53  ;;  %v7168_v6 = vadd.f32 %v5381_v2, %v2335_v43  ;;  %v7786_v43 = vld [vmem:[#allocation12_spill] sm:$0xff]  ;;  %v7787_v54 = vld [vmem:[#allocation38_spill] sm:$0xff]  ;;  %v4094_v59 = vrot.slane %v4092_v11, 4 }
 0x16b   : > { %v2209_v46 = vpop.f32.mrf.mxu1  ;;  %v2884_v8 = vpop.f32.mrf.mxu0  ;;  %5502 = vmatmul.mubr.msk.bf16.gmra.mxu1 %vm919_vm3, %v7784_v57  ;;  %5532 = vmatmul.mubr.msk.bf16.gmra.mxu0 %vm919_vm3, %v7785_v47  ;;  %v3885_v57 = vrot.slane %v3883_v35, 5  ;;  %v4097_v47 = vrot.slane %v4095_v4, 5  ;;  %v7791_v4 = vld [vmem:[#allocation42_spill] sm:$0xff] }
 0x16c   : > { %v2334_v14 = vadd.f32 %v2209_v46, %v2008_v17  ;;  %v7175_v53 = vadd.f32 %v2884_v8, %v2333_v45  ;;  %5505 = vmatprep.mubr.msk.bf16.mxu1 %vm919_vm3, %v7786_v43  ;;  %v4105_v45 = vshrl.u32 %v7054_v36, 16  ;;  %5535 = vmatprep.mubr.msk.bf16.mxu0 %vm919_vm3, %v7787_v54  ;;  %v2012_v46 = vadd.f32 %v7006_v40, %v1318_v30  ;;  %v7790_v40 = vld [vmem:[#allocation16_spill] sm:$0xff] }
 0x16d   : > { %v5351_v58 = vpop.f32.mrf.mxu1  ;;  %v5382_v37 = vpop.f32.mrf.mxu0  ;;  %v3871_v8 = vrot.slane %v3870_v32, 4  ;;  %v4103_v43 = vrot.slane %v4101_v10, 5  ;;  %v4098_v11 = vor.u32 %v4097_v47, %v4094_v59 }
 0x16e   : > { %v2339_v25 = vadd.f32 %v5351_v58, %v6998_v63  ;;  %v7188_v63 = vadd.f32 %v5382_v37, %v2336_v50  ;;  %v3881_v58 = vrot.slane %v3880_v1, 4  ;;  %v4107_v54 = vrot.slane %v4105_v45, 4  ;;  %v7788_v37 = vld [vmem:[#allocation14_spill] sm:$0xff] }
 0x16f   : > { %v2222_v23 = vpop.f32.mrf.mxu1  ;;  %v2887_v17 = vpop.f32.mrf.mxu0  ;;  %v1334_v1 = vadd.f32 %v7031_v49, %v6914_v13 }
 0x170   : > { %v2337_v28 = vadd.f32 %v2222_v23, %v7001_v20  ;;  %v7192_v48 = vadd.f32 %v2887_v17, %v2334_v14  ;;  %v7789_v20 = vld [vmem:[#allocation41_spill] sm:$0xff]  ;;  %v3886_v14 = vsel %vm5738_vm4, %v3881_v58, %v3885_v57  ;;  %v4108_v30 = vor.u32 %v4107_v54, %v4103_v43 }
 0x171   : > { %v5352_v2 = vpop.f32.mrf.mxu1  ;;  %v2016_v57 = vadd.f32 %v7033_v0, %v1334_v1  ;;  %v7793_v54 = vld [vmem:[#allocation45_spill] sm:$0xff] }
 0x172   : > { %v2340_v56 = vadd.f32 %v5352_v2, %v7008_v55  ;;  %v3876_v55 = vsel %vm5738_vm4, %v3871_v8, %v3875_v31  ;;  %v4109_v59 = vrot.slane %v4108_v30, 4 }
 0x173   : > { %v2225_v36 = vpop.f32.mrf.mxu1  ;;  %5506 = vmatmul.mubr.msk.bf16.gmra.mxu1 %vm919_vm3, %v7788_v37  ;;  %5536 = vmatmul.mubr.msk.bf16.gmra.mxu0 %vm919_vm3, %v7789_v20  ;;  %v4888_v10 = vcombine.low %v3876_v55, %v3886_v14  ;;  %v1350_v20 = vadd.f32 %v7064_v21, %v6959_v9 }
 0x174   : > { %v2338_v50 = vadd.f32 %v2225_v36, %v2012_v46  ;;  %5509 = vmatprep.mubr.msk.bf16.mxu1 %vm919_vm3, %v7790_v40  ;;  %5539 = vmatprep.mubr.msk.bf16.mxu0 %vm919_vm3, %v7791_v4  ;;  %v4099_v46 = vrot.slane %v4098_v11, 4  ;;  %v4110_v0 = vsel %vm5738_vm4, %v4109_v59, %v7165_v29 }
 0x175   : > { %v5355_v32 = vpop.f32.mrf.mxu1  ;;  %v5385_v35 = vpop.f32.mrf.mxu0 }
 0x176   : > { %v2343_v23 = vadd.f32 %v5355_v32, %v7023_v42  ;;  %v7210_v45 = vadd.f32 %v5385_v35, %v2339_v25  ;;  %v7792_v25 = vld [vmem:[#allocation43_spill] sm:$0xff] }
 0x177   : > { %v2238_v17 = vpop.f32.mrf.mxu1  ;;  %v2900_v31 = vpop.f32.mrf.mxu0 }
 0x178   : > { %v2341_v2 = vadd.f32 %v2238_v17, %v7028_v5  ;;  %v7213_v8 = vadd.f32 %v2900_v31, %v2337_v28  ;;  %v4104_v28 = vsel %vm5738_vm4, %v4099_v46, %v4103_v43 }
 0x179   : > { %v5356_v58 = vpop.f32.mrf.mxu1  ;;  %v5386_v36 = vpop.f32.mrf.mxu0 }
 0x17a   : > { %v2344_v13 = vadd.f32 %v5356_v58, %v7035_v26  ;;  %v7218_v42 = vadd.f32 %v5386_v36, %v2340_v56  ;;  %v4906_v56 = vcombine.low %v4104_v28, %v4110_v0 }
 0x17b   : > { %5510 = vmatmul.mubr.msk.bf16.gmra.mxu1 %vm919_vm3, %v4888_v10  ;;  %v2241_v49 = vpop.f32.mrf.mxu1  ;;  %5540 = vmatmul.mubr.msk.bf16.gmra.mxu0 %vm919_vm3, %v7792_v25  ;;  %v2903_v47 = vpop.f32.mrf.mxu0 }
 0x17c   : > { %v2342_v5 = vadd.f32 %v2241_v49, %v2016_v57  ;;  %5543 = vmatprep.mubr.msk.bf16.mxu0 %vm919_vm3, %v7793_v54  ;;  %v7229_v26 = vadd.f32 %v2903_v47, %v2338_v50  ;;  %v2020_v50 = vadd.f32 %v7066_v51, %v1350_v20 }
 0x180   : > { %v5359_v37 = vpop.f32.mrf.mxu1 }
 0x181   : > { %v2347_v55 = vadd.f32 %v5359_v37, %v7056_v22 }
 0x182   : > { %v5389_v40 = vpop.f32.mrf.mxu0  ;;  %v2254_v11 = vpop.f32.mrf.mxu1 }
 0x183   : > { %v7234_v14 = vadd.f32 %v5389_v40, %v2343_v23  ;;  %5544 = vmatmul.mubr.msk.bf16.gmra.mxu0 %vm919_vm3, %v4906_v56  ;;  %v2345_v30 = vadd.f32 %v2254_v11, %v7059_v61 }
 0x184   : > { %v2916_v43 = vpop.f32.mrf.mxu0  ;;  %v5360_v29 = vpop.f32.mrf.mxu1 }
 0x185   : > { %v7238_v34 = vadd.f32 %v2916_v43, %v2341_v2  ;;  %v2348_v32 = vadd.f32 %v5360_v29, %v7068_v62 }
 0x186   : > { %v5390_v4 = vpop.f32.mrf.mxu0  ;;  %v2257_v21 = vpop.f32.mrf.mxu1 }
 0x187   : > { %v7242_v9 = vadd.f32 %v5390_v4, %v2344_v13  ;;  %v2346_v1 = vadd.f32 %v2257_v21, %v2020_v50 }
 0x188   : > { %v2919_v22 = vpop.f32.mrf.mxu0 }
 0x189   : > { %v7244_v35 = vadd.f32 %v2919_v22, %v2342_v5 }
 0x18d   : > { %v5363_v23 = vpop.f32.mrf.mxu1 }
 0x18e   : > { %v2351_v10 = vadd.f32 %v5363_v23, %v7078_v27 }
 0x18f   : > { %v2270_v61 = vpop.f32.mrf.mxu1 }
 0x190   : > { %v5393_v17 = vpop.f32.mrf.mxu0  ;;  %v2349_v2 = vadd.f32 %v2270_v61, %v7081_v41 }
 0x191   : > { %v7247_v31 = vadd.f32 %v5393_v17, %v2347_v55  ;;  %v5364_v46 = vpop.f32.mrf.mxu1 }
 0x192   : > { %v2932_v51 = vpop.f32.mrf.mxu0  ;;  %v2352_v62 = vadd.f32 %v5364_v46, %v7084_v38 }
 0x193   : > { %v7250_v59 = vadd.f32 %v2932_v51, %v2345_v30  ;;  %v2273_v57 = vpop.f32.mrf.mxu1 }
 0x194   : > { %v5394_v58 = vpop.f32.mrf.mxu0  ;;  %v2350_v13 = vadd.f32 %v2273_v57, %v7089_v44 }
 0x195   : > { %v7253_v36 = vadd.f32 %v5394_v58, %v2348_v32 }
 0x196   : > { %v2935_v49 = vpop.f32.mrf.mxu0 }
 0x197   : > { %v7256_v27 = vadd.f32 %v2935_v49, %v2346_v1 }
 0x19b   : > { %v5397_v25 = vpop.f32.mrf.mxu0 }
 0x19c   : > { %v5367_v47 = vpop.f32.mrf.mxu1  ;;  %v7258_v5 = vadd.f32 %v5397_v25, %v2351_v10 }
 0x19d   : > { %v2355_v41 = vadd.f32 %v5367_v47, %v7098_v60  ;;  %v2948_v54 = vpop.f32.mrf.mxu0 }
 0x19e   : > { %v2286_v28 = vpop.f32.mrf.mxu1  ;;  %v7261_v0 = vadd.f32 %v2948_v54, %v2349_v2 }
 0x19f   : > { %v2353_v38 = vadd.f32 %v2286_v28, %v7101_v15  ;;  %v5398_v56 = vpop.f32.mrf.mxu0 }
 0x1a0   : > { %v5368_v37 = vpop.f32.mrf.mxu1  ;;  %v7264_v20 = vadd.f32 %v5398_v56, %v2352_v62 }
 0x1a1   : > { %v2356_v44 = vadd.f32 %v5368_v37, %v7104_v3  ;;  %v2951_v40 = vpop.f32.mrf.mxu0 }
 0x1a2   : > { %v2289_v55 = vpop.f32.mrf.mxu1  ;;  %v7267_v11 = vadd.f32 %v2951_v40, %v2350_v13 }
 0x1a3   : > { %v2354_v43 = vadd.f32 %v2289_v55, %v7109_v18 }
 0x1a8   : > { %v5371_v30 = vpop.f32.mrf.mxu1 }
 0x1a9   : > { %v2359_v60 = vadd.f32 %v5371_v30, %v7118_v12 }
 0x1aa   : > { %v5401_v29 = vpop.f32.mrf.mxu0  ;;  %v2302_v50 = vpop.f32.mrf.mxu1 }
 0x1ab   : > { %v7271_v4 = vadd.f32 %v5401_v29, %v2355_v41  ;;  %v2357_v15 = vadd.f32 %v2302_v50, %v7121_v52 }
 0x1ac   : > { %v2964_v32 = vpop.f32.mrf.mxu0  ;;  %v5372_v21 = vpop.f32.mrf.mxu1 }
 0x1ad   : > { %v7274_v22 = vadd.f32 %v2964_v32, %v2353_v38  ;;  %v2360_v3 = vadd.f32 %v5372_v21, %v7124_v33 }
 0x1ae   : > { %v5402_v1 = vpop.f32.mrf.mxu0  ;;  %v2305_v23 = vpop.f32.mrf.mxu1 }
 0x1af   : > { %v7277_v10 = vadd.f32 %v5402_v1, %v2356_v44  ;;  %v2358_v18 = vadd.f32 %v2305_v23, %v7129_v16 }
 0x1b0   : > { %v2967_v17 = vpop.f32.mrf.mxu0 }
 0x1b1   : > { %v7280_v12 = vadd.f32 %v2967_v17, %v2354_v43 }
 0x1b6   : > { %v5405_v61 = vpop.f32.mrf.mxu0  ;;  %v5375_v2 = vpop.f32.mrf.mxu1 }
 0x1b7   : > { %v7282_v51 = vadd.f32 %v5405_v61, %v2359_v60  ;;  %v2363_v52 = vadd.f32 %v5375_v2, %v7138_v7 }
 0x1b8   : > { %v2980_v46 = vpop.f32.mrf.mxu0  ;;  %v2318_v62 = vpop.f32.mrf.mxu1 }
 0x1b9   : > { %v7285_v58 = vadd.f32 %v2980_v46, %v2357_v15  ;;  %v2361_v33 = vadd.f32 %v2318_v62, %v7141_v39 }
 0x1ba   : > { %v5406_v57 = vpop.f32.mrf.mxu0  ;;  %v5376_v13 = vpop.f32.mrf.mxu1 }
 0x1bb   : > { %v7288_v49 = vadd.f32 %v5406_v57, %v2360_v3  ;;  %v2364_v16 = vadd.f32 %v5376_v13, %v7146_v19 }
 0x1bc   : > { %v2983_v25 = vpop.f32.mrf.mxu0  ;;  %v2321_v47 = vpop.f32.mrf.mxu1 }
 0x1bd   : > { %7794 = vst [vmem:[#allocation46_spill] sm:$0xff] %v7288_v49  ;;  %v7291_v41 = vadd.f32 %v2983_v25, %v2358_v18  ;;  %v2362_v54 = vadd.f32 %v2321_v47, %v7153_v24 }
 0x1bf   : > { %7795 = vst [vmem:[#allocation51_spill] sm:$0xff] %v7291_v41 }
 0x1c3   : > { %v5415_v28 = vpop.f32.mrf.mxu1  ;;  %v5409_v7 = vpop.f32.mrf.mxu0 }
 0x1c4   : > { %v3627_v38 = vadd.f32 %v5415_v28, %v7168_v6  ;;  %v7295_v56 = vadd.f32 %v5409_v7, %v2363_v52 }
 0x1c5   : > { %v3498_v37 = vpop.f32.mrf.mxu1  ;;  %v2996_v39 = vpop.f32.mrf.mxu0 }
 0x1c6   : > { %v3625_v44 = vadd.f32 %v3498_v37, %v7175_v53  ;;  %v7298_v40 = vadd.f32 %v2996_v39, %v2361_v33 }
 0x1c7   : > { %v7300_v55 = vpop.f32.mrf.mxu1  ;;  %v5410_v19 = vpop.f32.mrf.mxu0 }
 0x1c8   : > { %v7302_v43 = vadd.f32 %v5410_v19, %v2364_v16 }
 0x1c9   : > { %v7304_v30 = vpop.f32.mrf.mxu1  ;;  %v2999_v24 = vpop.f32.mrf.mxu0 }
 0x1ca   : > { %7796 = vst [vmem:[#allocation52_spill] sm:$0xff] %v7302_v43  ;;  %v7306_v60 = vadd.f32 %v2999_v24, %v2362_v54 }
 0x1cb   : > { %v5419_v29 = vpop.f32.mrf.mxu1  ;;  %v5449_v6 = vpop.f32.mrf.mxu0 }
 0x1cc   : > { %7797 = vst [vmem:[#allocation53_spill] sm:$0xff] %v7306_v60  ;;  %v3631_v50 = vadd.f32 %v5419_v29, %v7210_v45  ;;  %v7309_v15 = vadd.f32 %v5449_v6, %v3627_v38 }
 0x1cd   : > { %v3514_v32 = vpop.f32.mrf.mxu1  ;;  %v3704_v53 = vpop.f32.mrf.mxu0 }
 0x1ce   : > { %v3629_v21 = vadd.f32 %v3514_v32, %v7213_v8  ;;  %v7312_v3 = vadd.f32 %v3704_v53, %v3625_v44 }
 0x1cf   : > { %v7314_v1 = vpop.f32.mrf.mxu1  ;;  %v7316_v23 = vpop.f32.mrf.mxu0 }
 0x1d1   : > { %v7318_v18 = vpop.f32.mrf.mxu1  ;;  %v7320_v17 = vpop.f32.mrf.mxu0 }
 0x1d3   : > { %v5423_v61 = vpop.f32.mrf.mxu1  ;;  %v5453_v2 = vpop.f32.mrf.mxu0 }
 0x1d4   : > { %v3635_v45 = vadd.f32 %v5423_v61, %v7234_v14  ;;  %v7323_v52 = vadd.f32 %v5453_v2, %v3631_v50 }
 0x1d5   : > { %v3530_v46 = vpop.f32.mrf.mxu1  ;;  %v3720_v62 = vpop.f32.mrf.mxu0 }
 0x1d6   : > { %v3633_v8 = vadd.f32 %v3530_v46, %v7238_v34  ;;  %v7326_v33 = vadd.f32 %v3720_v62, %v3629_v21 }
 0x1d7   : > { %v7328_v57 = vpop.f32.mrf.mxu1  ;;  %v7330_v13 = vpop.f32.mrf.mxu0 }
 0x1d9   : > { %v7332_v16 = vpop.f32.mrf.mxu1  ;;  %v7334_v25 = vpop.f32.mrf.mxu0 }
 0x1db   : > { %v5427_v47 = vpop.f32.mrf.mxu1  ;;  %v5457_v54 = vpop.f32.mrf.mxu0 }
 0x1dc   : > { %v3639_v14 = vadd.f32 %v5427_v47, %v7247_v31  ;;  %v7337_v28 = vadd.f32 %v5457_v54, %v3635_v45 }
 0x1dd   : > { %v3546_v7 = vpop.f32.mrf.mxu1  ;;  %v3736_v38 = vpop.f32.mrf.mxu0 }
 0x1de   : > { %v3637_v34 = vadd.f32 %v3546_v7, %v7250_v59  ;;  %v7340_v37 = vadd.f32 %v3736_v38, %v3633_v8 }
 0x1df   : > { %v7342_v39 = vpop.f32.mrf.mxu1  ;;  %v7344_v44 = vpop.f32.mrf.mxu0 }
 0x1e1   : > { %v7346_v19 = vpop.f32.mrf.mxu1  ;;  %v7348_v24 = vpop.f32.mrf.mxu0 }
 0x1e3   : > { %v5431_v29 = vpop.f32.mrf.mxu1  ;;  %v5461_v6 = vpop.f32.mrf.mxu0 }
 0x1e4   : > { %v3643_v31 = vadd.f32 %v5431_v29, %v7258_v5  ;;  %v7351_v50 = vadd.f32 %v5461_v6, %v3639_v14 }
 0x1e5   : > { %v3562_v32 = vpop.f32.mrf.mxu1  ;;  %v3752_v53 = vpop.f32.mrf.mxu0 }
 0x1e6   : > { %v3641_v59 = vadd.f32 %v3562_v32, %v7261_v0  ;;  %v7354_v21 = vadd.f32 %v3752_v53, %v3637_v34 }
 0x1e7   : > { %v7356_v61 = vpop.f32.mrf.mxu1  ;;  %v7358_v2 = vpop.f32.mrf.mxu0 }
 0x1e9   : > { %v7360_v45 = vpop.f32.mrf.mxu1  ;;  %v7362_v46 = vpop.f32.mrf.mxu0 }
 0x1eb   : > { %v5435_v62 = vpop.f32.mrf.mxu1  ;;  %v5465_v8 = vpop.f32.mrf.mxu0 }
 0x1ec   : > { %v3647_v5 = vadd.f32 %v5435_v62, %v7271_v4  ;;  %v7365_v47 = vadd.f32 %v5465_v8, %v3643_v31 }
 0x1ed   : > { %v3578_v54 = vpop.f32.mrf.mxu1  ;;  %v3768_v14 = vpop.f32.mrf.mxu0 }
 0x1ee   : > { %v3645_v0 = vadd.f32 %v3578_v54, %v7274_v22  ;;  %v7368_v7 = vadd.f32 %v3768_v14, %v3641_v59 }
 0x1ef   : > { %v7370_v38 = vpop.f32.mrf.mxu1  ;;  %v7372_v34 = vpop.f32.mrf.mxu0 }
 0x1f1   : > { %v7374_v29 = vpop.f32.mrf.mxu1  ;;  %v7376_v6 = vpop.f32.mrf.mxu0 }
 0x1f3   : > { %v5439_v32 = vpop.f32.mrf.mxu1  ;;  %v5469_v53 = vpop.f32.mrf.mxu0 }
 0x1f4   : > { %v3651_v4 = vadd.f32 %v5439_v32, %v7282_v51  ;;  %v7379_v31 = vadd.f32 %v5469_v53, %v3647_v5 }
 0x1f5   : > { %v3594_v62 = vpop.f32.mrf.mxu1  ;;  %v3784_v8 = vpop.f32.mrf.mxu0 }
 0x1f6   : > { %v3649_v22 = vadd.f32 %v3594_v62, %v7285_v58  ;;  %v7382_v59 = vadd.f32 %v3784_v8, %v3645_v0 }
 0x1f7   : > { %v7384_v54 = vpop.f32.mrf.mxu1  ;;  %v7386_v14 = vpop.f32.mrf.mxu0 }
 0x1f8   : > { %7798 = vst [vmem:[#allocation54_spill] sm:$0xff] %v7382_v59  ;;  %7799 = vst [vmem:[#allocation47_spill] sm:$0xff] %v7384_v54 }
 0x1f9   : > { %7800 = vst [vmem:[#allocation56_spill] sm:$0xff] %v7386_v14  ;;  %v7388_v60 = vpop.f32.mrf.mxu1  ;;  %v7390_v43 = vpop.f32.mrf.mxu0 }
 0x1fa   : > { %7801 = vst [vmem:[#allocation57_spill] sm:$0xff] %v7388_v60  ;;  %7802 = vst [vmem:[#allocation58_spill] sm:$0xff] %v7390_v43 }
 0x1fb   : > { %v5443_v41 = vpop.f32.mrf.mxu1  ;;  %v5473_v49 = vpop.f32.mrf.mxu0 }
 0x1fc   : > { %v3655_v51 = vadd.f32 %v5443_v41, %v7295_v56  ;;  %v7393_v5 = vadd.f32 %v5473_v49, %v3651_v4  ;;  %v3628_v56 = vadd.f32 %v7300_v55, %v7188_v63 }
 0x1fd   : > { %v3610_v32 = vpop.f32.mrf.mxu1  ;;  %v3800_v53 = vpop.f32.mrf.mxu0 }
 0x1fe   : > { %v3653_v58 = vadd.f32 %v3610_v32, %v7298_v40  ;;  %v7396_v0 = vadd.f32 %v3800_v53, %v3649_v22  ;;  %v3626_v32 = vadd.f32 %v7304_v30, %v7192_v48  ;;  %v3632_v48 = vadd.f32 %v7314_v1, %v7218_v42 }
 0x1ff   : > { %v7398_v62 = vpop.f32.mrf.mxu1  ;;  %v7400_v8 = vpop.f32.mrf.mxu0 }
 0x200   : > { %7803 = vst [vmem:[#allocation59_spill] sm:$0xff] %v7398_v62  ;;  %v3832_v63 = vadd.f32 %v7320_v17, %v3626_v32  ;;  %v3838_v42 = vadd.f32 %v7330_v13, %v3632_v48  ;;  %v3636_v48 = vadd.f32 %v7328_v57, %v7242_v9 }
 0x201   : > { %v7402_v54 = vpop.f32.mrf.mxu1  ;;  %v7404_v60 = vpop.f32.mrf.mxu0 }
 0x202   : > { %7804 = vst [vmem:[#allocation61_spill] sm:$0xff] %v7402_v54  ;;  %7805 = vst [vmem:[#allocation62_spill] sm:$0xff] %v7404_v60 }
 0x203   : > { %v5483_v43 = vpop.f32.mrf.mxu1  ;;  %v5477_v59 = vpop.f32.mrf.mxu0 }
 0x204   : > { %v7406_v14 = vadd.f32 %v5477_v59, %v3655_v51  ;;  %v4061_v53 = vadd.f32 %v5483_v43, %v7309_v15  ;;  %v3834_v59 = vadd.f32 %v7316_v23, %v3628_v56  ;;  %v7427_v43 = vld [vmem:[%s7549_s3] ss:$0 sm:$0xff] }
 0x205   : > { %v3932_v49 = vpop.f32.mrf.mxu1  ;;  %v3816_v41 = vpop.f32.mrf.mxu0 }
 0x206   : > { %7806 = vst [vmem:[#allocation63_spill] sm:$0xff] %v7406_v14  ;;  %v7410_v40 = vadd.f32 %v3816_v41, %v3653_v58  ;;  %v4059_v51 = vadd.f32 %v3932_v49, %v7312_v3  ;;  %v3630_v49 = vadd.f32 %v7318_v18, %v7229_v26 }
 0x207   : > { %v5484_v4 = vpop.f32.mrf.mxu1  ;;  %v7412_v22 = vpop.f32.mrf.mxu0 }
 0x208   : > { %v4062_v58 = vadd.f32 %v5484_v4, %v3834_v59  ;;  %v3836_v26 = vadd.f32 %v7334_v25, %v3630_v49 }
 0x209   : > { %v3935_v54 = vpop.f32.mrf.mxu1  ;;  %v7417_v62 = vpop.f32.mrf.mxu0 }
 0x20a   : > { %v4060_v23 = vadd.f32 %v3935_v54, %v3832_v63 }
 0x20b   : > { %v5487_v14 = vpop.f32.mrf.mxu1  ;;  %v5517_v60 = vpop.f32.mrf.mxu0 }
 0x20c   : > { %v4285_v55 = vadd.f32 %v5517_v60, %v4061_v53  ;;  %v4065_v4 = vadd.f32 %v5487_v14, %v7323_v52 }
 0x20d   : > { %v3948_v41 = vpop.f32.mrf.mxu1  ;;  %v4156_v30 = vpop.f32.mrf.mxu0 }
 0x20e   : > { %v4283_v15 = vadd.f32 %v4156_v30, %v4059_v51  ;;  %v4324_v60 = vadd.f32 %v7427_v43, %v4285_v55  ;;  %v4063_v51 = vadd.f32 %v3948_v41, %v7326_v33 }
 0x20f   : > { %v5488_v3 = vpop.f32.mrf.mxu1  ;;  %v5518_v17 = vpop.f32.mrf.mxu0 }
 0x210   : > { %v4286_v56 = vadd.f32 %v5518_v17, %v4062_v58  ;;  %v4322_v53 = vadd.f32 %v7427_v43, %v4283_v15  ;;  %v4066_v55 = vadd.f32 %v5488_v3, %v3838_v42  ;;  %v4356_v58 = vmax.f32 %v4324_v60, 0.0 }
 0x211   : > { %v3951_v32 = vpop.f32.mrf.mxu1  ;;  %v4159_v1 = vpop.f32.mrf.mxu0  ;;  %v3634_v17 = vadd.f32 %v7332_v16, %v7244_v35 }
 0x212   : > { %v4325_v59 = vadd.f32 %v7427_v43, %v4286_v56  ;;  %v4284_v54 = vadd.f32 %v4159_v1, %v4060_v23  ;;  %v4064_v41 = vadd.f32 %v3951_v32, %v3836_v26  ;;  %v4354_v25 = vmax.f32 %v4322_v53, 0.0 }
 0x213   : > { %v5491_v63 = vpop.f32.mrf.mxu1  ;;  %v5521_v18 = vpop.f32.mrf.mxu0  ;;  %v3842_v32 = vadd.f32 %v7344_v44, %v3636_v48 }
 0x214   : > { %v4357_v30 = vmax.f32 %v4325_v59, 0.0  ;;  %v4323_v52 = vadd.f32 %v7427_v43, %v4284_v54  ;;  %v4289_v14 = vadd.f32 %v5521_v18, %v4065_v4  ;;  %v4069_v4 = vadd.f32 %v5491_v63, %v7337_v28 }
 0x215   : > { %v3964_v13 = vpop.f32.mrf.mxu1  ;;  %v4172_v33 = vpop.f32.mrf.mxu0 }
 0x216   : > { %v5001_v15 = vpack.c.bf16 %v4357_v30, %v4356_v58  ;;  %v4355_v23 = vmax.f32 %v4323_v52, 0.0  ;;  %v4287_v3 = vadd.f32 %v4172_v33, %v4063_v51  ;;  %v4328_v57 = vadd.f32 %v7427_v43, %v4289_v14 }
 0x217   : > { %v5492_v49 = vpop.f32.mrf.mxu1  ;;  %v5522_v60 = vpop.f32.mrf.mxu0  ;;  %v4067_v35 = vadd.f32 %v3964_v13, %v7340_v37  ;;  %v3840_v51 = vadd.f32 %v7348_v24, %v3634_v17  ;;  %v3640_v30 = vadd.f32 %v7342_v39, %v7253_v36 }
 0x218   : > { %5073 = vst [vmem:[%s7445_s27 + $0x8] sm:$0xff] %v5001_v15   ;;  %v4996_v9 = vpack.c.bf16 %v4355_v23, %v4354_v25  ;;  %v4290_v56 = vadd.f32 %v5522_v60, %v4066_v55  ;;  %v4326_v53 = vadd.f32 %v7427_v43, %v4287_v3  ;;  %v4070_v18 = vadd.f32 %v5492_v49, %v3842_v32 }
 0x219   : > { %v3967_v42 = vpop.f32.mrf.mxu1  ;;  %v4175_v1 = vpop.f32.mrf.mxu0  ;;  %v4360_v55 = vmax.f32 %v4328_v57, 0.0  ;;  %v3846_v39 = vadd.f32 %v7358_v2, %v3640_v30 }
 0x21a   : > { %4997 = vst [vmem:[%s7445_s27] sm:$0xff] %v4996_v9   ;;  %v4329_v59 = vadd.f32 %v7427_v43, %v4290_v56  ;;  %v4288_v54 = vadd.f32 %v4175_v1, %v4064_v41  ;;  %v4068_v14 = vadd.f32 %v3967_v42, %v3840_v51  ;;  %v4358_v48 = vmax.f32 %v4326_v53, 0.0 }
 0x21b   : > { %v5495_v16 = vpop.f32.mrf.mxu1  ;;  %v5525_v26 = vpop.f32.mrf.mxu0  ;;  %v3638_v41 = vadd.f32 %v7346_v19, %v7256_v27 }
 0x21c   : > { %v4361_v28 = vmax.f32 %v4329_v59, 0.0  ;;  %v4327_v63 = vadd.f32 %v7427_v43, %v4288_v54  ;;  %v4293_v44 = vadd.f32 %v5525_v26, %v4069_v4  ;;  %v4073_v49 = vadd.f32 %v5495_v16, %v7351_v50 }
 0x21d   : > { %v3980_v58 = vpop.f32.mrf.mxu1  ;;  %v4188_v52 = vpop.f32.mrf.mxu0  ;;  %v3844_v56 = vadd.f32 %v7362_v46, %v3638_v41  ;;  %v3644_v59 = vadd.f32 %v7356_v61, %v7264_v20 }
 0x21e   : > { %v5011_v37 = vpack.c.bf16 %v4361_v28, %v4360_v55  ;;  %v4359_v13 = vmax.f32 %v4327_v63, 0.0  ;;  %v4291_v33 = vadd.f32 %v4188_v52, %v4067_v35  ;;  %v4332_v23 = vadd.f32 %v7427_v43, %v4293_v44 }
 0x21f   : > { %v5496_v24 = vpop.f32.mrf.mxu1  ;;  %v5526_v25 = vpop.f32.mrf.mxu0  ;;  %v4071_v27 = vadd.f32 %v3980_v58, %v7354_v21  ;;  %v3850_v61 = vadd.f32 %v7372_v34, %v3644_v59 }
 0x220   : > { %5075 = vst [vmem:[%s7445_s27 + $0x18] sm:$0xff] %v5011_v37   ;;  %v5006_v15 = vpack.c.bf16 %v4359_v13, %v4358_v48  ;;  %v4294_v3 = vadd.f32 %v5526_v25, %v4070_v18  ;;  %v4330_v60 = vadd.f32 %v7427_v43, %v4291_v33  ;;  %v4074_v42 = vadd.f32 %v5496_v24, %v3846_v39 }
 0x221   : > { %v3983_v36 = vpop.f32.mrf.mxu1  ;;  %v4191_v17 = vpop.f32.mrf.mxu0  ;;  %v4364_v32 = vmax.f32 %v4332_v23, 0.0  ;;  %v3642_v18 = vadd.f32 %v7360_v45, %v7267_v11 }
 0x222   : > { %5074 = vst [vmem:[%s7445_s27 + $0x10] sm:$0xff] %v5006_v15   ;;  %v4333_v9 = vadd.f32 %v7427_v43, %v4294_v3  ;;  %v4292_v57 = vadd.f32 %v4191_v17, %v4068_v14  ;;  %v4072_v35 = vadd.f32 %v3983_v36, %v3844_v56  ;;  %v4362_v16 = vmax.f32 %v4330_v60, 0.0 }
 0x223   : > { %v5499_v19 = vpop.f32.mrf.mxu1  ;;  %v5529_v4 = vpop.f32.mrf.mxu0  ;;  %v3848_v37 = vadd.f32 %v7376_v6, %v3642_v18  ;;  %v3648_v15 = vadd.f32 %v7370_v38, %v7277_v10  ;;  %v3646_v17 = vadd.f32 %v7374_v29, %v7280_v12  ;;  %v7807_v38 = vld [vmem:[#allocation56_spill] sm:$0xff] }
 0x224   : > { %v4365_v50 = vmax.f32 %v4333_v9, 0.0  ;;  %v4331_v1 = vadd.f32 %v7427_v43, %v4292_v57  ;;  %v4297_v2 = vadd.f32 %v5529_v4, %v4073_v49  ;;  %v4077_v58 = vadd.f32 %v5499_v19, %v7365_v47 }
 0x225   : > { %v3996_v53 = vpop.f32.mrf.mxu1  ;;  %v4204_v54 = vpop.f32.mrf.mxu0  ;;  %v3854_v56 = vadd.f32 %v7807_v38, %v3648_v15 }
 0x226   : > { %v5021_v21 = vpack.c.bf16 %v4365_v50, %v4364_v32  ;;  %v4363_v51 = vmax.f32 %v4331_v1, 0.0  ;;  %v4295_v26 = vadd.f32 %v4204_v54, %v4071_v27  ;;  %v4336_v63 = vadd.f32 %v7427_v43, %v4297_v2  ;;  %v7808_v1 = vld [vmem:[#allocation54_spill] sm:$0xff] }
 0x227   : > { %v5500_v46 = vpop.f32.mrf.mxu1  ;;  %v5530_v55 = vpop.f32.mrf.mxu0  ;;  %v4075_v11 = vadd.f32 %v3996_v53, %v7368_v7  ;;  %v7809_v2 = vld [vmem:[#allocation58_spill] sm:$0xff] }
 0x228   : > { %5077 = vst [vmem:[%s7445_s27 + $0x28] sm:$0xff] %v5021_v21   ;;  %v5016_v28 = vpack.c.bf16 %v4363_v51, %v4362_v16  ;;  %v4298_v44 = vadd.f32 %v5530_v55, %v4074_v42  ;;  %v4334_v52 = vadd.f32 %v7427_v43, %v4295_v26  ;;  %v4078_v33 = vadd.f32 %v5500_v46, %v3850_v61  ;;  %v7810_v26 = vld [vmem:[#allocation46_spill] sm:$0xff]  ;;  %v7811_v46 = vld [vmem:[#allocation47_spill] sm:$0xff] }
 0x229   : > { %v3999_v20 = vpop.f32.mrf.mxu1  ;;  %v4207_v30 = vpop.f32.mrf.mxu0  ;;  %v4368_v24 = vmax.f32 %v4336_v63, 0.0  ;;  %v3852_v53 = vadd.f32 %v7809_v2, %v3646_v17  ;;  %v3652_v18 = vadd.f32 %v7811_v46, %v7810_v26 }
 0x22a   : > { %5076 = vst [vmem:[%s7445_s27 + $0x20] sm:$0xff] %v5016_v28   ;;  %v4337_v14 = vadd.f32 %v7427_v43, %v4298_v44  ;;  %v4296_v48 = vadd.f32 %v4207_v30, %v4072_v35  ;;  %v4076_v3 = vadd.f32 %v3999_v20, %v3848_v37  ;;  %v4366_v49 = vmax.f32 %v4334_v52, 0.0  ;;  %v7812_v30 = vld [vmem:[#allocation51_spill] sm:$0xff]  ;;  %v7813_v52 = vld [vmem:[#allocation57_spill] sm:$0xff] }
 0x22b   : > { %v5503_v45 = vpop.f32.mrf.mxu1  ;;  %v5533_v13 = vpop.f32.mrf.mxu0 }
 0x22c   : > { %v4369_v47 = vmax.f32 %v4337_v14, 0.0  ;;  %v4335_v41 = vadd.f32 %v7427_v43, %v4296_v48  ;;  %v4301_v34 = vadd.f32 %v5533_v13, %v4077_v58  ;;  %v4081_v19 = vadd.f32 %v5503_v45, %v7379_v31 }
 0x22d   : > { %v4012_v25 = vpop.f32.mrf.mxu1  ;;  %v4220_v23 = vpop.f32.mrf.mxu0  ;;  %v3650_v14 = vadd.f32 %v7813_v52, %v7812_v30 }
 0x22e   : > { %v5031_v7 = vpack.c.bf16 %v4369_v47, %v4368_v24  ;;  %v4367_v36 = vmax.f32 %v4335_v41, 0.0  ;;  %v4299_v39 = vadd.f32 %v4220_v23, %v4075_v11  ;;  %v4340_v57 = vadd.f32 %v7427_v43, %v4301_v34 }
 0x22f   : > { %v5504_v6 = vpop.f32.mrf.mxu1  ;;  %v5534_v60 = vpop.f32.mrf.mxu0  ;;  %v4079_v12 = vadd.f32 %v4012_v25, %v7808_v1  ;;  %v3858_v24 = vadd.f32 %v7400_v8, %v3652_v18 }
 0x230   : > { %5079 = vst [vmem:[%s7445_s27 + $0x38] sm:$0xff] %v5031_v7   ;;  %v5026_v9 = vpack.c.bf16 %v4367_v36, %v4366_v49  ;;  %v4302_v27 = vadd.f32 %v5534_v60, %v4078_v33  ;;  %v4338_v42 = vadd.f32 %v7427_v43, %v4299_v39  ;;  %v4082_v54 = vadd.f32 %v5504_v6, %v3854_v56  ;;  %v7815_v60 = vld [vmem:[#allocation52_spill] sm:$0xff] }
 0x231   : > { %v4015_v10 = vpop.f32.mrf.mxu1  ;;  %v4223_v4 = vpop.f32.mrf.mxu0  ;;  %v4372_v35 = vmax.f32 %v4340_v57, 0.0 }
 0x232   : > { %5078 = vst [vmem:[%s7445_s27 + $0x30] sm:$0xff] %v5026_v9   ;;  %v4341_v32 = vadd.f32 %v7427_v43, %v4302_v27  ;;  %v4300_v50 = vadd.f32 %v4223_v4, %v4076_v3  ;;  %v4080_v28 = vadd.f32 %v4015_v10, %v3852_v53  ;;  %v4370_v63 = vmax.f32 %v4338_v42, 0.0  ;;  %v7814_v3 = vld [vmem:[#allocation62_spill] sm:$0xff]  ;;  %v7816_v9 = vld [vmem:[#allocation59_spill] sm:$0xff]  ;;  %v7817_v42 = vld [vmem:[#allocation53_spill] sm:$0xff] }
 0x233   : > { %v5507_v29 = vpop.f32.mrf.mxu1  ;;  %v5537_v59 = vpop.f32.mrf.mxu0  ;;  %v3856_v49 = vadd.f32 %v7814_v3, %v3650_v14  ;;  %v3656_v57 = vadd.f32 %v7816_v9, %v7815_v60  ;;  %v7819_v53 = vld [vmem:[#allocation63_spill] sm:$0xff] }
 0x234   : > { %v4373_v31 = vmax.f32 %v4341_v32, 0.0  ;;  %v4339_v16 = vadd.f32 %v7427_v43, %v4300_v50  ;;  %v4305_v21 = vadd.f32 %v5537_v59, %v4081_v19  ;;  %v4085_v13 = vadd.f32 %v5507_v29, %v7393_v5  ;;  %v7818_v32 = vld [vmem:[#allocation61_spill] sm:$0xff] }
 0x235   : > { %v4028_v51 = vpop.f32.mrf.mxu1  ;;  %v4236_v55 = vpop.f32.mrf.mxu0  ;;  %v3654_v50 = vadd.f32 %v7818_v32, %v7817_v42 }
 0x236   : > { %v5041_v44 = vpack.c.bf16 %v4373_v31, %v4372_v35  ;;  %v4371_v58 = vmax.f32 %v4339_v16, 0.0  ;;  %v4303_v20 = vadd.f32 %v4236_v55, %v4079_v12  ;;  %v4344_v45 = vadd.f32 %v7427_v43, %v4305_v21 }
 0x237   : > { %v5508_v61 = vpop.f32.mrf.mxu1  ;;  %v5538_v48 = vpop.f32.mrf.mxu0  ;;  %v4083_v15 = vadd.f32 %v4028_v51, %v7396_v0  ;;  %v3860_v46 = vadd.f32 %v7417_v62, %v3654_v50 }
 0x238   : > { %5081 = vst [vmem:[%s7445_s27 + $0x48] sm:$0xff] %v5041_v44   ;;  %v5036_v11 = vpack.c.bf16 %v4371_v58, %v4370_v63  ;;  %v4306_v37 = vadd.f32 %v5538_v48, %v4082_v54  ;;  %v4342_v41 = vadd.f32 %v7427_v43, %v4303_v20  ;;  %v4086_v36 = vadd.f32 %v5508_v61, %v3858_v24 }
 0x239   : > { %v4031_v33 = vpop.f32.mrf.mxu1  ;;  %v4239_v47 = vpop.f32.mrf.mxu0  ;;  %v4376_v39 = vmax.f32 %v4344_v45, 0.0  ;;  %v3862_v54 = vadd.f32 %v7412_v22, %v3656_v57 }
 0x23a   : > { %5080 = vst [vmem:[%s7445_s27 + $0x40] sm:$0xff] %v5036_v11   ;;  %v4345_v34 = vadd.f32 %v7427_v43, %v4306_v37  ;;  %v4304_v25 = vadd.f32 %v4239_v47, %v4080_v28  ;;  %v4084_v19 = vadd.f32 %v4031_v33, %v3856_v49  ;;  %v4374_v10 = vmax.f32 %v4342_v41, 0.0 }
 0x23b   : > { %v5511_v23 = vpop.f32.mrf.mxu1  ;;  %v5541_v7 = vpop.f32.mrf.mxu0 }
 0x23c   : > { %v4377_v5 = vmax.f32 %v4345_v34, 0.0  ;;  %v4343_v6 = vadd.f32 %v7427_v43, %v4304_v25  ;;  %v4309_v8 = vadd.f32 %v5541_v7, %v4085_v13  ;;  %v4089_v59 = vadd.f32 %v5511_v23, %v7819_v53 }
 0x23d   : > { %v4044_v17 = vpop.f32.mrf.mxu1  ;;  %v4252_v27 = vpop.f32.mrf.mxu0 }
 0x23e   : > { %v5051_v0 = vpack.c.bf16 %v4377_v5, %v4376_v39  ;;  %v4375_v38 = vmax.f32 %v4343_v6, 0.0  ;;  %v4307_v56 = vadd.f32 %v4252_v27, %v4083_v15  ;;  %v4348_v29 = vadd.f32 %v7427_v43, %v4309_v8 }
 0x23f   : > { %v5512_v4 = vpop.f32.mrf.mxu1  ;;  %v5542_v1 = vpop.f32.mrf.mxu0  ;;  %v4087_v51 = vadd.f32 %v4044_v17, %v7410_v40 }
 0x240   : > { %5083 = vst [vmem:[%s7445_s27 + $0x58] sm:$0xff] %v5051_v0   ;;  %v5046_v12 = vpack.c.bf16 %v4375_v38, %v4374_v10  ;;  %v4310_v2 = vadd.f32 %v5542_v1, %v4086_v36  ;;  %v4346_v31 = vadd.f32 %v7427_v43, %v4307_v56  ;;  %v4090_v55 = vadd.f32 %v5512_v4, %v3862_v54 }
 0x241   : > { %v4255_v35 = vpop.f32.mrf.mxu0  ;;  %v4047_v26 = vpop.f32.mrf.mxu1  ;;  %v4380_v28 = vmax.f32 %v4348_v29, 0.0 }
 0x242   : > { %5082 = vst [vmem:[%s7445_s27 + $0x50] sm:$0xff] %v5046_v12   ;;  %v4349_v16 = vadd.f32 %v7427_v43, %v4310_v2  ;;  %v4308_v21 = vadd.f32 %v4255_v35, %v4084_v19  ;;  %v4088_v20 = vadd.f32 %v4047_v26, %v3860_v46  ;;  %v4378_v61 = vmax.f32 %v4346_v31, 0.0 }
 0x243   : > { %v5545_v18 = vpop.f32.mrf.mxu0 }
 0x244   : > { %v4381_v63 = vmax.f32 %v4349_v16, 0.0  ;;  %v4347_v22 = vadd.f32 %v7427_v43, %v4308_v21  ;;  %v4313_v44 = vadd.f32 %v5545_v18, %v4089_v59 }
 0x245   : > { %v4268_v58 = vpop.f32.mrf.mxu0 }
 0x246   : > { %v5061_v30 = vpack.c.bf16 %v4381_v63, %v4380_v28  ;;  %v4379_v52 = vmax.f32 %v4347_v22, 0.0  ;;  %v4311_v14 = vadd.f32 %v4268_v58, %v4087_v51  ;;  %v4352_v62 = vadd.f32 %v7427_v43, %v4313_v44 }
 0x247   : > { %v5546_v48 = vpop.f32.mrf.mxu0 }
 0x248   : > { %5085 = vst [vmem:[%s7445_s27 + $0x68] sm:$0xff] %v5061_v30   ;;  %v5056_v40 = vpack.c.bf16 %v4379_v52, %v4378_v61  ;;  %v4314_v11 = vadd.f32 %v5546_v48, %v4090_v55  ;;  %v4350_v37 = vadd.f32 %v7427_v43, %v4311_v14  ;;  %v4384_v24 = vmax.f32 %v4352_v62, 0.0 }
 0x249   : > { %v4271_v45 = vpop.f32.mrf.mxu0 }
 0x24a   : > { %5084 = vst [vmem:[%s7445_s27 + $0x60] sm:$0xff] %v5056_v40   ;;  %v4353_v13 = vadd.f32 %v7427_v43, %v4314_v11  ;;  %v4312_v33 = vadd.f32 %v4271_v45, %v4088_v20  ;;  %v4382_v34 = vmax.f32 %v4350_v37, 0.0 }
 0x24c   : > { %v4385_v47 = vmax.f32 %v4353_v13, 0.0  ;;  %v4351_v41 = vadd.f32 %v7427_v43, %v4312_v33 }
 0x24e   : > { %v5071_v25 = vpack.c.bf16 %v4385_v47, %v4384_v24  ;;  %v4383_v15 = vmax.f32 %v4351_v41, 0.0 }
 0x250   : > { %5087 = vst [vmem:[%s7445_s27 + $0x78] sm:$0xff] %v5071_v25   ;;  %v5066_v23 = vpack.c.bf16 %v4383_v15, %v4382_v34 }
 0x252   : > { %5086 = vst [vmem:[%s7445_s27 + $0x70] sm:$0xff] %v5066_v23  }
 0x253 PF: > { %s14_s17 = sadd.s32 1, %s5641_s17   ;;  %s7820_s15 = smov %s5637_s16 }
 0x254   : > { %p11_p5 = scmp.ge.s32.totalorder %s14_s17, 4   ;;  %s7821_s16 = smov %s7823_s18 }
 0x256   :  { %13 = sbr.rel (!%p11_p5) target bundleno = 2 (0x2), region = 77 }

// kernel: convolution_stem.7
= control target key start
LH: loop header
LB: loop body
LE: loop exit
PB: predicated region body
PF: predicated region fallthrough
CT: control target
= control target key end

     0   :  { %11 = vsyncpa [#allocation3], 0  ;;  %s3301_s0 = inlined_call_operand.vmem [shape: bf16[2,6,6,128], index: 0, kind: input, shape index: {}, may-alias: {0,1}]   ;;  %s3302_s1 = inlined_call_operand.vmem [shape: bf16[2,6,6,128], index: 1, kind: input, shape index: {}, may-alias: {0,1}]   ;;  %s3303_s2 = inlined_call_operand.vmem [shape: bf16[9,128,128], index: 2, kind: input, shape index: {}]   ;;  %s3304_s3 = inlined_call_operand.vmem [shape: f32[1,128], index: 3, kind: input, shape index: {}]   ;;  %s3305_s4 = inlined_call_operand.vmem [shape: bf16[128,128], index: 4, kind: input, shape index: {}]   ;;  %s3306_s5 = inlined_call_operand.vmem [shape: f32[1,128], index: 5, kind: input, shape index: {}]   ;;  %s3307_s6 = inlined_call_operand.hbm [shape: f32[2,2,2,128], index: 6, kind: output, shape index: {}]  }
   0x1   :  { %13 = vsyncpa [#allocation3 + $0x1], 0  ;;  %s2707_s21 = smov 0   ;;  %s2709_s22 = smov 0  }
   0x2   :  { %s2711_s23 = smov 0   ;;  %s2713_s24 = smov 0  }
   0x3   :  { %s2715_s25 = smov 0   ;;  %s2717_s26 = smov 0  }
   0x4 LB: > { %s1914_s27 = sadd.s32 4294967295, %s2663_s26   ;;  %s1915_s28 = sadd.s32 4294967294, %s2663_s26   ;;  %s2663_s26 = sphi %s2717_s26, %s19_s26   ;;  %s2659_s25 = sphi %s2715_s25, %s3318_s25   ;;  %s2655_s24 = sphi %s2713_s24, %s3317_s24   ;;  %s2651_s23 = sphi %s2711_s23, %s3316_s23   ;;  %s2647_s22 = sphi %s2709_s22, %s3315_s22   ;;  %s2643_s21 = sphi %s2707_s21, %s3314_s21  }
   0x5   : > { %s31_s29 = sadd.s32 1, %s2659_s25  ;;  %s184_s30 = sadd.s32 1, %s2651_s23 }
   0x6   : > { %p33_p0 = scmp.ge.s32.totalorder %s31_s29, 2  ;;  %p194_p1 = scmp.ne.s32.totalorder %s2651_s23, %s2647_s22 }
   0x7   : > { %p195_p2 = scmp.eq.s32.totalorder %s1914_s27, 1  ;;  %p200_p3 = scmp.ne.s32.totalorder %s2647_s22, %s2643_s21 }
   0x8   : > { %s3320_s29 = smov (%p33_p0, %s31_s29), 0  ;;  %p201_p5 = scmp.eq.s32.totalorder %s1915_s28, 1 }
   0x9   : > { %p2747_p4 = por %p195_p2, %p194_p1  ;;  %s179_s8 = ssub.s32 %s2659_s25, %s3320_s29 }
   0xa   : > { %p1918_p6 = scmp.ge.s32.totalorder %s2663_s26, 1  ;;  %p182_p7 = scmp.eq.s32.totalorder %s179_s8, 0 }
   0xb   : > { %p2754_p8 = por %p201_p5, %p200_p3  ;;  %p267_p9 = scmp.lt.s32.totalorder %s2663_s26, 3 }
   0xc   : > { %s2760_s10 = scalar_select %p182_p7, %s2651_s23, %s184_s30  }
   0xd   : > { %p268_p10 = pnand %p1918_p6, %p267_p9 }
   0xe   : > { %p320_p11 = scmp.lt.s32.totalorder (!%p268_p10), %s2655_s24, 1  ;;  %s312_s15 = sand.u32 (!%p268_p10), 1, %s2647_s22  }
   0xf   : > { %271 = sbr.rel (%p268_p10) target bundleno = 595 (0x253), region = 44  ;;  %s1919_s16 = sshll.u32 (!%p268_p10), %s312_s15, 2 }
  0x10   : > { %s314_s20 = scalar_lea.vmem (!%p268_p10), [#allocation2], %s1919_s16  ;;  %s2150_s28 = sshll.u32 (!%p268_p10), %s2655_s24, 6 }
  0x11   : > { %s3254_s11 = scalar_lea.hbm (!%p268_p10), %s3307_s6, %s2150_s28  ;;  %s3256_s12 = scalar_lea.sflag (!%p268_p10), [#allocation3], %s312_s15 }
  0x14   : > { %v2505_v0 = vld [vmem:[%s3303_s2 + $0x78] sm:$0xff]   ;;  %v2665_v1 = vmov 0.0   ;;  %v2507_v3 = vld [vmem:[%s3303_s2 + $0x70] sm:$0xff]   ;;  %vm2666_vm0 = vmmov 0   ;;  %s321_s19 = scalar_select %p320_p11, %s2655_s24, 1  ;;  %v2509_v5 = vld [vmem:[%s3303_s2 + $0x68] sm:$0xff]   ;;  %v373_v9 = vlaneseq }
  0x15   : > { %2241 = vmatprep.subr.bf16.mxu0 %v2665_v1  ;;  %2261 = vmatprep.subr.bf16.mxu1 %v2665_v1  ;;  %v2506_v2 = vld [vmem:[%s3303_s2 + $0x38] sm:$0xff]   ;;  %v2508_v4 = vld [vmem:[%s3303_s2 + $0x30] sm:$0xff]   ;;  %v2510_v6 = vld [vmem:[%s3303_s2 + $0x28] sm:$0xff]   ;;  %vm416_vm1 = vsmask.f32 256 }
  0x16   : > { %2242 = vmatpush3.bf16.msra.mxu0 %v2505_v0  ;;  %2257 = vmatprep.mubr.msk.bf16.mxu0 %vm2666_vm0, %v2665_v1  ;;  %s2441_s8 = smul.u32 24, %s321_s19  ;;  %v2511_v7 = vld [vmem:[%s3303_s2 + $0x60] sm:$0xff]   ;;  %v2513_v10 = vld [vmem:[%s3303_s2 + $0x58] sm:$0xff]   ;;  %v2515_v12 = vld [vmem:[%s3303_s2 + $0x50] sm:$0xff]   ;;  %v2820_v15 = vshrl.u32 %v373_v9, 7 }
  0x17   : > { %2262 = vmatpush3.bf16.msra.mxu1 %v2506_v2  ;;  %2243 = vmatprep.subr.bf16.mxu0 %v2665_v1  ;;  %v2512_v8 = vld [vmem:[%s3303_s2 + $0x20] sm:$0xff]   ;;  %v2514_v11 = vld [vmem:[%s3303_s2 + $0x18] sm:$0xff]   ;;  %vm417_vm2 = vsmask.f32 1284  ;;  %v2667_v16 = vmov 1966171168  }
  0x18   : > { %2263 = vmatprep.subr.bf16.mxu1 %v2665_v1  ;;  %2277 = vmatprep.mubr.msk.bf16.mxu1 %vm2666_vm0, %v2665_v1  ;;  %s2149_s13 = sadd.s32 16, %s2441_s8  ;;  %s2803_s18 = scalar_lea.vmem %s3301_s0, %s2441_s8  ;;  %v371_v17 = vunpack.c.l.s4 %v2667_v16  ;;  %vm418_vm3 = vmor %vm416_vm1, %vm417_vm2  ;;  %vm419_vm4 = vsmask.f32 2312  ;;  %vm421_vm5 = vsmask.f32 3340  ;;  %v2516_v18 = vld [vmem:[%s3303_s2 + $0x10] sm:$0xff]  }
  0x19   : > { %s342_s27 = scalar_lea.vmem %s3302_s1, %s2149_s13  ;;  %v349_v13 = vld [vmem:[%s2803_s18 + $0x8] sm:$0x7]  ;;  %vm423_vm6 = vsmask.f32 4368  ;;  %v347_v19 = vld [vmem:[%s2803_s18] sm:$0x7]  ;;  %vm420_vm7 = vmor %vm418_vm3, %vm419_vm4 }
  0x1a   : > { %2244 = vmatpush3.bf16.msra.mxu0 %v2507_v3  ;;  %v351_v14 = vld [vmem:[%s342_s27] sm:$0x7]  ;;  %v372_v21 = vunpack.c.0.s8 %v371_v17  ;;  %vm422_vm8 = vmor %vm420_vm7, %vm421_vm5  ;;  %vm425_vm9 = vsmask.f32 5396  ;;  %v570_v22 = vcombine.low %v347_v19, %v349_v13  ;;  %v2517_v23 = vld [vmem:[%s3303_s2 + $0x48] sm:$0xff]   ;;  %s1817_s27 = sshll.u32 %s314_s20, 4  ;;  %s3249_s27 = int_to_ptr.vmem [resolvable:$true] %s1817_s27 }
  0x1b   : > { %2264 = vmatpush3.bf16.msra.mxu1 %v2508_v4  ;;  %2245 = vmatprep.subr.bf16.mxu0 %v2665_v1  ;;  %v1278_v20 = vcombine.low %v349_v13, %v351_v14  ;;  %vm424_vm10 = vmor %vm422_vm8, %vm423_vm6  ;;  %v2518_v24 = vld [vmem:[%s3303_s2 + $0x8] sm:$0xff]   ;;  %vm427_vm12 = vsmask.f32 6424  ;;  %v2519_v27 = vld [vmem:[%s3303_s2 + $0x40] sm:$0xff]   ;;  %vm429_vm13 = vsmask.f32 7452 }
  0x1c   : > { %2265 = vmatprep.subr.bf16.mxu1 %v2665_v1  ;;  %v2835_v25 = vsub.s32 %v372_v21, %v2820_v15  ;;  %vm2838_vm11 = vmor %vm424_vm10, %vm425_vm9  ;;  %v2520_v37 = vld [vmem:[%s3303_s2] sm:$0xff]   ;;  %v2523_v55 = vld [vmem:[%s3303_s2 + $0xf8] sm:$0xff]   ;;  %s2587_s24 = scalar_lea.vmem %s3249_s27, 64  ;;  %s2669_s8 = smov [#allocation2]  }
  0x1d   : > { %vm428_vm14 = vmor %vm2838_vm11, %vm427_vm12  ;;  %v2522_v61 = vld [vmem:[%s3303_s2 + $0xb8] sm:$0xff]   ;;  %v2525_v63 = vld [vmem:[%s3303_s2 + $0xf0] sm:$0xff]   ;;  %p2588_p12 = scmp.ne.s32.totalorder %s3249_s27, %s2587_s24  ;;  %s2591_s14 = sshll.u32 %s2669_s8, 4  ;;  %s2592_s14 = int_to_ptr.vmem [resolvable:$false] %s2591_s14 }
  0x1e   : > { %2246 = vmatpush3.bf16.msra.mxu0 %v2509_v5  ;;  %v376_v28 = vrot.slane %v347_v19, %v2835_v25  ;;  %v399_v29 = vrot.slane %v349_v13, %v2835_v25  ;;  %v1389_v30 = vrot.slane %v351_v14, %v2835_v25  ;;  %v577_v31 = vrot.slane %v570_v22, %v2835_v25  ;;  %vm2872_vm15 = vmor %vm428_vm14, %vm429_vm13  ;;  %v2527_v9 = vld [vmem:[%s3303_s2 + $0xe8] sm:$0xff]   ;;  %v2549_v44 = vld [vmem:[%s3303_s2 + $0x110] sm:$0xff]   ;;  %s2593_s13 = scalar_lea.vmem %s2592_s14, 128  ;;  %p2594_p1 = scmp.lt.s32.totalorder %s3249_s27, %s2592_s14 }
  0x1f   : > { %2266 = vmatpush3.bf16.msra.mxu1 %v2510_v6  ;;  %2247 = vmatprep.subr.bf16.mxu0 %v2665_v1  ;;  %v2851_v32 = vrot.slane %v1278_v20, %v2835_v25  ;;  %v350_v13 = vld [vmem:[%s2803_s18 + $0xc] sm:$0x7]  ;;  %v2529_v20 = vld [vmem:[%s3303_s2 + $0xe0] sm:$0xff]   ;;  %p2589_p13 = pnand %p2588_p12, %p2747_p4  ;;  %p2595_p2 = scmp.lt.s32.totalorder %s2593_s13, %s2587_s24 }
  0x20   : > { %2267 = vmatprep.subr.bf16.mxu1 %v2665_v1  ;;  %v377_v33 = vcombine.high %v376_v28, %v376_v28  ;;  %v2854_v34 = vrot.slane %v376_v28, %v2835_v25  ;;  %v400_v35 = vcombine.high %v399_v29, %v399_v29  ;;  %v407_v36 = vrot.slane %v399_v29, %v2835_v25 }
  0x21   : > { %v1390_v38 = vcombine.high %v1389_v30, %v1389_v30  ;;  %v1397_v39 = vrot.slane %v1389_v30, %v2835_v25  ;;  %v584_v47 = vrot.slane %v577_v31, %v2835_v25  ;;  %v1292_v48 = vrot.slane %v2851_v32, %v2835_v25  ;;  %v2574_v32 = vld [vmem:[%s3303_s2 + $0x220] sm:$0xff]   ;;  %p2590_p0 = pneg %p2589_p13  ;;  %p2596_p3 = por %p2595_p2, %p2594_p1 }
  0x22   : > { %2248 = vmatpush3.bf16.msra.mxu0 %v2511_v7  ;;  %v2866_v40 = vrot.slane %v377_v33, %v2835_v25  ;;  %v392_v41 = vcombine.high %v2854_v34, %v2854_v34  ;;  %v414_v42 = vrot.slane %v400_v35, %v2835_v25  ;;  %v415_v43 = vcombine.high %v407_v36, %v407_v36  ;;  %v2531_v33 = vld [vmem:[%s3303_s2 + $0xd8] sm:$0xff]  }
  0x23   : > { %2268 = vmatpush3.bf16.msra.mxu1 %v2512_v8  ;;  %2249 = vmatprep.subr.bf16.mxu0 %v2665_v1  ;;  %v1404_v45 = vrot.slane %v1390_v38, %v2835_v25  ;;  %v1405_v46 = vcombine.high %v1397_v39, %v1397_v39  ;;  %v683_v0 = vshrl.u32 %v407_v36, 16  ;;  %v1538_v4 = vshrl.u32 %v1397_v39, 16  ;;  %v2524_v8 = vld [vmem:[%s3303_s2 + $0xb0] sm:$0xff]   ;;  %v2528_v36 = vld [vmem:[%s3303_s2 + $0xa0] sm:$0xff]   ;;  %p2597_p5 = pnand %p2596_p3, %p2590_p0 }
  0x24   : > { %2269 = vmatprep.subr.bf16.mxu1 %v2665_v1  ;;  %v432_v49 = vshrl.u32 %v2866_v40, 16  ;;  %v437_v50 = vshll.u32 %v392_v41, 16  ;;  %v441_v51 = vshrl.u32 %v414_v42, 16  ;;  %v446_v52 = vshll.u32 %v415_v43, 16  ;;  %v2533_v41 = vld [vmem:[%s3303_s2 + $0xd0] sm:$0xff]  }
  0x25   : > { %v1407_v53 = vshrl.u32 %v1404_v45, 16  ;;  %v1412_v54 = vshll.u32 %v1405_v46, 16  ;;  %v687_v2 = vshll.u32 %v414_v42, 16  ;;  %v1542_v6 = vshll.u32 %v1404_v45, 16  ;;  %v2530_v45 = vld [vmem:[%s3303_s2 + $0x98] sm:$0xff]  }
  0x26   : > { %2250 = vmatpush3.bf16.msra.mxu0 %v2513_v10  ;;  %v439_v56 = vsel %vm2872_vm15, %v432_v49, %v437_v50  ;;  %v448_v57 = vsel %vm2872_vm15, %v441_v51, %v446_v52  ;;  %v348_v10 = vld [vmem:[%s2803_s18 + $0x4] sm:$0x7]  ;;  %v965_v16 = vrot.slane %v350_v13, %v2835_v25  ;;  %v675_v42 = vshrl.u32 %v2854_v34, 16  ;;  %v2535_v34 = vld [vmem:[%s3303_s2 + $0xc8] sm:$0xff]   ;;  %v2532_v51 = vld [vmem:[%s3303_s2 + $0x90] sm:$0xff]  }
  0x27   : > { %2270 = vmatpush3.bf16.msra.mxu1 %v2514_v11  ;;  %2251 = vmatprep.subr.bf16.mxu0 %v2665_v1  ;;  %v466_v58 = vcombine.low %v439_v56, %v448_v57  ;;  %v1414_v59 = vsel %vm2872_vm15, %v1407_v53, %v1412_v54  ;;  %v1544_v11 = vsel %vm2872_vm15, %v1538_v4, %v1542_v6  ;;  %v679_v46 = vshll.u32 %v2866_v40, 16  ;;  %v2537_v54 = vld [vmem:[%s3303_s2 + $0xc0] sm:$0xff]   ;;  %v2534_v56 = vld [vmem:[%s3303_s2 + $0x88] sm:$0xff]  }
  0x28   : > { %2271 = vmatprep.subr.bf16.mxu1 %v2665_v1  ;;  %v1432_v60 = vcombine.low %v448_v57, %v1414_v59  ;;  %v942_v14 = vrot.slane %v348_v10, %v2835_v25  ;;  %v966_v21 = vcombine.high %v965_v16, %v965_v16  ;;  %v2936_v22 = vrot.slane %v965_v16, %v2835_v25  ;;  %v2540_v59 = vld [vmem:[%s3303_s2 + $0x178] sm:$0xff]   ;;  %v2546_v4 = vld [vmem:[%s3303_s2 + $0x160] sm:$0xff]  }
  0x29   : > { %v473_v62 = vrot.slane %v466_v58, %v2835_v25  ;;  %v831_v49 = vcombine.low %v348_v10, %v350_v13  ;;  %v681_v40 = vsel %vm2872_vm15, %v675_v42, %v679_v46  ;;  %v2545_v10 = vld [vmem:[%s3303_s2 + $0x120] sm:$0xff]   ;;  %v2550_v13 = vld [vmem:[%s3303_s2 + $0x150] sm:$0xff]   ;;  %v2568_v42 = vld [vmem:[%s3303_s2 + $0x1c8] sm:$0xff]  }
  0x2a   : > { %2252 = vmatpush3.bf16.msra.mxu0 %v2515_v12  ;;  %v2903_v3 = vrot.slane %v1432_v60, %v2835_v25  ;;  %v2920_v12 = vsel %vm2872_vm15, %v683_v0, %v687_v2  ;;  %v2930_v19 = vrot.slane %v942_v14, %v2835_v25  ;;  %v2952_v28 = vrot.slane %v966_v21, %v2835_v25  ;;  %v2536_v60 = vld [vmem:[%s3303_s2 + $0x80] sm:$0xff]   ;;  %v2544_v0 = vld [vmem:[%s3303_s2 + $0x168] sm:$0xff]   ;;  %v2541_v2 = vld [vmem:[%s3303_s2 + $0x130] sm:$0xff]  }
  0x2b   : > { %2272 = vmatpush3.bf16.msra.mxu1 %v2516_v18  ;;  %2253 = vmatprep.subr.bf16.mxu0 %v2665_v1  ;;  %v480_v5 = vrot.slane %v473_v62, %v2835_v25  ;;  %v1562_v17 = vcombine.low %v2920_v12, %v1544_v11  ;;  %v943_v18 = vcombine.high %v942_v14, %v942_v14  ;;  %v2542_v62 = vld [vmem:[%s3303_s2 + $0x170] sm:$0xff]   ;;  %v2554_v21 = vld [vmem:[%s3303_s2 + $0x140] sm:$0xff]   ;;  %v2567_v46 = vld [vmem:[%s3303_s2 + $0x188] sm:$0xff]  }
  0x2c   : > { %2273 = vmatprep.subr.bf16.mxu1 %v2665_v1  ;;  %v1446_v7 = vrot.slane %v2903_v3, %v2835_v25  ;;  %v981_v29 = vcombine.high %v2936_v22, %v2936_v22  ;;  %v838_v53 = vrot.slane %v831_v49, %v2835_v25  ;;  %v1123_v6 = vshrl.u32 %v2930_v19, 16  ;;  %v2571_v49 = vld [vmem:[%s3303_s2 + $0x238] sm:$0xff]   ;;  %v2572_v3 = vld [vmem:[%s3303_s2 + $0x230] sm:$0xff]  }
  0x2d   : > { %v2946_v26 = vrot.slane %v943_v18, %v2835_v25 }
  0x2e   : > { %2254 = vmatpush3.bf16.msra.mxu0 %v2517_v23  ;;  %v2939_v23 = vrot.slane %v1562_v17, %v2835_v25  ;;  %v997_v39 = vshll.u32 %v981_v29, 16  ;;  %v845_v57 = vrot.slane %v838_v53, %v2835_v25  ;;  %v2547_v17 = vld [vmem:[%s3303_s2 + $0x118] sm:$0xff]   ;;  %v2581_v53 = vld [vmem:[%s3305_s4 + $0x28] sm:$0xff]  }
  0x2f   : > { %2274 = vmatpush3.bf16.msra.mxu1 %v2518_v24  ;;  %2255 = vmatprep.subr.bf16.mxu0 %v2665_v1  ;;  %v2526_v24 = vld [vmem:[%s3303_s2 + $0xa8] sm:$0xff]   ;;  %v983_v31 = vshrl.u32 %v2946_v26, 16  ;;  %v1127_v11 = vshll.u32 %v2946_v26, 16  ;;  %v2556_v26 = vld [vmem:[%s3303_s2 + $0x1f8] sm:$0xff]  }
  0x30   : > { %2275 = vmatprep.subr.bf16.mxu1 %v2665_v1  ;;  %v1576_v30 = vrot.slane %v2939_v23, %v2835_v25  ;;  %v2555_v29 = vld [vmem:[%s3303_s2 + $0x1b8] sm:$0xff]  }
  0x31   : > { %v1129_v14 = vsel %vm2872_vm15, %v1123_v6, %v1127_v11  ;;  %v2583_v23 = vld [vmem:[%s3305_s4 + $0x18] sm:$0xff]  }
  0x32   : > { %2256 = vmatpush3.bf16.msra.mxu0 %v2519_v27  ;;  %v958_v27 = vcombine.high %v2930_v19, %v2930_v19  ;;  %v2552_v19 = vld [vmem:[%s3303_s2 + $0x148] sm:$0xff]  }
  0x33   : > { %2276 = vmatpush3.bf16.msra.mxu1 %v2520_v37  ;;  %2281 = vmatprep.subr.bf16.mxu0 %v2665_v1  ;;  %v992_v37 = vshrl.u32 %v2952_v28, 16 }
  0x34   : > { %2301 = vmatprep.subr.bf16.mxu1 %v2665_v1  ;;  %v988_v35 = vshll.u32 %v958_v27, 16  ;;  %v2553_v27 = vld [vmem:[%s3303_s2 + $0x100] sm:$0xff]  }
  0x35   : > { %2258 = vmatmul.mubr.bf16.vlgmr.msra.gmra.mxu0 %v480_v5  ;;  %v999_v43 = vsel %vm2872_vm15, %v992_v37, %v997_v39  ;;  %v2543_v5 = vld [vmem:[%s3303_s2 + $0x128] sm:$0xff]   ;;  %v2564_v37 = vld [vmem:[%s3303_s2 + $0x1d8] sm:$0xff]   ;;  %v2566_v39 = vld [vmem:[%s3303_s2 + $0x1d0] sm:$0xff]  }
  0x36   : > { %2278 = vmatmul.mubr.bf16.vlgmr.msra.gmra.mxu1 %v584_v47  ;;  %2282 = vmatpush3.bf16.msra.mxu0 %v2522_v61  ;;  %v990_v38 = vsel %vm2872_vm15, %v983_v31, %v988_v35  ;;  %v2560_v31 = vld [vmem:[%s3303_s2 + $0x1e8] sm:$0xff]   ;;  %v2562_v35 = vld [vmem:[%s3303_s2 + $0x1e0] sm:$0xff]  }
  0x37   : > { %2302 = vmatpush3.bf16.msra.mxu1 %v2523_v55  ;;  %2317 = vmatprep.mubr.msk.bf16.mxu1 %vm2666_vm0, %v2665_v1  ;;  %v1017_v47 = vcombine.low %v990_v38, %v999_v43  ;;  %v707_v55 = vcombine.low %v681_v40, %v2920_v12  ;;  %v1135_v12 = vshll.u32 %v2952_v28, 16  ;;  %v2558_v28 = vld [vmem:[%s3303_s2 + $0x1f0] sm:$0xff]   ;;  %v2561_v38 = vld [vmem:[%s3303_s2 + $0x1a0] sm:$0xff]   ;;  %v2579_v40 = vld [vmem:[%s3305_s4 + $0x38] sm:$0xff]  }
  0x38   : > { %2303 = vmatprep.subr.bf16.mxu1 %v2665_v1  ;;  %2283 = vmatprep.subr.bf16.mxu0 %v2665_v1  ;;  %v2565_v43 = vld [vmem:[%s3303_s2 + $0x190] sm:$0xff]  }
  0x39   : > { %2297 = vmatprep.mubr.msk.bf16.mxu0 %vm2666_vm0, %v2665_v1  ;;  %v2983_v50 = vrot.slane %v1017_v47, %v2835_v25  ;;  %v714_v58 = vrot.slane %v707_v55, %v2835_v25  ;;  %v2569_v47 = vld [vmem:[%s3303_s2 + $0x180] sm:$0xff]  }
  0x3a   : > { %2284 = vmatpush3.bf16.msra.mxu0 %v2524_v8  ;;  %v2548_v8 = vld [vmem:[%s3303_s2 + $0x158] sm:$0xff]  }
  0x3b   : > { %2304 = vmatpush3.bf16.msra.mxu1 %v2525_v63  ;;  %2285 = vmatprep.subr.bf16.mxu0 %v2665_v1  ;;  %v1031_v52 = vrot.slane %v2983_v50, %v2835_v25  ;;  %v721_v61 = vrot.slane %v714_v58, %v2835_v25  ;;  %v2538_v63 = vld [vmem:[%s3303_s2 + $0x138] sm:$0xff]   ;;  %v2576_v50 = vld [vmem:[%s3303_s2 + $0x210] sm:$0xff]   ;;  %v2585_v58 = vld [vmem:[%s3305_s4 + $0x8] sm:$0xff]  }
  0x3c   : > { %2305 = vmatprep.subr.bf16.mxu1 %v2665_v1 }
  0x3e   : > { %2286 = vmatpush3.bf16.msra.mxu0 %v2526_v24 }
  0x3f   : > { %2306 = vmatpush3.bf16.msra.mxu1 %v2527_v9  ;;  %2287 = vmatprep.subr.bf16.mxu0 %v2665_v1  ;;  %v1131_v9 = vshrl.u32 %v2936_v22, 16  ;;  %v2551_v22 = vld [vmem:[%s3303_s2 + $0x108] sm:$0xff]  }
  0x40   : > { %2307 = vmatprep.subr.bf16.mxu1 %v2665_v1 }
  0x41   : > { %v1137_v16 = vsel %vm2872_vm15, %v1131_v9, %v1135_v12 }
  0x42   : > { %2288 = vmatpush3.bf16.msra.mxu0 %v2528_v36  ;;  %v1155_v18 = vcombine.low %v1129_v14, %v1137_v16  ;;  %v2559_v36 = vld [vmem:[%s3303_s2 + $0x1a8] sm:$0xff]  }
  0x43   : > { %2308 = vmatpush3.bf16.msra.mxu1 %v2529_v20  ;;  %2289 = vmatprep.subr.bf16.mxu0 %v2665_v1 }
  0x44   : > { %2309 = vmatprep.subr.bf16.mxu1 %v2665_v1  ;;  %v1162_v20 = vrot.slane %v1155_v18, %v2835_v25 }
  0x46   : > { %2290 = vmatpush3.bf16.msra.mxu0 %v2530_v45  ;;  %v1169_v24 = vrot.slane %v1162_v20, %v2835_v25  ;;  %v2570_v45 = vld [vmem:[%s3303_s2 + $0x1c0] sm:$0xff]  }
  0x47   : > { %2310 = vmatpush3.bf16.msra.mxu1 %v2531_v33  ;;  %2291 = vmatprep.subr.bf16.mxu0 %v2665_v1  ;;  %v2557_v33 = vld [vmem:[%s3303_s2 + $0x1b0] sm:$0xff]   ;;  %v2582_v25 = vld [vmem:[%s3305_s4 + $0x20] sm:$0xff]  }
  0x48   : > { %2311 = vmatprep.subr.bf16.mxu1 %v2665_v1 }
  0x4a   : > { %2292 = vmatpush3.bf16.msra.mxu0 %v2532_v51  ;;  %v2578_v51 = vld [vmem:[%s3303_s2 + $0x200] sm:$0xff]  }
  0x4b   : > { %2312 = vmatpush3.bf16.msra.mxu1 %v2533_v41  ;;  %2293 = vmatprep.subr.bf16.mxu0 %v2665_v1  ;;  %v2563_v41 = vld [vmem:[%s3303_s2 + $0x198] sm:$0xff]  }
  0x4c   : > { %2313 = vmatprep.subr.bf16.mxu1 %v2665_v1 }
  0x4e   : > { %2294 = vmatpush3.bf16.msra.mxu0 %v2534_v56 }
  0x4f   : > { %2314 = vmatpush3.bf16.msra.mxu1 %v2535_v34  ;;  %2295 = vmatprep.subr.bf16.mxu0 %v2665_v1  ;;  %v2577_v34 = vld [vmem:[%s3303_s2 + $0x208] sm:$0xff]  }
  0x50   : > { %2315 = vmatprep.subr.bf16.mxu1 %v2665_v1 }
  0x52   : > { %2296 = vmatpush3.bf16.msra.mxu0 %v2536_v60 }
  0x53   : > { %2316 = vmatpush3.bf16.msra.mxu1 %v2537_v54  ;;  %2321 = vmatprep.subr.bf16.mxu0 %v2665_v1 }
  0x54   : > { %2341 = vmatprep.subr.bf16.mxu1 %v2665_v1 }
  0x55   : > { %2298 = vmatmul.mubr.bf16.vlgmr.msra.gmra.mxu0 %v721_v61 }
  0x56   : > { %2318 = vmatmul.mubr.bf16.vlgmr.msra.gmra.mxu1 %v845_v57  ;;  %2322 = vmatpush3.bf16.msra.mxu0 %v2538_v63  ;;  %v2586_v63 = vld [vmem:[%s3305_s4] sm:$0xff]  }
  0x57   : > { %2342 = vmatpush3.bf16.msra.mxu1 %v2540_v59  ;;  %2357 = vmatprep.mubr.msk.bf16.mxu1 %vm2666_vm0, %v2665_v1 }
  0x58   : > { %2343 = vmatprep.subr.bf16.mxu1 %v2665_v1  ;;  %2323 = vmatprep.subr.bf16.mxu0 %v2665_v1 }
  0x59   : > { %2337 = vmatprep.mubr.msk.bf16.mxu0 %vm2666_vm0, %v2665_v1 }
  0x5a   : > { %2324 = vmatpush3.bf16.msra.mxu0 %v2541_v2 }
  0x5b   : > { %2344 = vmatpush3.bf16.msra.mxu1 %v2542_v62  ;;  %2325 = vmatprep.subr.bf16.mxu0 %v2665_v1 }
  0x5c   : > { %2345 = vmatprep.subr.bf16.mxu1 %v2665_v1 }
  0x5e   : > { %2326 = vmatpush3.bf16.msra.mxu0 %v2543_v5 }
  0x5f   : > { %2346 = vmatpush3.bf16.msra.mxu1 %v2544_v0  ;;  %2327 = vmatprep.subr.bf16.mxu0 %v2665_v1 }
  0x60   : > { %2347 = vmatprep.subr.bf16.mxu1 %v2665_v1 }
  0x62   : > { %2328 = vmatpush3.bf16.msra.mxu0 %v2545_v10 }
  0x63   : > { %2348 = vmatpush3.bf16.msra.mxu1 %v2546_v4  ;;  %2329 = vmatprep.subr.bf16.mxu0 %v2665_v1 }
  0x64   : > { %2349 = vmatprep.subr.bf16.mxu1 %v2665_v1 }
  0x66   : > { %2330 = vmatpush3.bf16.msra.mxu0 %v2547_v17 }
  0x67   : > { %2350 = vmatpush3.bf16.msra.mxu1 %v2548_v8  ;;  %2331 = vmatprep.subr.bf16.mxu0 %v2665_v1 }
  0x68   : > { %2351 = vmatprep.subr.bf16.mxu1 %v2665_v1 }
  0x6a   : > { %2332 = vmatpush3.bf16.msra.mxu0 %v2549_v44 }
  0x6b   : > { %2352 = vmatpush3.bf16.msra.mxu1 %v2550_v13  ;;  %2333 = vmatprep.subr.bf16.mxu0 %v2665_v1 }
  0x6c   : > { %2353 = vmatprep.subr.bf16.mxu1 %v2665_v1 }
  0x6e   : > { %2334 = vmatpush3.bf16.msra.mxu0 %v2551_v22 }
  0x6f   : > { %2354 = vmatpush3.bf16.msra.mxu1 %v2552_v19  ;;  %2335 = vmatprep.subr.bf16.mxu0 %v2665_v1 }
  0x70   : > { %2355 = vmatprep.subr.bf16.mxu1 %v2665_v1 }
  0x72   : > { %2336 = vmatpush3.bf16.msra.mxu0 %v2553_v27 }
  0x73   : > { %2356 = vmatpush3.bf16.msra.mxu1 %v2554_v21  ;;  %2361 = vmatprep.subr.bf16.mxu0 %v2665_v1 }
  0x74   : > { %2381 = vmatprep.subr.bf16.mxu1 %v2665_v1 }
  0x75   : > { %2338 = vmatmul.mubr.bf16.vlgmr.msra.gmra.mxu0 %v1031_v52  ;;  %v2580_v52 = vld [vmem:[%s3305_s4 + $0x30] sm:$0xff]  }
  0x76   : > { %2358 = vmatmul.mubr.bf16.vlgmr.msra.gmra.mxu1 %v1169_v24  ;;  %2362 = vmatpush3.bf16.msra.mxu0 %v2555_v29 }
  0x77   : > { %2382 = vmatpush3.bf16.msra.mxu1 %v2556_v26  ;;  %2397 = vmatprep.mubr.msk.bf16.mxu1 %vm2666_vm0, %v2665_v1 }
  0x78   : > { %2383 = vmatprep.subr.bf16.mxu1 %v2665_v1  ;;  %2363 = vmatprep.subr.bf16.mxu0 %v2665_v1 }
  0x79   : > { %2377 = vmatprep.mubr.msk.bf16.mxu0 %vm2666_vm0, %v2665_v1 }
  0x7a   : > { %2364 = vmatpush3.bf16.msra.mxu0 %v2557_v33 }
  0x7b   : > { %2384 = vmatpush3.bf16.msra.mxu1 %v2558_v28  ;;  %2365 = vmatprep.subr.bf16.mxu0 %v2665_v1 }
  0x7c   : > { %2385 = vmatprep.subr.bf16.mxu1 %v2665_v1 }
  0x7e   : > { %2366 = vmatpush3.bf16.msra.mxu0 %v2559_v36 }
  0x7f   : > { %2386 = vmatpush3.bf16.msra.mxu1 %v2560_v31  ;;  %2367 = vmatprep.subr.bf16.mxu0 %v2665_v1 }
  0x80   : > { %2387 = vmatprep.subr.bf16.mxu1 %v2665_v1 }
  0x82   : > { %2368 = vmatpush3.bf16.msra.mxu0 %v2561_v38 }
  0x83   : > { %2388 = vmatpush3.bf16.msra.mxu1 %v2562_v35  ;;  %2369 = vmatprep.subr.bf16.mxu0 %v2665_v1 }
  0x84   : > { %2389 = vmatprep.subr.bf16.mxu1 %v2665_v1 }
  0x86   : > { %2370 = vmatpush3.bf16.msra.mxu0 %v2563_v41 }
  0x87   : > { %2390 = vmatpush3.bf16.msra.mxu1 %v2564_v37  ;;  %2371 = vmatprep.subr.bf16.mxu0 %v2665_v1 }
  0x88   : > { %2391 = vmatprep.subr.bf16.mxu1 %v2665_v1 }
  0x8a   : > { %2372 = vmatpush3.bf16.msra.mxu0 %v2565_v43 }
  0x8b   : > { %2392 = vmatpush3.bf16.msra.mxu1 %v2566_v39  ;;  %2373 = vmatprep.subr.bf16.mxu0 %v2665_v1  ;;  %v2132_v39 = vld [vmem:[%s3304_s3] ss:$0 sm:$0xff] }
  0x8c   : > { %2393 = vmatprep.subr.bf16.mxu1 %v2665_v1 }
  0x8e   : > { %2374 = vmatpush3.bf16.msra.mxu0 %v2567_v46 }
  0x8f   : > { %2394 = vmatpush3.bf16.msra.mxu1 %v2568_v42  ;;  %2375 = vmatprep.subr.bf16.mxu0 %v2665_v1 }
  0x90   : > { %2395 = vmatprep.subr.bf16.mxu1 %v2665_v1 }
  0x92   : > { %2376 = vmatpush3.bf16.msra.mxu0 %v2569_v47 }
  0x93   : > { %2396 = vmatpush3.bf16.msra.mxu1 %v2570_v45  ;;  %2401 = vmatprep.subr.bf16.mxu0 %v2665_v1 }
  0x94   : > { %2421 = vmatprep.subr.bf16.mxu1 %v2665_v1 }
  0x95   : > { %2378 = vmatmul.mubr.bf16.vlgmr.msra.gmra.mxu0 %v1292_v48  ;;  %v2575_v48 = vld [vmem:[%s3303_s2 + $0x218] sm:$0xff]  }
  0x96   : > { %2398 = vmatmul.mubr.bf16.vlgmr.msra.gmra.mxu1 %v1446_v7  ;;  %2402 = vmatpush3.bf16.msra.mxu0 %v2571_v49  ;;  %v2573_v7 = vld [vmem:[%s3303_s2 + $0x228] sm:$0xff]  }
  0x97   : > { %2437 = vmatprep.mubr.msk.bf16.mxu1 %vm2666_vm0, %v2665_v1  ;;  %2417 = vmatprep.mubr.msk.bf16.mxu0 %vm2666_vm0, %v2665_v1 }
  0x98   : > { %2403 = vmatprep.subr.bf16.mxu0 %v2665_v1  ;;  %2422 = vmatpush3.bf16.msra.mxu1 %v2579_v40 }
  0x99   : > { %2423 = vmatprep.subr.bf16.mxu1 %v2665_v1 }
  0x9a   : > { %2404 = vmatpush3.bf16.msra.mxu0 %v2572_v3  ;;  %v2668_v3 = vmov 1983009808  }
  0x9b   : > { %2405 = vmatprep.subr.bf16.mxu0 %v2665_v1 }
  0x9c   : > { %2424 = vmatpush3.bf16.msra.mxu1 %v2580_v52 }
  0x9d   : > { %2425 = vmatprep.subr.bf16.mxu1 %v2665_v1 }
  0x9e   : > { %2406 = vmatpush3.bf16.msra.mxu0 %v2573_v7  ;;  %v1790_v7 = vunpack.c.l.s4 %v2668_v3 }
  0x9f   : > { %2407 = vmatprep.subr.bf16.mxu0 %v2665_v1 }
  0xa0   : > { %2426 = vmatpush3.bf16.msra.mxu1 %v2581_v53 }
  0xa1   : > { %2427 = vmatprep.subr.bf16.mxu1 %v2665_v1 }
  0xa2   : > { %2408 = vmatpush3.bf16.msra.mxu0 %v2574_v32  ;;  %v1791_v32 = vunpack.c.0.s8 %v1790_v7 }
  0xa3   : > { %2409 = vmatprep.subr.bf16.mxu0 %v2665_v1 }
  0xa4   : > { %2428 = vmatpush3.bf16.msra.mxu1 %v2582_v25 }
  0xa5   : > { %2429 = vmatprep.subr.bf16.mxu1 %v2665_v1 }
  0xa6   : > { %2410 = vmatpush3.bf16.msra.mxu0 %v2575_v48  ;;  %v2133_v48 = vld [vmem:[%s3306_s5] ss:$0 sm:$0xff] }
  0xa7   : > { %2411 = vmatprep.subr.bf16.mxu0 %v2665_v1 }
  0xa8   : > { %2430 = vmatpush3.bf16.msra.mxu1 %v2583_v23 }
  0xa9   : > { %2431 = vmatprep.subr.bf16.mxu1 %v2665_v1 }
  0xaa   : > { %2412 = vmatpush3.bf16.msra.mxu0 %v2576_v50  ;;  %v1794_v50 = vsub.s32 %v1791_v32, %v2820_v15 }
  0xab   : > { %2413 = vmatprep.subr.bf16.mxu0 %v2665_v1 }
  0xae   : > { %2414 = vmatpush3.bf16.msra.mxu0 %v2577_v34 }
  0xaf   : > { %2415 = vmatprep.subr.bf16.mxu0 %v2665_v1 }
  0xb2   : > { %2416 = vmatpush3.bf16.msra.mxu0 %v2578_v51 }
  0xb5   : > { %2418 = vmatmul.mubr.bf16.vlgmr.msra.gmra.mxu0 %v1576_v30  ;;  %v2584_v30 = vld [vmem:[%s3305_s4 + $0x10] sm:$0xff]  }
  0xb6   : > { %2432 = vmatpush3.bf16.msra.mxu1 %v2584_v30 }
  0xb7   : > { %2433 = vmatprep.subr.bf16.mxu1 %v2665_v1 }
  0xba   : > { %2434 = vmatpush3.bf16.msra.mxu1 %v2585_v58 }
  0xbb   : > { %2435 = vmatprep.subr.bf16.mxu1 %v2665_v1 }
  0xbe   : > { %2436 = vmatpush3.bf16.msra.mxu1 %v2586_v63 }
  0xf5   : > { %v564_v57 = vpop.f32.mrf.mxu0 }
  0xf6   : > { %v668_v54 = vpop.f32.mrf.mxu1 }
  0xf7   : > { %v669_v59 = vadd.f32 %v668_v54, %v564_v57  ;;  %v2259_v61 = vpop.f32.mrf.mxu0 }
  0xf8   : > { %v2279_v55 = vpop.f32.mrf.mxu1 }
  0xf9   : > { %v567_v62 = vpop.f32.mrf.mxu0 }
  0xfa   : > { %v671_v56 = vpop.f32.mrf.mxu1 }
  0xfb   : > { %v2260_v0 = vpop.f32.mrf.mxu0 }
  0xfc   : > { %v2280_v60 = vpop.f32.mrf.mxu1 }
 0x115   : > { %v805_v6 = vpop.f32.mrf.mxu0 }
 0x116   : > { %v929_v2 = vpop.f32.mrf.mxu1  ;;  %v811_v8 = vadd.f32 %v805_v6, %v669_v59 }
 0x117   : > { %v2299_v10 = vpop.f32.mrf.mxu0 }
 0x118   : > { %v2319_v4 = vpop.f32.mrf.mxu1  ;;  %v935_v11 = vadd.f32 %v929_v2, %v811_v8 }
 0x119   : > { %v808_v12 = vpop.f32.mrf.mxu0 }
 0x11a   : > { %v932_v5 = vpop.f32.mrf.mxu1 }
 0x11b   : > { %v2300_v13 = vpop.f32.mrf.mxu0 }
 0x11c   : > { %v2320_v9 = vpop.f32.mrf.mxu1 }
 0x135   : > { %v1115_v17 = vpop.f32.mrf.mxu0 }
 0x136   : > { %v1253_v14 = vpop.f32.mrf.mxu1  ;;  %v1121_v33 = vadd.f32 %v1115_v17, %v935_v11 }
 0x137   : > { %v2339_v19 = vpop.f32.mrf.mxu0 }
 0x138   : > { %v2359_v16 = vpop.f32.mrf.mxu1  ;;  %v1259_v35 = vadd.f32 %v1253_v14, %v1121_v33 }
 0x139   : > { %v1118_v44 = vpop.f32.mrf.mxu0 }
 0x13a   : > { %v1256_v1 = vpop.f32.mrf.mxu1 }
 0x13b   : > { %v2340_v20 = vpop.f32.mrf.mxu0 }
 0x13c   : > { %v2360_v18 = vpop.f32.mrf.mxu1 }
 0x155   : > { %v1376_v26 = vpop.f32.mrf.mxu0 }
 0x156   : > { %v1530_v21 = vpop.f32.mrf.mxu1  ;;  %v1382_v36 = vadd.f32 %v1376_v26, %v1259_v35 }
 0x157   : > { %v2379_v28 = vpop.f32.mrf.mxu0 }
 0x158   : > { %v2399_v22 = vpop.f32.mrf.mxu1  ;;  %v1536_v37 = vadd.f32 %v1530_v21, %v1382_v36 }
 0x159   : > { %v1379_v29 = vpop.f32.mrf.mxu0 }
 0x15a   : > { %v1533_v24 = vpop.f32.mrf.mxu1 }
 0x15b   : > { %v2380_v31 = vpop.f32.mrf.mxu0 }
 0x15c   : > { %v2400_v27 = vpop.f32.mrf.mxu1 }
 0x175   : > { %v1660_v38 = vpop.f32.mrf.mxu0 }
 0x176   : > { %v1666_v41 = vadd.f32 %v1660_v38, %v1536_v37 }
 0x177   : > { %v2419_v42 = vpop.f32.mrf.mxu0 }
 0x178   : > { %v1674_v43 = vadd.f32 %v2132_v39, %v1666_v41 }
 0x179   : > { %v1663_v45 = vpop.f32.mrf.mxu0 }
 0x17a   : > { %v1675_v46 = vmax.f32 %v1674_v43, 0.0 }
 0x17b   : > { %v2420_v47 = vpop.f32.mrf.mxu0 }
 0x17c   : > { %v1676_v49 = vpack.c.bf16 %v1675_v46, %v1675_v46 }
 0x17e   : > { %2438 = vmatmul.mubr.bf16.vlgmr.msra.gmra.mxu1 %v1676_v49 }
 0x23e   : > { %v1782_v34 = vpop.f32.mrf.mxu1 }
 0x23f   : > { %v1783_v51 = vadd.f32 %v2133_v48, %v1782_v34 }
 0x240   : > { %v2439_v40 = vpop.f32.mrf.mxu1 }
 0x241   : > { %v1795_v52 = vrot.slane %v1783_v51, %v1794_v50  ;;  %2142 = vst.sshfl [vmem:[%s314_s20] sm:$0x3 pattern:$0x76325410] %v1783_v51 }
 0x242   : > { %v1785_v53 = vpop.f32.mrf.mxu1 }
 0x243   : > { %v1796_v15 = vcombine.high %v1795_v52, %v1795_v52 }
 0x244   : > { %v2440_v25 = vpop.f32.mrf.mxu1 }
 0x245   : > { %1800 = vst [vmem:[%s314_s20 + $0x2] sm:$0x3] %v1796_v15 }
 0x246   : > { %2600 = shalt.err (!%p2597_p5)
}
 0x247   : > { %s2601_s15 = scalar_lea.hbm %s3254_s11, 64  ;;  %s2605_s19 = scalar_lea.hbm %s3307_s6, 128 }
 0x248   : > { %p2602_p6 = scmp.ne.s32.totalorder %s3254_s11, %s2601_s15  ;;  %p2606_p10 = scmp.lt.s32.totalorder %s3254_s11, %s3307_s6 }
 0x249   : > { %p2607_p11 = scmp.lt.s32.totalorder %s2605_s19, %s2601_s15 }
 0x24a   : > { %p2603_p7 = pnand %p2602_p6, %p2747_p4 }
 0x24b   : > { %p2608_p12 = por %p2607_p11, %p2606_p10 }
 0x24c   : > { %p2604_p9 = pneg %p2603_p7 }
 0x24e   : > { %p2609_p13 = pnand %p2608_p12, %p2604_p9 }
 0x250   : > { %2612 = shalt.err (!%p2609_p13)
}
 0x251   : > { %s2670_s30 = smov 32   ;;  %s2671_s18 = smov 2  }
 0x252   : > { %2443 = dma.vmem_to_hbm [thread:$0]  (%p2747_p4), %s3249_s27, 64, %s3254_s11, %s3256_s12, %s2670_s30, %s2670_s30, %s2671_s18  }
 0x253 PF: > { %p2450_p0 = scmp.ge.s32.totalorder %s2663_s26, 2  ;;  %s1832_s24 = sand.u32 1, %s2643_s21  }
 0x254   : > { %s1833_s8 = scalar_lea.sflag [#allocation3], %s1832_s24 }
 0x255   : > { %p2446_p1 = pnand %p2450_p0, %p2754_p8 }
 0x257   : > { %p2447_p2 = pneg %p2446_p1 }
 0x259   : > { %2638 = dma.done.wait (%p2447_p2), %s1833_s8, 64  }
 0x25a   : > { %2640 = vsyncadd (%p2447_p2), %s1833_s8, 4294967232  ;;  %s19_s26 = sadd.s32 1, %s2663_s26   ;;  %s3314_s21 = smov %s2647_s22 }
 0x25b   : > { %p16_p3 = scmp.ge.s32.totalorder %s19_s26, 4   ;;  %s3315_s22 = smov %s2651_s23 }
 0x25c   : > { %s3316_s23 = smov %s2760_s10  ;;  %s3317_s24 = smov %s2659_s25 }
 0x25d   : > { %s3318_s25 = smov %s3320_s29  ;;  %18 = sbr.rel (!%p16_p3) target bundleno = 4 (0x4), region = 90 }
 0x262   :  { %1838 = vsyncpa [#allocation3], 1 }
 0x263   :  { %1840 = vsyncpa [#allocation3 + $0x1], 1 }

// kernel: convolution_stem.6
= control target key start
LH: loop header
LB: loop body
LE: loop exit
PB: predicated region body
PF: predicated region fallthrough
CT: control target
= control target key end

     0   :  { %s2617_s15 = smov 0   ;;  %s2619_s16 = smov 0   ;;  %s3205_s0 = inlined_call_operand.vmem [shape: bf16[2,10,10,128], index: 0, kind: input, shape index: {}, may-alias: {0,1}]   ;;  %s3206_s1 = inlined_call_operand.vmem [shape: bf16[2,10,10,128], index: 1, kind: input, shape index: {}, may-alias: {0,1}]   ;;  %s3207_s2 = inlined_call_operand.vmem [shape: bf16[9,128,128], index: 2, kind: input, shape index: {}]   ;;  %s3208_s3 = inlined_call_operand.vmem [shape: f32[1,128], index: 3, kind: input, shape index: {}]   ;;  %s3209_s4 = inlined_call_operand.vmem [shape: bf16[2,4,4,128], index: 4, kind: output, shape index: {}]  }
   0x1   :  { %s2621_s17 = smov 0  }
   0x2 LB: > { %s26_s18 = sadd.s32 1, %s2583_s16  ;;  %p1977_p0 = scmp.ge.s32.totalorder %s2587_s17, 1  ;;  %s2587_s17 = sphi %s2621_s17, %s14_s17   ;;  %s2583_s16 = sphi %s2619_s16, %s3215_s16   ;;  %s2579_s15 = sphi %s2617_s15, %s3214_s15  }
   0x3   : > { %p28_p1 = scmp.ge.s32.totalorder %s26_s18, 2  ;;  %p218_p2 = scmp.lt.s32.totalorder %s2587_s17, 3 }
   0x5   : > { %s3217_s18 = smov (%p28_p1, %s26_s18), 0  ;;  %p219_p3 = pnand %p1977_p0, %p218_p2 }
   0x6   : > { %p275_p4 = scmp.lt.s32.totalorder (!%p219_p3), %s2579_s15, 1 }
   0x7   : > { %222 = sbr.rel (%p219_p3) target bundleno = 387 (0x183), region = 36 }
   0xc   : > { %v2488_v0 = vld [vmem:[%s3207_s2 + $0x78] sm:$0xff]   ;;  %v2589_v1 = vmov 0.0   ;;  %v2490_v3 = vld [vmem:[%s3207_s2 + $0x70] sm:$0xff]   ;;  %vm2590_vm0 = vmmov 0   ;;  %s3219_s15 = smov (!%p275_p4, %s2579_s15), 1  ;;  %v2492_v5 = vld [vmem:[%s3207_s2 + $0x68] sm:$0xff]   ;;  %v359_v9 = vlaneseq }
   0xd   : > { %2278 = vmatprep.subr.bf16.mxu0 %v2589_v1  ;;  %2298 = vmatprep.subr.bf16.mxu1 %v2589_v1  ;;  %v2489_v2 = vld [vmem:[%s3207_s2 + $0x38] sm:$0xff]   ;;  %v2491_v4 = vld [vmem:[%s3207_s2 + $0x30] sm:$0xff]   ;;  %v2493_v6 = vld [vmem:[%s3207_s2 + $0x28] sm:$0xff]   ;;  %s2458_s7 = smul.u32 80, %s3219_s15  ;;  %v2591_v28 = vmov 1983009808  }
   0xe   : > { %2279 = vmatpush3.bf16.msra.mxu0 %v2488_v0  ;;  %2294 = vmatprep.mubr.msk.bf16.mxu0 %vm2590_vm0, %v2589_v1  ;;  %v2494_v7 = vld [vmem:[%s3207_s2 + $0x60] sm:$0xff]   ;;  %v2496_v10 = vld [vmem:[%s3207_s2 + $0x58] sm:$0xff]   ;;  %v2498_v12 = vld [vmem:[%s3207_s2 + $0x50] sm:$0xff]   ;;  %v360_v13 = vshrl.u32 %v359_v9, 7  ;;  %v357_v29 = vunpack.c.l.s4 %v2591_v28  ;;  %vm416_vm1 = vsmask.f32 1280 }
   0xf   : > { %2299 = vmatpush3.bf16.msra.mxu1 %v2489_v2  ;;  %2280 = vmatprep.subr.bf16.mxu0 %v2589_v1  ;;  %v2495_v8 = vld [vmem:[%s3207_s2 + $0x20] sm:$0xff]   ;;  %s2680_s14 = scalar_lea.vmem %s3205_s0, %s2458_s7  ;;  %s2195_s19 = sadd.s32 64, %s2458_s7  ;;  %v2497_v11 = vld [vmem:[%s3207_s2 + $0x18] sm:$0xff]   ;;  %v2499_v14 = vld [vmem:[%s3207_s2 + $0x10] sm:$0xff]   ;;  %vm417_vm2 = vsmask.f32 3336 }
  0x10   : > { %2300 = vmatprep.subr.bf16.mxu1 %v2589_v1  ;;  %2314 = vmatprep.mubr.msk.bf16.mxu1 %vm2590_vm0, %v2589_v1  ;;  %s300_s28 = scalar_lea.vmem %s3206_s1, %s2195_s19  ;;  %v1982_v15 = vld.sshfl [vmem:[%s2680_s14 + $0x4] sm:$0x1 pattern:$0x76325410]  ;;  %v318_v16 = vld [vmem:[%s2680_s14 + $0x10] sm:$0xf]  ;;  %v358_v36 = vunpack.c.0.s8 %v357_v29  ;;  %vm418_vm5 = vmor %vm416_vm1, %vm417_vm2 }
  0x11   : > { %v1983_v17 = vld.sshfl [vmem:[%s2680_s14 + $0x14] sm:$0x1 pattern:$0x76325410]  ;;  %v322_v18 = vld [vmem:[%s2680_s14 + $0x20] sm:$0xf] }
  0x12   : > { %2281 = vmatpush3.bf16.msra.mxu0 %v2490_v3  ;;  %v1984_v19 = vld.sshfl [vmem:[%s2680_s14 + $0x24] sm:$0x1 pattern:$0x76325410]  ;;  %v326_v20 = vld [vmem:[%s2680_s14 + $0x30] sm:$0xf]  ;;  %v1436_v21 = vcombine.low %v318_v16, %v322_v18  ;;  %v2723_v41 = vsub.s32 %v358_v36, %v360_v13 }
  0x13   : > { %2301 = vmatpush3.bf16.msra.mxu1 %v2491_v4  ;;  %2282 = vmatprep.subr.bf16.mxu0 %v2589_v1  ;;  %v1985_v22 = vld.sshfl [vmem:[%s2680_s14 + $0x34] sm:$0x1 pattern:$0x76325410]  ;;  %v330_v23 = vld [vmem:[%s300_s28] sm:$0xf]  ;;  %v604_v40 = vcombine.low %v322_v18, %v326_v20 }
  0x14   : > { %2302 = vmatprep.subr.bf16.mxu1 %v2589_v1  ;;  %v2705_v24 = vld.sshfl [vmem:[%s300_s28 + $0x4] sm:$0x1 pattern:$0x76325410]  ;;  %v1437_v25 = vcombine.low %v326_v20, %v330_v23  ;;  %v2500_v26 = vld [vmem:[%s3207_s2 + $0x48] sm:$0xff]   ;;  %v433_v30 = vshll.u32 %v1982_v15, 16  ;;  %v2739_v47 = vrot.slane %v318_v16, %v2723_v41  ;;  %v2742_v48 = vrot.slane %v322_v18, %v2723_v41 }
  0x15   : > { %v314_v27 = vld [vmem:[%s2680_s14] sm:$0xf]  ;;  %v2501_v31 = vld [vmem:[%s3207_s2 + $0x8] sm:$0xff]   ;;  %v447_v32 = vshll.u32 %v1983_v17, 16  ;;  %v461_v33 = vshll.u32 %v1984_v19, 16  ;;  %v475_v34 = vshll.u32 %v1985_v22, 16  ;;  %v2745_v49 = vrot.slane %v326_v20, %v2723_v41 }
  0x16   : > { %2283 = vmatpush3.bf16.msra.mxu0 %v2492_v5  ;;  %v2502_v35 = vld [vmem:[%s3207_s2 + $0x40] sm:$0xff]   ;;  %vm419_vm3 = vsmask.f32 5392  ;;  %vm421_vm4 = vsmask.f32 7448  ;;  %v1571_v38 = vshll.u32 %v2705_v24, 16  ;;  %v603_v39 = vcombine.low %v314_v27, %v318_v16 }
  0x17   : > { %2303 = vmatpush3.bf16.msra.mxu1 %v2493_v6  ;;  %2284 = vmatprep.subr.bf16.mxu0 %v2589_v1  ;;  %v2503_v37 = vld [vmem:[%s3207_s2] sm:$0xff]   ;;  %v2725_v42 = vrot.slane %v433_v30, 7  ;;  %v2727_v43 = vrot.slane %v447_v32, 7  ;;  %v2730_v44 = vrot.slane %v461_v33, 7  ;;  %v2732_v45 = vrot.slane %v475_v34, 7  ;;  %v2507_v60 = vld [vmem:[%s3207_s2 + $0xf8] sm:$0xff]   ;;  %vm2777_vm6 = vmor %vm418_vm5, %vm419_vm3 }
  0x18   : > { %2304 = vmatprep.subr.bf16.mxu1 %v2589_v1  ;;  %v2736_v46 = vrot.slane %v314_v27, %v2723_v41  ;;  %v2748_v50 = vrot.slane %v330_v23, %v2723_v41  ;;  %v611_v51 = vrot.slane %v603_v39, %v2723_v41  ;;  %v618_v52 = vrot.slane %v604_v40, %v2723_v41  ;;  %v2509_v9 = vld [vmem:[%s3207_s2 + $0xf0] sm:$0xff]   ;;  %vm2797_vm7 = vmor %vm2777_vm6, %vm421_vm4  ;;  %v2511_v34 = vld [vmem:[%s3207_s2 + $0xe8] sm:$0xff]   ;;  %s2196_s21 = sshll.u32 %s3219_s15, 3 }
  0x19   : > { %v2753_v53 = vrot.slane %v1436_v21, %v2723_v41  ;;  %v378_v55 = vcombine.high %v2739_v47, %v2739_v47  ;;  %v393_v56 = vcombine.high %v2742_v48, %v2742_v48  ;;  %v408_v57 = vcombine.high %v2745_v49, %v2745_v49  ;;  %v2530_v18 = vld [vmem:[%s3207_s2 + $0x120] sm:$0xff]   ;;  %s311_s24 = scalar_lea.vmem %s3209_s4, %s2196_s21 }
  0x1a   : > { %2285 = vmatpush3.bf16.msra.mxu0 %v2494_v7  ;;  %v363_v54 = vcombine.high %v2736_v46, %v2736_v46  ;;  %v1553_v58 = vcombine.high %v2748_v50, %v2748_v50  ;;  %v619_v59 = vcombine.low %v611_v51, %v618_v52  ;;  %v711_v61 = vshrl.u32 %v2736_v46, 16 }
  0x1b   : > { %2305 = vmatpush3.bf16.msra.mxu1 %v2495_v8  ;;  %2286 = vmatprep.subr.bf16.mxu0 %v2589_v1  ;;  %v2773_v62 = vrot.slane %v1437_v25, %v2723_v41  ;;  %v438_v2 = vshrl.u32 %v378_v55, 16  ;;  %v441_v3 = vshll.u32 %v378_v55, 16  ;;  %v452_v5 = vshrl.u32 %v393_v56, 16 }
  0x1c   : > { %2306 = vmatprep.subr.bf16.mxu1 %v2589_v1  ;;  %v424_v63 = vshrl.u32 %v363_v54, 16  ;;  %v427_v0 = vshll.u32 %v363_v54, 16  ;;  %v455_v6 = vshll.u32 %v393_v56, 16  ;;  %v466_v7 = vshrl.u32 %v408_v57, 16 }
  0x1d   : > { %v469_v8 = vshll.u32 %v408_v57, 16  ;;  %v2786_v13 = vrot.slane %v441_v3, 7  ;;  %v1562_v21 = vshrl.u32 %v1553_v58, 16  ;;  %v1565_v22 = vshll.u32 %v1553_v58, 16 }
  0x1e   : > { %2287 = vmatpush3.bf16.msra.mxu0 %v2496_v10  ;;  %v426_v10 = vrot.slane %v424_v63, 6  ;;  %v2788_v15 = vrot.slane %v455_v6, 7  ;;  %v468_v16 = vrot.slane %v466_v7, 6  ;;  %v1573_v33 = vrot.slane %v1571_v38, 7 }
  0x1f   : > { %2307 = vmatpush3.bf16.msra.mxu1 %v2497_v11  ;;  %2288 = vmatprep.subr.bf16.mxu0 %v2589_v1  ;;  %v2784_v11 = vrot.slane %v427_v0, 7  ;;  %v2790_v17 = vrot.slane %v469_v8, 7  ;;  %v1564_v29 = vrot.slane %v1562_v21, 6  ;;  %v2808_v30 = vrot.slane %v1565_v22, 7  ;;  %v316_v8 = vld [vmem:[%s2680_s14 + $0x8] sm:$0xf] }
  0x20   : > { %2308 = vmatprep.subr.bf16.mxu1 %v2589_v1  ;;  %v713_v51 = vrot.slane %v711_v61, 6  ;;  %v714_v54 = vshll.u32 %v2736_v46, 16  ;;  %v724_v55 = vshll.u32 %v2739_v47, 16  ;;  %v731_v58 = vshrl.u32 %v2742_v48, 16  ;;  %v2506_v46 = vld [vmem:[%s3207_s2 + $0xb8] sm:$0xff]  }
  0x21   : > { %v430_v19 = vor.u32 %v2784_v11, %v426_v10  ;;  %v472_v25 = vor.u32 %v2790_v17, %v468_v16  ;;  %v741_v4 = vshrl.u32 %v2745_v49, 16  ;;  %v744_v7 = vshll.u32 %v2745_v49, 16  ;;  %v324_v10 = vld [vmem:[%s2680_s14 + $0x28] sm:$0xf]  ;;  %v2517_v16 = vld [vmem:[%s3207_s2 + $0xd0] sm:$0xff]  }
  0x22   : > { %2289 = vmatpush3.bf16.msra.mxu0 %v2498_v12  ;;  %v440_v12 = vrot.slane %v438_v2, 6  ;;  %v726_v63 = vrot.slane %v724_v55, 7  ;;  %v733_v2 = vrot.slane %v731_v58, 6 }
  0x23   : > { %2309 = vmatpush3.bf16.msra.mxu1 %v2499_v14  ;;  %2290 = vmatprep.subr.bf16.mxu0 %v2589_v1  ;;  %v454_v14 = vrot.slane %v452_v5, 6  ;;  %v431_v27 = vrot.slane %v430_v19, 2  ;;  %v473_v32 = vrot.slane %v472_v25, 2  ;;  %v746_v19 = vrot.slane %v744_v7, 7  ;;  %v2510_v25 = vld [vmem:[%s3207_s2 + $0xa8] sm:$0xff]  }
  0x24   : > { %2310 = vmatprep.subr.bf16.mxu1 %v2589_v1  ;;  %v444_v20 = vor.u32 %v2786_v13, %v440_v12  ;;  %v2508_v12 = vld [vmem:[%s3207_s2 + $0xb0] sm:$0xff]  }
  0x25   : > { %v458_v23 = vor.u32 %v2788_v15, %v454_v14  ;;  %v478_v38 = vsel %vm2797_vm7, %v473_v32, %v2732_v45  ;;  %v721_v45 = vshrl.u32 %v2739_v47, 16  ;;  %v716_v47 = vrot.slane %v714_v54, 7  ;;  %v2512_v54 = vld [vmem:[%s3207_s2 + $0xa0] sm:$0xff]  }
  0x26   : > { %2291 = vmatpush3.bf16.msra.mxu0 %v2500_v26  ;;  %v1452_v26 = vcombine.low %v2753_v53, %v2773_v62  ;;  %v445_v28 = vrot.slane %v444_v20, 2  ;;  %v743_v14 = vrot.slane %v741_v4, 6  ;;  %v328_v20 = vld [vmem:[%s2680_s14 + $0x38] sm:$0xf]  ;;  %v2560_v53 = vld [vmem:[%s3207_s2 + $0x220] sm:$0xff]  }
  0x27   : > { %2311 = vmatpush3.bf16.msra.mxu1 %v2501_v31  ;;  %2292 = vmatprep.subr.bf16.mxu0 %v2589_v1  ;;  %v459_v31 = vrot.slane %v458_v23, 2  ;;  %v723_v61 = vrot.slane %v721_v45, 6  ;;  %v717_v5 = vor.u32 %v716_v47, %v713_v51  ;;  %v1016_v23 = vrot.slane %v316_v8, %v2723_v41  ;;  %v2561_v62 = vld [vmem:[%s3207_s2 + $0x218] sm:$0xff]  }
  0x28   : > { %2312 = vmatprep.subr.bf16.mxu1 %v2589_v1  ;;  %v2821_v36 = vsel %vm2797_vm7, %v445_v28, %v2727_v43  ;;  %v2904_v58 = vrot.slane %v328_v20, %v2723_v41 }
  0x29   : > { %v2828_v24 = vsel %vm2797_vm7, %v459_v31, %v2730_v44  ;;  %v2513_v44 = vld [vmem:[%s3207_s2 + $0xe0] sm:$0xff]   ;;  %v727_v6 = vor.u32 %v726_v63, %v723_v61  ;;  %v718_v21 = vrot.slane %v717_v5, 2 }
  0x2a   : > { %2293 = vmatpush3.bf16.msra.mxu0 %v2502_v35  ;;  %v436_v35 = vsel %vm2797_vm7, %v431_v27, %v2725_v42  ;;  %v497_v40 = vcombine.low %v2828_v24, %v478_v38  ;;  %v1592_v43 = vcombine.low %v2821_v36, %v2828_v24  ;;  %v747_v27 = vor.u32 %v746_v19, %v743_v14  ;;  %v2525_v24 = vld [vmem:[%s3207_s2 + $0x178] sm:$0xff]  }
  0x2b   : > { %2313 = vmatpush3.bf16.msra.mxu1 %v2503_v37  ;;  %2318 = vmatprep.subr.bf16.mxu0 %v2589_v1  ;;  %v1568_v37 = vor.u32 %v2808_v30, %v1564_v29  ;;  %v496_v39 = vcombine.low %v436_v35, %v2821_v36  ;;  %v728_v22 = vrot.slane %v727_v6, 2  ;;  %v898_v29 = vcombine.low %v324_v10, %v328_v20 }
  0x2c   : > { %2338 = vmatprep.subr.bf16.mxu1 %v2589_v1  ;;  %v511_v56 = vrot.slane %v497_v40, %v2723_v41  ;;  %v1017_v35 = vcombine.high %v1016_v23, %v1016_v23  ;;  %v748_v51 = vrot.slane %v747_v27, 2  ;;  %v1283_v36 = vshrl.u32 %v2904_v58, 16  ;;  %v2068_v27 = vld.sshfl [vmem:[%s2680_s14 + $0x2c] sm:$0x1 pattern:$0x76325410] }
  0x2d   : > { %v1569_v42 = vrot.slane %v1568_v37, 2  ;;  %v504_v52 = vrot.slane %v496_v39, %v2723_v41  ;;  %v1256_v37 = vshll.u32 %v1016_v23, 16  ;;  %v729_v45 = vsel %vm2797_vm7, %v728_v22, %v2786_v13  ;;  %v2514_v13 = vld [vmem:[%s3207_s2 + $0x98] sm:$0xff]  }
  0x2e   : > { %2315 = vmatmul.mubr.bf16.vlgmr.msra.gmra.mxu1 %v619_v59  ;;  %v734_v59 = vshll.u32 %v2742_v48, 16  ;;  %v2515_v48 = vld [vmem:[%s3207_s2 + $0xd8] sm:$0xff]   ;;  %v1062_v20 = vcombine.high %v2904_v58, %v2904_v58 }
  0x2f   : > { %2339 = vmatpush3.bf16.msra.mxu1 %v2507_v60  ;;  %2354 = vmatprep.mubr.msk.bf16.mxu1 %vm2590_vm0, %v2589_v1  ;;  %v1574_v57 = vsel %vm2797_vm7, %v1569_v42, %v1573_v33  ;;  %v512_v0 = vcombine.low %v504_v52, %v511_v56  ;;  %v1253_v33 = vshrl.u32 %v1016_v23, 16  ;;  %v719_v42 = vsel %vm2797_vm7, %v718_v21, %v2784_v11  ;;  %v2527_v21 = vld [vmem:[%s3207_s2 + $0x170] sm:$0xff]   ;;  %v2067_v22 = vld.sshfl [vmem:[%s2680_s14 + $0x1c] sm:$0x1 pattern:$0x76325410] }
  0x30   : > { %2340 = vmatprep.subr.bf16.mxu1 %v2589_v1  ;;  %v2850_v60 = vcombine.low %v478_v38, %v1574_v57  ;;  %v736_v3 = vrot.slane %v734_v59, 7  ;;  %v1046_v38 = vrot.slane %v324_v10, %v2723_v41  ;;  %v2906_v59 = vrot.slane %v1256_v37, 7 }
  0x31   : > { %2295 = vmatmul.mubr.bf16.vlgmr.msra.gmra.mxu0 %v512_v0  ;;  %v2900_v56 = vrot.slane %v1253_v33, 6  ;;  %v1600_v0 = vrot.slane %v1592_v43, %v2723_v41  ;;  %v1074_v43 = vshll.u32 %v1017_v35, 16 }
  0x32   : > { %2319 = vmatpush3.bf16.msra.mxu0 %v2506_v46  ;;  %2334 = vmatprep.mubr.msk.bf16.mxu0 %vm2590_vm0, %v2589_v1  ;;  %v737_v49 = vor.u32 %v736_v3, %v733_v2  ;;  %v1273_v11 = vshrl.u32 %v1046_v38, 16  ;;  %v1071_v46 = vshrl.u32 %v1017_v35, 16  ;;  %v1276_v63 = vshll.u32 %v1046_v38, 16 }
  0x33   : > { %2341 = vmatpush3.bf16.msra.mxu1 %v2509_v9  ;;  %v320_v9 = vld [vmem:[%s2680_s14 + $0x18] sm:$0xf]  ;;  %2320 = vmatprep.subr.bf16.mxu0 %v2589_v1  ;;  %v2926_v2 = vsel %vm2797_vm7, %v748_v51, %v2790_v17  ;;  %v1607_v3 = vrot.slane %v2850_v60, %v2723_v41  ;;  %v1047_v10 = vcombine.high %v1046_v38, %v1046_v38  ;;  %v2953_v19 = vrot.slane %v1074_v43, 7 }
  0x34   : > { %2342 = vmatprep.subr.bf16.mxu1 %v2589_v1  ;;  %v897_v28 = vcombine.low %v316_v8, %v320_v9  ;;  %v738_v31 = vrot.slane %v737_v49, 2  ;;  %v1031_v32 = vrot.slane %v320_v9, %v2723_v41  ;;  %v2932_v6 = vrot.slane %v1273_v11, 6  ;;  %v2516_v8 = vld [vmem:[%s3207_s2 + $0x90] sm:$0xff]  }
  0x35   : > { %v1073_v17 = vrot.slane %v1071_v46, 6  ;;  %v2939_v60 = vcombine.low %v1600_v0, %v1607_v3  ;;  %v2066_v49 = vld.sshfl [vmem:[%s2680_s14 + $0xc] sm:$0x1 pattern:$0x76325410]  ;;  %v1099_v38 = vshrl.u32 %v1047_v10, 16 }
  0x36   : > { %2321 = vmatpush3.bf16.msra.mxu0 %v2508_v12  ;;  %v1263_v39 = vshrl.u32 %v1031_v32, 16  ;;  %v1266_v40 = vshll.u32 %v1031_v32, 16  ;;  %v905_v52 = vrot.slane %v897_v28, %v2723_v41  ;;  %v739_v55 = vsel %vm2797_vm7, %v738_v31, %v2788_v15  ;;  %v2521_v15 = vld [vmem:[%s3207_s2 + $0xc0] sm:$0xff]  }
  0x37   : > { %2343 = vmatpush3.bf16.msra.mxu1 %v2511_v34  ;;  %2322 = vmatprep.subr.bf16.mxu0 %v2589_v1  ;;  %v2519_v34 = vld [vmem:[%s3207_s2 + $0xc8] sm:$0xff]   ;;  %v1032_v57 = vcombine.high %v1031_v32, %v1031_v32  ;;  %v1728_v4 = vcombine.low %v729_v45, %v739_v55  ;;  %v768_v9 = vcombine.low %v739_v55, %v2926_v2  ;;  %v1286_v12 = vshll.u32 %v2904_v58, 16  ;;  %v2069_v35 = vld.sshfl [vmem:[%s2680_s14 + $0x3c] sm:$0x1 pattern:$0x76325410] }
  0x38   : > { %2344 = vmatprep.subr.bf16.mxu1 %v2589_v1  ;;  %v2914_v47 = vrot.slane %v1263_v39, 6  ;;  %v2916_v61 = vrot.slane %v1266_v40, 7  ;;  %v1080_v23 = vshll.u32 %v2066_v49, 16  ;;  %v1077_v28 = vor.u32 %v2953_v19, %v1073_v17  ;;  %v2518_v32 = vld [vmem:[%s3207_s2 + $0x88] sm:$0xff]  }
  0x39   : > { %v2942_v7 = vrot.slane %v1728_v4, %v2723_v41  ;;  %v1085_v14 = vshrl.u32 %v1032_v57, 16  ;;  %v1094_v31 = vshll.u32 %v2067_v22, 16  ;;  %v1102_v51 = vshll.u32 %v1047_v10, 16  ;;  %v2529_v55 = vld [vmem:[%s3207_s2 + $0x168] sm:$0xff]  }
  0x3a   : > { %2323 = vmatpush3.bf16.msra.mxu0 %v2510_v25  ;;  %v1082_v37 = vrot.slane %v1080_v23, 7  ;;  %v1078_v39 = vrot.slane %v1077_v28, 2  ;;  %v1122_v46 = vshll.u32 %v2069_v35, 16  ;;  %v1269_v43 = vor.u32 %v2916_v61, %v2914_v47 }
  0x3b   : > { %2345 = vmatpush3.bf16.msra.mxu1 %v2513_v44  ;;  %v912_v44 = vrot.slane %v898_v29, %v2723_v41  ;;  %2324 = vmatprep.subr.bf16.mxu0 %v2589_v1  ;;  %v1087_v25 = vrot.slane %v1085_v14, 6  ;;  %v1088_v29 = vshll.u32 %v1032_v57, 16  ;;  %v2983_v58 = vrot.slane %v1102_v51, 7 }
  0x3c   : > { %2346 = vmatprep.subr.bf16.mxu1 %v2589_v1  ;;  %v1083_v11 = vsel %vm2797_vm7, %v1078_v39, %v1082_v37  ;;  %v1270_v23 = vrot.slane %v1269_v43, 2  ;;  %v2553_v43 = vld [vmem:[%s3207_s2 + $0x1c8] sm:$0xff]  }
  0x3d   : > { %v913_v5 = vcombine.low %v905_v52, %v912_v44  ;;  %v2974_v40 = vrot.slane %v1088_v29, 7  ;;  %v1101_v52 = vrot.slane %v1099_v38, 6  ;;  %v1108_v44 = vshll.u32 %v2068_v27, 16  ;;  %v2535_v38 = vld [vmem:[%s3207_s2 + $0x150] sm:$0xff]  }
  0x3e   : > { %2325 = vmatpush3.bf16.msra.mxu0 %v2512_v54  ;;  %v1113_v54 = vshrl.u32 %v1062_v20, 16 }
  0x3f   : > { %2347 = vmatpush3.bf16.msra.mxu1 %v2515_v48  ;;  %v2930_v48 = vcombine.low %v719_v42, %v729_v45  ;;  %2326 = vmatprep.subr.bf16.mxu0 %v2589_v1  ;;  %v1096_v42 = vrot.slane %v1094_v31, 7  ;;  %v1116_v45 = vshll.u32 %v1062_v20, 16  ;;  %v1091_v57 = vor.u32 %v2974_v40, %v1087_v25 }
  0x40   : > { %2348 = vmatprep.subr.bf16.mxu1 %v2589_v1  ;;  %v1105_v4 = vor.u32 %v2983_v58, %v1101_v52  ;;  %v1705_v25 = vshll.u32 %v2748_v50, 16  ;;  %v1271_v39 = vsel %vm2797_vm7, %v1270_v23, %v2974_v40 }
  0x41   : > { %v775_v33 = vrot.slane %v2930_v48, %v2723_v41  ;;  %v1118_v0 = vrot.slane %v1116_v45, 7  ;;  %v1092_v3 = vrot.slane %v1091_v57, 2  ;;  %v1110_v48 = vrot.slane %v1108_v44, 7 }
  0x42   : > { %2327 = vmatpush3.bf16.msra.mxu0 %v2514_v13  ;;  %v1285_v13 = vrot.slane %v1283_v36, 6  ;;  %v1124_v36 = vrot.slane %v1122_v46, 7  ;;  %v2532_v46 = vld [vmem:[%s3207_s2 + $0x118] sm:$0xff]  }
  0x43   : > { %2349 = vmatpush3.bf16.msra.mxu1 %v2517_v16  ;;  %v2949_v16 = vrot.slane %v1276_v63, 7  ;;  %2328 = vmatprep.subr.bf16.mxu0 %v2589_v1  ;;  %v1115_v63 = vrot.slane %v1113_v54, 6 }
  0x44   : > { %2350 = vmatprep.subr.bf16.mxu1 %v2589_v1 }
  0x45   : > { %v1119_v17 = vor.u32 %v1118_v0, %v1115_v63  ;;  %v1279_v10 = vor.u32 %v2949_v16, %v2932_v6  ;;  %v1702_v6 = vshrl.u32 %v2748_v50, 16  ;;  %v2533_v16 = vld [vmem:[%s3207_s2 + $0x158] sm:$0xff]   ;;  %v2536_v63 = vld [vmem:[%s3207_s2 + $0x108] sm:$0xff]  }
  0x46   : > { %2329 = vmatpush3.bf16.msra.mxu0 %v2516_v8  ;;  %v1097_v8 = vsel %vm2797_vm7, %v1092_v3, %v1096_v42  ;;  %v2538_v3 = vld [vmem:[%s3207_s2 + $0x100] sm:$0xff]  }
  0x47   : > { %2351 = vmatpush3.bf16.msra.mxu1 %v2519_v34  ;;  %v782_v34 = vrot.slane %v768_v9, %v2723_v41  ;;  %2330 = vmatprep.subr.bf16.mxu0 %v2589_v1  ;;  %v1106_v9 = vrot.slane %v1105_v4, 2  ;;  %v1143_v47 = vcombine.low %v1083_v11, %v1097_v8  ;;  %v1280_v28 = vrot.slane %v1279_v10, 2  ;;  %v2547_v4 = vld [vmem:[%s3207_s2 + $0x1e0] sm:$0xff]   ;;  %v2548_v10 = vld [vmem:[%s3207_s2 + $0x198] sm:$0xff]  }
  0x48   : > { %2352 = vmatprep.subr.bf16.mxu1 %v2589_v1  ;;  %v1704_v29 = vrot.slane %v1702_v6, 6  ;;  %v2546_v8 = vld [vmem:[%s3207_s2 + $0x1a0] sm:$0xff]  }
  0x49   : > { %v783_v14 = vcombine.low %v775_v33, %v782_v34  ;;  %v1111_v49 = vsel %vm2797_vm7, %v1106_v9, %v1110_v48  ;;  %v1151_v22 = vrot.slane %v1143_v47, %v2723_v41  ;;  %v2526_v34 = vld [vmem:[%s3207_s2 + $0x130] sm:$0xff]   ;;  %v1281_v42 = vsel %vm2797_vm7, %v1280_v28, %v2983_v58  ;;  %v2539_v58 = vld [vmem:[%s3207_s2 + $0x140] sm:$0xff]   ;;  %v2540_v48 = vld [vmem:[%s3207_s2 + $0x1b8] sm:$0xff]  }
  0x4a   : > { %2331 = vmatpush3.bf16.msra.mxu0 %v2518_v32  ;;  %v1707_v32 = vrot.slane %v1705_v25, 7  ;;  %v2555_v9 = vld [vmem:[%s3207_s2 + $0x1c0] sm:$0xff]   ;;  %v2557_v47 = vld [vmem:[%s3207_s2 + $0x238] sm:$0xff]  }
  0x4b   : > { %2353 = vmatpush3.bf16.msra.mxu1 %v2521_v15  ;;  %v1288_v15 = vrot.slane %v1286_v12, 7  ;;  %2332 = vmatprep.subr.bf16.mxu0 %v2589_v1  ;;  %v1120_v12 = vrot.slane %v1119_v17, 2  ;;  %v2551_v17 = vld [vmem:[%s3207_s2 + $0x1d0] sm:$0xff]  }
  0x4c   : > { %2378 = vmatprep.subr.bf16.mxu1 %v2589_v1  ;;  %v1708_v50 = vor.u32 %v1707_v32, %v1704_v29 }
  0x4d   : > { %v1289_v61 = vor.u32 %v1288_v15, %v1285_v13  ;;  %v2543_v15 = vld [vmem:[%s3207_s2 + $0x1f0] sm:$0xff]  }
  0x4e   : > { %2355 = vmatmul.mubr.bf16.vlgmr.msra.gmra.mxu1 %v913_v5  ;;  %v1259_v5 = vor.u32 %v2906_v59, %v2900_v56  ;;  %v2522_v56 = vld [vmem:[%s3207_s2 + $0x138] sm:$0xff]   ;;  %v2531_v59 = vld [vmem:[%s3207_s2 + $0x160] sm:$0xff]   ;;  %v1709_v52 = vrot.slane %v1708_v50, 2 }
  0x4f   : > { %2379 = vmatpush3.bf16.msra.mxu1 %v2525_v24  ;;  %2394 = vmatprep.mubr.msk.bf16.mxu1 %vm2590_vm0, %v2589_v1  ;;  %v2520_v24 = vld [vmem:[%s3207_s2 + $0x80] sm:$0xff]   ;;  %v1290_v31 = vrot.slane %v1289_v61, 2  ;;  %v2559_v61 = vld [vmem:[%s3207_s2 + $0x228] sm:$0xff]  }
  0x50   : > { %2380 = vmatprep.subr.bf16.mxu1 %v2589_v1  ;;  %v1260_v20 = vrot.slane %v1259_v5, 2  ;;  %2333 = vmatpush3.bf16.msra.mxu0 %v2520_v24  ;;  %v1710_v44 = vsel %vm2797_vm7, %v1709_v52, %v2808_v30  ;;  %v2549_v5 = vld [vmem:[%s3207_s2 + $0x1d8] sm:$0xff]   ;;  %v2542_v24 = vld [vmem:[%s3207_s2 + $0x1b0] sm:$0xff]  }
  0x51   : > { %2358 = vmatprep.subr.bf16.mxu0 %v2589_v1  ;;  %v1291_v51 = vsel %vm2797_vm7, %v1290_v31, %v1118_v0  ;;  %v1729_v45 = vcombine.low %v2926_v2, %v1710_v44  ;;  %v2545_v0 = vld [vmem:[%s3207_s2 + $0x1e8] sm:$0xff]  }
  0x52   : > { %v1261_v37 = vsel %vm2797_vm7, %v1260_v20, %v2953_v19  ;;  %v2528_v19 = vld [vmem:[%s3207_s2 + $0x128] sm:$0xff]   ;;  %v1310_v54 = vcombine.low %v1281_v42, %v1291_v51 }
  0x53   : > { %2381 = vmatpush3.bf16.msra.mxu1 %v2527_v21  ;;  %v1125_v21 = vsel %vm2797_vm7, %v1120_v12, %v1124_v36  ;;  %2335 = vmatmul.mubr.bf16.vlgmr.msra.gmra.mxu0 %v783_v14  ;;  %v1309_v40 = vcombine.low %v1261_v37, %v1271_v39  ;;  %v1743_v11 = vrot.slane %v1729_v45, %v2723_v41  ;;  %v2544_v36 = vld [vmem:[%s3207_s2 + $0x1a8] sm:$0xff]   ;;  %v2554_v12 = vld [vmem:[%s3207_s2 + $0x180] sm:$0xff]  }
  0x54   : > { %2382 = vmatprep.subr.bf16.mxu1 %v2589_v1  ;;  %v1144_v27 = vcombine.low %v1111_v49, %v1125_v21  ;;  %2359 = vmatpush3.bf16.msra.mxu0 %v2522_v56  ;;  %v1324_v2 = vrot.slane %v1310_v54, %v2723_v41  ;;  %v2550_v56 = vld [vmem:[%s3207_s2 + $0x190] sm:$0xff]   ;;  %v2563_v14 = vld [vmem:[%s3207_s2 + $0x208] sm:$0xff]   ;;  %v2564_v49 = vld [vmem:[%s3207_s2 + $0x200] sm:$0xff]  }
  0x55   : > { %2374 = vmatprep.mubr.msk.bf16.mxu0 %vm2590_vm0, %v2589_v1  ;;  %2360 = vmatprep.subr.bf16.mxu0 %v2589_v1  ;;  %v1317_v30 = vrot.slane %v1309_v40, %v2723_v41  ;;  %v3060_v57 = vcombine.low %v2942_v7, %v1743_v11  ;;  %v2534_v7 = vld [vmem:[%s3207_s2 + $0x110] sm:$0xff]  }
  0x56   : > { %v1158_v33 = vrot.slane %v1144_v27, %v2723_v41  ;;  %v2541_v41 = vld [vmem:[%s3207_s2 + $0x1f8] sm:$0xff]  }
  0x57   : > { %2383 = vmatpush3.bf16.msra.mxu1 %v2529_v55  ;;  %v2537_v55 = vld [vmem:[%s3207_s2 + $0x148] sm:$0xff]   ;;  %v1325_v13 = vcombine.low %v1317_v30, %v1324_v2 }
  0x58   : > { %2384 = vmatprep.subr.bf16.mxu1 %v2589_v1  ;;  %v1159_v35 = vcombine.low %v1151_v22, %v1158_v33  ;;  %2361 = vmatpush3.bf16.msra.mxu0 %v2526_v34 }
  0x59   : > { %2362 = vmatprep.subr.bf16.mxu0 %v2589_v1 }
  0x5b   : > { %2385 = vmatpush3.bf16.msra.mxu1 %v2531_v59  ;;  %v2552_v59 = vld [vmem:[%s3207_s2 + $0x188] sm:$0xff]  }
  0x5c   : > { %2386 = vmatprep.subr.bf16.mxu1 %v2589_v1  ;;  %2363 = vmatpush3.bf16.msra.mxu0 %v2528_v19 }
  0x5d   : > { %2364 = vmatprep.subr.bf16.mxu0 %v2589_v1 }
  0x5f   : > { %2387 = vmatpush3.bf16.msra.mxu1 %v2533_v16 }
  0x60   : > { %2388 = vmatprep.subr.bf16.mxu1 %v2589_v1  ;;  %2365 = vmatpush3.bf16.msra.mxu0 %v2530_v18 }
  0x61   : > { %2366 = vmatprep.subr.bf16.mxu0 %v2589_v1 }
  0x63   : > { %2389 = vmatpush3.bf16.msra.mxu1 %v2535_v38 }
  0x64   : > { %2390 = vmatprep.subr.bf16.mxu1 %v2589_v1  ;;  %2367 = vmatpush3.bf16.msra.mxu0 %v2532_v46 }
  0x65   : > { %2368 = vmatprep.subr.bf16.mxu0 %v2589_v1 }
  0x67   : > { %2391 = vmatpush3.bf16.msra.mxu1 %v2537_v55 }
  0x68   : > { %2392 = vmatprep.subr.bf16.mxu1 %v2589_v1  ;;  %2369 = vmatpush3.bf16.msra.mxu0 %v2534_v7 }
  0x69   : > { %2370 = vmatprep.subr.bf16.mxu0 %v2589_v1 }
  0x6b   : > { %2393 = vmatpush3.bf16.msra.mxu1 %v2539_v58 }
  0x6c   : > { %2418 = vmatprep.subr.bf16.mxu1 %v2589_v1  ;;  %2371 = vmatpush3.bf16.msra.mxu0 %v2536_v63 }
  0x6d   : > { %2372 = vmatprep.subr.bf16.mxu0 %v2589_v1 }
  0x6e   : > { %2395 = vmatmul.mubr.bf16.vlgmr.msra.gmra.mxu1 %v1325_v13 }
  0x6f   : > { %2419 = vmatpush3.bf16.msra.mxu1 %v2541_v41  ;;  %2434 = vmatprep.mubr.msk.bf16.mxu1 %vm2590_vm0, %v2589_v1 }
  0x70   : > { %2420 = vmatprep.subr.bf16.mxu1 %v2589_v1  ;;  %2373 = vmatpush3.bf16.msra.mxu0 %v2538_v3 }
  0x71   : > { %2398 = vmatprep.subr.bf16.mxu0 %v2589_v1 }
  0x73   : > { %2421 = vmatpush3.bf16.msra.mxu1 %v2543_v15  ;;  %2375 = vmatmul.mubr.bf16.vlgmr.msra.gmra.mxu0 %v1159_v35 }
  0x74   : > { %2422 = vmatprep.subr.bf16.mxu1 %v2589_v1  ;;  %2399 = vmatpush3.bf16.msra.mxu0 %v2540_v48 }
  0x75   : > { %2414 = vmatprep.mubr.msk.bf16.mxu0 %vm2590_vm0, %v2589_v1  ;;  %2400 = vmatprep.subr.bf16.mxu0 %v2589_v1 }
  0x77   : > { %2423 = vmatpush3.bf16.msra.mxu1 %v2545_v0 }
  0x78   : > { %2424 = vmatprep.subr.bf16.mxu1 %v2589_v1  ;;  %2401 = vmatpush3.bf16.msra.mxu0 %v2542_v24  ;;  %v2191_v24 = vld [vmem:[%s3208_s3] ss:$0 sm:$0xff] }
  0x79   : > { %2402 = vmatprep.subr.bf16.mxu0 %v2589_v1 }
  0x7b   : > { %2425 = vmatpush3.bf16.msra.mxu1 %v2547_v4 }
  0x7c   : > { %2426 = vmatprep.subr.bf16.mxu1 %v2589_v1  ;;  %2403 = vmatpush3.bf16.msra.mxu0 %v2544_v36 }
  0x7d   : > { %2404 = vmatprep.subr.bf16.mxu0 %v2589_v1 }
  0x7f   : > { %2427 = vmatpush3.bf16.msra.mxu1 %v2549_v5 }
  0x80   : > { %2428 = vmatprep.subr.bf16.mxu1 %v2589_v1  ;;  %2405 = vmatpush3.bf16.msra.mxu0 %v2546_v8 }
  0x81   : > { %2406 = vmatprep.subr.bf16.mxu0 %v2589_v1 }
  0x83   : > { %2429 = vmatpush3.bf16.msra.mxu1 %v2551_v17 }
  0x84   : > { %2430 = vmatprep.subr.bf16.mxu1 %v2589_v1  ;;  %2407 = vmatpush3.bf16.msra.mxu0 %v2548_v10 }
  0x85   : > { %2408 = vmatprep.subr.bf16.mxu0 %v2589_v1 }
  0x87   : > { %2431 = vmatpush3.bf16.msra.mxu1 %v2553_v43 }
  0x88   : > { %2432 = vmatprep.subr.bf16.mxu1 %v2589_v1  ;;  %2409 = vmatpush3.bf16.msra.mxu0 %v2550_v56 }
  0x89   : > { %2410 = vmatprep.subr.bf16.mxu0 %v2589_v1 }
  0x8b   : > { %2433 = vmatpush3.bf16.msra.mxu1 %v2555_v9 }
  0x8c   : > { %2411 = vmatpush3.bf16.msra.mxu0 %v2552_v59 }
  0x8d   : > { %2412 = vmatprep.subr.bf16.mxu0 %v2589_v1 }
  0x8e   : > { %2435 = vmatmul.mubr.bf16.vlgmr.msra.gmra.mxu1 %v2939_v60  ;;  %v2558_v60 = vld [vmem:[%s3207_s2 + $0x230] sm:$0xff]  }
  0x90   : > { %2413 = vmatpush3.bf16.msra.mxu0 %v2554_v12 }
  0x91   : > { %2438 = vmatprep.subr.bf16.mxu0 %v2589_v1 }
  0x93   : > { %2415 = vmatmul.mubr.bf16.vlgmr.msra.gmra.mxu0 %v1452_v26  ;;  %v2562_v26 = vld [vmem:[%s3207_s2 + $0x210] sm:$0xff]  }
  0x94   : > { %2439 = vmatpush3.bf16.msra.mxu0 %v2557_v47  ;;  %2454 = vmatprep.mubr.msk.bf16.mxu0 %vm2590_vm0, %v2589_v1 }
  0x95   : > { %2440 = vmatprep.subr.bf16.mxu0 %v2589_v1 }
  0x98   : > { %2441 = vmatpush3.bf16.msra.mxu0 %v2558_v60 }
  0x99   : > { %2442 = vmatprep.subr.bf16.mxu0 %v2589_v1 }
  0x9c   : > { %2443 = vmatpush3.bf16.msra.mxu0 %v2559_v61 }
  0x9d   : > { %2444 = vmatprep.subr.bf16.mxu0 %v2589_v1 }
  0xa0   : > { %2445 = vmatpush3.bf16.msra.mxu0 %v2560_v53 }
  0xa1   : > { %2446 = vmatprep.subr.bf16.mxu0 %v2589_v1 }
  0xa4   : > { %2447 = vmatpush3.bf16.msra.mxu0 %v2561_v62 }
  0xa5   : > { %2448 = vmatprep.subr.bf16.mxu0 %v2589_v1 }
  0xa8   : > { %2449 = vmatpush3.bf16.msra.mxu0 %v2562_v26 }
  0xa9   : > { %2450 = vmatprep.subr.bf16.mxu0 %v2589_v1 }
  0xac   : > { %2451 = vmatpush3.bf16.msra.mxu0 %v2563_v14 }
  0xad   : > { %2452 = vmatprep.subr.bf16.mxu0 %v2589_v1 }
  0xb0   : > { %2453 = vmatpush3.bf16.msra.mxu0 %v2564_v49 }
  0xb3   : > { %2455 = vmatmul.mubr.bf16.vlgmr.msra.gmra.mxu0 %v3060_v57 }
  0xee   : > { %v703_v20 = vpop.f32.mrf.mxu1 }
  0xf0   : > { %v2316_v6 = vpop.f32.mrf.mxu1 }
  0xf1   : > { %v596_v22 = vpop.f32.mrf.mxu0 }
  0xf2   : > { %v706_v16 = vpop.f32.mrf.mxu1  ;;  %v704_v23 = vadd.f32 %v703_v20, %v596_v22 }
  0xf3   : > { %v2296_v25 = vpop.f32.mrf.mxu0 }
  0xf4   : > { %v2317_v21 = vpop.f32.mrf.mxu1 }
  0xf5   : > { %v599_v27 = vpop.f32.mrf.mxu0 }
  0xf6   : > { %v707_v28 = vadd.f32 %v706_v16, %v599_v27 }
  0xf7   : > { %v2297_v29 = vpop.f32.mrf.mxu0 }
 0x10e   : > { %v997_v31 = vpop.f32.mrf.mxu1 }
 0x110   : > { %v2356_v32 = vpop.f32.mrf.mxu1 }
 0x112   : > { %v1000_v33 = vpop.f32.mrf.mxu1 }
 0x113   : > { %v867_v50 = vpop.f32.mrf.mxu0 }
 0x114   : > { %v2357_v34 = vpop.f32.mrf.mxu1  ;;  %v874_v35 = vadd.f32 %v867_v50, %v704_v23 }
 0x115   : > { %v2336_v1 = vpop.f32.mrf.mxu0 }
 0x116   : > { %v1004_v37 = vadd.f32 %v997_v31, %v874_v35 }
 0x117   : > { %v870_v38 = vpop.f32.mrf.mxu0 }
 0x118   : > { %v875_v39 = vadd.f32 %v870_v38, %v707_v28 }
 0x119   : > { %v2337_v42 = vpop.f32.mrf.mxu0 }
 0x11a   : > { %v1005_v51 = vadd.f32 %v1000_v33, %v875_v39 }
 0x12e   : > { %v1409_v52 = vpop.f32.mrf.mxu1 }
 0x130   : > { %v2396_v19 = vpop.f32.mrf.mxu1 }
 0x132   : > { %v1412_v44 = vpop.f32.mrf.mxu1 }
 0x133   : > { %v1243_v54 = vpop.f32.mrf.mxu0 }
 0x134   : > { %v2397_v40 = vpop.f32.mrf.mxu1  ;;  %v1250_v45 = vadd.f32 %v1243_v54, %v1004_v37 }
 0x135   : > { %v2376_v55 = vpop.f32.mrf.mxu0 }
 0x136   : > { %v1416_v11 = vadd.f32 %v1409_v52, %v1250_v45 }
 0x137   : > { %v1246_v18 = vpop.f32.mrf.mxu0 }
 0x138   : > { %v1251_v30 = vadd.f32 %v1246_v18, %v1005_v51 }
 0x139   : > { %v2377_v2 = vpop.f32.mrf.mxu0 }
 0x13a   : > { %v1417_v57 = vadd.f32 %v1412_v44, %v1251_v30 }
 0x14e   : > { %v1692_v58 = vpop.f32.mrf.mxu1 }
 0x150   : > { %v2436_v46 = vpop.f32.mrf.mxu1 }
 0x152   : > { %v1695_v13 = vpop.f32.mrf.mxu1 }
 0x153   : > { %v1536_v7 = vpop.f32.mrf.mxu0 }
 0x154   : > { %v2437_v41 = vpop.f32.mrf.mxu1  ;;  %v1543_v3 = vadd.f32 %v1536_v7, %v1416_v11 }
 0x155   : > { %v2416_v15 = vpop.f32.mrf.mxu0 }
 0x156   : > { %v1699_v4 = vadd.f32 %v1692_v58, %v1543_v3 }
 0x157   : > { %v1539_v63 = vpop.f32.mrf.mxu0 }
 0x158   : > { %v1544_v48 = vadd.f32 %v1539_v63, %v1417_v57 }
 0x159   : > { %v2417_v0 = vpop.f32.mrf.mxu0 }
 0x15a   : > { %v1700_v43 = vadd.f32 %v1695_v13, %v1544_v48 }
 0x173   : > { %v1828_v5 = vpop.f32.mrf.mxu0 }
 0x174   : > { %v1835_v17 = vadd.f32 %v1828_v5, %v1699_v4 }
 0x175   : > { %v2456_v36 = vpop.f32.mrf.mxu0 }
 0x176   : > { %v1844_v8 = vadd.f32 %v2191_v24, %v1835_v17 }
 0x177   : > { %v1831_v9 = vpop.f32.mrf.mxu0 }
 0x178   : > { %v1846_v10 = vmax.f32 %v1844_v8, 0.0  ;;  %v1836_v56 = vadd.f32 %v1831_v9, %v1700_v43 }
 0x179   : > { %v2457_v59 = vpop.f32.mrf.mxu0 }
 0x17a   : > { %v1850_v12 = vcombine.high %v1846_v10, %v1846_v10  ;;  %v1854_v47 = vpack.c.bf16 %v1846_v10, %v1846_v10  ;;  %v1845_v60 = vadd.f32 %v2191_v24, %v1836_v56 }
 0x17c   : > { %v1855_v61 = vpack.c.bf16 %v1850_v12, %v1850_v12  ;;  %1858 = vst [vmem:[%s311_s24] sm:$0x3] %v1854_v47  ;;  %v1847_v53 = vmax.f32 %v1845_v60, 0.0 }
 0x17e   : > { %1859 = vst [vmem:[%s311_s24 + $0x2] sm:$0x3] %v1855_v61  ;;  %v1851_v62 = vcombine.high %v1847_v53, %v1847_v53  ;;  %v1856_v26 = vpack.c.bf16 %v1847_v53, %v1847_v53 }
 0x180   : > { %v1857_v14 = vpack.c.bf16 %v1851_v62, %v1851_v62  ;;  %1860 = vst [vmem:[%s311_s24 + $0x4] sm:$0x3] %v1856_v26 }
 0x182   : > { %1861 = vst [vmem:[%s311_s24 + $0x6] sm:$0x3] %v1857_v14 }
 0x183 PF: > { %s14_s17 = sadd.s32 1, %s2587_s17   ;;  %s3214_s15 = smov %s2583_s16 }
 0x184   : > { %p11_p5 = scmp.ge.s32.totalorder %s14_s17, 4   ;;  %s3215_s16 = smov %s3217_s18 }
 0x186   :  { %13 = sbr.rel (!%p11_p5) target bundleno = 2 (0x2), region = 77 }

</bundles_post_ra>
